<compile_context>
chip_gen: v7x
topology: tpu7x:2x2x1
jax: 0.10.0
libtpu: 0.0.40
codegen_flags: <defaults>
</compile_context>

<pallas_src>
import math
import functools

import jax
import jax.numpy as jnp
from jax import lax
from jax.experimental import pallas as pl
from jax.experimental.pallas import tpu as pltpu


# ---------------------------------------------------------------------------
# Small in-kernel helpers.
# ---------------------------------------------------------------------------
def _gelu_tanh(x):
    c = math.sqrt(2.0 / math.pi)
    return 0.5 * x * (1.0 + jnp.tanh(c * (x + 0.044715 * x * x * x)))


def _ln(x_f32, eps=1e-5):
    mu = jnp.mean(x_f32, axis=-1, keepdims=True)
    var = jnp.mean((x_f32 - mu) ** 2, axis=-1, keepdims=True)
    return (x_f32 - mu) * lax.rsqrt(var + eps)


def _positive_features(feat, wfeat, m):
    # feat: (n, E) f32, wfeat = feat @ wprm (+bias) precomputed: (n, m) f32.
    arg = wfeat - 0.5 * jnp.sum(feat * feat, axis=-1, keepdims=True)
    return (jnp.exp(arg) * (1.0 / math.sqrt(m))).astype(jnp.bfloat16)


def _kp_v1_outer(kp, v, emb):
    # Ones-column trick padded to 128 lanes: kpv[:, E] is the softmax denominator.
    n = v.shape[0]
    pad = 2 * emb - emb - 1                                   # 63 for E=64
    v1 = jnp.concatenate(
        [v.astype(jnp.bfloat16),
         jnp.ones((n, 1), jnp.bfloat16),
         jnp.zeros((n, pad), jnp.bfloat16)], axis=-1)          # (n, 128)
    # Contract dim 0 of both operands (transposed-LHS form, MXU friendly).
    return lax.dot_general(kp, v1, (((0,), (0,)), ((), ())),
                           preferred_element_type=jnp.float32)  # (m, 128)


def _attn_tail(v, qp, kpv_f32, wproj_ref, bproj_ref, wm1_ref, bm1_ref,
               wm2_ref, bm2_ref, emb):
    # numerator | denominator in one matmul against the 128-lane kpv.
    num_d = jnp.dot(qp, kpv_f32.astype(jnp.bfloat16),
                    preferred_element_type=jnp.float32)          # (n, 128)
    inv_den = pl.reciprocal(num_d[:, emb:emb + 1] + 1e-8, approx=True)
    attn = num_d[:, :emb] * inv_den

    y = v + jnp.dot(attn.astype(jnp.bfloat16), wproj_ref[...],
                    preferred_element_type=jnp.float32) + bproj_ref[...]

    # LN2 affine folded into wm1/bm1 on the host.
    yn = _ln(y).astype(jnp.bfloat16)
    h = jnp.dot(yn, wm1_ref[...], preferred_element_type=jnp.float32) + bm1_ref[...]
    h = _gelu_tanh(h)
    h = jnp.dot(h.astype(jnp.bfloat16), wm2_ref[...],
                preferred_element_type=jnp.float32) + bm2_ref[...]
    return y + h                                                 # (n, emb) f32


def _pack_pairs(res, half):
    # rows [0:half] = even tokens, [half:] = odd tokens -> (half, 2E) lane-dense.
    return jnp.concatenate([res[:half, :], res[half:, :]], axis=-1)


# ---------------------------------------------------------------------------
# Fused single-pass kernel (whole batch of N tokens resident in VMEM).
# ---------------------------------------------------------------------------
def _performer_fused_kernel(xe_ref, xo_ref, wall_ref, ball_ref, wproj_ref,
                            bproj_ref, wm1_ref, bm1_ref, wm2_ref, bm2_ref,
                            o_ref, *, emb, m):
    x = jnp.concatenate([xe_ref[0], xo_ref[0]], axis=0).astype(jnp.float32)
    n = x.shape[0]
    half = n // 2
    xn = _ln(x).astype(jnp.bfloat16)

    # Single 256-wide fused projection: [k | v | k@wprm | q | q@wprm].
    proj = jnp.dot(xn, wall_ref[...], preferred_element_type=jnp.float32) + ball_ref[...]
    k = proj[:, :emb]
    v = proj[:, emb:2 * emb]
    kw = proj[:, 2 * emb:2 * emb + m]
    q = proj[:, 2 * emb + m:3 * emb + m]
    qw = proj[:, 3 * emb + m:]

    kp = _positive_features(k, kw, m)                            # (n, m) bf16
    qp = _positive_features(q, qw, m)                            # (n, m) bf16
    kpv = _kp_v1_outer(kp, v, emb)                               # (m, 128) f32

    res = _attn_tail(v, qp, kpv, wproj_ref, bproj_ref,
                     wm1_ref, bm1_ref, wm2_ref, bm2_ref, emb)
    o_ref[0] = _pack_pairs(res.astype(o_ref.dtype), half)        # (n//2, 128)


# ---------------------------------------------------------------------------
# Two-pass kernels (for N too large to keep resident).
# Pass 1: accumulate kpv = sum_tokens kp^T @ [v | 1 | 0] into VMEM scratch.
# ---------------------------------------------------------------------------
def _performer_kv_kernel(xe_ref, xo_ref, wkv_ref, bkv_ref, o_ref, acc_ref,
                         *, emb, m):
    t = pl.program_id(1)
    x = jnp.concatenate([xe_ref[0], xo_ref[0]], axis=0).astype(jnp.float32)
    xn = _ln(x).astype(jnp.bfloat16)

    proj = jnp.dot(xn, wkv_ref[...], preferred_element_type=jnp.float32) + bkv_ref[...]
    k = proj[:, :emb]
    v = proj[:, emb:2 * emb]
    kw = proj[:, 2 * emb:]

    kp = _positive_features(k, kw, m)
    contrib = _kp_v1_outer(kp, v, emb)                           # (m, 128) f32

    @pl.when(t == 0)
    def _():
        acc_ref[...] = contrib

    @pl.when(t > 0)
    def _():
        acc_ref[...] = acc_ref[...] + contrib

    @pl.when(t == pl.num_programs(1) - 1)
    def _():
        o_ref[0] = acc_ref[...]


def _performer_out_kernel(xe_ref, xo_ref, kpv_ref, wqv_ref, bqv_ref,
                          wproj_ref, bproj_ref, wm1_ref, bm1_ref,
                          wm2_ref, bm2_ref, o_ref, *, emb, m):
    x = jnp.concatenate([xe_ref[0], xo_ref[0]], axis=0).astype(jnp.float32)
    half = x.shape[0] // 2
    xn = _ln(x).astype(jnp.bfloat16)

    proj = jnp.dot(xn, wqv_ref[...], preferred_element_type=jnp.float32) + bqv_ref[...]
    q = proj[:, :emb]
    v = proj[:, emb:2 * emb]
    qw = proj[:, 2 * emb:]

    qp = _positive_features(q, qw, m)
    res = _attn_tail(v, qp, kpv_ref[0], wproj_ref, bproj_ref,
                     wm1_ref, bm1_ref, wm2_ref, bm2_ref, emb)
    o_ref[0] = _pack_pairs(res.astype(o_ref.dtype), half)        # (hn, 128)


# ---------------------------------------------------------------------------
# Host-side weight preparation: fold LN affines + wprm, fuse projections, bf16.
# ---------------------------------------------------------------------------
def _prepare_kernel_params(p):
    g1, b1 = p["g1"][0], p["b1"][0]
    wk, wq, wv = p["wk"], p["wq"], p["wv"]
    bk, bq, bv = p["bk"][0], p["bq"][0], p["bv"][0]
    wprm = p["wprm_t"]                                           # (E, m)

    def fold_ln1(w, b):                                          # LN1 affine folded
        return g1[:, None] * w, b + b1 @ w

    wkf, bkf = fold_ln1(wk, bk)
    wqf, bqf = fold_ln1(wq, bq)
    wvf, bvf = fold_ln1(wv, bv)
    wkw, bkw = wkf @ wprm, bkf @ wprm                            # k @ wprm folded
    wqw, bqw = wqf @ wprm, bqf @ wprm                            # q @ wprm folded

    wall = jnp.concatenate([wkf, wvf, wkw, wqf, wqw], axis=1)    # (Cin, 3E+2m)
    ball = jnp.concatenate([bkf, bvf, bkw, bqf, bqw])[None, :]
    wkv = jnp.concatenate([wkf, wvf, wkw], axis=1)               # (Cin, 2E+m)
    bkv = jnp.concatenate([bkf, bvf, bkw])[None, :]
    wqv = jnp.concatenate([wqf, wvf, wqw], axis=1)
    bqv = jnp.concatenate([bqf, bvf, bqw])[None, :]

    g2, b2 = p["g2"][0], p["b2"][0]
    wm1 = g2[:, None] * p["wm1"]                                 # LN2 affine folded
    bm1 = (p["bm1"][0] + b2 @ p["wm1"])[None, :]

    bf, f32 = jnp.bfloat16, jnp.float32
    return dict(
        wall=wall.astype(bf), ball=ball.astype(f32),
        wkv=wkv.astype(bf), bkv=bkv.astype(f32),
        wqv=wqv.astype(bf), bqv=bqv.astype(f32),
        wproj=p["wproj"].astype(bf), bproj=p["bproj"].astype(f32),
        wm1=wm1.astype(bf), bm1=bm1.astype(f32),
        wm2=p["wm2"].astype(bf), bm2=p["bm2"].astype(f32),
    )


def _choose_half_block(np_tokens, target):
    """Largest divisor of np_tokens that is <= target and a multiple of 8."""
    if np_tokens <= target:
        return np_tokens
    for hn in range(target, 7, -1):
        if np_tokens % hn == 0 and hn % 8 == 0:
            return hn
    # TODO(synk): awkward NP without an 8-aligned divisor falls back to one
    # whole-NP tile; guard against VMEM overflow for very large N on v7x.
    return np_tokens


# ---------------------------------------------------------------------------
# Pallas Token_performer (fused single pass, or two-pass for large N).
# ---------------------------------------------------------------------------
def token_performer_pallas(tokens, params, *, block_tokens=1024,
                           max_fused_tokens=2048):
    """tokens: (B, N, Cin) bf16/f32 -> (B, N, E) f32."""
    B, N, Cin = tokens.shape
    E = params["wproj"].shape[0]
    m = params["wprm_t"].shape[1]
    assert 2 * E == 128, "packed output path assumes out_channel == 64"
    assert N % 16 == 0, "packed token-pair path needs N % 16 == 0"

    kp = _prepare_kernel_params(params)
    tokens = tokens.astype(jnp.bfloat16)
    x_even = tokens[:, 0::2, :]                                  # (B, N/2, Cin)
    x_odd = tokens[:, 1::2, :]

    if N <= max_fused_tokens:
        out_packed = _token_performer_fused(x_even, x_odd, kp, E, m)
    else:
        out_packed = _token_performer_two_pass(x_even, x_odd, kp, E, m,
                                               block_tokens)
    # Free row-major unpack: row j = [token 2j | token 2j+1].
    return out_packed.reshape(B, N, E)


def _token_performer_fused(x_even, x_odd, kp, emb, m):
    B, NP, Cin = x_even.shape
    P = kp["wall"].shape[1]
    n_tok = 2 * NP

    def cs(a):
        nd = a.ndim
        return pl.BlockSpec(a.shape, lambda b, _nd=nd: (0,) * _nd)

    tok_spec = pl.BlockSpec((1, NP, Cin), lambda b: (b, 0, 0))
    p_args = [kp["wall"], kp["ball"], kp["wproj"], kp["bproj"],
              kp["wm1"], kp["bm1"], kp["wm2"], kp["bm2"]]
    flops = 2 * B * n_tok * (Cin * P + 2 * m * 2 * emb + 3 * emb * emb)
    return pl.pallas_call(
        functools.partial(_performer_fused_kernel, emb=emb, m=m),
        out_shape=jax.ShapeDtypeStruct((B, NP, 2 * emb), jnp.float32),
        grid=(B,),
        in_specs=[tok_spec, tok_spec] + [cs(a) for a in p_args],
        out_specs=pl.BlockSpec((1, NP, 2 * emb), lambda b: (b, 0, 0)),
        compiler_params=pltpu.CompilerParams(
            dimension_semantics=("parallel",),
            vmem_limit_bytes=32 * 1024 * 1024),
        cost_estimate=pl.CostEstimate(
            flops=flops,
            transcendentals=2 * B * n_tok * m,
            bytes_accessed=2 * B * n_tok * Cin + 4 * B * NP * 2 * emb),
    )(x_even, x_odd, *p_args)


def _token_performer_two_pass(x_even, x_odd, kp, emb, m, block_tokens):
    B, NP, Cin = x_even.shape
    hn = _choose_half_block(NP, max(8, block_tokens // 2))
    n_tiles = NP // hn

    def cs(a):
        nd = a.ndim
        return pl.BlockSpec(a.shape, lambda b, t, _nd=nd: (0,) * _nd)

    tok_spec = pl.BlockSpec((1, hn, Cin), lambda b, t: (b, t, 0))
    kpv_spec = pl.BlockSpec((1, m, 2 * emb), lambda b, t: (b, 0, 0))

    # ---- pass 1: kpv = sum over tokens of kp^T @ [v | 1 | 0] -> (B, m, 128) ----
    p1_args = [kp["wkv"], kp["bkv"]]
    kpv = pl.pallas_call(
        functools.partial(_performer_kv_kernel, emb=emb, m=m),
        out_shape=jax.ShapeDtypeStruct((B, m, 2 * emb), jnp.float32),
        grid=(B, n_tiles),
        in_specs=[tok_spec, tok_spec] + [cs(a) for a in p1_args],
        out_specs=kpv_spec,
        scratch_shapes=[pltpu.VMEM((m, 2 * emb), jnp.float32)],
        compiler_params=pltpu.CompilerParams(
            dimension_semantics=("parallel", "arbitrary"),
            vmem_limit_bytes=32 * 1024 * 1024),
    )(x_even, x_odd, *p1_args)

    # ---- pass 2: attention output + proj + MLP per token tile ----
    p2_args = [kp["wqv"], kp["bqv"], kp["wproj"], kp["bproj"],
               kp["wm1"], kp["bm1"], kp["wm2"], kp["bm2"]]
    out = pl.pallas_call(
        functools.partial(_performer_out_kernel, emb=emb, m=m),
        out_shape=jax.ShapeDtypeStruct((B, NP, 2 * emb), jnp.float32),
        grid=(B, n_tiles),
        in_specs=[tok_spec, tok_spec, kpv_spec] + [cs(a) for a in p2_args],
        out_specs=pl.BlockSpec((1, hn, 2 * emb), lambda b, t: (b, t, 0)),
        compiler_params=pltpu.CompilerParams(
            dimension_semantics=("parallel", "parallel"),
            vmem_limit_bytes=32 * 1024 * 1024),
    )(x_even, x_odd, kpv, *p2_args)
    return out


# ---------------------------------------------------------------------------
# Glue: 3-D unfold emitted directly in channel-last (B, L, C*k^3) layout.
# Feature ordering matches torch.nn.Unfold: channel-major, kernel offsets
# (kd, kh, kw) row-major; L iterates output positions row-major.
# ---------------------------------------------------------------------------
def unfold_3d_tokens(x, kernel=4, stride=2, padding=1, dtype=jnp.bfloat16):
    B, C, D, H, W = x.shape
    xp = jnp.pad(x, ((0, 0), (0, 0),
                     (padding, padding), (padding, padding),
                     (padding, padding))).astype(dtype)
    Ld = (D + 2 * padding - kernel) // stride + 1
    Lh = (H + 2 * padding - kernel) // stride + 1
    Lw = (W + 2 * padding - kernel) // stride + 1
    cols = []
    for kd in range(kernel):
        for kh in range(kernel):
            for kw in range(kernel):
                sl = xp[:, :,
                        kd:kd + stride * (Ld - 1) + 1:stride,
                        kh:kh + stride * (Lh - 1) + 1:stride,
                        kw:kw + stride * (Lw - 1) + 1:stride]
                cols.append(jnp.moveaxis(sl, 1, -1))             # (B, Ld, Lh, Lw, C)
    patches = jnp.stack(cols, axis=-1)                           # (B, Ld, Lh, Lw, C, k^3)
    return patches.reshape(B, Ld * Lh * Lw, C * kernel ** 3)     # (B, L, C*k^3)


def swt4_3d_forward(x, params, patch=4, stride=2, padding=1, attention=True,
                    **perf_kwargs):
    if not attention:
        return unfold_3d_tokens(x, patch, stride, padding, dtype=x.dtype)
    tokens = unfold_3d_tokens(x, patch, stride, padding, dtype=jnp.bfloat16)
    return token_performer_pallas(tokens, params, **perf_kwargs)


# ---------------------------------------------------------------------------
# Pure-JAX f32 reference of Token_performer (exact erf GELU / exact divide).
# ---------------------------------------------------------------------------
def token_performer_ref(tokens, p):
    def ln(z, g, b):
        mu = z.mean(-1, keepdims=True)
        var = ((z - mu) ** 2).mean(-1, keepdims=True)
        return (z - mu) / jnp.sqrt(var + 1e-5) * g + b

    m = p["wprm_t"].shape[1]
    xn = ln(tokens, p["g1"][0], p["b1"][0])
    k = xn @ p["wk"] + p["bk"][0]
    q = xn @ p["wq"] + p["bq"][0]
    v = xn @ p["wv"] + p["bv"][0]

    def prm(z):
        zd = 0.5 * jnp.sum(z * z, axis=-1, keepdims=True)
        return jnp.exp(jnp.einsum("bti,im->btm", z, p["wprm_t"]) - zd) / math.sqrt(m)

    kp, qp = prm(k), prm(q)
    D = jnp.einsum("btm,bm->bt", qp, kp.sum(1))[..., None]
    kptv = jnp.einsum("bin,bim->bnm", v, kp)
    y = jnp.einsum("btm,bnm->btn", qp, kptv) / (D + 1e-8)
    y = v + y @ p["wproj"] + p["bproj"][0]
    yn = ln(y, p["g2"][0], p["b2"][0])
    h = yn @ p["wm1"] + p["bm1"][0]
    h = 0.5 * h * (1.0 + jax.scipy.special.erf(h / math.sqrt(2.0)))
    h = h @ p["wm2"] + p["bm2"][0]
    return y + h


# ---------------------------------------------------------------------------
# Deterministic synthetic parameter init (shapes from Token_performer.__init__).
# ---------------------------------------------------------------------------
def init_params(key, c_in, emb, kernel_ratio=0.5, scale=0.05):
    m = int(emb * kernel_ratio)
    ks = jax.random.split(key, 12)
    wkqv = scale * jax.random.normal(ks[0], (c_in, 3 * emb), jnp.float32)
    bkqv = scale * jax.random.normal(ks[1], (1, 3 * emb), jnp.float32)
    w_prm = jax.nn.initializers.orthogonal()(ks[2], (m, emb), jnp.float32) * math.sqrt(m)
    return dict(
        g1=jnp.ones((1, c_in), jnp.float32),
        b1=jnp.zeros((1, c_in), jnp.float32),
        wk=wkqv[:, :emb], bk=bkqv[:, :emb],
        wq=wkqv[:, emb:2 * emb], bq=bkqv[:, emb:2 * emb],
        wv=wkqv[:, 2 * emb:], bv=bkqv[:, 2 * emb:],
        wprm_t=jnp.asarray(w_prm.T),                             # (emb, m)
        wproj=scale * jax.random.normal(ks[3], (emb, emb), jnp.float32),
        bproj=scale * jax.random.normal(ks[4], (1, emb), jnp.float32),
        g2=jnp.ones((1, emb), jnp.float32),
        b2=jnp.zeros((1, emb), jnp.float32),
        wm1=scale * jax.random.normal(ks[5], (emb, emb), jnp.float32),
        bm1=scale * jax.random.normal(ks[6], (1, emb), jnp.float32),
        wm2=scale * jax.random.normal(ks[7], (emb, emb), jnp.float32),
        bm2=scale * jax.random.normal(ks[8], (1, emb), jnp.float32),
    )


if __name__ == "__main__":
    # SWT4_3D(in_channel=1, out_channel=64, patch=4, stride=2, padding=1)
    B, C_IN, D, H, W = 2, 1, 16, 16, 16
    PATCH, STRIDE, PAD = 4, 2, 1
    E_OUT = 64
    DIM = C_IN * PATCH ** 3                                      # 64

    key = jax.random.PRNGKey(0)
    kx, kparam = jax.random.split(key)
    x = jax.random.normal(kx, (B, C_IN, D, H, W), jnp.float32)
    params = init_params(kparam, DIM, E_OUT)

    @jax.jit
    def run_fused(x_in, prm):
        return swt4_3d_forward(x_in, prm, PATCH, STRIDE, PAD,
                               max_fused_tokens=2048)

    @jax.jit
    def run_two_pass(x_in, prm):
        return swt4_3d_forward(x_in, prm, PATCH, STRIDE, PAD,
                               block_tokens=256, max_fused_tokens=0)

    @jax.jit
    def run_ref(x_in, prm):
        tokens = unfold_3d_tokens(x_in, PATCH, STRIDE, PAD, dtype=jnp.float32)
        return token_performer_ref(tokens, prm)

    out = jax.block_until_ready(run_fused(x, params))
    L = ((D + 2 * PAD - PATCH) // STRIDE + 1) ** 3               # 512 tokens
    assert out.shape == (B, L, E_OUT), (out.shape, (B, L, E_OUT))

    out2 = jax.block_until_ready(run_two_pass(x, params))
    ref = jax.block_until_ready(run_ref(x, params))

    err_fused = float(jnp.max(jnp.abs(out - ref)))
    err_two = float(jnp.max(jnp.abs(out2 - ref)))
    # Tolerance covers bf16 MXU operands / bf16 tokens, tanh-GELU and approx
    # reciprocal vs the exact f32/erf reference (observed errors are O(1e-2)).
    assert err_fused < 1e-1, f"fused max abs error {err_fused}"
    assert err_two < 1e-1, f"two-pass max abs error {err_two}"

    print("KERNEL_OK")
</pallas_src>

<mosaic_0001>
module attributes {stable_mosaic.version = 11 : i64} {
  func.func @_performer_fused_kernel(%arg0: i32, %arg1: memref<1x256x64xbf16, #tpu.memory_space<vmem>>, %arg2: memref<1x256x64xbf16, #tpu.memory_space<vmem>>, %arg3: memref<64x256xbf16, #tpu.memory_space<vmem>>, %arg4: memref<1x256xf32, #tpu.memory_space<vmem>>, %arg5: memref<64x64xbf16, #tpu.memory_space<vmem>>, %arg6: memref<1x64xf32, #tpu.memory_space<vmem>>, %arg7: memref<64x64xbf16, #tpu.memory_space<vmem>>, %arg8: memref<1x64xf32, #tpu.memory_space<vmem>>, %arg9: memref<64x64xbf16, #tpu.memory_space<vmem>>, %arg10: memref<1x64xf32, #tpu.memory_space<vmem>>, %arg11: memref<1x256x128xf32, #tpu.memory_space<vmem>>) attributes {dimension_semantics = [#tpu.dimension_semantics<parallel>], iteration_bounds = array<i64: 2>, scalar_prefetch = 0 : i64, scratch_operands = 0 : i64, tpu.core_type = #tpu.core_type<tc>, window_params = [{transform_indices = @transform_0, window_bounds = array<i64: 1, 256, 64>}, {transform_indices = @transform_1, window_bounds = array<i64: 1, 256, 64>}, {pipeline_mode = #tpu.pipeline_mode<synchronous>, transform_indices = @transform_2, window_bounds = array<i64: 64, 256>}, {pipeline_mode = #tpu.pipeline_mode<synchronous>, transform_indices = @transform_3, window_bounds = array<i64: 1, 256>}, {pipeline_mode = #tpu.pipeline_mode<synchronous>, transform_indices = @transform_4, window_bounds = array<i64: 64, 64>}, {pipeline_mode = #tpu.pipeline_mode<synchronous>, transform_indices = @transform_5, window_bounds = array<i64: 1, 64>}, {pipeline_mode = #tpu.pipeline_mode<synchronous>, transform_indices = @transform_6, window_bounds = array<i64: 64, 64>}, {pipeline_mode = #tpu.pipeline_mode<synchronous>, transform_indices = @transform_7, window_bounds = array<i64: 1, 64>}, {pipeline_mode = #tpu.pipeline_mode<synchronous>, transform_indices = @transform_8, window_bounds = array<i64: 64, 64>}, {pipeline_mode = #tpu.pipeline_mode<synchronous>, transform_indices = @transform_9, window_bounds = array<i64: 1, 64>}, {transform_indices = @transform_10, window_bounds = array<i64: 1, 256, 128>}]} {
    %c0 = arith.constant 0 : index
    %c0_0 = arith.constant 0 : index
    %c0_1 = arith.constant 0 : index
    %0 = vector.load %arg1[%c0, %c0_0, %c0_1] : memref<1x256x64xbf16, #tpu.memory_space<vmem>>, vector<1x256x64xbf16>
    %1 = vector.shape_cast %0 : vector<1x256x64xbf16> to vector<256x64xbf16>
    %c0_2 = arith.constant 0 : index
    %c0_3 = arith.constant 0 : index
    %c0_4 = arith.constant 0 : index
    %2 = vector.load %arg2[%c0_2, %c0_3, %c0_4] : memref<1x256x64xbf16, #tpu.memory_space<vmem>>, vector<1x256x64xbf16>
    %3 = vector.shape_cast %2 : vector<1x256x64xbf16> to vector<256x64xbf16>
    %4 = tpu.concatenate %1, %3 in 0 : vector<256x64xbf16>, vector<256x64xbf16> -> vector<512x64xbf16>
    %5 = arith.extf %4 : vector<512x64xbf16> to vector<512x64xf32>
    %cst = arith.constant dense<0.000000e+00> : vector<512xf32>
    %6 = vector.multi_reduction <add>, %5, %cst [1] : vector<512x64xf32> to vector<512xf32>
    %7 = vector.shape_cast %6 : vector<512xf32> to vector<512x1xf32>
    %cst_5 = arith.constant 6.400000e+01 : f32
    %8 = vector.broadcast %cst_5 : f32 to vector<512x1xf32>
    %9 = arith.divf %7, %8 : vector<512x1xf32>
    %10 = vector.broadcast %9 : vector<512x1xf32> to vector<512x64xf32>
    %11 = arith.subf %5, %10 : vector<512x64xf32>
    %12 = arith.mulf %11, %11 : vector<512x64xf32>
    %cst_6 = arith.constant dense<0.000000e+00> : vector<512xf32>
    %13 = vector.multi_reduction <add>, %12, %cst_6 [1] : vector<512x64xf32> to vector<512xf32>
    %14 = vector.shape_cast %13 : vector<512xf32> to vector<512x1xf32>
    %cst_7 = arith.constant 6.400000e+01 : f32
    %15 = vector.broadcast %cst_7 : f32 to vector<512x1xf32>
    %16 = arith.divf %14, %15 : vector<512x1xf32>
    %17 = vector.broadcast %9 : vector<512x1xf32> to vector<512x64xf32>
    %18 = arith.subf %5, %17 : vector<512x64xf32>
    %cst_8 = arith.constant 9.99999974E-6 : f32
    %19 = vector.broadcast %cst_8 : f32 to vector<512x1xf32>
    %20 = arith.addf %16, %19 : vector<512x1xf32>
    %21 = math.rsqrt %20 : vector<512x1xf32>
    %22 = vector.broadcast %21 : vector<512x1xf32> to vector<512x64xf32>
    %23 = arith.mulf %18, %22 : vector<512x64xf32>
    %24 = arith.truncf %23 : vector<512x64xf32> to vector<512x64xbf16>
    %c0_9 = arith.constant 0 : index
    %c0_10 = arith.constant 0 : index
    %25 = vector.load %arg3[%c0_9, %c0_10] : memref<64x256xbf16, #tpu.memory_space<vmem>>, vector<64x256xbf16>
    %cst_11 = arith.constant dense<0.000000e+00> : vector<512x256xf32>
    %26 = tpu.matmul %24, %25, %cst_11 {dimension_numbers = #tpu.dot_dimension_numbers<[1], [0], [0], [1], [0, 0, 1, 1], [], []>} : vector<512x64xbf16>, vector<64x256xbf16>, vector<512x256xf32> -> vector<512x256xf32>
    %c0_12 = arith.constant 0 : index
    %c0_13 = arith.constant 0 : index
    %27 = vector.load %arg4[%c0_12, %c0_13] : memref<1x256xf32, #tpu.memory_space<vmem>>, vector<1x256xf32>
    %28 = vector.broadcast %27 : vector<1x256xf32> to vector<512x256xf32>
    %29 = arith.addf %26, %28 : vector<512x256xf32>
    %30 = vector.extract_strided_slice %29 {offsets = [0, 0], sizes = [512, 64], strides = [1, 1]} : vector<512x256xf32> to vector<512x64xf32>
    %31 = vector.extract_strided_slice %29 {offsets = [0, 64], sizes = [512, 64], strides = [1, 1]} : vector<512x256xf32> to vector<512x64xf32>
    %32 = vector.extract_strided_slice %29 {offsets = [0, 128], sizes = [512, 32], strides = [1, 1]} : vector<512x256xf32> to vector<512x32xf32>
    %33 = vector.extract_strided_slice %29 {offsets = [0, 160], sizes = [512, 64], strides = [1, 1]} : vector<512x256xf32> to vector<512x64xf32>
    %34 = vector.extract_strided_slice %29 {offsets = [0, 224], sizes = [512, 32], strides = [1, 1]} : vector<512x256xf32> to vector<512x32xf32>
    %35 = arith.mulf %30, %30 : vector<512x64xf32>
    %cst_14 = arith.constant dense<0.000000e+00> : vector<512xf32>
    %36 = vector.multi_reduction <add>, %35, %cst_14 [1] : vector<512x64xf32> to vector<512xf32>
    %37 = vector.shape_cast %36 : vector<512xf32> to vector<512x1xf32>
    %cst_15 = arith.constant 5.000000e-01 : f32
    %38 = vector.broadcast %cst_15 : f32 to vector<512x1xf32>
    %39 = arith.mulf %38, %37 : vector<512x1xf32>
    %40 = vector.broadcast %39 : vector<512x1xf32> to vector<512x32xf32>
    %41 = arith.subf %32, %40 : vector<512x32xf32>
    %42 = math.exp %41 : vector<512x32xf32>
    %cst_16 = arith.constant 0.176776692 : f32
    %43 = vector.broadcast %cst_16 : f32 to vector<512x32xf32>
    %44 = arith.mulf %42, %43 : vector<512x32xf32>
    %45 = arith.truncf %44 : vector<512x32xf32> to vector<512x32xbf16>
    %46 = arith.mulf %33, %33 : vector<512x64xf32>
    %cst_17 = arith.constant dense<0.000000e+00> : vector<512xf32>
    %47 = vector.multi_reduction <add>, %46, %cst_17 [1] : vector<512x64xf32> to vector<512xf32>
    %48 = vector.shape_cast %47 : vector<512xf32> to vector<512x1xf32>
    %cst_18 = arith.constant 5.000000e-01 : f32
    %49 = vector.broadcast %cst_18 : f32 to vector<512x1xf32>
    %50 = arith.mulf %49, %48 : vector<512x1xf32>
    %51 = vector.broadcast %50 : vector<512x1xf32> to vector<512x32xf32>
    %52 = arith.subf %34, %51 : vector<512x32xf32>
    %53 = math.exp %52 : vector<512x32xf32>
    %cst_19 = arith.constant 0.176776692 : f32
    %54 = vector.broadcast %cst_19 : f32 to vector<512x32xf32>
    %55 = arith.mulf %53, %54 : vector<512x32xf32>
    %56 = arith.truncf %55 : vector<512x32xf32> to vector<512x32xbf16>
    %57 = arith.truncf %31 : vector<512x64xf32> to vector<512x64xbf16>
    %cst_20 = arith.constant 1.000000e+00 : bf16
    %58 = vector.broadcast %cst_20 : bf16 to vector<512x1xbf16>
    %cst_21 = arith.constant 0.000000e+00 : bf16
    %59 = vector.broadcast %cst_21 : bf16 to vector<512x63xbf16>
    %60 = tpu.concatenate %57, %58, %59 in 1 : vector<512x64xbf16>, vector<512x1xbf16>, vector<512x63xbf16> -> vector<512x128xbf16>
    %cst_22 = arith.constant dense<0.000000e+00> : vector<32x128xf32>
    %61 = tpu.matmul %45, %60, %cst_22 {dimension_numbers = #tpu.dot_dimension_numbers<[0], [0], [1], [1], [0, 1, 1, 1], [], []>} : vector<512x32xbf16>, vector<512x128xbf16>, vector<32x128xf32> -> vector<32x128xf32>
    %62 = arith.truncf %61 : vector<32x128xf32> to vector<32x128xbf16>
    %cst_23 = arith.constant dense<0.000000e+00> : vector<512x128xf32>
    %63 = tpu.matmul %56, %62, %cst_23 {dimension_numbers = #tpu.dot_dimension_numbers<[1], [0], [0], [1], [0, 0, 1, 1], [], []>} : vector<512x32xbf16>, vector<32x128xbf16>, vector<512x128xf32> -> vector<512x128xf32>
    %64 = vector.extract_strided_slice %63 {offsets = [0, 64], sizes = [512, 1], strides = [1, 1]} : vector<512x128xf32> to vector<512x1xf32>
    %cst_24 = arith.constant 9.99999993E-9 : f32
    %65 = vector.broadcast %cst_24 : f32 to vector<512x1xf32>
    %66 = arith.addf %64, %65 : vector<512x1xf32>
    %67 = tpu.reciprocal %66 {approx = true} : vector<512x1xf32> -> vector<512x1xf32>
    %68 = vector.extract_strided_slice %63 {offsets = [0, 0], sizes = [512, 64], strides = [1, 1]} : vector<512x128xf32> to vector<512x64xf32>
    %69 = vector.broadcast %67 : vector<512x1xf32> to vector<512x64xf32>
    %70 = arith.mulf %68, %69 : vector<512x64xf32>
    %71 = arith.truncf %70 : vector<512x64xf32> to vector<512x64xbf16>
    %c0_25 = arith.constant 0 : index
    %c0_26 = arith.constant 0 : index
    %72 = vector.load %arg5[%c0_25, %c0_26] : memref<64x64xbf16, #tpu.memory_space<vmem>>, vector<64x64xbf16>
    %cst_27 = arith.constant dense<0.000000e+00> : vector<512x64xf32>
    %73 = tpu.matmul %71, %72, %cst_27 {dimension_numbers = #tpu.dot_dimension_numbers<[1], [0], [0], [1], [0, 0, 1, 1], [], []>} : vector<512x64xbf16>, vector<64x64xbf16>, vector<512x64xf32> -> vector<512x64xf32>
    %74 = arith.addf %31, %73 : vector<512x64xf32>
    %c0_28 = arith.constant 0 : index
    %c0_29 = arith.constant 0 : index
    %75 = vector.load %arg6[%c0_28, %c0_29] : memref<1x64xf32, #tpu.memory_space<vmem>>, vector<1x64xf32>
    %76 = vector.broadcast %75 : vector<1x64xf32> to vector<512x64xf32>
    %77 = arith.addf %74, %76 : vector<512x64xf32>
    %cst_30 = arith.constant dense<0.000000e+00> : vector<512xf32>
    %78 = vector.multi_reduction <add>, %77, %cst_30 [1] : vector<512x64xf32> to vector<512xf32>
    %79 = vector.shape_cast %78 : vector<512xf32> to vector<512x1xf32>
    %cst_31 = arith.constant 6.400000e+01 : f32
    %80 = vector.broadcast %cst_31 : f32 to vector<512x1xf32>
    %81 = arith.divf %79, %80 : vector<512x1xf32>
    %82 = vector.broadcast %81 : vector<512x1xf32> to vector<512x64xf32>
    %83 = arith.subf %77, %82 : vector<512x64xf32>
    %84 = arith.mulf %83, %83 : vector<512x64xf32>
    %cst_32 = arith.constant dense<0.000000e+00> : vector<512xf32>
    %85 = vector.multi_reduction <add>, %84, %cst_32 [1] : vector<512x64xf32> to vector<512xf32>
    %86 = vector.shape_cast %85 : vector<512xf32> to vector<512x1xf32>
    %cst_33 = arith.constant 6.400000e+01 : f32
    %87 = vector.broadcast %cst_33 : f32 to vector<512x1xf32>
    %88 = arith.divf %86, %87 : vector<512x1xf32>
    %89 = vector.broadcast %81 : vector<512x1xf32> to vector<512x64xf32>
    %90 = arith.subf %77, %89 : vector<512x64xf32>
    %cst_34 = arith.constant 9.99999974E-6 : f32
    %91 = vector.broadcast %cst_34 : f32 to vector<512x1xf32>
    %92 = arith.addf %88, %91 : vector<512x1xf32>
    %93 = math.rsqrt %92 : vector<512x1xf32>
    %94 = vector.broadcast %93 : vector<512x1xf32> to vector<512x64xf32>
    %95 = arith.mulf %90, %94 : vector<512x64xf32>
    %96 = arith.truncf %95 : vector<512x64xf32> to vector<512x64xbf16>
    %c0_35 = arith.constant 0 : index
    %c0_36 = arith.constant 0 : index
    %97 = vector.load %arg7[%c0_35, %c0_36] : memref<64x64xbf16, #tpu.memory_space<vmem>>, vector<64x64xbf16>
    %cst_37 = arith.constant dense<0.000000e+00> : vector<512x64xf32>
    %98 = tpu.matmul %96, %97, %cst_37 {dimension_numbers = #tpu.dot_dimension_numbers<[1], [0], [0], [1], [0, 0, 1, 1], [], []>} : vector<512x64xbf16>, vector<64x64xbf16>, vector<512x64xf32> -> vector<512x64xf32>
    %c0_38 = arith.constant 0 : index
    %c0_39 = arith.constant 0 : index
    %99 = vector.load %arg8[%c0_38, %c0_39] : memref<1x64xf32, #tpu.memory_space<vmem>>, vector<1x64xf32>
    %100 = vector.broadcast %99 : vector<1x64xf32> to vector<512x64xf32>
    %101 = arith.addf %98, %100 : vector<512x64xf32>
    %cst_40 = arith.constant 5.000000e-01 : f32
    %102 = vector.broadcast %cst_40 : f32 to vector<512x64xf32>
    %103 = arith.mulf %102, %101 : vector<512x64xf32>
    %cst_41 = arith.constant 4.471500e-02 : f32
    %104 = vector.broadcast %cst_41 : f32 to vector<512x64xf32>
    %105 = arith.mulf %104, %101 : vector<512x64xf32>
    %106 = arith.mulf %105, %101 : vector<512x64xf32>
    %107 = arith.mulf %106, %101 : vector<512x64xf32>
    %108 = arith.addf %101, %107 : vector<512x64xf32>
    %cst_42 = arith.constant 0.797884583 : f32
    %109 = vector.broadcast %cst_42 : f32 to vector<512x64xf32>
    %110 = arith.mulf %109, %108 : vector<512x64xf32>
    %111 = math.tanh %110 : vector<512x64xf32>
    %cst_43 = arith.constant 1.000000e+00 : f32
    %112 = vector.broadcast %cst_43 : f32 to vector<512x64xf32>
    %113 = arith.addf %112, %111 : vector<512x64xf32>
    %114 = arith.mulf %103, %113 : vector<512x64xf32>
    %115 = arith.truncf %114 : vector<512x64xf32> to vector<512x64xbf16>
    %c0_44 = arith.constant 0 : index
    %c0_45 = arith.constant 0 : index
    %116 = vector.load %arg9[%c0_44, %c0_45] : memref<64x64xbf16, #tpu.memory_space<vmem>>, vector<64x64xbf16>
    %cst_46 = arith.constant dense<0.000000e+00> : vector<512x64xf32>
    %117 = tpu.matmul %115, %116, %cst_46 {dimension_numbers = #tpu.dot_dimension_numbers<[1], [0], [0], [1], [0, 0, 1, 1], [], []>} : vector<512x64xbf16>, vector<64x64xbf16>, vector<512x64xf32> -> vector<512x64xf32>
    %c0_47 = arith.constant 0 : index
    %c0_48 = arith.constant 0 : index
    %118 = vector.load %arg10[%c0_47, %c0_48] : memref<1x64xf32, #tpu.memory_space<vmem>>, vector<1x64xf32>
    %119 = vector.broadcast %118 : vector<1x64xf32> to vector<512x64xf32>
    %120 = arith.addf %117, %119 : vector<512x64xf32>
    %121 = arith.addf %77, %120 : vector<512x64xf32>
    %122 = vector.extract_strided_slice %121 {offsets = [0, 0], sizes = [256, 64], strides = [1, 1]} : vector<512x64xf32> to vector<256x64xf32>
    %123 = vector.extract_strided_slice %121 {offsets = [256, 0], sizes = [256, 64], strides = [1, 1]} : vector<512x64xf32> to vector<256x64xf32>
    %124 = tpu.concatenate %122, %123 in 1 : vector<256x64xf32>, vector<256x64xf32> -> vector<256x128xf32>
    %c0_49 = arith.constant 0 : index
    %c0_50 = arith.constant 0 : index
    %c0_51 = arith.constant 0 : index
    %125 = vector.load %arg11[%c0_49, %c0_50, %c0_51] : memref<1x256x128xf32, #tpu.memory_space<vmem>>, vector<1x256x128xf32>
    %126 = vector.shape_cast %125 : vector<1x256x128xf32> to vector<256x128xf32>
    %127 = vector.shape_cast %124 : vector<256x128xf32> to vector<1x256x128xf32>
    tpu.vector_store %arg11[%c0_49, %c0_50, %c0_51], %127 {strides = array<i32>} : memref<1x256x128xf32, #tpu.memory_space<vmem>>, vector<1x256x128xf32>,
    return
  }
  func.func @transform_0(%arg0: i32) -> (i32, i32, i32) {
    %c0_i32 = arith.constant 0 : i32
    %c0_i32_0 = arith.constant 0 : i32
    %c0_i32_1 = arith.constant 0 : i32
    return %arg0, %c0_i32, %c0_i32_0 : i32, i32, i32
  }
  func.func @transform_1(%arg0: i32) -> (i32, i32, i32) {
    %c0_i32 = arith.constant 0 : i32
    %c0_i32_0 = arith.constant 0 : i32
    %c0_i32_1 = arith.constant 0 : i32
    return %arg0, %c0_i32, %c0_i32_0 : i32, i32, i32
  }
  func.func @transform_2(%arg0: i32) -> (i32, i32) {
    %c0_i32 = arith.constant 0 : i32
    %c0_i32_0 = arith.constant 0 : i32
    %c0_i32_1 = arith.constant 0 : i32
    return %c0_i32, %c0_i32_0 : i32, i32
  }
  func.func @transform_3(%arg0: i32) -> (i32, i32) {
    %c0_i32 = arith.constant 0 : i32
    %c0_i32_0 = arith.constant 0 : i32
    %c0_i32_1 = arith.constant 0 : i32
    return %c0_i32, %c0_i32_0 : i32, i32
  }
  func.func @transform_4(%arg0: i32) -> (i32, i32) {
    %c0_i32 = arith.constant 0 : i32
    %c0_i32_0 = arith.constant 0 : i32
    %c0_i32_1 = arith.constant 0 : i32
    return %c0_i32, %c0_i32_0 : i32, i32
  }
  func.func @transform_5(%arg0: i32) -> (i32, i32) {
    %c0_i32 = arith.constant 0 : i32
    %c0_i32_0 = arith.constant 0 : i32
    %c0_i32_1 = arith.constant 0 : i32
    return %c0_i32, %c0_i32_0 : i32, i32
  }
  func.func @transform_6(%arg0: i32) -> (i32, i32) {
    %c0_i32 = arith.constant 0 : i32
    %c0_i32_0 = arith.constant 0 : i32
    %c0_i32_1 = arith.constant 0 : i32
    return %c0_i32, %c0_i32_0 : i32, i32
  }
  func.func @transform_7(%arg0: i32) -> (i32, i32) {
    %c0_i32 = arith.constant 0 : i32
    %c0_i32_0 = arith.constant 0 : i32
    %c0_i32_1 = arith.constant 0 : i32
    return %c0_i32, %c0_i32_0 : i32, i32
  }
  func.func @transform_8(%arg0: i32) -> (i32, i32) {
    %c0_i32 = arith.constant 0 : i32
    %c0_i32_0 = arith.constant 0 : i32
    %c0_i32_1 = arith.constant 0 : i32
    return %c0_i32, %c0_i32_0 : i32, i32
  }
  func.func @transform_9(%arg0: i32) -> (i32, i32) {
    %c0_i32 = arith.constant 0 : i32
    %c0_i32_0 = arith.constant 0 : i32
    %c0_i32_1 = arith.constant 0 : i32
    return %c0_i32, %c0_i32_0 : i32, i32
  }
  func.func @transform_10(%arg0: i32) -> (i32, i32, i32) {
    %c0_i32 = arith.constant 0 : i32
    %c0_i32_0 = arith.constant 0 : i32
    %c0_i32_1 = arith.constant 0 : i32
    return %arg0, %c0_i32, %c0_i32_0 : i32, i32, i32
  }
}

</mosaic_0001>

<bundles_post_ra>
// kernel: run_fused.1
= control target key start
LH: loop header
LB: loop body
LE: loop exit
PB: predicated region body
PF: predicated region fallthrough
CT: control target
= control target key end

     0   :  { %s10960_s13 = smov 0   ;;  %s16805_s0 = inlined_call_operand.vmem [shape: bf16[2,256,64], index: 0, kind: input, shape index: {}]   ;;  %s16806_s1 = inlined_call_operand.vmem [shape: bf16[2,256,64], index: 1, kind: input, shape index: {}]   ;;  %s16807_s2 = inlined_call_operand.vmem [shape: bf16[64,256], index: 2, kind: input, shape index: {}]   ;;  %s16808_s3 = inlined_call_operand.vmem [shape: f32[1,256], index: 3, kind: input, shape index: {}]   ;;  %s16809_s4 = inlined_call_operand.vmem [shape: bf16[64,64], index: 4, kind: input, shape index: {}]   ;;  %s16810_s5 = inlined_call_operand.vmem [shape: f32[1,64], index: 5, kind: input, shape index: {}]   ;;  %s16811_s6 = inlined_call_operand.vmem [shape: bf16[64,64], index: 6, kind: input, shape index: {}]   ;;  %s16812_s7 = inlined_call_operand.vmem [shape: f32[1,64], index: 7, kind: input, shape index: {}]   ;;  %s16813_s8 = inlined_call_operand.vmem [shape: bf16[64,64], index: 8, kind: input, shape index: {}]   ;;  %s16814_s9 = inlined_call_operand.vmem [shape: f32[1,64], index: 9, kind: input, shape index: {}]   ;;  %s16815_s10 = inlined_call_operand.vmem [shape: f32[2,256,128], index: 10, kind: output, shape index: {}]  }
   0x1 LB: > { %s9315_s14 = sadd.s32 4294967295, %s10898_s13   ;;  %p9319_p0 = scmp.ge.s32.totalorder %s10898_s13, 1  ;;  %s10898_s13 = sphi %s10960_s13, %s20_s13  }
   0x2   : > { %p322_p1 = scmp.lt.s32.totalorder %s10898_s13, 3 }
   0x4   : > { %p323_p2 = pnand %p9319_p0, %p322_p1 }
   0x6   : > { %326 = sbr.rel (%p323_p2) target bundleno = 6302 (0x189e), region = 60 }
   0xd   : > { %p365_p3 = scmp.lt.s32.totalorder %s9315_s14, 1  ;;  %vm702_vm0 = vcmask 523264   ;;  %s10901_s22 = smov 96   ;;  %vm3742_vm1 = vcmask 531456   ;;  %vm4068_vm2 = vcmask 261120  }
   0xe   : > { %s10902_s23 = smov 64   ;;  %s10903_s24 = smov 32  }
   0xf   : > { %s17922_s14 = smov (!%p365_p3, %s9315_s14), 1 }
  0x10   : > { %s9543_s15 = sshll.u32 %s17922_s14, 7 }
  0x11   : > { %s10976_s18 = scalar_lea.vmem %s16805_s0, %s9543_s15  ;;  %s11036_s21 = scalar_lea.vmem %s16806_s1, %s9543_s15 }
  0x12   : > { %v10979_v0 = vld [vmem:[%s10976_s18] sm:$0xff]   ;;  %v10982_v1 = vld [vmem:[%s10976_s18 + $0x8] sm:$0xff]   ;;  %v10987_v4 = vld [vmem:[%s10976_s18 + $0x10] sm:$0xff]  }
  0x13   : > { %v638_v2 = vunpack.c.l.bf16 %v10979_v0  ;;  %v639_v3 = vunpack.c.h.bf16 %v10979_v0  ;;  %v640_v5 = vunpack.c.l.bf16 %v10982_v1  ;;  %v641_v6 = vunpack.c.h.bf16 %v10982_v1  ;;  %v11002_v11 = vld [vmem:[%s10976_s18 + $0x18] sm:$0xff]   ;;  %v11014_v17 = vld [vmem:[%s10976_s18 + $0x20] sm:$0xff]   ;;  %v11020_v19 = vld [vmem:[%s10976_s18 + $0x28] sm:$0xff]  }
  0x14   : > { %v642_v10 = vunpack.c.l.bf16 %v10987_v4  ;;  %v643_v13 = vunpack.c.h.bf16 %v10987_v4  ;;  %v644_v15 = vunpack.c.l.bf16 %v11002_v11  ;;  %v645_v16 = vunpack.c.h.bf16 %v11002_v11  ;;  %v11042_v26 = vld [vmem:[%s10976_s18 + $0x30] sm:$0xff]   ;;  %v11052_v30 = vld [vmem:[%s10976_s18 + $0x38] sm:$0xff]   ;;  %v11060_v34 = vld [vmem:[%s10976_s18 + $0x40] sm:$0xff]  }
  0x15   : > { %v703_v7 = vsel %vm702_vm0, %v638_v2, 0.0  ;;  %v709_v8 = vsel %vm702_vm0, %v640_v5, 0.0  ;;  %v706_v9 = vsel %vm702_vm0, %v639_v3, 0.0  ;;  %v712_v12 = vsel %vm702_vm0, %v641_v6, 0.0  ;;  %v11063_v35 = vld [vmem:[%s10976_s18 + $0x48] sm:$0xff]   ;;  %v11092_v48 = vld [vmem:[%s10976_s18 + $0x50] sm:$0xff]  }
  0x16   : > { %704 = vadd.xlane.f32.xlu0 %v703_v7  ;;  %710 = vadd.xlane.f32.xlu1 %v709_v8  ;;  %v715_v14 = vsel %vm702_vm0, %v642_v10, 0.0  ;;  %v718_v18 = vsel %vm702_vm0, %v643_v13, 0.0  ;;  %v721_v20 = vsel %vm702_vm0, %v644_v15, 0.0  ;;  %v724_v21 = vsel %vm702_vm0, %v645_v16, 0.0  ;;  %v11096_v50 = vld [vmem:[%s10976_s18 + $0x58] sm:$0xff]   ;;  %v11108_v56 = vld [vmem:[%s10976_s18 + $0x60] sm:$0xff]  }
  0x17   : > { %v646_v22 = vunpack.c.l.bf16 %v11014_v17  ;;  %v647_v23 = vunpack.c.h.bf16 %v11014_v17  ;;  %v648_v24 = vunpack.c.l.bf16 %v11020_v19  ;;  %v649_v28 = vunpack.c.h.bf16 %v11020_v19  ;;  %v11119_v61 = vld [vmem:[%s10976_s18 + $0x68] sm:$0xff]  }
  0x18   : > { %v650_v31 = vunpack.c.l.bf16 %v11042_v26  ;;  %v651_v33 = vunpack.c.h.bf16 %v11042_v26  ;;  %v652_v37 = vunpack.c.l.bf16 %v11052_v30  ;;  %v653_v39 = vunpack.c.h.bf16 %v11052_v30  ;;  %v10101_v26 = vld [vmem:[%s16807_s2] ss:$8 sps:$4 sm:$0xff]   ;;  %v10104_v30 = vld [vmem:[%s16807_s2 + $0x10] ss:$8 sps:$4 sm:$0xff]  }
  0x19   : > { %v727_v25 = vsel %vm702_vm0, %v646_v22, 0.0  ;;  %v730_v27 = vsel %vm702_vm0, %v647_v23, 0.0  ;;  %v733_v29 = vsel %vm702_vm0, %v648_v24, 0.0  ;;  %v736_v32 = vsel %vm702_vm0, %v649_v28, 0.0 }
  0x1a   : > { %707 = vadd.xlane.f32.xlu0 %v706_v9  ;;  %713 = vadd.xlane.f32.xlu1 %v712_v12  ;;  %v739_v36 = vsel %vm702_vm0, %v650_v31, 0.0  ;;  %v742_v38 = vsel %vm702_vm0, %v651_v33, 0.0  ;;  %v654_v40 = vunpack.c.l.bf16 %v11060_v34  ;;  %v655_v41 = vunpack.c.h.bf16 %v11060_v34  ;;  %v11130_v9 = vld [vmem:[%s10976_s18 + $0x70] sm:$0xff]   ;;  %v10107_v34 = vld [vmem:[%s16807_s2 + $0x20] ss:$8 sps:$4 sm:$0xff]  }
  0x1b   : > { %v656_v42 = vunpack.c.l.bf16 %v11063_v35  ;;  %v745_v43 = vsel %vm702_vm0, %v652_v37, 0.0  ;;  %v748_v44 = vsel %vm702_vm0, %v653_v39, 0.0  ;;  %v657_v49 = vunpack.c.h.bf16 %v11063_v35  ;;  %v10110_v35 = vld [vmem:[%s16807_s2 + $0x30] ss:$8 sps:$4 sm:$0xff]  }
  0x1c   : > { %v751_v45 = vsel %vm702_vm0, %v654_v40, 0.0  ;;  %v754_v46 = vsel %vm702_vm0, %v655_v41, 0.0  ;;  %v658_v51 = vunpack.c.l.bf16 %v11092_v48  ;;  %v659_v53 = vunpack.c.h.bf16 %v11092_v48 }
  0x1d   : > { %v757_v47 = vsel %vm702_vm0, %v656_v42, 0.0  ;;  %v760_v52 = vsel %vm702_vm0, %v657_v49, 0.0  ;;  %v660_v55 = vunpack.c.l.bf16 %v11096_v50  ;;  %v661_v58 = vunpack.c.h.bf16 %v11096_v50 }
  0x1e   : > { %716 = vadd.xlane.f32.xlu0 %v715_v14  ;;  %719 = vadd.xlane.f32.xlu1 %v718_v18  ;;  %v763_v54 = vsel %vm702_vm0, %v658_v51, 0.0  ;;  %v766_v57 = vsel %vm702_vm0, %v659_v53, 0.0  ;;  %v662_v60 = vunpack.c.l.bf16 %v11108_v56  ;;  %v663_v63 = vunpack.c.h.bf16 %v11108_v56 }
  0x1f   : > { %v769_v59 = vsel %vm702_vm0, %v660_v55, 0.0  ;;  %v772_v62 = vsel %vm702_vm0, %v661_v58, 0.0  ;;  %v16839_v8 = vunpack.c.l.bf16 %v11119_v61  ;;  %v16837_v14 = vunpack.c.h.bf16 %v11119_v61 }
  0x20   : > { %v775_v7 = vsel %vm702_vm0, %v662_v60, 0.0  ;;  %v778_v12 = vsel %vm702_vm0, %v663_v63, 0.0 }
  0x21   : > { %v781_v18 = vsel %vm702_vm0, %v16839_v8, 0.0 }
  0x22   : > { %722 = vadd.xlane.f32.xlu0 %v721_v20  ;;  %725 = vadd.xlane.f32.xlu1 %v724_v21  ;;  %v16834_v20 = vunpack.c.l.bf16 %v11130_v9  ;;  %v11141_v21 = vld [vmem:[%s10976_s18 + $0x78] sm:$0xff]  }
  0x26   : > { %728 = vadd.xlane.f32.xlu0 %v727_v25  ;;  %731 = vadd.xlane.f32.xlu1 %v730_v27  ;;  %v784_v25 = vsel %vm702_vm0, %v16837_v14, 0.0  ;;  %v16833_v27 = vunpack.c.h.bf16 %v11130_v9 }
  0x2a   : > { %734 = vadd.xlane.f32.xlu0 %v733_v29  ;;  %737 = vadd.xlane.f32.xlu1 %v736_v32  ;;  %v787_v29 = vsel %vm702_vm0, %v16834_v20, 0.0  ;;  %v16828_v32 = vunpack.c.l.bf16 %v11141_v21 }
  0x2e   : > { %740 = vadd.xlane.f32.xlu0 %v739_v36  ;;  %743 = vadd.xlane.f32.xlu1 %v742_v38  ;;  %v11152_v36 = vld [vmem:[%s11036_s21] sm:$0xff]   ;;  %v790_v38 = vsel %vm702_vm0, %v16833_v27, 0.0 }
  0x32   : > { %746 = vadd.xlane.f32.xlu0 %v745_v43  ;;  %749 = vadd.xlane.f32.xlu1 %v748_v44  ;;  %v16825_v43 = vunpack.c.h.bf16 %v11141_v21  ;;  %v793_v44 = vsel %vm702_vm0, %v16828_v32, 0.0 }
  0x36   : > { %752 = vadd.xlane.f32.xlu0 %v751_v45  ;;  %755 = vadd.xlane.f32.xlu1 %v754_v46  ;;  %v16822_v45 = vunpack.c.l.bf16 %v11152_v36  ;;  %v11163_v46 = vld [vmem:[%s11036_s21 + $0x8] sm:$0xff]  }
  0x3a   : > { %758 = vadd.xlane.f32.xlu0 %v757_v47  ;;  %761 = vadd.xlane.f32.xlu1 %v760_v52  ;;  %v796_v47 = vsel %vm702_vm0, %v16825_v43, 0.0  ;;  %v16819_v52 = vunpack.c.h.bf16 %v11152_v36 }
  0x3e   : > { %764 = vadd.xlane.f32.xlu0 %v763_v54  ;;  %767 = vadd.xlane.f32.xlu1 %v766_v57  ;;  %v799_v54 = vsel %vm702_vm0, %v16822_v45, 0.0  ;;  %v16816_v57 = vunpack.c.l.bf16 %v11163_v46 }
  0x42   : > { %770 = vadd.xlane.f32.xlu0 %v769_v59  ;;  %773 = vadd.xlane.f32.xlu1 %v772_v62  ;;  %v11174_v59 = vld [vmem:[%s11036_s21 + $0x10] sm:$0xff]   ;;  %v802_v62 = vsel %vm702_vm0, %v16819_v52, 0.0 }
  0x46   : > { %776 = vadd.xlane.f32.xlu0 %v775_v7  ;;  %779 = vadd.xlane.f32.xlu1 %v778_v12  ;;  %v16818_v7 = vunpack.c.h.bf16 %v11163_v46  ;;  %v805_v12 = vsel %vm702_vm0, %v16816_v57, 0.0 }
  0x4a   : > { %782 = vadd.xlane.f32.xlu0 %v781_v18  ;;  %785 = vadd.xlane.f32.xlu1 %v784_v25  ;;  %v16817_v18 = vunpack.c.l.bf16 %v11174_v59  ;;  %v11185_v25 = vld [vmem:[%s11036_s21 + $0x18] sm:$0xff]  }
  0x4b   : > { %v16824_v57 = vunpack.c.h.bf16 %v11185_v25 }
  0x4e   : > { %788 = vadd.xlane.f32.xlu0 %v787_v29  ;;  %791 = vadd.xlane.f32.xlu1 %v790_v38  ;;  %v808_v29 = vsel %vm702_vm0, %v16818_v7, 0.0  ;;  %v16821_v38 = vunpack.c.h.bf16 %v11174_v59  ;;  %v820_v7 = vsel %vm702_vm0, %v16824_v57, 0.0 }
  0x52   : > { %794 = vadd.xlane.f32.xlu0 %v793_v44  ;;  %797 = vadd.xlane.f32.xlu1 %v796_v47  ;;  %v811_v44 = vsel %vm702_vm0, %v16817_v18, 0.0  ;;  %v16820_v47 = vunpack.c.l.bf16 %v11185_v25  ;;  %v11207_v18 = vld [vmem:[%s11036_s21 + $0x28] sm:$0xff]  }
  0x53   : > { %v16830_v45 = vunpack.c.h.bf16 %v11207_v18 }
  0x55   : > { %v832_v57 = vsel %vm702_vm0, %v16830_v45, 0.0 }
  0x56   : > { %800 = vadd.xlane.f32.xlu0 %v799_v54  ;;  %803 = vadd.xlane.f32.xlu1 %v802_v62  ;;  %v11196_v54 = vld [vmem:[%s11036_s21 + $0x20] sm:$0xff]   ;;  %v814_v62 = vsel %vm702_vm0, %v16821_v38, 0.0 }
  0x57   : > { %v16826_v52 = vunpack.c.h.bf16 %v11196_v54 }
  0x59   : > { %v826_v38 = vsel %vm702_vm0, %v16826_v52, 0.0  ;;  %v11240_v52 = vld [vmem:[%s11036_s21 + $0x40] sm:$0xff]  }
  0x5a   : > { %806 = vadd.xlane.f32.xlu0 %v805_v12  ;;  %809 = vadd.xlane.f32.xlu1 %v808_v29  ;;  %v817_v12 = vsel %vm702_vm0, %v16820_v47, 0.0  ;;  %v16823_v29 = vunpack.c.l.bf16 %v11196_v54  ;;  %v11218_v47 = vld [vmem:[%s11036_s21 + $0x30] sm:$0xff]   ;;  %v16838_v45 = vunpack.c.h.bf16 %v11240_v52 }
  0x5b   : > { %v16831_v43 = vunpack.c.h.bf16 %v11218_v47 }
  0x5e   : > { %812 = vadd.xlane.f32.xlu0 %v811_v44  ;;  %815 = vadd.xlane.f32.xlu1 %v814_v62  ;;  %v823_v44 = vsel %vm702_vm0, %v16823_v29, 0.0  ;;  %v16827_v62 = vunpack.c.l.bf16 %v11207_v18  ;;  %v11229_v29 = vld [vmem:[%s11036_s21 + $0x38] sm:$0xff]  }
  0x5f   : > { %v16835_v32 = vunpack.c.h.bf16 %v11229_v29 }
  0x62   : > { %818 = vadd.xlane.f32.xlu0 %v817_v12  ;;  %821 = vadd.xlane.f32.xlu1 %v820_v7  ;;  %v829_v7 = vsel %vm702_vm0, %v16827_v62, 0.0  ;;  %v16829_v12 = vunpack.c.l.bf16 %v11218_v47  ;;  %v838_v62 = vsel %vm702_vm0, %v16831_v43, 0.0 }
  0x66   : > { %824 = vadd.xlane.f32.xlu0 %v823_v44  ;;  %827 = vadd.xlane.f32.xlu1 %v826_v38  ;;  %v835_v38 = vsel %vm702_vm0, %v16829_v12, 0.0  ;;  %v16832_v44 = vunpack.c.l.bf16 %v11229_v29  ;;  %v844_v12 = vsel %vm702_vm0, %v16835_v32, 0.0 }
  0x6a   : > { %830 = vadd.xlane.f32.xlu0 %v829_v7  ;;  %833 = vadd.xlane.f32.xlu1 %v832_v57  ;;  %v841_v57 = vsel %vm702_vm0, %v16832_v44, 0.0  ;;  %v16836_v7 = vunpack.c.l.bf16 %v11240_v52 }
  0x6c   : > { %v847_v43 = vsel %vm702_vm0, %v16836_v7, 0.0 }
  0x6e   : > { %836 = vadd.xlane.f32.xlu0 %v835_v38  ;;  %839 = vadd.xlane.f32.xlu1 %v838_v62  ;;  %v850_v62 = vsel %vm702_vm0, %v16838_v45, 0.0 }
  0x72   : > { %842 = vadd.xlane.f32.xlu0 %v841_v57  ;;  %845 = vadd.xlane.f32.xlu1 %v844_v12 }
  0x76   : > { %848 = vadd.xlane.f32.xlu0 %v847_v43  ;;  %851 = vadd.xlane.f32.xlu1 %v850_v62 }
  0xa3   : > { %v705_v38 = vpop.xlane.xlu0 %704  ;;  %v711_v27 = vpop.xlane.xlu1 %710 }
  0xa4   : > { %v896_v44 = vmul.f32 0.015625, %v705_v38  ;;  %v898_v20 = vmul.f32 0.015625, %v711_v27 }
  0xa6   : > { %v11262_v32 = vsub.f32 %v638_v2, %v896_v44  ;;  %v11266_v12 = vsub.f32 %v640_v5, %v898_v20 }
  0xa7   : > { %v708_v57 = vpop.xlane.xlu0 %707  ;;  %v714_v14 = vpop.xlane.xlu1 %713 }
  0xa8   : > { %v897_v7 = vmul.f32 0.015625, %v708_v57  ;;  %v1024_v45 = vmul.f32 %v11262_v32, %v11262_v32  ;;  %v899_v43 = vmul.f32 0.015625, %v714_v14  ;;  %v1026_v62 = vmul.f32 %v11266_v12, %v11266_v12 }
  0xaa   : > { %v11274_v27 = vsub.f32 %v639_v3, %v897_v7  ;;  %v1088_v2 = vsel %vm702_vm0, %v1024_v45, 0.0  ;;  %v11279_v5 = vsub.f32 %v641_v6, %v899_v43  ;;  %v1094_v57 = vsel %vm702_vm0, %v1026_v62, 0.0 }
  0xab   : > { %1089 = vadd.xlane.f32.xlu0 %v1088_v2  ;;  %v717_v20 = vpop.xlane.xlu0 %716  ;;  %v720_v38 = vpop.xlane.xlu1 %719 }
  0xac   : > { %v900_v44 = vmul.f32 0.015625, %v717_v20  ;;  %v1025_v14 = vmul.f32 %v11274_v27, %v11274_v27  ;;  %v901_v8 = vmul.f32 0.015625, %v720_v38  ;;  %v1027_v0 = vmul.f32 %v11279_v5, %v11279_v5 }
  0xae   : > { %v11288_v3 = vsub.f32 %v642_v10, %v900_v44  ;;  %v1091_v1 = vsel %vm702_vm0, %v1025_v14, 0.0  ;;  %v11293_v6 = vsub.f32 %v643_v13, %v901_v8  ;;  %v1097_v62 = vsel %vm702_vm0, %v1027_v0, 0.0 }
  0xaf   : > { %1095 = vadd.xlane.f32.xlu0 %v1094_v57  ;;  %1092 = vadd.xlane.f32.xlu1 %v1091_v1  ;;  %v723_v45 = vpop.xlane.xlu0 %722  ;;  %v726_v43 = vpop.xlane.xlu1 %725 }
  0xb0   : > { %v902_v7 = vmul.f32 0.015625, %v723_v45  ;;  %v1028_v2 = vmul.f32 %v11288_v3, %v11288_v3  ;;  %v903_v20 = vmul.f32 0.015625, %v726_v43  ;;  %v1029_v10 = vmul.f32 %v11293_v6, %v11293_v6 }
  0xb2   : > { %v11302_v44 = vsub.f32 %v644_v15, %v902_v7  ;;  %v1100_v4 = vsel %vm702_vm0, %v1028_v2, 0.0  ;;  %v11307_v13 = vsub.f32 %v645_v16, %v903_v20  ;;  %v1103_v14 = vsel %vm702_vm0, %v1029_v10, 0.0 }
  0xb3   : > { %1098 = vadd.xlane.f32.xlu1 %v1097_v62  ;;  %1101 = vadd.xlane.f32.xlu0 %v1100_v4  ;;  %v729_v8 = vpop.xlane.xlu0 %728  ;;  %v732_v57 = vpop.xlane.xlu1 %731 }
  0xb4   : > { %v904_v38 = vmul.f32 0.015625, %v729_v8  ;;  %v1030_v0 = vmul.f32 %v11302_v44, %v11302_v44  ;;  %v905_v1 = vmul.f32 0.015625, %v732_v57  ;;  %v1031_v15 = vmul.f32 %v11307_v13, %v11307_v13 }
  0xb6   : > { %v11316_v45 = vsub.f32 %v646_v22, %v904_v38  ;;  %v1106_v11 = vsel %vm702_vm0, %v1030_v0, 0.0  ;;  %v11321_v16 = vsub.f32 %v647_v23, %v905_v1  ;;  %v1109_v2 = vsel %vm702_vm0, %v1031_v15, 0.0 }
  0xb7   : > { %1104 = vadd.xlane.f32.xlu1 %v1103_v14  ;;  %1107 = vadd.xlane.f32.xlu0 %v1106_v11  ;;  %v735_v7 = vpop.xlane.xlu0 %734  ;;  %v738_v62 = vpop.xlane.xlu1 %737 }
  0xb8   : > { %v906_v43 = vmul.f32 0.015625, %v735_v7  ;;  %v1032_v20 = vmul.f32 %v11316_v45, %v11316_v45  ;;  %v907_v10 = vmul.f32 0.015625, %v738_v62  ;;  %v1033_v22 = vmul.f32 %v11321_v16, %v11321_v16  ;;  %v10099_v7 = vld [vmem:[%s16807_s2 + $0x4] ss:$8 sps:$4 sm:$0xff]  }
  0xb9   : > { %1724 = vmatprep.subr.bf16.mxu0 %v10099_v7 }
  0xba   : > { %v11330_v4 = vsub.f32 %v648_v24, %v906_v43  ;;  %v1112_v17 = vsel %vm702_vm0, %v1032_v20, 0.0  ;;  %v11335_v23 = vsub.f32 %v649_v28, %v907_v10  ;;  %v1115_v14 = vsel %vm702_vm0, %v1033_v22, 0.0  ;;  %1725 = vmatpush1.bf16.msra.mxu0 %v10101_v26 }
  0xbb   : > { %1110 = vadd.xlane.f32.xlu1 %v1109_v2  ;;  %1113 = vadd.xlane.f32.xlu0 %v1112_v17  ;;  %v741_v8 = vpop.xlane.xlu0 %740  ;;  %v744_v57 = vpop.xlane.xlu1 %743 }
  0xbc   : > { %v908_v38 = vmul.f32 0.015625, %v741_v8  ;;  %v1034_v0 = vmul.f32 %v11330_v4, %v11330_v4  ;;  %v909_v1 = vmul.f32 0.015625, %v744_v57  ;;  %v1035_v24 = vmul.f32 %v11335_v23, %v11335_v23 }
  0xbe   : > { %v11344_v15 = vsub.f32 %v650_v31, %v908_v38  ;;  %v1118_v19 = vsel %vm702_vm0, %v1034_v0, 0.0  ;;  %v11349_v28 = vsub.f32 %v651_v33, %v909_v1  ;;  %v1121_v2 = vsel %vm702_vm0, %v1035_v24, 0.0  ;;  %v10102_v38 = vld [vmem:[%s16807_s2 + $0x14] ss:$8 sps:$4 sm:$0xff]  }
  0xbf   : > { %1116 = vadd.xlane.f32.xlu1 %v1115_v14  ;;  %1119 = vadd.xlane.f32.xlu0 %v1118_v19  ;;  %v747_v11 = vpop.xlane.xlu0 %746  ;;  %v750_v62 = vpop.xlane.xlu1 %749 }
  0xc0   : > { %v910_v43 = vmul.f32 0.015625, %v747_v11  ;;  %v1036_v31 = vmul.f32 %v11344_v15, %v11344_v15  ;;  %v911_v33 = vmul.f32 0.015625, %v750_v62  ;;  %v1037_v20 = vmul.f32 %v11349_v28, %v11349_v28  ;;  %1726 = vmatprep.subr.bf16.mxu0 %v10102_v38  ;;  %v10108_v38 = vld [vmem:[%s16807_s2 + $0x34] ss:$8 sps:$4 sm:$0xff]  }
  0xc1   : > { %1727 = vmatpush1.bf16.msra.mxu0 %v10104_v30 }
  0xc2   : > { %v11364_v10 = vsub.f32 %v652_v37, %v910_v43  ;;  %v1124_v22 = vsel %vm702_vm0, %v1036_v31, 0.0  ;;  %v11369_v17 = vsub.f32 %v653_v39, %v911_v33  ;;  %v1127_v0 = vsel %vm702_vm0, %v1037_v20, 0.0  ;;  %v10105_v43 = vld [vmem:[%s16807_s2 + $0x24] ss:$8 sps:$4 sm:$0xff]  }
  0xc3   : > { %1122 = vadd.xlane.f32.xlu1 %v1121_v2  ;;  %1125 = vadd.xlane.f32.xlu0 %v1124_v22  ;;  %v753_v8 = vpop.xlane.xlu0 %752  ;;  %v756_v14 = vpop.xlane.xlu1 %755 }
  0xc4   : > { %v912_v57 = vmul.f32 0.015625, %v753_v8  ;;  %v1038_v37 = vmul.f32 %v11364_v10, %v11364_v10  ;;  %v913_v39 = vmul.f32 0.015625, %v756_v14  ;;  %v1039_v1 = vmul.f32 %v11369_v17, %v11369_v17  ;;  %1728 = vmatprep.subr.bf16.mxu0 %v10105_v43 }
  0xc5   : > { %1729 = vmatpush1.bf16.msra.mxu0 %v10107_v34 }
  0xc6   : > { %v11384_v24 = vsub.f32 %v654_v40, %v912_v57  ;;  %v1130_v19 = vsel %vm702_vm0, %v1038_v37, 0.0  ;;  %v11389_v11 = vsub.f32 %v655_v41, %v913_v39  ;;  %v1133_v31 = vsel %vm702_vm0, %v1039_v1, 0.0  ;;  %1730 = vmatprep.subr.bf16.mxu0 %v10108_v38 }
  0xc7   : > { %1128 = vadd.xlane.f32.xlu1 %v1127_v0  ;;  %1131 = vadd.xlane.f32.xlu0 %v1130_v19  ;;  %v759_v7 = vpop.xlane.xlu0 %758  ;;  %v762_v2 = vpop.xlane.xlu1 %761 }
  0xc8   : > { %v914_v62 = vmul.f32 0.015625, %v759_v7  ;;  %v1040_v40 = vmul.f32 %v11384_v24, %v11384_v24  ;;  %v915_v41 = vmul.f32 0.015625, %v762_v2  ;;  %v1041_v26 = vmul.f32 %v11389_v11, %v11389_v11 }
  0xc9   : > { %1731 = vmatpush1.bf16.msra.mxu0 %v10110_v35 }
  0xca   : > { %v11404_v33 = vsub.f32 %v656_v42, %v914_v62  ;;  %v1136_v20 = vsel %vm702_vm0, %v1040_v40, 0.0  ;;  %v11409_v22 = vsub.f32 %v657_v49, %v915_v41  ;;  %v1139_v0 = vsel %vm702_vm0, %v1041_v26, 0.0 }
  0xcb   : > { %1134 = vadd.xlane.f32.xlu1 %v1133_v31  ;;  %1137 = vadd.xlane.f32.xlu0 %v1136_v20  ;;  %v765_v8 = vpop.xlane.xlu0 %764  ;;  %v768_v14 = vpop.xlane.xlu1 %767  ;;  %v16847_v31 = vmov 0  }
  0xcc   : > { %v916_v57 = vmul.f32 0.015625, %v765_v8  ;;  %v1042_v42 = vmul.f32 %v11404_v33, %v11404_v33  ;;  %v917_v49 = vmul.f32 0.015625, %v768_v14  ;;  %v1043_v37 = vmul.f32 %v11409_v22, %v11409_v22  ;;  %1756 = vmatprep.mubr.bf16.mxu0 %v16847_v31 }
  0xce   : > { %v11424_v30 = vsub.f32 %v658_v51, %v916_v57  ;;  %v1142_v39 = vsel %vm702_vm0, %v1042_v42, 0.0  ;;  %v11429_v1 = vsub.f32 %v659_v53, %v917_v49  ;;  %v1145_v62 = vsel %vm702_vm0, %v1043_v37, 0.0 }
  0xcf   : > { %1140 = vadd.xlane.f32.xlu1 %v1139_v0  ;;  %1143 = vadd.xlane.f32.xlu0 %v1142_v39  ;;  %v771_v19 = vpop.xlane.xlu0 %770  ;;  %v774_v43 = vpop.xlane.xlu1 %773 }
  0xd0   : > { %v918_v7 = vmul.f32 0.015625, %v771_v19  ;;  %v1044_v2 = vmul.f32 %v11424_v30, %v11424_v30  ;;  %v919_v51 = vmul.f32 0.015625, %v774_v43  ;;  %v1045_v40 = vmul.f32 %v11429_v1, %v11429_v1 }
  0xd1   : > { %v17158_v19 = vunpack.c.l.bf16 %v11119_v61 }
  0xd2   : > { %v11439_v48 = vsub.f32 %v660_v55, %v918_v7  ;;  %v1148_v53 = vsel %vm702_vm0, %v1044_v2, 0.0  ;;  %v11444_v34 = vsub.f32 %v661_v58, %v919_v51  ;;  %v1151_v8 = vsel %vm702_vm0, %v1045_v40, 0.0 }
  0xd3   : > { %1146 = vadd.xlane.f32.xlu1 %v1145_v62  ;;  %1149 = vadd.xlane.f32.xlu0 %v1148_v53  ;;  %v777_v41 = vpop.xlane.xlu0 %776  ;;  %v780_v20 = vpop.xlane.xlu1 %779 }
  0xd4   : > { %v920_v26 = vmul.f32 0.015625, %v777_v41  ;;  %v1046_v38 = vmul.f32 %v11439_v48, %v11439_v48  ;;  %v921_v57 = vmul.f32 0.015625, %v780_v20  ;;  %v1047_v55 = vmul.f32 %v11444_v34, %v11444_v34 }
  0xd5   : > { %v17160_v20 = vunpack.c.l.bf16 %v11130_v9 }
  0xd6   : > { %v11453_v14 = vsub.f32 %v662_v60, %v920_v26  ;;  %v1154_v50 = vsel %vm702_vm0, %v1046_v38, 0.0  ;;  %v11458_v58 = vsub.f32 %v663_v63, %v921_v57  ;;  %v1157_v49 = vsel %vm702_vm0, %v1047_v55, 0.0 }
  0xd7   : > { %1152 = vadd.xlane.f32.xlu1 %v1151_v8  ;;  %1155 = vadd.xlane.f32.xlu0 %v1154_v50  ;;  %v783_v0 = vpop.xlane.xlu0 %782  ;;  %v786_v35 = vpop.xlane.xlu1 %785  ;;  %v17159_v63 = vunpack.c.h.bf16 %v11119_v61  ;;  %v17161_v38 = vunpack.c.h.bf16 %v11130_v9  ;;  %v11489_v50 = vld [vmem:[%s11036_s21 + $0x48] sm:$0xff]   ;;  %v17162_v9 = vunpack.c.l.bf16 %v11141_v21 }
  0xd8   : > { %v922_v42 = vmul.f32 0.015625, %v783_v0  ;;  %v1048_v37 = vmul.f32 %v11453_v14, %v11453_v14  ;;  %v923_v39 = vmul.f32 0.015625, %v786_v35  ;;  %v1049_v60 = vmul.f32 %v11458_v58, %v11458_v58 }
  0xda   : > { %v11467_v7 = vsub.f32 %v17158_v19, %v922_v42  ;;  %v1160_v56 = vsel %vm702_vm0, %v1048_v37, 0.0  ;;  %v11472_v43 = vsub.f32 %v17159_v63, %v923_v39  ;;  %v1163_v40 = vsel %vm702_vm0, %v1049_v60, 0.0 }
  0xdb   : > { %1158 = vadd.xlane.f32.xlu1 %v1157_v49  ;;  %1161 = vadd.xlane.f32.xlu0 %v1160_v56  ;;  %v789_v62 = vpop.xlane.xlu0 %788  ;;  %v792_v51 = vpop.xlane.xlu1 %791  ;;  %v17163_v56 = vunpack.c.h.bf16 %v11141_v21 }
  0xdc   : > { %v924_v2 = vmul.f32 0.015625, %v789_v62  ;;  %v1050_v53 = vmul.f32 %v11467_v7, %v11467_v7  ;;  %v925_v41 = vmul.f32 0.015625, %v792_v51  ;;  %v1051_v26 = vmul.f32 %v11472_v43, %v11472_v43 }
  0xde   : > { %v11481_v61 = vsub.f32 %v17160_v20, %v924_v2  ;;  %v1166_v8 = vsel %vm702_vm0, %v1050_v53, 0.0  ;;  %v11486_v57 = vsub.f32 %v17161_v38, %v925_v41  ;;  %v1169_v35 = vsel %vm702_vm0, %v1051_v26, 0.0 }
  0xdf   : > { %1164 = vadd.xlane.f32.xlu1 %v1163_v40  ;;  %1167 = vadd.xlane.f32.xlu0 %v1166_v8  ;;  %v795_v55 = vpop.xlane.xlu0 %794  ;;  %v798_v42 = vpop.xlane.xlu1 %797  ;;  %v16845_v2 = vunpack.c.l.bf16 %v11489_v50  ;;  %v17164_v8 = vunpack.c.l.bf16 %v11152_v36 }
  0xe0   : > { %v926_v0 = vmul.f32 0.015625, %v795_v55  ;;  %v1052_v49 = vmul.f32 %v11481_v61, %v11481_v61  ;;  %v927_v37 = vmul.f32 0.015625, %v798_v42  ;;  %v1053_v39 = vmul.f32 %v11486_v57, %v11486_v57 }
  0xe1   : > { %v853_v55 = vsel %vm702_vm0, %v16845_v2, 0.0 }
  0xe2   : > { %v11498_v60 = vsub.f32 %v17162_v9, %v926_v0  ;;  %v1172_v19 = vsel %vm702_vm0, %v1052_v49, 0.0  ;;  %v11503_v63 = vsub.f32 %v17163_v56, %v927_v37  ;;  %v1175_v51 = vsel %vm702_vm0, %v1053_v39, 0.0 }
  0xe3   : > { %1170 = vadd.xlane.f32.xlu1 %v1169_v35  ;;  %1173 = vadd.xlane.f32.xlu0 %v1172_v19  ;;  %v801_v62 = vpop.xlane.xlu0 %800  ;;  %v804_v41 = vpop.xlane.xlu1 %803  ;;  %v16843_v0 = vunpack.c.h.bf16 %v11489_v50  ;;  %v11521_v35 = vld [vmem:[%s11036_s21 + $0x50] sm:$0xff]   ;;  %v17165_v49 = vunpack.c.h.bf16 %v11152_v36 }
  0xe4   : > { %v1054_v40 = vmul.f32 %v11498_v60, %v11498_v60  ;;  %v928_v53 = vmul.f32 0.015625, %v801_v62  ;;  %v929_v26 = vmul.f32 0.015625, %v804_v41  ;;  %v1055_v20 = vmul.f32 %v11503_v63, %v11503_v63 }
  0xe5   : > { %v856_v62 = vsel %vm702_vm0, %v16843_v0, 0.0 }
  0xe6   : > { %v1178_v21 = vsel %vm702_vm0, %v1054_v40, 0.0  ;;  %v11514_v38 = vsub.f32 %v17164_v8, %v928_v53  ;;  %v11525_v37 = vsub.f32 %v17165_v49, %v929_v26  ;;  %v1181_v39 = vsel %vm702_vm0, %v1055_v20, 0.0 }
  0xe7   : > { %1176 = vadd.xlane.f32.xlu1 %v1175_v51  ;;  %1179 = vadd.xlane.f32.xlu0 %v1178_v21  ;;  %v807_v42 = vpop.xlane.xlu0 %806  ;;  %v810_v56 = vpop.xlane.xlu1 %809  ;;  %v16841_v51 = vunpack.c.l.bf16 %v11521_v35  ;;  %v17166_v40 = vunpack.c.l.bf16 %v11163_v46  ;;  %v16840_v8 = vunpack.c.h.bf16 %v11521_v35 }
  0xe8   : > { %v1056_v9 = vmul.f32 %v11514_v38, %v11514_v38  ;;  %v930_v19 = vmul.f32 0.015625, %v807_v42  ;;  %v931_v41 = vmul.f32 0.015625, %v810_v56  ;;  %v1057_v26 = vmul.f32 %v11525_v37, %v11525_v37 }
  0xe9   : > { %v859_v21 = vsel %vm702_vm0, %v16841_v51, 0.0  ;;  %v17168_v42 = vunpack.c.h.bf16 %v11163_v46 }
  0xea   : > { %v1184_v36 = vsel %vm702_vm0, %v1056_v9, 0.0  ;;  %v11537_v53 = vsub.f32 %v17166_v40, %v930_v19  ;;  %v17169_v40 = vunpack.c.l.bf16 %v11174_v59 }
  0xeb   : > { %1182 = vadd.xlane.f32.xlu1 %v1181_v39  ;;  %854 = vadd.xlane.f32.xlu0 %v853_v55  ;;  %v813_v20 = vpop.xlane.xlu0 %812  ;;  %v11546_v55 = vld [vmem:[%s11036_s21 + $0x58] sm:$0xff]   ;;  %v11550_v49 = vsub.f32 %v17168_v42, %v931_v41  ;;  %v1187_v39 = vsel %vm702_vm0, %v1057_v26, 0.0  ;;  %v816_v56 = vpop.xlane.xlu1 %815 }
  0xec   : > { %17167 = vst [vmem:[#allocation2_spill] sm:$0xff] %v11537_v53  ;;  %v1058_v9 = vmul.f32 %v11537_v53, %v11537_v53  ;;  %v932_v19 = vmul.f32 0.015625, %v813_v20  ;;  %v933_v26 = vmul.f32 0.015625, %v816_v56 }
  0xed   : > { %v1059_v42 = vmul.f32 %v11550_v49, %v11550_v49 }
  0xee   : > { %v1190_v46 = vsel %vm702_vm0, %v1058_v9, 0.0  ;;  %v11562_v41 = vsub.f32 %v17169_v40, %v932_v19  ;;  %v17171_v9 = vunpack.c.h.bf16 %v11174_v59 }
  0xef   : > { %857 = vadd.xlane.f32.xlu1 %v856_v62  ;;  %1185 = vadd.xlane.f32.xlu0 %v1184_v36  ;;  %v862_v62 = vsel %vm702_vm0, %v16840_v8, 0.0  ;;  %v16842_v36 = vunpack.c.l.bf16 %v11546_v55  ;;  %v819_v20 = vpop.xlane.xlu0 %818  ;;  %v11571_v8 = vld [vmem:[%s11036_s21 + $0x60] sm:$0xff]   ;;  %v1193_v19 = vsel %vm702_vm0, %v1059_v42, 0.0 }
  0xf0   : > { %17170 = vst [vmem:[#allocation3_spill] sm:$0xff] %v11562_v41  ;;  %v11575_v51 = vsub.f32 %v17171_v9, %v933_v26  ;;  %v1060_v56 = vmul.f32 %v11562_v41, %v11562_v41  ;;  %v17173_v26 = vunpack.c.l.bf16 %v11185_v25 }
  0xf2   : > { %17172 = vst [vmem:[#allocation4_spill] sm:$0xff] %v11575_v51  ;;  %v1196_v59 = vsel %vm702_vm0, %v1060_v56, 0.0  ;;  %v1061_v0 = vmul.f32 %v11575_v51, %v11575_v51  ;;  %v17175_v56 = vunpack.c.h.bf16 %v11185_v25 }
  0xf3   : > { %1188 = vadd.xlane.f32.xlu1 %v1187_v39  ;;  %860 = vadd.xlane.f32.xlu0 %v859_v21  ;;  %v865_v21 = vsel %vm702_vm0, %v16842_v36, 0.0  ;;  %v16844_v39 = vunpack.c.h.bf16 %v11546_v55  ;;  %v16846_v36 = vunpack.c.l.bf16 %v11571_v8 }
  0xf5   : > { %v868_v40 = vsel %vm702_vm0, %v16844_v39, 0.0  ;;  %v11596_v39 = vld [vmem:[%s11036_s21 + $0x68] sm:$0xff]  }
  0xf7   : > { %863 = vadd.xlane.f32.xlu1 %v862_v62  ;;  %1191 = vadd.xlane.f32.xlu0 %v1190_v46  ;;  %v934_v62 = vmul.f32 0.015625, %v819_v20  ;;  %v822_v46 = vpop.xlane.xlu1 %821  ;;  %v825_v20 = vpop.xlane.xlu0 %824 }
  0xf8   : > { %v935_v42 = vmul.f32 0.015625, %v822_v46 }
  0xf9   : > { %v11587_v9 = vsub.f32 %v17173_v26, %v934_v62  ;;  %v1199_v62 = vsel %vm702_vm0, %v1061_v0, 0.0 }
  0xfa   : > { %v11600_v2 = vsub.f32 %v17175_v56, %v935_v42  ;;  %v17177_v42 = vunpack.c.l.bf16 %v11196_v54 }
  0xfb   : > { %1194 = vadd.xlane.f32.xlu1 %v1193_v19  ;;  %866 = vadd.xlane.f32.xlu0 %v865_v21  ;;  %17174 = vst [vmem:[#allocation5_spill] sm:$0xff] %v11587_v9  ;;  %v871_v21 = vsel %vm702_vm0, %v16846_v36, 0.0  ;;  %v16849_v19 = vunpack.c.h.bf16 %v11571_v8  ;;  %v1062_v46 = vmul.f32 %v11587_v9, %v11587_v9  ;;  %v16851_v36 = vunpack.c.l.bf16 %v11596_v39 }
  0xfc   : > { %17176 = vst [vmem:[#allocation6_spill] sm:$0xff] %v11600_v2  ;;  %v1063_v31 = vmul.f32 %v11600_v2, %v11600_v2 }
  0xfd   : > { %v874_v26 = vsel %vm702_vm0, %v16849_v19, 0.0  ;;  %v1202_v25 = vsel %vm702_vm0, %v1062_v46, 0.0  ;;  %v11621_v19 = vld [vmem:[%s11036_s21 + $0x70] sm:$0xff]   ;;  %v17179_v46 = vunpack.c.h.bf16 %v11196_v54 }
  0xfe   : > { %v16857_v2 = vunpack.c.l.bf16 %v11621_v19 }
  0xff   : > { %869 = vadd.xlane.f32.xlu1 %v868_v40  ;;  %1197 = vadd.xlane.f32.xlu0 %v1196_v59  ;;  %v936_v40 = vmul.f32 0.015625, %v825_v20  ;;  %v828_v59 = vpop.xlane.xlu1 %827  ;;  %v831_v20 = vpop.xlane.xlu0 %830 }
 0x100   : > { %v937_v0 = vmul.f32 0.015625, %v828_v59 }
 0x101   : > { %v11612_v56 = vsub.f32 %v17177_v42, %v936_v40  ;;  %v1205_v40 = vsel %vm702_vm0, %v1063_v31, 0.0  ;;  %v938_v42 = vmul.f32 0.015625, %v831_v20 }
 0x102   : > { %v11625_v9 = vsub.f32 %v17179_v46, %v937_v0  ;;  %v17181_v0 = vunpack.c.l.bf16 %v11207_v18 }
 0x103   : > { %1200 = vadd.xlane.f32.xlu1 %v1199_v62  ;;  %872 = vadd.xlane.f32.xlu0 %v871_v21  ;;  %17178 = vst [vmem:[#allocation7_spill] sm:$0xff] %v11612_v56  ;;  %v877_v21 = vsel %vm702_vm0, %v16851_v36, 0.0  ;;  %v16854_v62 = vunpack.c.h.bf16 %v11596_v39  ;;  %v1064_v59 = vmul.f32 %v11612_v56, %v11612_v56 }
 0x104   : > { %17180 = vst [vmem:[#allocation8_spill] sm:$0xff] %v11625_v9  ;;  %v11637_v31 = vsub.f32 %v17181_v0, %v938_v42  ;;  %v1065_v20 = vmul.f32 %v11625_v9, %v11625_v9 }
 0x105   : > { %v880_v36 = vsel %vm702_vm0, %v16854_v62, 0.0  ;;  %v1208_v54 = vsel %vm702_vm0, %v1064_v59, 0.0  ;;  %v11645_v62 = vld [vmem:[%s11036_s21 + $0x78] sm:$0xff]   ;;  %v17183_v59 = vunpack.c.h.bf16 %v11207_v18 }
 0x106   : > { %17182 = vst [vmem:[#allocation9_spill] sm:$0xff] %v11637_v31  ;;  %v1211_v42 = vsel %vm702_vm0, %v1065_v20, 0.0 }
 0x107   : > { %875 = vadd.xlane.f32.xlu1 %v874_v26  ;;  %1203 = vadd.xlane.f32.xlu0 %v1202_v25  ;;  %v834_v26 = vpop.xlane.xlu1 %833  ;;  %v837_v25 = vpop.xlane.xlu0 %836 }
 0x108   : > { %v939_v46 = vmul.f32 0.015625, %v834_v26  ;;  %v16859_v26 = vunpack.c.h.bf16 %v11621_v19 }
 0x10a   : > { %v11649_v51 = vsub.f32 %v17183_v59, %v939_v46  ;;  %v886_v18 = vsel %vm702_vm0, %v16859_v26, 0.0 }
 0x10b   : > { %1206 = vadd.xlane.f32.xlu1 %v1205_v40  ;;  %878 = vadd.xlane.f32.xlu0 %v877_v21  ;;  %v840_v56 = vpop.xlane.xlu1 %839  ;;  %v883_v21 = vsel %vm702_vm0, %v16857_v2, 0.0  ;;  %v940_v40 = vmul.f32 0.015625, %v837_v25  ;;  %v843_v41 = vpop.xlane.xlu0 %842  ;;  %v16861_v2 = vunpack.c.l.bf16 %v11645_v62 }
 0x10c   : > { %17184 = vst [vmem:[#allocation10_spill] sm:$0xff] %v11649_v51  ;;  %v941_v25 = vmul.f32 0.015625, %v840_v56  ;;  %v1067_v20 = vmul.f32 %v11649_v51, %v11649_v51  ;;  %v942_v59 = vmul.f32 0.015625, %v843_v41  ;;  %v17189_v41 = vunpack.c.l.bf16 %v11229_v29 }
 0x10d   : > { %v889_v56 = vsel %vm702_vm0, %v16861_v2, 0.0  ;;  %v17197_v51 = vmov 0  }
 0x10e   : > { %v1217_v26 = vsel %vm702_vm0, %v1067_v20, 0.0  ;;  %v17191_v20 = vunpack.c.h.bf16 %v11229_v29 }
 0x10f   : > { %881 = vadd.xlane.f32.xlu1 %v880_v36  ;;  %1209 = vadd.xlane.f32.xlu0 %v1208_v54  ;;  %v1066_v36 = vmul.f32 %v11637_v31, %v11637_v31  ;;  %v17185_v54 = vunpack.c.l.bf16 %v11218_v47  ;;  %v846_v9 = vpop.xlane.xlu1 %845  ;;  %v11679_v31 = vsub.f32 %v17189_v41, %v942_v59  ;;  %v17193_v59 = vunpack.c.l.bf16 %v11240_v52 }
 0x111   : > { %v11657_v0 = vsub.f32 %v17185_v54, %v940_v40  ;;  %v1214_v46 = vsel %vm702_vm0, %v1066_v36, 0.0  ;;  %v16863_v54 = vunpack.c.h.bf16 %v11645_v62  ;;  %17190 = vst [vmem:[#allocation13_spill] sm:$0xff] %v11679_v31 }
 0x113   : > { %1212 = vadd.xlane.f32.xlu1 %v1211_v42  ;;  %884 = vadd.xlane.f32.xlu0 %v883_v21  ;;  %17186 = vst [vmem:[#allocation11_spill] sm:$0xff] %v11657_v0  ;;  %v849_v42 = vpop.xlane.xlu0 %848  ;;  %v17187_v21 = vunpack.c.h.bf16 %v11218_v47  ;;  %v1068_v36 = vmul.f32 %v11657_v0, %v11657_v0  ;;  %v852_v47 = vpop.xlane.xlu1 %851 }
 0x115   : > { %v11668_v40 = vsub.f32 %v17187_v21, %v941_v25  ;;  %v892_v25 = vsel %vm702_vm0, %v16863_v54, 0.0  ;;  %v1220_v21 = vsel %vm702_vm0, %v1068_v36, 0.0  ;;  %v17195_v36 = vunpack.c.h.bf16 %v11240_v52 }
 0x117   : > { %887 = vadd.xlane.f32.xlu1 %v886_v18  ;;  %1215 = vadd.xlane.f32.xlu0 %v1214_v46  ;;  %17188 = vst [vmem:[#allocation12_spill] sm:$0xff] %v11668_v40  ;;  %v943_v18 = vmul.f32 0.015625, %v846_v9  ;;  %v944_v46 = vmul.f32 0.015625, %v849_v42  ;;  %v1069_v2 = vmul.f32 %v11668_v40, %v11668_v40  ;;  %v945_v42 = vmul.f32 0.015625, %v852_v47 }
 0x119   : > { %v11689_v0 = vsub.f32 %v17191_v20, %v943_v18  ;;  %v11693_v9 = vsub.f32 %v17193_v59, %v944_v46  ;;  %v11700_v41 = vsub.f32 %v17195_v36, %v945_v42 }
 0x11b   : > { %1218 = vadd.xlane.f32.xlu1 %v1217_v26  ;;  %890 = vadd.xlane.f32.xlu0 %v889_v56  ;;  %17192 = vst [vmem:[#allocation14_spill] sm:$0xff] %v11689_v0  ;;  %17194 = vst [vmem:[#allocation15_spill] sm:$0xff] %v11693_v9  ;;  %v1070_v26 = vmul.f32 %v11679_v31, %v11679_v31  ;;  %v1223_v56 = vsel %vm702_vm0, %v1069_v2, 0.0  ;;  %v1071_v18 = vmul.f32 %v11689_v0, %v11689_v0 }
 0x11c   : > { %17196 = vst [vmem:[#allocation16_spill] sm:$0xff] %v11700_v41  ;;  %v1072_v46 = vmul.f32 %v11693_v9, %v11693_v9  ;;  %v1073_v2 = vmul.f32 %v11700_v41, %v11700_v41 }
 0x11d   : > { %v1226_v29 = vsel %vm702_vm0, %v1070_v26, 0.0  ;;  %v1229_v47 = vsel %vm702_vm0, %v1071_v18, 0.0 }
 0x11e   : > { %v1235_v52 = vsel %vm702_vm0, %v1073_v2, 0.0 }
 0x11f   : > { %893 = vadd.xlane.f32.xlu1 %v892_v25  ;;  %1221 = vadd.xlane.f32.xlu0 %v1220_v21  ;;  %v1232_v25 = vsel %vm702_vm0, %v1072_v46, 0.0 }
 0x123   : > { %1224 = vadd.xlane.f32.xlu1 %v1223_v56  ;;  %1227 = vadd.xlane.f32.xlu0 %v1226_v29 }
 0x127   : > { %1230 = vadd.xlane.f32.xlu1 %v1229_v47  ;;  %1233 = vadd.xlane.f32.xlu0 %v1232_v25 }
 0x12b   : > { %1236 = vadd.xlane.f32.xlu1 %v1235_v52 }
 0x138   : > { %v1090_v21 = vpop.xlane.xlu0 %1089 }
 0x139   : > { %v1280_v20 = vmul.f32 0.015625, %v1090_v21 }
 0x13b   : > { %v1344_v59 = vadd.f32 1e-05, %v1280_v20 }
 0x13c   : > { %v1093_v42 = vpop.xlane.xlu1 %1092  ;;  %v1096_v26 = vpop.xlane.xlu0 %1095 }
 0x13d   : > { %v1281_v36 = vmul.f32 0.015625, %v1093_v42  ;;  %10123 = vrsqrt.f32 %v1344_v59  ;;  %v1282_v29 = vmul.f32 0.015625, %v1096_v26 }
 0x13f   : > { %v1345_v56 = vadd.f32 1e-05, %v1281_v36  ;;  %v1346_v9 = vadd.f32 1e-05, %v1282_v29 }
 0x140   : > { %v1099_v18 = vpop.xlane.xlu1 %1098  ;;  %v1102_v54 = vpop.xlane.xlu0 %1101 }
 0x141   : > { %10125 = vrsqrt.f32 %v1345_v56  ;;  %v1283_v46 = vmul.f32 0.015625, %v1099_v18  ;;  %v1284_v52 = vmul.f32 0.015625, %v1102_v54 }
 0x143   : > { %v1347_v41 = vadd.f32 1e-05, %v1283_v46  ;;  %v1348_v59 = vadd.f32 1e-05, %v1284_v52 }
 0x144   : > { %v1105_v47 = vpop.xlane.xlu1 %1104  ;;  %v1108_v25 = vpop.xlane.xlu0 %1107 }
 0x145   : > { %10127 = vrsqrt.f32 %v1347_v41  ;;  %v1285_v2 = vmul.f32 0.015625, %v1105_v47  ;;  %v1286_v41 = vmul.f32 0.015625, %v1108_v25 }
 0x146   : > { %10129 = vrsqrt.f32 %v1346_v9 }
 0x147   : > { %v10124_v31 = vpop.eup %10123  ;;  %v1349_v0 = vadd.f32 1e-05, %v1285_v2  ;;  %v1350_v53 = vadd.f32 1e-05, %v1286_v41 }
 0x148   : > { %v1111_v21 = vpop.xlane.xlu1 %1110  ;;  %v1114_v20 = vpop.xlane.xlu0 %1113  ;;  %v1472_v40 = vmul.f32 %v10124_v31, %v11262_v32 }
 0x149   : > { %10131 = vrsqrt.f32 %v1349_v0  ;;  %v1287_v29 = vmul.f32 0.015625, %v1111_v21  ;;  %v1288_v25 = vmul.f32 0.015625, %v1114_v20 }
 0x14a   : > { %10133 = vrsqrt.f32 %v1348_v59 }
 0x14b   : > { %v10126_v42 = vpop.eup %10125  ;;  %v1351_v2 = vadd.f32 1e-05, %v1287_v29 }
 0x14c   : > { %v1117_v36 = vpop.xlane.xlu1 %1116  ;;  %v1120_v26 = vpop.xlane.xlu0 %1119  ;;  %v1473_v56 = vmul.f32 %v10126_v42, %v11274_v27 }
 0x14d   : > { %10135 = vrsqrt.f32 %v1351_v2  ;;  %v1289_v0 = vmul.f32 0.015625, %v1117_v36 }
 0x14e   : > { %v1536_v18 = vpack.c.bf16 %v1473_v56, %v1472_v40  ;;  %10137 = vrsqrt.f32 %v1350_v53 }
 0x14f   : > { %v10128_v46 = vpop.eup %10127  ;;  %v1353_v29 = vadd.f32 1e-05, %v1289_v0 }
 0x150   : > { %v1123_v9 = vpop.xlane.xlu1 %1122  ;;  %9366 = vmatmul.mubr.msk.bf16.vlgmr.msra.gmra.mrb[0].mxu0 %vm702_vm0, %v1536_v18  ;;  %v1126_v54 = vpop.xlane.xlu0 %1125  ;;  %v1475_v52 = vmul.f32 %v10128_v46, %v11279_v5  ;;  %v1352_v18 = vadd.f32 1e-05, %v1288_v25 }
 0x151   : > { %v10130_v47 = vpop.eup %10129  ;;  %1766 = vmatprep.mubr.bf16.mxu0 %v17197_v51  ;;  %10139 = vrsqrt.f32 %v1353_v29  ;;  %v1291_v53 = vmul.f32 0.015625, %v1123_v9  ;;  %v1292_v29 = vmul.f32 0.015625, %v1126_v54 }
 0x152   : > { %v1474_v27 = vmul.f32 %v10130_v47, %v11266_v12  ;;  %10141 = vrsqrt.f32 %v1352_v18  ;;  %v1290_v47 = vmul.f32 0.015625, %v1120_v26 }
 0x153   : > { %v10132_v21 = vpop.eup %10131 }
 0x154   : > { %v1129_v32 = vpop.xlane.xlu1 %1128  ;;  %v1132_v31 = vpop.xlane.xlu0 %1131  ;;  %v1537_v40 = vpack.c.bf16 %v1475_v52, %v1474_v27  ;;  %v1477_v5 = vmul.f32 %v10132_v21, %v11293_v6  ;;  %v1355_v6 = vadd.f32 1e-05, %v1291_v53 }
 0x155   : > { %v10134_v56 = vpop.eup %10133  ;;  %v1293_v26 = vmul.f32 0.015625, %v1129_v32 }
 0x156   : > { %v1476_v36 = vmul.f32 %v10134_v56, %v11288_v3  ;;  %10143 = vrsqrt.f32 %v1355_v6  ;;  %v1294_v6 = vmul.f32 0.015625, %v1132_v31 }
 0x157   : > { %v10136_v41 = vpop.eup %10135 }
 0x158   : > { %v1135_v42 = vpop.xlane.xlu1 %1134  ;;  %9367 = vmatmul.mubr.msk.bf16.gmra.mrb[4].mxu0 %vm702_vm0, %v1537_v40  ;;  %v11719_v59 = vpop.xlane.xlu0 %1137  ;;  %v1538_v20 = vpack.c.bf16 %v1477_v5, %v1476_v36  ;;  %v1479_v0 = vmul.f32 %v10136_v41, %v11307_v13  ;;  %v1354_v40 = vadd.f32 1e-05, %v1290_v47  ;;  %v1357_v36 = vadd.f32 1e-05, %v1293_v26 }
 0x159   : > { %1776 = vmatprep.mubr.bf16.mxu0 %v17197_v51  ;;  %v10138_v27 = vpop.eup %10137  ;;  %v1295_v54 = vmul.f32 0.015625, %v1135_v42 }
 0x15a   : > { %v1478_v21 = vmul.f32 %v10138_v27, %v11302_v44  ;;  %10145 = vrsqrt.f32 %v1354_v40 }
 0x15b   : > { %v10140_v56 = vpop.eup %10139  ;;  %10147 = vrsqrt.f32 %v1357_v36  ;;  %v1296_v36 = vmul.f32 0.015625, %v11719_v59 }
 0x15c   : > { %v1141_v46 = vpop.xlane.xlu1 %1140  ;;  %v11723_v12 = vpop.xlane.xlu0 %1143  ;;  %v1539_v25 = vpack.c.bf16 %v1479_v0, %v1478_v21  ;;  %v1481_v53 = vmul.f32 %v10140_v56, %v11321_v16  ;;  %v1359_v21 = vadd.f32 1e-05, %v1295_v54 }
 0x15d   : > { %v10142_v13 = vpop.eup %10141  ;;  %v1297_v31 = vmul.f32 0.015625, %v1141_v46  ;;  %v17198_v46 = vunpack.c.l.bf16 %v11489_v50 }
 0x15e   : > { %v1480_v41 = vmul.f32 %v10142_v13, %v11316_v45 }
 0x160   : > { %v11726_v2 = vpop.xlane.xlu1 %1146  ;;  %9368 = vmatmul.mubr.msk.bf16.gmra.mrb[8].mxu0 %vm702_vm0, %v1538_v20  ;;  %v11729_v52 = vpop.xlane.xlu0 %1149  ;;  %v1356_v20 = vadd.f32 1e-05, %v1292_v29  ;;  %v1540_v47 = vpack.c.bf16 %v1481_v53, %v1480_v41  ;;  %v1361_v41 = vadd.f32 1e-05, %v1297_v31 }
 0x161   : > { %1786 = vmatprep.mubr.bf16.mxu0 %v17197_v51  ;;  %v10144_v27 = vpop.eup %10143 }
 0x162   : > { %10149 = vrsqrt.f32 %v1356_v20  ;;  %v1483_v26 = vmul.f32 %v10144_v27, %v11335_v23 }
 0x163   : > { %10151 = vrsqrt.f32 %v1359_v21  ;;  %v1299_v21 = vmul.f32 0.015625, %v11726_v2 }
 0x164   : > { %v11733_v3 = vpop.xlane.xlu1 %1152  ;;  %v11735_v9 = vpop.xlane.xlu0 %1155 }
 0x165   : > { %v10146_v16 = vpop.eup %10145 }
 0x166   : > { %v1482_v56 = vmul.f32 %v10146_v16, %v11330_v4  ;;  %v10148_v13 = vpop.eup %10147  ;;  %v1360_v4 = vadd.f32 1e-05, %v1296_v36 }
 0x168   : > { %v11738_v5 = vpop.xlane.xlu1 %1158  ;;  %9369 = vmatmul.mubr.msk.bf16.gmra.mrb[12].mxu0 %vm702_vm0, %v1539_v25  ;;  %v11741_v18 = vpop.xlane.xlu0 %1161  ;;  %v1358_v25 = vadd.f32 1e-05, %v1294_v6  ;;  %v1541_v29 = vpack.c.bf16 %v1483_v26, %v1482_v56 }
 0x169   : > { %1796 = vmatprep.mubr.bf16.mxu0 %v17197_v51 }
 0x16a   : > { %10153 = vrsqrt.f32 %v1358_v25 }
 0x16b   : > { %10155 = vrsqrt.f32 %v1361_v41 }
 0x16c   : > { %v11745_v44 = vpop.xlane.xlu1 %1164  ;;  %v11747_v32 = vpop.xlane.xlu0 %1167  ;;  %10157 = vrsqrt.f32 %v1360_v4 }
 0x16d   : > { %v10150_v23 = vpop.eup %10149 }
 0x16e   : > { %v1484_v59 = vmul.f32 %v10150_v23, %v11344_v15  ;;  %v10152_v31 = vpop.eup %10151  ;;  %v1363_v23 = vadd.f32 1e-05, %v1299_v21 }
 0x170   : > { %v11750_v0 = vpop.xlane.xlu1 %1170  ;;  %9370 = vmatmul.mubr.msk.bf16.gmra.mrb[16].mxu0 %vm702_vm0, %v1540_v47  ;;  %v11753_v40 = vpop.xlane.xlu0 %1173  ;;  %v1485_v47 = vmul.f32 %v10148_v13, %v11349_v28  ;;  %v1298_v28 = vmul.f32 0.015625, %v11723_v12  ;;  %10159 = vrsqrt.f32 %v1363_v23 }
 0x171   : > { %1806 = vmatprep.mubr.bf16.mxu0 %v17197_v51 }
 0x172   : > { %v1542_v56 = vpack.c.bf16 %v1485_v47, %v1484_v59  ;;  %v1362_v12 = vadd.f32 1e-05, %v1298_v28  ;;  %v17200_v47 = vunpack.c.l.bf16 %v11521_v35  ;;  %v1300_v28 = vmul.f32 0.015625, %v11729_v52 }
 0x174   : > { %v11757_v45 = vpop.xlane.xlu1 %1176  ;;  %v11759_v42 = vpop.xlane.xlu0 %1179  ;;  %10161 = vrsqrt.f32 %v1362_v12  ;;  %v1364_v52 = vadd.f32 1e-05, %v1300_v28  ;;  %v17203_v28 = vunpack.c.h.bf16 %v11546_v55 }
 0x175   : > { %v10154_v2 = vpop.eup %10153 }
 0x176   : > { %v1486_v21 = vmul.f32 %v10154_v2, %v11364_v10 }
 0x178   : > { %v11763_v53 = vpop.xlane.xlu1 %1182  ;;  %9371 = vmatmul.mubr.msk.bf16.gmra.mrb[20].mxu0 %vm702_vm0, %v1541_v29  ;;  %v855_v20 = vpop.xlane.xlu0 %854  ;;  %v17199_v29 = vunpack.c.h.bf16 %v11489_v50  ;;  %v1487_v50 = vmul.f32 %v10152_v31, %v11369_v17 }
 0x179   : > { %v946_v54 = vmul.f32 0.015625, %v855_v20  ;;  %1816 = vmatprep.mubr.bf16.mxu0 %v17197_v51  ;;  %v10156_v31 = vpop.eup %10155 }
 0x17b   : > { %v11770_v27 = vsub.f32 %v17198_v46, %v946_v54 }
 0x17c   : > { %v858_v6 = vpop.xlane.xlu1 %857  ;;  %v11772_v16 = vpop.xlane.xlu0 %1185 }
 0x17d   : > { %v947_v26 = vmul.f32 0.015625, %v858_v6  ;;  %v1074_v25 = vmul.f32 %v11770_v27, %v11770_v27 }
 0x17f   : > { %v11781_v13 = vsub.f32 %v17199_v29, %v947_v26  ;;  %v1238_v36 = vsel %vm702_vm0, %v1074_v25, 0.0  ;;  %v1301_v26 = vmul.f32 0.015625, %v11733_v3  ;;  %v17201_v29 = vunpack.c.h.bf16 %v11521_v35  ;;  %v10158_v3 = vpop.eup %10157 }
 0x180   : > { %v11784_v20 = vpop.xlane.xlu1 %1188  ;;  %9372 = vmatmul.mubr.msk.bf16.gmra.mrb[24].mxu0 %vm702_vm0, %v1542_v56  ;;  %v861_v15 = vpop.xlane.xlu0 %860  ;;  %1239 = vadd.xlane.f32.xlu0 %v1238_v36  ;;  %v1543_v56 = vpack.c.bf16 %v1487_v50, %v1486_v21  ;;  %v1489_v35 = vmul.f32 %v10156_v31, %v11389_v11  ;;  %v17202_v50 = vunpack.c.l.bf16 %v11546_v55  ;;  %v1488_v21 = vmul.f32 %v10158_v3, %v11384_v24 }
 0x181   : > { %v948_v41 = vmul.f32 0.015625, %v861_v15  ;;  %v1075_v54 = vmul.f32 %v11781_v13, %v11781_v13  ;;  %1826 = vmatprep.mubr.bf16.mxu0 %v17197_v51  ;;  %v1365_v2 = vadd.f32 1e-05, %v1301_v26  ;;  %v1303_v26 = vmul.f32 0.015625, %v11738_v5 }
 0x182   : > { %v1302_v31 = vmul.f32 0.015625, %v11735_v9 }
 0x183   : > { %v11793_v4 = vsub.f32 %v17200_v47, %v948_v41  ;;  %v1241_v46 = vsel %vm702_vm0, %v1075_v54, 0.0  ;;  %10163 = vrsqrt.f32 %v1365_v2  ;;  %v1367_v3 = vadd.f32 1e-05, %v1303_v26 }
 0x184   : > { %1242 = vadd.xlane.f32.xlu1 %v1241_v46  ;;  %v864_v6 = vpop.xlane.xlu1 %863  ;;  %v11796_v59 = vpop.xlane.xlu0 %1191  ;;  %10165 = vrsqrt.f32 %v1364_v52  ;;  %v1366_v9 = vadd.f32 1e-05, %v1302_v31 }
 0x185   : > { %v949_v25 = vmul.f32 0.015625, %v864_v6  ;;  %v1076_v17 = vmul.f32 %v11793_v4, %v11793_v4  ;;  %10167 = vrsqrt.f32 %v1367_v3 }
 0x186   : > { %10169 = vrsqrt.f32 %v1366_v9 }
 0x187   : > { %v11805_v36 = vsub.f32 %v17201_v29, %v949_v25  ;;  %v1244_v15 = vsel %vm702_vm0, %v1076_v17, 0.0  ;;  %v1544_v17 = vpack.c.bf16 %v1489_v35, %v1488_v21  ;;  %v1305_v21 = vmul.f32 0.015625, %v11745_v44 }
 0x188   : > { %v11808_v41 = vpop.xlane.xlu1 %1194  ;;  %9373 = vmatmul.mubr.msk.bf16.gmra.mrb[28].mxu0 %vm702_vm0, %v1543_v56  ;;  %v867_v10 = vpop.xlane.xlu0 %866  ;;  %1245 = vadd.xlane.f32.xlu0 %v1244_v15 }
 0x189   : > { %v950_v23 = vmul.f32 0.015625, %v867_v10  ;;  %v1077_v54 = vmul.f32 %v11805_v36, %v11805_v36  ;;  %1836 = vmatprep.mubr.bf16.mxu0 %v17197_v51  ;;  %v10160_v56 = vpop.eup %10159 }
 0x18a   : > { %v10162_v5 = vpop.eup %10161  ;;  %v1491_v55 = vmul.f32 %v10160_v56, %v11409_v22  ;;  %v17205_v56 = vunpack.c.h.bf16 %v11571_v8 }
 0x18b   : > { %v11817_v12 = vsub.f32 %v17202_v50, %v950_v23  ;;  %v1247_v47 = vsel %vm702_vm0, %v1077_v54, 0.0  ;;  %v17204_v54 = vunpack.c.l.bf16 %v11571_v8 }
 0x18c   : > { %1248 = vadd.xlane.f32.xlu1 %v1247_v47  ;;  %v870_v46 = vpop.xlane.xlu1 %869  ;;  %v11820_v6 = vpop.xlane.xlu0 %1197 }
 0x18d   : > { %v951_v25 = vmul.f32 0.015625, %v870_v46  ;;  %v1078_v11 = vmul.f32 %v11817_v12, %v11817_v12  ;;  %v1490_v46 = vmul.f32 %v10162_v5, %v11404_v33 }
 0x18f   : > { %v11829_v29 = vsub.f32 %v17203_v28, %v951_v25  ;;  %v1250_v15 = vsel %vm702_vm0, %v1078_v11, 0.0  ;;  %v1545_v25 = vpack.c.bf16 %v1491_v55, %v1490_v46  ;;  %v10164_v11 = vpop.eup %10163 }
 0x190   : > { %v11832_v10 = vpop.xlane.xlu1 %1200  ;;  %9374 = vmatmul.mubr.msk.bf16.gmra.mrb[32].mxu0 %vm702_vm0, %v1544_v17  ;;  %v873_v24 = vpop.xlane.xlu0 %872  ;;  %1251 = vadd.xlane.f32.xlu0 %v1250_v15  ;;  %v1304_v17 = vmul.f32 0.015625, %v11741_v18  ;;  %v1493_v8 = vmul.f32 %v10164_v11, %v11429_v1 }
 0x191   : > { %v952_v2 = vmul.f32 0.015625, %v873_v24  ;;  %v1079_v23 = vmul.f32 %v11829_v29, %v11829_v29  ;;  %1846 = vmatprep.mubr.bf16.mxu0 %v17197_v51  ;;  %v10166_v44 = vpop.eup %10165  ;;  %v1369_v24 = vadd.f32 1e-05, %v1305_v21 }
 0x192   : > { %v1368_v18 = vadd.f32 1e-05, %v1304_v17 }
 0x193   : > { %v11841_v35 = vsub.f32 %v17204_v54, %v952_v2  ;;  %v1253_v52 = vsel %vm702_vm0, %v1079_v23, 0.0  ;;  %v17206_v2 = vunpack.c.l.bf16 %v11596_v39  ;;  %10171 = vrsqrt.f32 %v1369_v24 }
 0x194   : > { %1254 = vadd.xlane.f32.xlu1 %v1253_v52  ;;  %v876_v50 = vpop.xlane.xlu1 %875  ;;  %v11844_v47 = vpop.xlane.xlu0 %1203  ;;  %v1492_v52 = vmul.f32 %v10166_v44, %v11424_v30  ;;  %10173 = vrsqrt.f32 %v1368_v18  ;;  %v17208_v24 = vunpack.c.l.bf16 %v11621_v19 }
 0x195   : > { %v953_v26 = vmul.f32 0.015625, %v876_v50  ;;  %v1080_v22 = vmul.f32 %v11841_v35, %v11841_v35  ;;  %v1307_v50 = vmul.f32 0.015625, %v11750_v0 }
 0x196   : > { %v1546_v21 = vpack.c.bf16 %v1493_v8, %v1492_v52 }
 0x197   : > { %v11853_v31 = vsub.f32 %v17205_v56, %v953_v26  ;;  %v1256_v28 = vsel %vm702_vm0, %v1080_v22, 0.0  ;;  %v10168_v26 = vpop.eup %10167  ;;  %v1306_v22 = vmul.f32 0.015625, %v11747_v32 }
 0x198   : > { %v11856_v15 = vpop.xlane.xlu1 %1206  ;;  %9375 = vmatmul.mubr.msk.bf16.gmra.mrb[36].mxu0 %vm702_vm0, %v1545_v25  ;;  %v879_v33 = vpop.xlane.xlu0 %878  ;;  %1257 = vadd.xlane.f32.xlu0 %v1256_v28  ;;  %v17207_v25 = vunpack.c.h.bf16 %v11596_v39  ;;  %v1371_v28 = vadd.f32 1e-05, %v1307_v50  ;;  %v1495_v39 = vmul.f32 %v10168_v26, %v11444_v34 }
 0x199   : > { %v954_v5 = vmul.f32 0.015625, %v879_v33  ;;  %v1081_v3 = vmul.f32 %v11853_v31, %v11853_v31  ;;  %1856 = vmatprep.mubr.bf16.mxu0 %v17197_v51  ;;  %v10170_v0 = vpop.eup %10169  ;;  %v1370_v32 = vadd.f32 1e-05, %v1306_v22 }
 0x19a   : > { %10175 = vrsqrt.f32 %v1371_v28 }
 0x19b   : > { %v11865_v23 = vsub.f32 %v17206_v2, %v954_v5  ;;  %v1259_v55 = vsel %vm702_vm0, %v1081_v3, 0.0  ;;  %v1494_v2 = vmul.f32 %v10170_v0, %v11439_v48  ;;  %10177 = vrsqrt.f32 %v1370_v32 }
 0x19c   : > { %1260 = vadd.xlane.f32.xlu1 %v1259_v55  ;;  %v882_v9 = vpop.xlane.xlu1 %881  ;;  %v11868_v54 = vpop.xlane.xlu0 %1209  ;;  %v1309_v55 = vmul.f32 0.015625, %v11757_v45  ;;  %v17210_v0 = vunpack.c.l.bf16 %v11645_v62  ;;  %v1311_v32 = vmul.f32 0.015625, %v11763_v53 }
 0x19d   : > { %v955_v46 = vmul.f32 0.015625, %v882_v9  ;;  %v1082_v1 = vmul.f32 %v11865_v23, %v11865_v23  ;;  %v1547_v52 = vpack.c.bf16 %v1495_v39, %v1494_v2  ;;  %v10172_v50 = vpop.eup %10171  ;;  %v1310_v2 = vmul.f32 0.015625, %v11759_v42 }
 0x19e   : > { %v10174_v45 = vpop.eup %10173  ;;  %v1375_v53 = vadd.f32 1e-05, %v1311_v32 }
 0x19f   : > { %v11877_v11 = vsub.f32 %v17207_v25, %v955_v46  ;;  %v1262_v17 = vsel %vm702_vm0, %v1082_v1, 0.0  ;;  %v1308_v46 = vmul.f32 0.015625, %v11753_v40  ;;  %v17209_v1 = vunpack.c.h.bf16 %v11621_v19 }
 0x1a0   : > { %v11880_v56 = vpop.xlane.xlu1 %1212  ;;  %9376 = vmatmul.mubr.msk.bf16.gmra.mrb[40].mxu0 %vm702_vm0, %v1546_v21  ;;  %v885_v30 = vpop.xlane.xlu0 %884  ;;  %1263 = vadd.xlane.f32.xlu0 %v1262_v17  ;;  %v1373_v25 = vadd.f32 1e-05, %v1309_v55  ;;  %v1497_v19 = vmul.f32 %v10172_v50, %v11458_v58  ;;  %v1496_v39 = vmul.f32 %v10174_v45, %v11453_v14  ;;  %v17211_v55 = vunpack.c.h.bf16 %v11645_v62 }
 0x1a1   : > { %v956_v33 = vmul.f32 0.015625, %v885_v30  ;;  %v1083_v44 = vmul.f32 %v11877_v11, %v11877_v11  ;;  %1866 = vmatprep.mubr.bf16.mxu0 %v17197_v51  ;;  %v1372_v40 = vadd.f32 1e-05, %v1308_v46  ;;  %v1374_v46 = vadd.f32 1e-05, %v1310_v2 }
 0x1a2   : > { %10179 = vrsqrt.f32 %v1373_v25  ;;  %v1312_v45 = vmul.f32 0.015625, %v11772_v16 }
 0x1a3   : > { %v11889_v5 = vsub.f32 %v17208_v24, %v956_v33  ;;  %v1265_v3 = vsel %vm702_vm0, %v1083_v44, 0.0  ;;  %10181 = vrsqrt.f32 %v1372_v40 }
 0x1a4   : > { %1266 = vadd.xlane.f32.xlu1 %v1265_v3  ;;  %v888_v8 = vpop.xlane.xlu1 %887  ;;  %v11892_v18 = vpop.xlane.xlu0 %1215  ;;  %10183 = vrsqrt.f32 %v1375_v53  ;;  %v17212_v53 = vld [vmem:[#allocation2_spill] sm:$0xff] }
 0x1a5   : > { %v957_v9 = vmul.f32 0.015625, %v888_v8  ;;  %v1084_v34 = vmul.f32 %v11889_v5, %v11889_v5  ;;  %v1548_v8 = vpack.c.bf16 %v1497_v19, %v1496_v39  ;;  %v10176_v58 = vpop.eup %10175  ;;  %10185 = vrsqrt.f32 %v1374_v46 }
 0x1a6   : > { %v10178_v14 = vpop.eup %10177  ;;  %v1499_v50 = vmul.f32 %v10176_v58, %v11472_v43  ;;  %v1320_v46 = vmul.f32 0.015625, %v11868_v54 }
 0x1a7   : > { %v11901_v21 = vsub.f32 %v17209_v1, %v957_v9  ;;  %v1268_v26 = vsel %vm702_vm0, %v1084_v34, 0.0  ;;  %v1498_v62 = vmul.f32 %v10178_v14, %v11467_v7  ;;  %v1313_v1 = vmul.f32 0.015625, %v11784_v20 }
 0x1a8   : > { %v11904_v22 = vpop.xlane.xlu1 %1218  ;;  %9377 = vmatmul.mubr.msk.bf16.gmra.mrb[44].mxu0 %vm702_vm0, %v1547_v52  ;;  %v891_v48 = vpop.xlane.xlu0 %890  ;;  %1269 = vadd.xlane.f32.xlu0 %v1268_v26  ;;  %v1315_v7 = vmul.f32 0.015625, %v11808_v41 }
 0x1a9   : > { %v958_v17 = vmul.f32 0.015625, %v891_v48  ;;  %v1085_v30 = vmul.f32 %v11901_v21, %v11901_v21  ;;  %1876 = vmatprep.mubr.bf16.mxu0 %v17197_v51  ;;  %v1549_v26 = vpack.c.bf16 %v1499_v50, %v1498_v62  ;;  %v17213_v62 = vld [vmem:[#allocation4_spill] sm:$0xff] }
 0x1ab   : > { %v11913_v28 = vsub.f32 %v17210_v0, %v958_v17  ;;  %v1271_v33 = vsel %vm702_vm0, %v1085_v30, 0.0  ;;  %v1377_v17 = vadd.f32 1e-05, %v1313_v1  ;;  %v1376_v30 = vadd.f32 1e-05, %v1312_v45 }
 0x1ac   : > { %1272 = vadd.xlane.f32.xlu1 %v1271_v33  ;;  %v894_v44 = vpop.xlane.xlu1 %893  ;;  %v10180_v48 = vpop.eup %10179  ;;  %v1314_v0 = vmul.f32 0.015625, %v11796_v59  ;;  %v1379_v33 = vadd.f32 1e-05, %v1315_v7  ;;  %v1323_v45 = vmul.f32 0.015625, %v11904_v22 }
 0x1ad   : > { %v959_v24 = vmul.f32 0.015625, %v894_v44  ;;  %v1086_v3 = vmul.f32 %v11913_v28, %v11913_v28  ;;  %v10182_v25 = vpop.eup %10181  ;;  %v1501_v43 = vmul.f32 %v10180_v48, %v11486_v57  ;;  %10187 = vrsqrt.f32 %v1377_v17 }
 0x1ae   : > { %v1500_v19 = vmul.f32 %v10182_v25, %v11481_v61  ;;  %v10184_v40 = vpop.eup %10183  ;;  %10189 = vrsqrt.f32 %v1376_v30  ;;  %v1378_v57 = vadd.f32 1e-05, %v1314_v0  ;;  %v1317_v61 = vmul.f32 0.015625, %v11832_v10  ;;  %v17216_v0 = vld [vmem:[#allocation5_spill] sm:$0xff] }
 0x1af   : > { %v11923_v9 = vsub.f32 %v17211_v55, %v959_v24  ;;  %v1274_v34 = vsel %vm702_vm0, %v1086_v3, 0.0  ;;  %v10186_v16 = vpop.eup %10185  ;;  %v1503_v44 = vmul.f32 %v10184_v40, %v11503_v63  ;;  %10191 = vrsqrt.f32 %v1379_v33  ;;  %v1222_v40 = vpop.xlane.xlu0 %1221 }
 0x1b0   : > { %9378 = vmatmul.mubr.msk.bf16.gmra.mrb[48].mxu0 %vm702_vm0, %v1548_v8  ;;  %1275 = vadd.xlane.f32.xlu0 %v1274_v34  ;;  %v1550_v20 = vpack.c.bf16 %v1501_v43, %v1500_v19  ;;  %v1502_v39 = vmul.f32 %v10186_v16, %v11498_v60  ;;  %10193 = vrsqrt.f32 %v1378_v57  ;;  %v1316_v24 = vmul.f32 0.015625, %v11820_v6  ;;  %v1225_v30 = vpop.xlane.xlu1 %1224  ;;  %v17215_v19 = vld [vmem:[#allocation6_spill] sm:$0xff] }
 0x1b1   : > { %v1087_v52 = vmul.f32 %v11923_v9, %v11923_v9  ;;  %1886 = vmatprep.mubr.bf16.mxu0 %v17197_v51  ;;  %v1381_v3 = vadd.f32 1e-05, %v1317_v61  ;;  %v1319_v60 = vmul.f32 0.015625, %v11856_v15  ;;  %v1318_v55 = vmul.f32 0.015625, %v11844_v47 }
 0x1b2   : > { %v1551_v41 = vpack.c.bf16 %v1503_v44, %v1502_v39  ;;  %v1380_v63 = vadd.f32 1e-05, %v1316_v24  ;;  %v1322_v17 = vmul.f32 0.015625, %v11892_v18  ;;  %v1387_v43 = vadd.f32 1e-05, %v1323_v45 }
 0x1b3   : > { %v1277_v42 = vsel %vm702_vm0, %v1087_v52, 0.0  ;;  %10195 = vrsqrt.f32 %v1381_v3  ;;  %v1383_v34 = vadd.f32 1e-05, %v1319_v60  ;;  %v1325_v22 = vmul.f32 0.015625, %v1225_v30  ;;  %v17218_v3 = vld [vmem:[#allocation7_spill] sm:$0xff]  ;;  %v17224_v30 = vld [vmem:[#allocation13_spill] sm:$0xff] }
 0x1b4   : > { %1278 = vadd.xlane.f32.xlu1 %v1277_v42  ;;  %10197 = vrsqrt.f32 %v1380_v63  ;;  %v1324_v57 = vmul.f32 0.015625, %v1222_v40  ;;  %v1231_v61 = vpop.xlane.xlu1 %1230 }
 0x1b5   : > { %10199 = vrsqrt.f32 %v1383_v34  ;;  %v1389_v39 = vadd.f32 1e-05, %v1325_v22  ;;  %v1327_v63 = vmul.f32 0.015625, %v1231_v61  ;;  %v17219_v34 = vld [vmem:[#allocation10_spill] sm:$0xff]  ;;  %v17226_v22 = vld [vmem:[#allocation15_spill] sm:$0xff] }
 0x1b6   : > { %v1388_v24 = vadd.f32 1e-05, %v1324_v57 }
 0x1b7   : > { %v10188_v32 = vpop.eup %10187 }
 0x1b8   : > { %9379 = vmatmul.mubr.msk.bf16.gmra.mrb[52].mxu0 %vm702_vm0, %v1549_v26  ;;  %v10190_v59 = vpop.eup %10189  ;;  %v1505_v8 = vmul.f32 %v10188_v32, %v11525_v37  ;;  %v1382_v37 = vadd.f32 1e-05, %v1318_v55  ;;  %v17214_v26 = vld [vmem:[#allocation3_spill] sm:$0xff]  ;;  %v1391_v55 = vadd.f32 1e-05, %v1327_v63 }
 0x1b9   : > { %1896 = vmatprep.mubr.bf16.mxu0 %v17197_v51  ;;  %v1504_v58 = vmul.f32 %v10190_v59, %v11514_v38  ;;  %v10192_v2 = vpop.eup %10191  ;;  %v1321_v38 = vmul.f32 0.015625, %v11880_v56  ;;  %v1228_v59 = vpop.xlane.xlu0 %1227 }
 0x1ba   : > { %v10194_v6 = vpop.eup %10193  ;;  %v1507_v14 = vmul.f32 %v10192_v2, %v11550_v49  ;;  %10201 = vrsqrt.f32 %v1382_v37  ;;  %v1384_v49 = vadd.f32 1e-05, %v1320_v46 }
 0x1bb   : > { %v1552_v10 = vpack.c.bf16 %v1505_v8, %v1504_v58  ;;  %v1506_v52 = vmul.f32 %v10194_v6, %v17212_v53  ;;  %v1385_v42 = vadd.f32 1e-05, %v1321_v38  ;;  %v1237_v6 = vpop.xlane.xlu1 %1236 }
 0x1bd   : > { %v1553_v15 = vpack.c.bf16 %v1507_v14, %v1506_v52  ;;  %v10196_v50 = vpop.eup %10195  ;;  %10203 = vrsqrt.f32 %v1385_v42  ;;  %v1234_v53 = vpop.xlane.xlu0 %1233  ;;  %v17220_v52 = vld [vmem:[#allocation9_spill] sm:$0xff] }
 0x1be   : > { %v10198_v47 = vpop.eup %10197  ;;  %v1509_v1 = vmul.f32 %v10196_v50, %v17213_v62  ;;  %10205 = vrsqrt.f32 %v1384_v49 }
 0x1bf   : > { %v1508_v48 = vmul.f32 %v10198_v47, %v17214_v26  ;;  %v10200_v25 = vpop.eup %10199  ;;  %10207 = vrsqrt.f32 %v1387_v43  ;;  %v1328_v47 = vmul.f32 0.015625, %v1234_v53 }
 0x1c0   : > { %9380 = vmatmul.mubr.msk.bf16.gmra.mrb[56].mxu0 %vm702_vm0, %v1550_v20  ;;  %v1511_v7 = vmul.f32 %v10200_v25, %v17215_v19  ;;  %v1386_v20 = vadd.f32 1e-05, %v1322_v17 }
 0x1c1   : > { %1906 = vmatprep.mubr.bf16.mxu0 %v17197_v51  ;;  %v1554_v56 = vpack.c.bf16 %v1509_v1, %v1508_v48  ;;  %v17221_v1 = vld [vmem:[#allocation12_spill] sm:$0xff]  ;;  %v1392_v26 = vadd.f32 1e-05, %v1328_v47  ;;  %v17222_v48 = vld [vmem:[#allocation11_spill] sm:$0xff] }
 0x1c2   : > { %10209 = vrsqrt.f32 %v1386_v20 }
 0x1c3   : > { %10211 = vrsqrt.f32 %v1389_v39 }
 0x1c4   : > { %v10202_v54 = vpop.eup %10201  ;;  %10213 = vrsqrt.f32 %v1388_v24  ;;  %v1578_v24 = vlaneseq }
 0x1c5   : > { %v1510_v16 = vmul.f32 %v10202_v54, %v17216_v0  ;;  %10215 = vrsqrt.f32 %v1391_v55  ;;  %v17223_v54 = vld [vmem:[#allocation14_spill] sm:$0xff]  ;;  %v17225_v0 = vld [vmem:[#allocation16_spill] sm:$0xff] }
 0x1c6   : > { %v11991_v63 = vshrl.u32 %v1578_v24, 7 }
 0x1c7   : > { %v1555_v33 = vpack.c.bf16 %v1511_v7, %v1510_v16  ;;  %v10204_v44 = vpop.eup %10203 }
 0x1c8   : > { %9381 = vmatmul.mubr.msk.bf16.gmra.mrb[60].mxu0 %vm702_vm0, %v1551_v41  ;;  %v10206_v18 = vpop.eup %10205  ;;  %v17217_v41 = vld [vmem:[#allocation8_spill] sm:$0xff]  ;;  %v1580_v55 = vsub.s32 0, %v11991_v63 }
 0x1c9   : > { %1916 = vmatprep.mubr.bf16.mxu0 %v17197_v51  ;;  %v1513_v32 = vmul.f32 %v10204_v44, %v17217_v41  ;;  %v1512_v8 = vmul.f32 %v10206_v18, %v17218_v3  ;;  %v10208_v60 = vpop.eup %10207 }
 0x1ca   : > { %v1515_v14 = vmul.f32 %v10208_v60, %v17219_v34  ;;  %v1576_v34 = vld [vmem:[%s16808_s3] sm:$0x3] }
 0x1cb   : > { %v1556_v58 = vpack.c.bf16 %v1513_v32, %v1512_v8 }
 0x1cc   : > { %v10210_v2 = vpop.eup %10209 }
 0x1cd   : > { %v1514_v38 = vmul.f32 %v10210_v2, %v17220_v52  ;;  %v10212_v46 = vpop.eup %10211 }
 0x1ce   : > { %v10214_v42 = vpop.eup %10213  ;;  %v1517_v49 = vmul.f32 %v10212_v46, %v17221_v1 }
 0x1cf   : > { %v1557_v50 = vpack.c.bf16 %v1515_v14, %v1514_v38  ;;  %v1516_v45 = vmul.f32 %v10214_v42, %v17222_v48  ;;  %v10216_v25 = vpop.eup %10215  ;;  %v11998_v38 = vrot.slane %v1576_v34, %v1580_v55 }
 0x1d0   : > { %9382 = vmatmul.mubr.msk.bf16.gmra.mrb[64].mxu0 %vm702_vm0, %v1552_v10  ;;  %v1326_v10 = vmul.f32 0.015625, %v1228_v59  ;;  %v1519_v43 = vmul.f32 %v10216_v25, %v17223_v54 }
 0x1d1   : > { %1926 = vmatprep.mubr.bf16.mxu0 %v17197_v51 }
 0x1d2   : > { %v1390_v37 = vadd.f32 1e-05, %v1326_v10 }
 0x1d4   : > { %10217 = vrsqrt.f32 %v1390_v37 }
 0x1d8   : > { %9383 = vmatmul.mubr.msk.bf16.gmra.mrb[68].mxu0 %vm702_vm0, %v1553_v15  ;;  %v1329_v15 = vmul.f32 0.015625, %v1237_v6 }
 0x1d9   : > { %1936 = vmatprep.mubr.bf16.mxu0 %v17197_v51 }
 0x1da   : > { %v1393_v62 = vadd.f32 1e-05, %v1329_v15 }
 0x1dc   : > { %10219 = vrsqrt.f32 %v1393_v62 }
 0x1dd   : > { %10221 = vrsqrt.f32 %v1392_v26 }
 0x1de   : > { %v10218_v17 = vpop.eup %10217 }
 0x1df   : > { %v1518_v19 = vmul.f32 %v10218_v17, %v17224_v30 }
 0x1e0   : > { %9384 = vmatmul.mubr.msk.bf16.gmra.mrb[72].mxu0 %vm702_vm0, %v1554_v56  ;;  %v1558_v56 = vpack.c.bf16 %v1517_v49, %v1516_v45 }
 0x1e1   : > { %1946 = vmatprep.mubr.bf16.mxu0 %v17197_v51  ;;  %v1559_v7 = vpack.c.bf16 %v1519_v43, %v1518_v19 }
 0x1e6   : > { %v10220_v20 = vpop.eup %10219 }
 0x1e7   : > { %v10222_v40 = vpop.eup %10221  ;;  %v1521_v16 = vmul.f32 %v10220_v20, %v17225_v0 }
 0x1e8   : > { %9385 = vmatmul.mubr.msk.bf16.gmra.mrb[76].mxu0 %vm702_vm0, %v1555_v33  ;;  %v1520_v33 = vmul.f32 %v10222_v40, %v17226_v22 }
 0x1e9   : > { %1956 = vmatprep.mubr.bf16.mxu0 %v17197_v51 }
 0x1ea   : > { %v1560_v57 = vpack.c.bf16 %v1521_v16, %v1520_v33 }
 0x1f0   : > { %9386 = vmatmul.mubr.msk.bf16.gmra.mrb[80].mxu0 %vm702_vm0, %v1556_v58 }
 0x1f1   : > { %1966 = vmatprep.mubr.bf16.mxu0 %v17197_v51 }
 0x1f8   : > { %9387 = vmatmul.mubr.msk.bf16.gmra.mrb[84].mxu0 %vm702_vm0, %v1557_v50 }
 0x1f9   : > { %1976 = vmatprep.mubr.bf16.mxu0 %v17197_v51 }
 0x200   : > { %9388 = vmatmul.mubr.msk.bf16.gmra.mrb[88].mxu0 %vm702_vm0, %v1558_v56 }
 0x201   : > { %1986 = vmatprep.mubr.bf16.mxu0 %v17197_v51 }
 0x208   : > { %9389 = vmatmul.mubr.msk.bf16.gmra.mrb[92].mxu0 %vm702_vm0, %v1559_v7 }
 0x209   : > { %1996 = vmatprep.mubr.bf16.mxu0 %v17197_v51 }
 0x20d   : > { %v1240_v44 = vpop.xlane.xlu0 %1239 }
 0x20e   : > { %v1330_v18 = vmul.f32 0.015625, %v1240_v44 }
 0x210   : > { %9390 = vmatmul.mubr.msk.bf16.gmra.mrb[96].mxu0 %vm702_vm0, %v1560_v57  ;;  %v1394_v39 = vadd.f32 1e-05, %v1330_v18 }
 0x211   : > { %v1243_v61 = vpop.xlane.xlu1 %1242  ;;  %2006 = vmatprep.mubr.bf16.mxu0 %v17197_v51 }
 0x212   : > { %v1331_v41 = vmul.f32 0.015625, %v1243_v61  ;;  %10223 = vrsqrt.f32 %v1394_v39 }
 0x214   : > { %v1395_v32 = vadd.f32 1e-05, %v1331_v41 }
 0x215   : > { %v1246_v59 = vpop.xlane.xlu0 %1245 }
 0x216   : > { %10225 = vrsqrt.f32 %v1395_v32  ;;  %v1332_v3 = vmul.f32 0.015625, %v1246_v59  ;;  %v1584_v32 = vsub.s32 1, %v11991_v63 }
 0x218   : > { %v1396_v8 = vadd.f32 1e-05, %v1332_v3 }
 0x219   : > { %v1249_v58 = vpop.xlane.xlu1 %1248 }
 0x21a   : > { %v1333_v60 = vmul.f32 0.015625, %v1249_v58  ;;  %10227 = vrsqrt.f32 %v1396_v8 }
 0x21c   : > { %v10224_v10 = vpop.eup %10223  ;;  %v1397_v2 = vadd.f32 1e-05, %v1333_v60 }
 0x21d   : > { %v1252_v6 = vpop.xlane.xlu0 %1251  ;;  %v1522_v37 = vmul.f32 %v10224_v10, %v11770_v27 }
 0x21e   : > { %10229 = vrsqrt.f32 %v1397_v2  ;;  %v1334_v14 = vmul.f32 0.015625, %v1252_v6  ;;  %v12032_v2 = vrot.slane %v1576_v34, %v1584_v32 }
 0x220   : > { %v10226_v53 = vpop.eup %10225  ;;  %v1398_v52 = vadd.f32 1e-05, %v1334_v14  ;;  %17229 = vst [vmem:[#allocation3_spill] sm:$0xff] %v12032_v2 }
 0x221   : > { %v1255_v15 = vpop.xlane.xlu1 %1254  ;;  %v1523_v50 = vmul.f32 %v10226_v53, %v11781_v13 }
 0x222   : > { %v1335_v46 = vmul.f32 0.015625, %v1255_v15  ;;  %10231 = vrsqrt.f32 %v1398_v52 }
 0x223   : > { %v1758_v47 = vpop.f32.mrb[0].mxu0  ;;  %v1561_v42 = vpack.c.bf16 %v1523_v50, %v1522_v37 }
 0x224   : > { %v10228_v62 = vpop.eup %10227  ;;  %v1399_v1 = vadd.f32 1e-05, %v1335_v46  ;;  %v12002_v49 = vadd.f32 %v1758_v47, %v11998_v38  ;;  %v1760_v26 = vpop.f32.mrb[1].mxu0 }
 0x225   : > { %v1762_v48 = vpop.f32.mrb[2].mxu0  ;;  %9391 = vmatmul.mubr.msk.bf16.gmra.mrb[100].mxu0 %vm702_vm0, %v1561_v42  ;;  %v1258_v27 = vpop.xlane.xlu0 %1257  ;;  %v1524_v17 = vmul.f32 %v10228_v62, %v11793_v4  ;;  %v12047_v15 = vadd.f32 %v1760_v26, %v12032_v2 }
 0x226   : > { %17227 = vst [vmem:[#allocation2_spill] sm:$0xff] %v12002_v49  ;;  %10233 = vrsqrt.f32 %v1399_v1  ;;  %v12006_v45 = vadd.f32 %v1762_v48, %v11998_v38  ;;  %v1764_v56 = vpop.f32.mrb[3].mxu0  ;;  %v2077_v13 = vmul.f32 %v12002_v49, %v12002_v49  ;;  %v1336_v25 = vmul.f32 0.015625, %v1258_v27  ;;  %2016 = vmatprep.mubr.bf16.mxu0 %v17197_v51 }
 0x227   : > { %v12040_v63 = vadd.f32 %v1764_v56, %v12032_v2  ;;  %17231 = vst [vmem:[#allocation5_spill] sm:$0xff] %v12047_v15  ;;  %v2685_v26 = vmul.f32 %v12047_v15, %v12047_v15 }
 0x228   : > { %17228 = vst [vmem:[#allocation4_spill] sm:$0xff] %v12006_v45  ;;  %v10230_v54 = vpop.eup %10229  ;;  %v2141_v43 = vsel %vm702_vm0, %v2077_v13, 0.0  ;;  %v1400_v30 = vadd.f32 1e-05, %v1336_v25  ;;  %v2078_v19 = vmul.f32 %v12006_v45, %v12006_v45 }
 0x229   : > { %v1261_v7 = vpop.xlane.xlu1 %1260  ;;  %2142 = vadd.xlane.f32.xlu0 %v2141_v43  ;;  %v1525_v20 = vmul.f32 %v10230_v54, %v11805_v36  ;;  %17230 = vst [vmem:[#allocation6_spill] sm:$0xff] %v12040_v63  ;;  %v2686_v47 = vmul.f32 %v12040_v63, %v12040_v63 }
 0x22a   : > { %v1337_v40 = vmul.f32 0.015625, %v1261_v7  ;;  %10235 = vrsqrt.f32 %v1400_v30  ;;  %v2144_v0 = vsel %vm702_vm0, %v2078_v19, 0.0  ;;  %v3549_v30 = vpack.c.bf16 %v12006_v45, %v12002_v49 }
 0x22b   : > { %2145 = vadd.xlane.f32.xlu1 %v2144_v0  ;;  %v12017_v16 = vpop.f32.mrb[4].mxu0  ;;  %v1562_v22 = vpack.c.bf16 %v1525_v20, %v1524_v17 }
 0x22c   : > { %v10232_v4 = vpop.eup %10231  ;;  %v1401_v33 = vadd.f32 1e-05, %v1337_v40  ;;  %v12019_v44 = vpop.f32.mrb[5].mxu0 }
 0x22d   : > { %v12021_v57 = vpop.f32.mrb[6].mxu0  ;;  %9392 = vmatmul.mubr.msk.bf16.gmra.mrb[104].mxu0 %vm702_vm0, %v1562_v22  ;;  %v1264_v18 = vpop.xlane.xlu0 %1263  ;;  %v1526_v61 = vmul.f32 %v10232_v4, %v11817_v12 }
 0x22e   : > { %10237 = vrsqrt.f32 %v1401_v33  ;;  %v12024_v39 = vpop.f32.mrb[7].mxu0  ;;  %v1338_v36 = vmul.f32 0.015625, %v1264_v18  ;;  %2026 = vmatprep.mubr.bf16.mxu0 %v17197_v51 }
 0x230   : > { %v10234_v41 = vpop.eup %10233  ;;  %v1402_v24 = vadd.f32 1e-05, %v1338_v36 }
 0x231   : > { %v1267_v59 = vpop.xlane.xlu1 %1266  ;;  %v1527_v3 = vmul.f32 %v10234_v41, %v11829_v29 }
 0x232   : > { %v1339_v8 = vmul.f32 0.015625, %v1267_v59  ;;  %10239 = vrsqrt.f32 %v1402_v24 }
 0x233   : > { %v12030_v58 = vpop.f32.mrb[8].mxu0  ;;  %v1563_v60 = vpack.c.bf16 %v1527_v3, %v1526_v61 }
 0x234   : > { %v10236_v10 = vpop.eup %10235  ;;  %v1403_v55 = vadd.f32 1e-05, %v1339_v8  ;;  %v12034_v6 = vpop.f32.mrb[9].mxu0 }
 0x235   : > { %v12036_v14 = vpop.f32.mrb[10].mxu0  ;;  %9393 = vmatmul.mubr.msk.bf16.gmra.mrb[108].mxu0 %vm702_vm0, %v1563_v60  ;;  %v1270_v12 = vpop.xlane.xlu0 %1269  ;;  %v1528_v34 = vmul.f32 %v10236_v10, %v11841_v35 }
 0x236   : > { %10241 = vrsqrt.f32 %v1403_v55  ;;  %v12042_v29 = vpop.f32.mrb[11].mxu0  ;;  %v1340_v37 = vmul.f32 0.015625, %v1270_v12  ;;  %2036 = vmatprep.mubr.bf16.mxu0 %v17197_v51 }
 0x238   : > { %v10238_v53 = vpop.eup %10237  ;;  %v1404_v52 = vadd.f32 1e-05, %v1340_v37 }
 0x239   : > { %v1273_v50 = vpop.xlane.xlu1 %1272  ;;  %v1529_v46 = vmul.f32 %v10238_v53, %v11853_v31  ;;  %v12106_v53 = vadd.f32 %v12021_v57, %v11998_v38 }
 0x23a   : > { %v1341_v42 = vmul.f32 0.015625, %v1273_v50  ;;  %10243 = vrsqrt.f32 %v1404_v52 }
 0x23b   : > { %v12052_v62 = vpop.f32.mrb[12].mxu0  ;;  %v1564_v1 = vpack.c.bf16 %v1529_v46, %v1528_v34  ;;  %17232 = vst [vmem:[#allocation8_spill] sm:$0xff] %v12106_v53 }
 0x23c   : > { %v10240_v48 = vpop.eup %10239  ;;  %v1405_v27 = vadd.f32 1e-05, %v1341_v42  ;;  %2815 = vrot.lane.b32.xlu1 %v2686_v47, %s10901_s22  ;;  %v12055_v35 = vpop.f32.mrb[13].mxu0 }
 0x23d   : > { %v12059_v56 = vpop.f32.mrb[14].mxu0  ;;  %9394 = vmatmul.mubr.msk.bf16.gmra.mrb[112].mxu0 %vm702_vm0, %v1564_v1  ;;  %v1276_v31 = vpop.xlane.xlu0 %1275  ;;  %v1530_v17 = vmul.f32 %v10240_v48, %v11865_v23 }
 0x23e   : > { %10245 = vrsqrt.f32 %v1405_v27  ;;  %v12062_v13 = vpop.f32.mrb[15].mxu0  ;;  %v1342_v25 = vmul.f32 0.015625, %v1276_v31  ;;  %2046 = vmatprep.mubr.bf16.mxu0 %v17197_v51 }
 0x23f   : > { %2813 = vrot.lane.b32.xlu0 %v2685_v26, %s10901_s22  ;;  %v12136_v26 = vadd.f32 %v12024_v39, %v12032_v2 }
 0x240   : > { %v10242_v54 = vpop.eup %10241  ;;  %v1406_v43 = vadd.f32 1e-05, %v1342_v25 }
 0x241   : > { %v1279_v19 = vpop.xlane.xlu1 %1278  ;;  %v1531_v7 = vmul.f32 %v10242_v54, %v11877_v11  ;;  %17234 = vst [vmem:[#allocation10_spill] sm:$0xff] %v12136_v26 }
 0x242   : > { %v1343_v20 = vmul.f32 0.015625, %v1279_v19  ;;  %10247 = vrsqrt.f32 %v1406_v43  ;;  %v2688_v43 = vmul.f32 %v12136_v26, %v12136_v26 }
 0x243   : > { %v12070_v40 = vpop.f32.mrb[16].mxu0  ;;  %3613 = vrot.lane.b32.xlu0 %v3549_v30, %s10902_s23  ;;  %v1565_v0 = vpack.c.bf16 %v1531_v7, %v1530_v17  ;;  %v12151_v30 = vadd.f32 %v12019_v44, %v12032_v2 }
 0x244   : > { %v10244_v22 = vpop.eup %10243  ;;  %v1407_v4 = vadd.f32 1e-05, %v1343_v20  ;;  %v12073_v33 = vpop.f32.mrb[17].mxu0 }
 0x245   : > { %v12075_v23 = vpop.f32.mrb[18].mxu0  ;;  %9395 = vmatmul.mubr.msk.bf16.gmra.mrb[116].mxu0 %vm702_vm0, %v1565_v0  ;;  %v1532_v11 = vmul.f32 %v10244_v22, %v11889_v5  ;;  %17235 = vst [vmem:[#allocation9_spill] sm:$0xff] %v12151_v30  ;;  %v2687_v20 = vmul.f32 %v12151_v30, %v12151_v30 }
 0x246   : > { %10249 = vrsqrt.f32 %v1407_v4  ;;  %v12078_v18 = vpop.f32.mrb[19].mxu0  ;;  %2056 = vmatprep.mubr.bf16.mxu0 %v17197_v51 }
 0x248   : > { %v10246_v36 = vpop.eup %10245 }
 0x249   : > { %v1533_v61 = vmul.f32 %v10246_v36, %v11901_v21 }
 0x24b   : > { %v12083_v41 = vpop.f32.mrb[20].mxu0  ;;  %v1566_v32 = vpack.c.bf16 %v1533_v61, %v1532_v11 }
 0x24c   : > { %v10248_v24 = vpop.eup %10247  ;;  %v12085_v59 = vpop.f32.mrb[21].mxu0 }
 0x24d   : > { %v12087_v3 = vpop.f32.mrb[22].mxu0  ;;  %9396 = vmatmul.mubr.msk.bf16.gmra.mrb[120].mxu0 %vm702_vm0, %v1566_v32  ;;  %v1534_v60 = vmul.f32 %v10248_v24, %v11913_v28 }
 0x24e   : > { %v12090_v8 = vpop.f32.mrb[23].mxu0  ;;  %2066 = vmatprep.mubr.bf16.mxu0 %v17197_v51  ;;  %v12110_v51 = vadd.f32 %v12017_v16, %v11998_v38 }
 0x250   : > { %v10250_v5 = vpop.eup %10249  ;;  %17233 = vst [vmem:[#allocation7_spill] sm:$0xff] %v12110_v51  ;;  %v2079_v46 = vmul.f32 %v12110_v51, %v12110_v51  ;;  %v3550_v22 = vpack.c.bf16 %v12106_v53, %v12110_v51 }
 0x251   : > { %v1535_v10 = vmul.f32 %v10250_v5, %v11923_v9  ;;  %v2080_v9 = vmul.f32 %v12106_v53, %v12106_v53 }
 0x252   : > { %v2147_v16 = vsel %vm702_vm0, %v2079_v46, 0.0 }
 0x253   : > { %v12095_v21 = vpop.f32.mrb[24].mxu0  ;;  %v1567_v55 = vpack.c.bf16 %v1535_v10, %v1534_v60  ;;  %v2150_v57 = vsel %vm702_vm0, %v2080_v9, 0.0  ;;  %v12187_v10 = vadd.f32 %v12036_v14, %v11998_v38 }
 0x254   : > { %v12097_v12 = vpop.f32.mrb[25].mxu0 }
 0x255   : > { %v12099_v37 = vpop.f32.mrb[26].mxu0  ;;  %9397 = vmatmul.mubr.msk.bf16.gmra.mrb[124].mxu0 %vm702_vm0, %v1567_v55  ;;  %17236 = vst [vmem:[#allocation12_spill] sm:$0xff] %v12187_v10 }
 0x256   : > { %v12102_v34 = vpop.f32.mrb[27].mxu0 }
 0x25b   : > { %v12112_v28 = vpop.f32.mrb[28].mxu0 }
 0x25c   : > { %v12116_v52 = vpop.f32.mrb[29].mxu0 }
 0x25d   : > { %v12118_v50 = vpop.f32.mrb[30].mxu0 }
 0x25e   : > { %v12122_v47 = vpop.f32.mrb[31].mxu0 }
 0x260   : > { %2151 = vadd.xlane.f32.xlu1 %v2150_v57  ;;  %v2082_v57 = vmul.f32 %v12187_v10, %v12187_v10 }
 0x262   : > { %2148 = vadd.xlane.f32.xlu0 %v2147_v16  ;;  %v12199_v16 = vadd.f32 %v12030_v58, %v11998_v38  ;;  %v2156_v14 = vsel %vm702_vm0, %v2082_v57, 0.0  ;;  %v12223_v57 = vadd.f32 %v12042_v29, %v12032_v2 }
 0x263   : > { %v12126_v42 = vpop.f32.mrb[32].mxu0 }
 0x264   : > { %v12128_v1 = vpop.f32.mrb[33].mxu0  ;;  %17237 = vst [vmem:[#allocation11_spill] sm:$0xff] %v12199_v16  ;;  %v2081_v49 = vmul.f32 %v12199_v16, %v12199_v16  ;;  %17241 = vst [vmem:[#allocation15_spill] sm:$0xff] %v12223_v57  ;;  %v2690_v15 = vmul.f32 %v12223_v57, %v12223_v57 }
 0x265   : > { %v12130_v48 = vpop.f32.mrb[34].mxu0 }
 0x266   : > { %v12132_v27 = vpop.f32.mrb[35].mxu0  ;;  %v2153_v53 = vsel %vm702_vm0, %v2081_v49, 0.0 }
 0x26b   : > { %v12138_v31 = vpop.f32.mrb[36].mxu0 }
 0x26c   : > { %v12140_v25 = vpop.f32.mrb[37].mxu0 }
 0x26d   : > { %v12142_v17 = vpop.f32.mrb[38].mxu0 }
 0x26e   : > { %v12144_v54 = vpop.f32.mrb[39].mxu0 }
 0x271   : > { %2819 = vrot.lane.b32.xlu1 %v2688_v43, %s10901_s22 }
 0x273   : > { %v12153_v19 = vpop.f32.mrb[40].mxu0 }
 0x274   : > { %v12155_v39 = vpop.f32.mrb[41].mxu0 }
 0x275   : > { %v12157_v7 = vpop.f32.mrb[42].mxu0 }
 0x276   : > { %v12161_v0 = vpop.f32.mrb[43].mxu0 }
 0x278   : > { %2817 = vrot.lane.b32.xlu0 %v2687_v20, %s10901_s22 }
 0x27b   : > { %v12166_v4 = vpop.f32.mrb[44].mxu0 }
 0x27c   : > { %v12168_v44 = vpop.f32.mrb[45].mxu0  ;;  %3615 = vrot.lane.b32.xlu0 %v3550_v22, %s10902_s23 }
 0x27d   : > { %v12171_v11 = vpop.f32.mrb[46].mxu0 }
 0x27e   : > { %v12173_v36 = vpop.f32.mrb[47].mxu0 }
 0x283   : > { %v12175_v61 = vpop.f32.mrb[48].mxu0 }
 0x284   : > { %v12177_v32 = vpop.f32.mrb[49].mxu0 }
 0x285   : > { %v12179_v24 = vpop.f32.mrb[50].mxu0 }
 0x286   : > { %v12181_v60 = vpop.f32.mrb[51].mxu0 }
 0x28b   : > { %v12183_v5 = vpop.f32.mrb[52].mxu0 }
 0x28c   : > { %v12189_v55 = vpop.f32.mrb[53].mxu0 }
 0x28d   : > { %v12191_v9 = vpop.f32.mrb[54].mxu0 }
 0x28e   : > { %v12193_v46 = vpop.f32.mrb[55].mxu0 }
 0x293   : > { %v12201_v43 = vpop.f32.mrb[56].mxu0 }
 0x294   : > { %v12203_v20 = vpop.f32.mrb[57].mxu0 }
 0x295   : > { %2157 = vadd.xlane.f32.xlu1 %v2156_v14  ;;  %v12206_v22 = vpop.f32.mrb[58].mxu0 }
 0x296   : > { %v12208_v45 = vpop.f32.mrb[59].mxu0 }
 0x29b   : > { %v12213_v51 = vpop.f32.mrb[60].mxu0  ;;  %2154 = vadd.xlane.f32.xlu0 %v2153_v53 }
 0x29c   : > { %v12215_v58 = vpop.f32.mrb[61].mxu0 }
 0x29d   : > { %17238 = vst [vmem:[#allocation14_spill] sm:$0xff] %v12215_v58  ;;  %v12217_v26 = vpop.f32.mrb[62].mxu0 }
 0x29e   : > { %17239 = vst [vmem:[#allocation13_spill] sm:$0xff] %v12217_v26  ;;  %v12219_v30 = vpop.f32.mrb[63].mxu0 }
 0x29f   : > { %17240 = vst [vmem:[#allocation16_spill] sm:$0xff] %v12219_v30  ;;  %v12238_v30 = vadd.f32 %v12034_v6, %v12032_v2 }
 0x2a1   : > { %17245 = vst [vmem:[#allocation20_spill] sm:$0xff] %v12238_v30  ;;  %v2689_v57 = vmul.f32 %v12238_v30, %v12238_v30 }
 0x2a3   : > { %v12225_v14 = vpop.f32.mrb[64].mxu0 }
 0x2a4   : > { %17242 = vst [vmem:[#allocation17_spill] sm:$0xff] %v12225_v14  ;;  %v12229_v63 = vpop.f32.mrb[65].mxu0 }
 0x2a5   : > { %17243 = vst [vmem:[#allocation18_spill] sm:$0xff] %v12229_v63  ;;  %v12231_v49 = vpop.f32.mrb[66].mxu0 }
 0x2a6   : > { %2823 = vrot.lane.b32.xlu1 %v2690_v15, %s10901_s22  ;;  %v12234_v53 = vpop.f32.mrb[67].mxu0  ;;  %v3551_v15 = vpack.c.bf16 %v12187_v10, %v12199_v16  ;;  %v12272_v10 = vadd.f32 %v12059_v56, %v11998_v38 }
 0x2a7   : > { %17244 = vst [vmem:[#allocation19_spill] sm:$0xff] %v12234_v53 }
 0x2a8   : > { %17256 = vst [vmem:[#allocation31_spill] sm:$0xff] %v12272_v10 }
 0x2ab   : > { %v12240_v58 = vpop.f32.mrb[68].mxu0 }
 0x2ac   : > { %v12242_v29 = vpop.f32.mrb[69].mxu0 }
 0x2ad   : > { %17246 = vst [vmem:[#allocation21_spill] sm:$0xff] %v12242_v29  ;;  %v12244_v14 = vpop.f32.mrb[70].mxu0 }
 0x2ae   : > { %17247 = vst [vmem:[#allocation22_spill] sm:$0xff] %v12244_v14  ;;  %v12246_v26 = vpop.f32.mrb[71].mxu0 }
 0x2af   : > { %17248 = vst [vmem:[#allocation23_spill] sm:$0xff] %v12246_v26 }
 0x2b1   : > { %2821 = vrot.lane.b32.xlu0 %v2689_v57, %s10901_s22 }
 0x2b3   : > { %v12253_v53 = vpop.f32.mrb[72].mxu0 }
 0x2b4   : > { %v12255_v6 = vpop.f32.mrb[73].mxu0 }
 0x2b5   : > { %17249 = vst [vmem:[#allocation24_spill] sm:$0xff] %v12255_v6  ;;  %v12257_v63 = vpop.f32.mrb[74].mxu0  ;;  %3617 = vrot.lane.b32.xlu0 %v3551_v15, %s10902_s23  ;;  %v2084_v15 = vmul.f32 %v12272_v10, %v12272_v10 }
 0x2b6   : > { %17250 = vst [vmem:[#allocation25_spill] sm:$0xff] %v12257_v63  ;;  %v12260_v29 = vpop.f32.mrb[75].mxu0 }
 0x2b7   : > { %17251 = vst [vmem:[#allocation26_spill] sm:$0xff] %v12260_v29 }
 0x2bb   : > { %v12262_v14 = vpop.f32.mrb[76].mxu0 }
 0x2bc   : > { %17252 = vst [vmem:[#allocation27_spill] sm:$0xff] %v12262_v14  ;;  %v12264_v26 = vpop.f32.mrb[77].mxu0 }
 0x2bd   : > { %17253 = vst [vmem:[#allocation28_spill] sm:$0xff] %v12264_v26  ;;  %v12266_v30 = vpop.f32.mrb[78].mxu0  ;;  %v2162_v26 = vsel %vm702_vm0, %v2084_v15, 0.0 }
 0x2be   : > { %17254 = vst [vmem:[#allocation29_spill] sm:$0xff] %v12266_v30  ;;  %v12268_v57 = vpop.f32.mrb[79].mxu0 }
 0x2bf   : > { %17255 = vst [vmem:[#allocation30_spill] sm:$0xff] %v12268_v57  ;;  %v12287_v57 = vadd.f32 %v12052_v62, %v11998_v38  ;;  %v12306_v62 = vadd.f32 %v12062_v13, %v12032_v2  ;;  %v12327_v13 = vadd.f32 %v12055_v35, %v12032_v2  ;;  %v12343_v35 = vadd.f32 %v12075_v23, %v11998_v38 }
 0x2c1   : > { %17261 = vst [vmem:[#allocation36_spill] sm:$0xff] %v12287_v57  ;;  %17267 = vst [vmem:[#allocation42_spill] sm:$0xff] %v12306_v62 }
 0x2c2   : > { %17272 = vst [vmem:[#allocation47_spill] sm:$0xff] %v12327_v13  ;;  %17276 = vst [vmem:[#allocation51_spill] sm:$0xff] %v12343_v35 }
 0x2c3   : > { %v12274_v16 = vpop.f32.mrb[80].mxu0 }
 0x2c4   : > { %17257 = vst [vmem:[#allocation32_spill] sm:$0xff] %v12274_v16  ;;  %v12276_v6 = vpop.f32.mrb[81].mxu0 }
 0x2c5   : > { %17258 = vst [vmem:[#allocation33_spill] sm:$0xff] %v12276_v6  ;;  %v12278_v63 = vpop.f32.mrb[82].mxu0 }
 0x2c6   : > { %17259 = vst [vmem:[#allocation34_spill] sm:$0xff] %v12278_v63  ;;  %v12282_v29 = vpop.f32.mrb[83].mxu0  ;;  %v2083_v63 = vmul.f32 %v12287_v57, %v12287_v57 }
 0x2c7   : > { %17260 = vst [vmem:[#allocation35_spill] sm:$0xff] %v12282_v29 }
 0x2c8   : > { %v2159_v15 = vsel %vm702_vm0, %v2083_v63, 0.0 }
 0x2ca   : > { %2163 = vadd.xlane.f32.xlu1 %v2162_v26 }
 0x2cb   : > { %v12289_v56 = vpop.f32.mrb[84].mxu0 }
 0x2cc   : > { %v12291_v30 = vpop.f32.mrb[85].mxu0 }
 0x2cd   : > { %17262 = vst [vmem:[#allocation37_spill] sm:$0xff] %v12291_v30  ;;  %v12293_v16 = vpop.f32.mrb[86].mxu0 }
 0x2ce   : > { %17263 = vst [vmem:[#allocation38_spill] sm:$0xff] %v12293_v16  ;;  %v12295_v6 = vpop.f32.mrb[87].mxu0 }
 0x2cf   : > { %17264 = vst [vmem:[#allocation39_spill] sm:$0xff] %v12295_v6  ;;  %v2692_v6 = vmul.f32 %v12306_v62, %v12306_v62 }
 0x2d3   : > { %v12299_v14 = vpop.f32.mrb[88].mxu0 }
 0x2d4   : > { %17265 = vst [vmem:[#allocation40_spill] sm:$0xff] %v12299_v14  ;;  %2160 = vadd.xlane.f32.xlu0 %v2159_v15  ;;  %v12302_v26 = vpop.f32.mrb[89].mxu0 }
 0x2d5   : > { %17266 = vst [vmem:[#allocation41_spill] sm:$0xff] %v12302_v26  ;;  %v12308_v29 = vpop.f32.mrb[90].mxu0 }
 0x2d6   : > { %17268 = vst [vmem:[#allocation43_spill] sm:$0xff] %v12308_v29  ;;  %v12310_v30 = vpop.f32.mrb[91].mxu0 }
 0x2d7   : > { %17269 = vst [vmem:[#allocation44_spill] sm:$0xff] %v12310_v30 }
 0x2db   : > { %2827 = vrot.lane.b32.xlu1 %v2692_v6, %s10901_s22  ;;  %v12315_v16 = vpop.f32.mrb[92].mxu0  ;;  %v2691_v6 = vmul.f32 %v12327_v13, %v12327_v13 }
 0x2dc   : > { %v12317_v14 = vpop.f32.mrb[93].mxu0 }
 0x2dd   : > { %17270 = vst [vmem:[#allocation45_spill] sm:$0xff] %v12317_v14  ;;  %v12319_v63 = vpop.f32.mrb[94].mxu0 }
 0x2de   : > { %v12321_v15 = vpop.f32.mrb[95].mxu0 }
 0x2df   : > { %17271 = vst [vmem:[#allocation46_spill] sm:$0xff] %v12321_v15  ;;  %v3552_v15 = vpack.c.bf16 %v12272_v10, %v12287_v57 }
 0x2e3   : > { %v12323_v26 = vpop.f32.mrb[96].mxu0 }
 0x2e4   : > { %v12329_v30 = vpop.f32.mrb[97].mxu0 }
 0x2e5   : > { %17273 = vst [vmem:[#allocation48_spill] sm:$0xff] %v12329_v30  ;;  %v12331_v29 = vpop.f32.mrb[98].mxu0 }
 0x2e6   : > { %17274 = vst [vmem:[#allocation49_spill] sm:$0xff] %v12331_v29  ;;  %v12333_v62 = vpop.f32.mrb[99].mxu0 }
 0x2e7   : > { %17275 = vst [vmem:[#allocation50_spill] sm:$0xff] %v12333_v62  ;;  %v2086_v62 = vmul.f32 %v12343_v35, %v12343_v35 }
 0x2ea   : > { %2825 = vrot.lane.b32.xlu0 %v2691_v6, %s10901_s22  ;;  %v2168_v6 = vsel %vm702_vm0, %v2086_v62, 0.0  ;;  %v12376_v62 = vadd.f32 %v12078_v18, %v12032_v2 }
 0x2ec   : > { %17288 = vst [vmem:[#allocation63_spill] sm:$0xff] %v12376_v62 }
 0x2ee   : > { %3619 = vrot.lane.b32.xlu0 %v3552_v15, %s10902_s23 }
 0x2f8   : > { %v12345_v14 = vpop.f32.mrb[100].mxu0 }
 0x2f9   : > { %17277 = vst [vmem:[#allocation52_spill] sm:$0xff] %v12345_v14  ;;  %v12347_v30 = vpop.f32.mrb[101].mxu0 }
 0x2fa   : > { %17278 = vst [vmem:[#allocation53_spill] sm:$0xff] %v12347_v30  ;;  %v12349_v29 = vpop.f32.mrb[102].mxu0  ;;  %v12366_v30 = vadd.f32 %v12070_v40, %v11998_v38  ;;  %v2694_v40 = vmul.f32 %v12376_v62, %v12376_v62 }
 0x2fb   : > { %17279 = vst [vmem:[#allocation54_spill] sm:$0xff] %v12349_v29  ;;  %v12353_v13 = vpop.f32.mrb[103].mxu0 }
 0x2fc   : > { %17280 = vst [vmem:[#allocation55_spill] sm:$0xff] %v12353_v13  ;;  %17285 = vst [vmem:[#allocation60_spill] sm:$0xff] %v12366_v30  ;;  %v2085_v13 = vmul.f32 %v12366_v30, %v12366_v30 }
 0x2ff   : > { %2169 = vadd.xlane.f32.xlu1 %v2168_v6 }
 0x300   : > { %v12356_v10 = vpop.f32.mrb[104].mxu0 }
 0x301   : > { %17281 = vst [vmem:[#allocation56_spill] sm:$0xff] %v12356_v10  ;;  %v12358_v15 = vpop.f32.mrb[105].mxu0 }
 0x302   : > { %17282 = vst [vmem:[#allocation57_spill] sm:$0xff] %v12358_v15  ;;  %v12360_v23 = vpop.f32.mrb[106].mxu0 }
 0x303   : > { %17283 = vst [vmem:[#allocation58_spill] sm:$0xff] %v12360_v23  ;;  %v12362_v57 = vpop.f32.mrb[107].mxu0 }
 0x304   : > { %17284 = vst [vmem:[#allocation59_spill] sm:$0xff] %v12362_v57  ;;  %v2165_v57 = vsel %vm702_vm0, %v2085_v13, 0.0  ;;  %v12404_v13 = vadd.f32 %v12073_v33, %v12032_v2 }
 0x306   : > { %17299 = vst [vmem:[#allocation74_spill] sm:$0xff] %v12404_v13 }
 0x308   : > { %v12368_v29 = vpop.f32.mrb[108].mxu0 }
 0x309   : > { %17286 = vst [vmem:[#allocation61_spill] sm:$0xff] %v12368_v29  ;;  %v12372_v14 = vpop.f32.mrb[109].mxu0 }
 0x30a   : > { %17287 = vst [vmem:[#allocation62_spill] sm:$0xff] %v12372_v14  ;;  %v12378_v6 = vpop.f32.mrb[110].mxu0 }
 0x30b   : > { %17289 = vst [vmem:[#allocation64_spill] sm:$0xff] %v12378_v6  ;;  %v12380_v15 = vpop.f32.mrb[111].mxu0 }
 0x30c   : > { %17290 = vst [vmem:[#allocation65_spill] sm:$0xff] %v12380_v15 }
 0x30d   : > { %2166 = vadd.xlane.f32.xlu0 %v2165_v57 }
 0x310   : > { %2831 = vrot.lane.b32.xlu1 %v2694_v40, %s10901_s22  ;;  %v12386_v23 = vpop.f32.mrb[112].mxu0 }
 0x311   : > { %17291 = vst [vmem:[#allocation66_spill] sm:$0xff] %v12386_v23  ;;  %v12388_v29 = vpop.f32.mrb[113].mxu0 }
 0x312   : > { %17292 = vst [vmem:[#allocation67_spill] sm:$0xff] %v12388_v29  ;;  %v12390_v14 = vpop.f32.mrb[114].mxu0  ;;  %v2693_v29 = vmul.f32 %v12404_v13, %v12404_v13 }
 0x313   : > { %17293 = vst [vmem:[#allocation68_spill] sm:$0xff] %v12390_v14  ;;  %v12392_v18 = vpop.f32.mrb[115].mxu0 }
 0x314   : > { %17294 = vst [vmem:[#allocation69_spill] sm:$0xff] %v12392_v18 }
 0x318   : > { %v12394_v10 = vpop.f32.mrb[116].mxu0 }
 0x319   : > { %17295 = vst [vmem:[#allocation70_spill] sm:$0xff] %v12394_v10  ;;  %v12396_v6 = vpop.f32.mrb[117].mxu0 }
 0x31a   : > { %17296 = vst [vmem:[#allocation71_spill] sm:$0xff] %v12396_v6  ;;  %v12398_v15 = vpop.f32.mrb[118].mxu0 }
 0x31b   : > { %17297 = vst [vmem:[#allocation72_spill] sm:$0xff] %v12398_v15  ;;  %v12400_v57 = vpop.f32.mrb[119].mxu0 }
 0x31c   : > { %17298 = vst [vmem:[#allocation73_spill] sm:$0xff] %v12400_v57  ;;  %v3553_v57 = vpack.c.bf16 %v12343_v35, %v12366_v30  ;;  %v12441_v35 = vadd.f32 %v12090_v8, %v12032_v2 }
 0x31e   : > { %17310 = vst [vmem:[#allocation85_spill] sm:$0xff] %v12441_v35  ;;  %v2696_v30 = vmul.f32 %v12441_v35, %v12441_v35 }
 0x320   : > { %v12406_v40 = vpop.f32.mrb[120].mxu0 }
 0x321   : > { %17300 = vst [vmem:[#allocation75_spill] sm:$0xff] %v12406_v40  ;;  %v12410_v14 = vpop.f32.mrb[121].mxu0 }
 0x322   : > { %17301 = vst [vmem:[#allocation76_spill] sm:$0xff] %v12410_v14  ;;  %v12412_v18 = vpop.f32.mrb[122].mxu0  ;;  %v12428_v14 = vadd.f32 %v12087_v3, %v11998_v38 }
 0x323   : > { %17302 = vst [vmem:[#allocation77_spill] sm:$0xff] %v12412_v18  ;;  %2829 = vrot.lane.b32.xlu0 %v2693_v29, %s10901_s22  ;;  %v12415_v6 = vpop.f32.mrb[123].mxu0 }
 0x324   : > { %17303 = vst [vmem:[#allocation78_spill] sm:$0xff] %v12415_v6  ;;  %17307 = vst [vmem:[#allocation82_spill] sm:$0xff] %v12428_v14  ;;  %v2088_v29 = vmul.f32 %v12428_v14, %v12428_v14 }
 0x326   : > { %v2174_v6 = vsel %vm702_vm0, %v2088_v29, 0.0  ;;  %v12460_v29 = vadd.f32 %v12099_v37, %v11998_v38 }
 0x327   : > { %3621 = vrot.lane.b32.xlu0 %v3553_v57, %s10902_s23  ;;  %v12437_v57 = vadd.f32 %v12083_v41, %v11998_v38 }
 0x328   : > { %v12420_v33 = vpop.f32.mrb[124].mxu0  ;;  %17312 = vst [vmem:[#allocation87_spill] sm:$0xff] %v12460_v29 }
 0x329   : > { %17304 = vst [vmem:[#allocation79_spill] sm:$0xff] %v12420_v33  ;;  %v12422_v15 = vpop.f32.mrb[125].mxu0  ;;  %17309 = vst [vmem:[#allocation84_spill] sm:$0xff] %v12437_v57  ;;  %v2087_v3 = vmul.f32 %v12437_v57, %v12437_v57  ;;  %v3554_v8 = vpack.c.bf16 %v12428_v14, %v12437_v57  ;;  %v12590_v57 = vadd.f32 %v12144_v54, %v12032_v2 }
 0x32a   : > { %17305 = vst [vmem:[#allocation80_spill] sm:$0xff] %v12422_v15  ;;  %v12424_v40 = vpop.f32.mrb[126].mxu0 }
 0x32b   : > { %17306 = vst [vmem:[#allocation81_spill] sm:$0xff] %v12424_v40  ;;  %v12430_v18 = vpop.f32.mrb[127].mxu0  ;;  %v2171_v15 = vsel %vm702_vm0, %v2087_v3, 0.0  ;;  %v12472_v3 = vadd.f32 %v12095_v21, %v11998_v38  ;;  %v12488_v21 = vadd.f32 %v12118_v50, %v11998_v38  ;;  %17326 = vst [vmem:[#allocation101_spill] sm:$0xff] %v12590_v57 }
 0x32c   : > { %17308 = vst [vmem:[#allocation83_spill] sm:$0xff] %v12430_v18 }
 0x32d   : > { %17314 = vst [vmem:[#allocation89_spill] sm:$0xff] %v12472_v3  ;;  %17316 = vst [vmem:[#allocation91_spill] sm:$0xff] %v12488_v21 }
 0x334   : > { %2175 = vadd.xlane.f32.xlu1 %v2174_v6  ;;  %v12451_v6 = vadd.f32 %v12085_v59, %v12032_v2 }
 0x336   : > { %17311 = vst [vmem:[#allocation86_spill] sm:$0xff] %v12451_v6  ;;  %v2695_v41 = vmul.f32 %v12451_v6, %v12451_v6 }
 0x345   : > { %2835 = vrot.lane.b32.xlu1 %v2696_v30, %s10901_s22  ;;  %v2090_v30 = vmul.f32 %v12460_v29, %v12460_v29 }
 0x346   : > { %2172 = vadd.xlane.f32.xlu0 %v2171_v15  ;;  %v12468_v15 = vadd.f32 %v12102_v34, %v12032_v2 }
 0x347   : > { %v2180_v59 = vsel %vm702_vm0, %v2090_v30, 0.0  ;;  %v12482_v30 = vadd.f32 %v12097_v12, %v12032_v2 }
 0x348   : > { %17313 = vst [vmem:[#allocation88_spill] sm:$0xff] %v12468_v15  ;;  %v2698_v37 = vmul.f32 %v12468_v15, %v12468_v15 }
 0x349   : > { %17315 = vst [vmem:[#allocation90_spill] sm:$0xff] %v12482_v30  ;;  %v2697_v34 = vmul.f32 %v12482_v30, %v12482_v30 }
 0x35c   : > { %2833 = vrot.lane.b32.xlu0 %v2695_v41, %s10901_s22  ;;  %v2089_v41 = vmul.f32 %v12472_v3, %v12472_v3 }
 0x360   : > { %3623 = vrot.lane.b32.xlu0 %v3554_v8, %s10902_s23  ;;  %v2177_v8 = vsel %vm702_vm0, %v2089_v41, 0.0  ;;  %v12499_v41 = vadd.f32 %v12122_v47, %v12032_v2 }
 0x362   : > { %17317 = vst [vmem:[#allocation92_spill] sm:$0xff] %v12499_v41  ;;  %v2700_v50 = vmul.f32 %v12499_v41, %v12499_v41 }
 0x369   : > { %2181 = vadd.xlane.f32.xlu1 %v2180_v59  ;;  %v3555_v59 = vpack.c.bf16 %v12460_v29, %v12472_v3  ;;  %v12570_v3 = vadd.f32 %v12128_v1, %v12032_v2 }
 0x36b   : > { %17325 = vst [vmem:[#allocation100_spill] sm:$0xff] %v12570_v3 }
 0x37a   : > { %2839 = vrot.lane.b32.xlu1 %v2698_v37, %s10901_s22  ;;  %v2092_v37 = vmul.f32 %v12488_v21, %v12488_v21 }
 0x37c   : > { %v2186_v12 = vsel %vm702_vm0, %v2092_v37, 0.0 }
 0x37f   : > { %2178 = vadd.xlane.f32.xlu0 %v2177_v8  ;;  %v12505_v8 = vadd.f32 %v12130_v48, %v11998_v38 }
 0x381   : > { %17318 = vst [vmem:[#allocation93_spill] sm:$0xff] %v12505_v8 }
 0x395   : > { %2837 = vrot.lane.b32.xlu0 %v2697_v34, %s10901_s22  ;;  %v12509_v34 = vadd.f32 %v12112_v28, %v11998_v38  ;;  %v12524_v28 = vadd.f32 %v12116_v52, %v12032_v2  ;;  %v12537_v52 = vadd.f32 %v12132_v27, %v12032_v2 }
 0x397   : > { %17319 = vst [vmem:[#allocation94_spill] sm:$0xff] %v12509_v34  ;;  %v2091_v37 = vmul.f32 %v12509_v34, %v12509_v34  ;;  %17321 = vst [vmem:[#allocation96_spill] sm:$0xff] %v12524_v28 }
 0x398   : > { %17322 = vst [vmem:[#allocation97_spill] sm:$0xff] %v12537_v52 }
 0x399   : > { %3625 = vrot.lane.b32.xlu0 %v3555_v59, %s10902_s23  ;;  %v12513_v59 = vadd.f32 %v12126_v42, %v11998_v38  ;;  %v2183_v48 = vsel %vm702_vm0, %v2091_v37, 0.0  ;;  %v2699_v42 = vmul.f32 %v12524_v28, %v12524_v28  ;;  %v12539_v37 = vpop.xlane.xlu1 %2145 }
 0x39b   : > { %17320 = vst [vmem:[#allocation95_spill] sm:$0xff] %v12513_v59  ;;  %v3557_v47 = vpack.c.bf16 %v12505_v8, %v12513_v59 }
 0x39d   : > { %v12554_v27 = vpop.permute.xlu1 %2815 }
 0x39e   : > { %2187 = vadd.xlane.f32.xlu1 %v2186_v12  ;;  %v3556_v12 = vpack.c.bf16 %v12488_v21, %v12509_v34 }
 0x3af   : > { %2843 = vrot.lane.b32.xlu1 %v2700_v50, %s10901_s22  ;;  %v2094_v50 = vmul.f32 %v12505_v8, %v12505_v8  ;;  %v12559_v8 = vpop.xlane.xlu1 %2151 }
 0x3b3   : > { %3629 = vrot.lane.b32.xlu1 %v3557_v47, %s10902_s23  ;;  %v2192_v47 = vsel %vm702_vm0, %v2094_v50, 0.0  ;;  %v12562_v29 = vpop.permute.xlu1 %2819 }
 0x3b8   : > { %2184 = vadd.xlane.f32.xlu0 %v2183_v48  ;;  %v2702_v48 = vmul.f32 %v12537_v52, %v12537_v52  ;;  %v12611_v52 = vpop.xlane.xlu0 %2142 }
 0x3ce   : > { %2841 = vrot.lane.b32.xlu0 %v2699_v42, %s10901_s22  ;;  %v12545_v42 = vadd.f32 %v12142_v17, %v11998_v38 }
 0x3d0   : > { %17323 = vst [vmem:[#allocation98_spill] sm:$0xff] %v12545_v42 }
 0x3d2   : > { %3627 = vrot.lane.b32.xlu0 %v3556_v12, %s10902_s23  ;;  %v12549_v12 = vadd.f32 %v12138_v31, %v11998_v38  ;;  %v12564_v31 = vpop.xlane.xlu1 %2157 }
 0x3d4   : > { %17324 = vst [vmem:[#allocation99_spill] sm:$0xff] %v12549_v12  ;;  %v3558_v50 = vpack.c.bf16 %v12545_v42, %v12549_v12  ;;  %v2095_v54 = vmul.f32 %v12549_v12, %v12549_v12 }
 0x3d7   : > { %2193 = vadd.xlane.f32.xlu1 %v2192_v47  ;;  %v2093_v47 = vmul.f32 %v12513_v59, %v12513_v59 }
 0x3d9   : > { %v2189_v17 = vsel %vm702_vm0, %v2093_v47, 0.0  ;;  %v2096_v47 = vmul.f32 %v12545_v42, %v12545_v42  ;;  %v12598_v42 = vadd.f32 %v12157_v7, %v11998_v38  ;;  %v2195_v7 = vsel %vm702_vm0, %v2095_v54, 0.0 }
 0x3da   : > { %v12629_v54 = vadd.f32 %v12140_v25, %v12032_v2 }
 0x3db   : > { %v2198_v34 = vsel %vm702_vm0, %v2096_v47, 0.0  ;;  %17327 = vst [vmem:[#allocation102_spill] sm:$0xff] %v12598_v42 }
 0x3dc   : > { %17331 = vst [vmem:[#allocation106_spill] sm:$0xff] %v12629_v54 }
 0x3e8   : > { %2847 = vrot.lane.b32.xlu1 %v2702_v48, %s10901_s22  ;;  %v12566_v48 = vpop.permute.xlu1 %2823 }
 0x3ec   : > { %3631 = vrot.lane.b32.xlu1 %v3558_v50, %s10902_s23  ;;  %v12572_v21 = vpop.xlane.xlu1 %2163  ;;  %v2701_v50 = vmul.f32 %v12570_v3, %v12570_v3 }
 0x3f0   : > { %v12577_v59 = vpop.permute.xlu1 %2827 }
 0x3f1   : > { %2190 = vadd.xlane.f32.xlu0 %v2189_v17 }
 0x3f4   : > { %v12581_v17 = vpop.xlane.xlu1 %2169 }
 0x3f8   : > { %v12584_v14 = vpop.permute.xlu1 %2831 }
 0x3fc   : > { %v12586_v1 = vpop.xlane.xlu1 %2175 }
 0x400   : > { %v12592_v18 = vpop.permute.xlu1 %2835 }
 0x404   : > { %v12604_v47 = vpop.xlane.xlu1 %2181 }
 0x407   : > { %2845 = vrot.lane.b32.xlu0 %v2701_v50, %s10901_s22  ;;  %v2704_v50 = vmul.f32 %v12590_v57, %v12590_v57 }
 0x408   : > { %v12615_v57 = vpop.permute.xlu1 %2839 }
 0x409   : > { %17329 = vst [vmem:[#allocation104_spill] sm:$0xff] %v12615_v57 }
 0x410   : > { %2199 = vadd.xlane.f32.xlu1 %v2198_v34  ;;  %v12602_v34 = vadd.f32 %v12153_v19, %v11998_v38  ;;  %v12617_v19 = vpop.permute.xlu0 %2813 }
 0x412   : > { %17328 = vst [vmem:[#allocation103_spill] sm:$0xff] %v12602_v34  ;;  %v3559_v40 = vpack.c.bf16 %v12598_v42, %v12602_v34  ;;  %v2097_v25 = vmul.f32 %v12602_v34, %v12602_v34 }
 0x421   : > { %2851 = vrot.lane.b32.xlu1 %v2704_v50, %s10901_s22  ;;  %v3614_v50 = vpop.permute.xlu0 %3613 }
 0x422   : > { %v3679_v12 = vsel %vm702_vm0, %v3614_v50, 1065369472  ;;  %v2098_v50 = vmul.f32 %v12598_v42, %v12598_v42 }
 0x424   : > { %v2204_v57 = vsel %vm702_vm0, %v2098_v50, 0.0 }
 0x425   : > { %3633 = vrot.lane.b32.xlu1 %v3559_v40, %s10902_s23  ;;  %v3744_v40 = vsel %vm3742_vm1, %v3679_v12, 0  ;;  %v12647_v12 = vadd.f32 %v12171_v11, %v11998_v38 }
 0x426   : > { %2196 = vadd.xlane.f32.xlu0 %v2195_v7  ;;  %v2703_v7 = vmul.f32 %v12629_v54, %v12629_v54 }
 0x427   : > { %17333 = vst [vmem:[#allocation108_spill] sm:$0xff] %v12647_v12 }
 0x42b   : > { %v12619_v3 = vpop.xlane.xlu1 %2187 }
 0x42f   : > { %v12621_v33 = vpop.permute.xlu1 %2843 }
 0x430   : > { %17330 = vst [vmem:[#allocation105_spill] sm:$0xff] %v12621_v33 }
 0x433   : > { %v3630_v10 = vpop.permute.xlu1 %3629 }
 0x434   : > { %v3695_v23 = vsel %vm702_vm0, %v3630_v10, 1065369472  ;;  %v12639_v10 = vadd.f32 %v12161_v0, %v12032_v2 }
 0x435   : > { %10036 = vmatprep.subr.msk.bf16.mxu0 %vm3742_vm1, %v3695_v23 }
 0x436   : > { %9547 = vmatpush3.bf16.msra.mxu0 %v3744_v40  ;;  %17332 = vst [vmem:[#allocation107_spill] sm:$0xff] %v12639_v10  ;;  %v2706_v23 = vmul.f32 %v12639_v10, %v12639_v10  ;;  %v12651_v40 = vadd.f32 %v12166_v4, %v11998_v38  ;;  %v12668_v4 = vadd.f32 %v12155_v39, %v12032_v2 }
 0x438   : > { %17334 = vst [vmem:[#allocation109_spill] sm:$0xff] %v12651_v40  ;;  %v3560_v0 = vpack.c.bf16 %v12647_v12, %v12651_v40  ;;  %17336 = vst [vmem:[#allocation111_spill] sm:$0xff] %v12668_v4 }
 0x43c   : > { %2849 = vrot.lane.b32.xlu0 %v2703_v7, %s10901_s22  ;;  %v12657_v7 = vpop.xlane.xlu0 %2148 }
 0x440   : > { %v12660_v50 = vpop.permute.xlu0 %2817 }
 0x444   : > { %v3616_v42 = vpop.permute.xlu0 %3615 }
 0x449   : > { %2205 = vadd.xlane.f32.xlu1 %v2204_v57  ;;  %v2201_v57 = vsel %vm702_vm0, %v2097_v25, 0.0  ;;  %v3681_v25 = vsel %vm702_vm0, %v3616_v42, 1065369472  ;;  %v2099_v42 = vmul.f32 %v12651_v40, %v12651_v40 }
 0x44a   : > { %v3746_v33 = vsel %vm3742_vm1, %v3681_v25, 0  ;;  %v12684_v25 = vadd.f32 %v12173_v36, %v12032_v2 }
 0x44c   : > { %17337 = vst [vmem:[#allocation112_spill] sm:$0xff] %v12684_v25 }
 0x45a   : > { %2855 = vrot.lane.b32.xlu1 %v2706_v23, %s10901_s22 }
 0x45b   : > { %2202 = vadd.xlane.f32.xlu0 %v2201_v57 }
 0x45e   : > { %3635 = vrot.lane.b32.xlu1 %v3560_v0, %s10902_s23  ;;  %v2705_v0 = vmul.f32 %v12668_v4, %v12668_v4 }
 0x464   : > { %v12662_v11 = vpop.xlane.xlu1 %2193 }
 0x468   : > { %v12664_v34 = vpop.permute.xlu1 %2847 }
 0x469   : > { %17335 = vst [vmem:[#allocation110_spill] sm:$0xff] %v12664_v34  ;;  %v2100_v34 = vmul.f32 %v12647_v12, %v12647_v12 }
 0x46b   : > { %v2210_v39 = vsel %vm702_vm0, %v2100_v34, 0.0  ;;  %v12695_v34 = vadd.f32 %v12175_v61, %v11998_v38 }
 0x46c   : > { %v3632_v23 = vpop.permute.xlu1 %3631 }
 0x46d   : > { %v3697_v57 = vsel %vm702_vm0, %v3632_v23, 1065369472  ;;  %v2207_v23 = vsel %vm702_vm0, %v2099_v42, 0.0  ;;  %17339 = vst [vmem:[#allocation114_spill] sm:$0xff] %v12695_v34 }
 0x46e   : > { %10037 = vmatprep.subr.msk.bf16.mxu0 %vm3742_vm1, %v3697_v57  ;;  %v12691_v57 = vadd.f32 %v12179_v24, %v11998_v38  ;;  %v12709_v24 = vadd.f32 %v12168_v44, %v12032_v2 }
 0x46f   : > { %9549 = vmatpush3.bf16.msra.mxu0 %v3746_v33  ;;  %v2708_v33 = vmul.f32 %v12684_v25, %v12684_v25 }
 0x470   : > { %17338 = vst [vmem:[#allocation113_spill] sm:$0xff] %v12691_v57  ;;  %v3561_v36 = vpack.c.bf16 %v12691_v57, %v12695_v34  ;;  %17340 = vst [vmem:[#allocation115_spill] sm:$0xff] %v12709_v24  ;;  %v2102_v44 = vmul.f32 %v12691_v57, %v12691_v57 }
 0x471   : > { %2853 = vrot.lane.b32.xlu0 %v2705_v0, %s10901_s22  ;;  %v12700_v0 = vpop.xlane.xlu0 %2154 }
 0x482   : > { %2211 = vadd.xlane.f32.xlu1 %v2210_v39  ;;  %v12703_v39 = vpop.permute.xlu0 %2821 }
 0x490   : > { %2208 = vadd.xlane.f32.xlu0 %v2207_v23  ;;  %v3618_v23 = vpop.permute.xlu0 %3617 }
 0x491   : > { %v3683_v12 = vsel %vm702_vm0, %v3618_v23, 1065369472 }
 0x493   : > { %2859 = vrot.lane.b32.xlu1 %v2708_v33, %s10901_s22  ;;  %v2707_v33 = vmul.f32 %v12709_v24, %v12709_v24  ;;  %v2101_v24 = vmul.f32 %v12695_v34, %v12695_v34 }
 0x495   : > { %v2213_v23 = vsel %vm702_vm0, %v2101_v24, 0.0 }
 0x497   : > { %3637 = vrot.lane.b32.xlu1 %v3561_v36, %s10902_s23  ;;  %v3748_v36 = vsel %vm3742_vm1, %v3683_v12, 0 }
 0x49d   : > { %v12705_v42 = vpop.xlane.xlu1 %2199 }
 0x4a1   : > { %v12711_v61 = vpop.permute.xlu1 %2851 }
 0x4a2   : > { %17341 = vst [vmem:[#allocation116_spill] sm:$0xff] %v12711_v61  ;;  %v2216_v61 = vsel %vm702_vm0, %v2102_v44, 0.0 }
 0x4a5   : > { %v3634_v40 = vpop.permute.xlu1 %3633 }
 0x4a6   : > { %v3699_v25 = vsel %vm702_vm0, %v3634_v40, 1065369472  ;;  %2857 = vrot.lane.b32.xlu0 %v2707_v33, %s10901_s22  ;;  %v12728_v40 = vadd.f32 %v12181_v60, %v12032_v2  ;;  %v12743_v33 = vpop.xlane.xlu0 %2160 }
 0x4a7   : > { %10038 = vmatprep.subr.msk.bf16.mxu0 %vm3742_vm1, %v3699_v25  ;;  %v12734_v25 = vadd.f32 %v12191_v9, %v11998_v38 }
 0x4a8   : > { %9551 = vmatpush3.bf16.msra.mxu0 %v3748_v36  ;;  %17342 = vst [vmem:[#allocation117_spill] sm:$0xff] %v12728_v40  ;;  %v2710_v12 = vmul.f32 %v12728_v40, %v12728_v40  ;;  %v12750_v36 = vadd.f32 %v12177_v32, %v12032_v2 }
 0x4a9   : > { %17343 = vst [vmem:[#allocation118_spill] sm:$0xff] %v12734_v25  ;;  %v2104_v32 = vmul.f32 %v12734_v25, %v12734_v25 }
 0x4aa   : > { %v12746_v60 = vpop.permute.xlu0 %2825  ;;  %17345 = vst [vmem:[#allocation120_spill] sm:$0xff] %v12750_v36 }
 0x4ab   : > { %v2222_v40 = vsel %vm702_vm0, %v2104_v32, 0.0 }
 0x4ae   : > { %v3620_v44 = vpop.permute.xlu0 %3619 }
 0x4bb   : > { %2217 = vadd.xlane.f32.xlu1 %v2216_v61  ;;  %v12738_v61 = vadd.f32 %v12183_v5, %v11998_v38  ;;  %v2709_v5 = vmul.f32 %v12750_v36, %v12750_v36 }
 0x4bd   : > { %17344 = vst [vmem:[#allocation119_spill] sm:$0xff] %v12738_v61  ;;  %v3562_v24 = vpack.c.bf16 %v12734_v25, %v12738_v61 }
 0x4c5   : > { %2214 = vadd.xlane.f32.xlu0 %v2213_v23 }
 0x4cc   : > { %2863 = vrot.lane.b32.xlu1 %v2710_v12, %s10901_s22  ;;  %v3685_v12 = vsel %vm702_vm0, %v3620_v44, 1065369472 }
 0x4cd   : > { %v3750_v34 = vsel %vm3742_vm1, %v3685_v12, 0  ;;  %v12786_v12 = vpop.xlane.xlu0 %2166 }
 0x4d0   : > { %3639 = vrot.lane.b32.xlu1 %v3562_v24, %s10902_s23 }
 0x4d6   : > { %v12752_v9 = vpop.xlane.xlu1 %2205 }
 0x4da   : > { %v12756_v23 = vpop.permute.xlu1 %2855 }
 0x4db   : > { %17346 = vst [vmem:[#allocation121_spill] sm:$0xff] %v12756_v23  ;;  %2861 = vrot.lane.b32.xlu0 %v2709_v5, %s10901_s22  ;;  %v2103_v23 = vmul.f32 %v12738_v61, %v12738_v61 }
 0x4dd   : > { %v2219_v5 = vsel %vm702_vm0, %v2103_v23, 0.0 }
 0x4de   : > { %v3636_v57 = vpop.permute.xlu1 %3635 }
 0x4df   : > { %v3701_v24 = vsel %vm702_vm0, %v3636_v57, 1065369472  ;;  %v12771_v57 = vadd.f32 %v12193_v46, %v12032_v2  ;;  %v12791_v46 = vadd.f32 %v12189_v55, %v12032_v2 }
 0x4e0   : > { %10039 = vmatprep.subr.msk.bf16.mxu0 %vm3742_vm1, %v3701_v24  ;;  %v12793_v24 = vpop.permute.xlu0 %2829 }
 0x4e1   : > { %9553 = vmatpush3.bf16.msra.mxu0 %v3750_v34  ;;  %17347 = vst [vmem:[#allocation122_spill] sm:$0xff] %v12771_v57  ;;  %v2712_v44 = vmul.f32 %v12771_v57, %v12771_v57  ;;  %v12777_v34 = vadd.f32 %v12206_v22, %v11998_v38  ;;  %17350 = vst [vmem:[#allocation125_spill] sm:$0xff] %v12791_v46  ;;  %v2711_v22 = vmul.f32 %v12791_v46, %v12791_v46 }
 0x4e3   : > { %17348 = vst [vmem:[#allocation123_spill] sm:$0xff] %v12777_v34  ;;  %v2106_v61 = vmul.f32 %v12777_v34, %v12777_v34 }
 0x4e4   : > { %v3622_v32 = vpop.permute.xlu0 %3621 }
 0x4f4   : > { %2223 = vadd.xlane.f32.xlu1 %v2222_v40  ;;  %v12781_v40 = vadd.f32 %v12201_v43, %v11998_v38 }
 0x4f6   : > { %17349 = vst [vmem:[#allocation124_spill] sm:$0xff] %v12781_v40  ;;  %v3563_v23 = vpack.c.bf16 %v12777_v34, %v12781_v40  ;;  %v2105_v57 = vmul.f32 %v12781_v40, %v12781_v40  ;;  %v3008_v40 = vsel %vm702_vm0, %v12554_v27, 0.0  ;;  %v17358_v27 = vld [vmem:[#allocation14_spill] sm:$0xff] }
 0x4fa   : > { %2220 = vadd.xlane.f32.xlu0 %v2219_v5 }
 0x505   : > { %2867 = vrot.lane.b32.xlu1 %v2712_v44, %s10901_s22  ;;  %v3687_v44 = vsel %vm702_vm0, %v3622_v32, 1065369472 }
 0x506   : > { %v3752_v55 = vsel %vm3742_vm1, %v3687_v44, 0  ;;  %v12821_v44 = vadd.f32 %v12203_v20, %v12032_v2 }
 0x508   : > { %17353 = vst [vmem:[#allocation128_spill] sm:$0xff] %v12821_v44 }
 0x509   : > { %3641 = vrot.lane.b32.xlu1 %v3563_v23, %s10902_s23 }
 0x50f   : > { %v12797_v43 = vpop.xlane.xlu1 %2211 }
 0x510   : > { %2865 = vrot.lane.b32.xlu0 %v2711_v22, %s10901_s22  ;;  %v2228_v22 = vsel %vm702_vm0, %v2106_v61, 0.0  ;;  %v2713_v61 = vmul.f32 %v12821_v44, %v12821_v44 }
 0x513   : > { %v12800_v5 = vpop.permute.xlu1 %2859 }
 0x514   : > { %17351 = vst [vmem:[#allocation126_spill] sm:$0xff] %v12800_v5  ;;  %v2225_v5 = vsel %vm702_vm0, %v2105_v57, 0.0 }
 0x517   : > { %v3638_v25 = vpop.permute.xlu1 %3637 }
 0x518   : > { %v3703_v23 = vsel %vm702_vm0, %v3638_v25, 1065369472  ;;  %v12814_v25 = vadd.f32 %v12208_v45, %v12032_v2 }
 0x519   : > { %10040 = vmatprep.subr.msk.bf16.mxu0 %vm3742_vm1, %v3703_v23  ;;  %v12823_v23 = vpop.xlane.xlu0 %2172 }
 0x51a   : > { %9555 = vmatpush3.bf16.msra.mxu0 %v3752_v55  ;;  %17352 = vst [vmem:[#allocation127_spill] sm:$0xff] %v12814_v25  ;;  %v2714_v32 = vmul.f32 %v12814_v25, %v12814_v25 }
 0x51d   : > { %v12828_v57 = vpop.permute.xlu0 %2833 }
 0x52d   : > { %2229 = vadd.xlane.f32.xlu1 %v2228_v22 }
 0x52f   : > { %2226 = vadd.xlane.f32.xlu0 %v2225_v5  ;;  %v3624_v5 = vpop.permute.xlu0 %3623 }
 0x530   : > { %v3689_v22 = vsel %vm702_vm0, %v3624_v5, 1065369472 }
 0x531   : > { %v3754_v34 = vsel %vm3742_vm1, %v3689_v22, 0 }
 0x53e   : > { %2871 = vrot.lane.b32.xlu1 %v2714_v32, %s10901_s22 }
 0x545   : > { %2869 = vrot.lane.b32.xlu0 %v2713_v61, %s10901_s22  ;;  %v12840_v61 = vadd.f32 %v12213_v51, %v11998_v38 }
 0x547   : > { %17355 = vst [vmem:[#allocation130_spill] sm:$0xff] %v12840_v61  ;;  %v2107_v5 = vmul.f32 %v12840_v61, %v12840_v61 }
 0x548   : > { %v12830_v45 = vpop.xlane.xlu1 %2217 }
 0x549   : > { %v2231_v22 = vsel %vm702_vm0, %v2107_v5, 0.0 }
 0x54c   : > { %v12832_v55 = vpop.permute.xlu1 %2863 }
 0x54d   : > { %17354 = vst [vmem:[#allocation129_spill] sm:$0xff] %v12832_v55  ;;  %v3005_v55 = vsel %vm702_vm0, %v12617_v19, 0.0  ;;  %v12860_v19 = vpop.xlane.xlu0 %2178 }
 0x550   : > { %v3640_v32 = vpop.permute.xlu1 %3639 }
 0x551   : > { %v3705_v20 = vsel %vm702_vm0, %v3640_v32, 1065369472 }
 0x552   : > { %10041 = vmatprep.subr.msk.bf16.mxu0 %vm3742_vm1, %v3705_v20  ;;  %v12865_v20 = vpop.permute.xlu0 %2837 }
 0x553   : > { %9557 = vmatpush3.bf16.msra.mxu0 %v3754_v34  ;;  %v17356_v34 = vld [vmem:[#allocation13_spill] sm:$0xff]  ;;  %17360 = vst [vmem:[#allocation131_spill] sm:$0xff] %v12865_v20 }
 0x554   : > { %v12851_v32 = vadd.f32 %v17356_v34, %v11998_v38 }
 0x556   : > { %17357 = vst [vmem:[#allocation13_spill] sm:$0xff] %v12851_v32  ;;  %v3564_v51 = vpack.c.bf16 %v12851_v32, %v12840_v61 }
 0x562   : > { %3009 = vadd.xlane.f32.xlu1 %v3008_v40  ;;  %v12858_v40 = vadd.f32 %v17358_v27, %v12032_v2 }
 0x564   : > { %3006 = vadd.xlane.f32.xlu0 %v3005_v55  ;;  %17359 = vst [vmem:[#allocation14_spill] sm:$0xff] %v12858_v40  ;;  %v2715_v55 = vmul.f32 %v12858_v40, %v12858_v40  ;;  %v17362_v40 = vld [vmem:[#allocation17_spill] sm:$0xff] }
 0x565   : > { %v12880_v44 = vadd.f32 %v17362_v40, %v11998_v38 }
 0x567   : > { %17363 = vst [vmem:[#allocation17_spill] sm:$0xff] %v12880_v44 }
 0x568   : > { %2232 = vadd.xlane.f32.xlu0 %v2231_v22  ;;  %v3626_v22 = vpop.permute.xlu0 %3625 }
 0x573   : > { %3643 = vrot.lane.b32.xlu1 %v3564_v51, %s10902_s23  ;;  %v3691_v51 = vsel %vm702_vm0, %v3626_v22, 1065369472  ;;  %v3011_v22 = vsel %vm702_vm0, %v12660_v50, 0.0  ;;  %v12897_v50 = vadd.f32 %v12231_v49, %v11998_v38 }
 0x574   : > { %v3756_v25 = vsel %vm3742_vm1, %v3691_v51, 0  ;;  %v17364_v51 = vld [vmem:[#allocation16_spill] sm:$0xff] }
 0x575   : > { %17366 = vst [vmem:[#allocation133_spill] sm:$0xff] %v12897_v50  ;;  %v2110_v49 = vmul.f32 %v12897_v50, %v12897_v50 }
 0x57e   : > { %2873 = vrot.lane.b32.xlu0 %v2715_v55, %s10901_s22  ;;  %v2108_v55 = vmul.f32 %v12851_v32, %v12851_v32 }
 0x580   : > { %v2234_v20 = vsel %vm702_vm0, %v2108_v55, 0.0  ;;  %v17367_v55 = vld [vmem:[#allocation18_spill] sm:$0xff] }
 0x581   : > { %v12867_v5 = vpop.xlane.xlu1 %2223 }
 0x585   : > { %v12869_v34 = vpop.permute.xlu1 %2867 }
 0x586   : > { %17361 = vst [vmem:[#allocation132_spill] sm:$0xff] %v12869_v34 }
 0x589   : > { %v3642_v61 = vpop.permute.xlu1 %3641 }
 0x58a   : > { %v3707_v27 = vsel %vm702_vm0, %v3642_v61, 1065369472  ;;  %v3014_v61 = vsel %vm702_vm0, %v12562_v29, 0.0  ;;  %v3565_v29 = vpack.c.bf16 %v12897_v50, %v12880_v44 }
 0x58b   : > { %10042 = vmatprep.subr.msk.bf16.mxu0 %vm3742_vm1, %v3707_v27  ;;  %v12890_v27 = vadd.f32 %v17364_v51, %v12032_v2  ;;  %v12915_v51 = vadd.f32 %v12240_v58, %v11998_v38  ;;  %v12929_v58 = vpop.xlane.xlu0 %2184 }
 0x58c   : > { %9559 = vmatpush3.bf16.msra.mxu0 %v3756_v25  ;;  %v2109_v25 = vmul.f32 %v12880_v44, %v12880_v44 }
 0x58d   : > { %17365 = vst [vmem:[#allocation16_spill] sm:$0xff] %v12890_v27  ;;  %v2716_v40 = vmul.f32 %v12890_v27, %v12890_v27  ;;  %17369 = vst [vmem:[#allocation134_spill] sm:$0xff] %v12915_v51 }
 0x597   : > { %2235 = vadd.xlane.f32.xlu1 %v2234_v20  ;;  %v2237_v20 = vsel %vm702_vm0, %v2109_v25, 0.0  ;;  %v2240_v25 = vsel %vm702_vm0, %v2110_v49, 0.0 }
 0x59d   : > { %3012 = vadd.xlane.f32.xlu0 %v3011_v22  ;;  %v12905_v22 = vadd.f32 %v17367_v55, %v12032_v2 }
 0x59f   : > { %17368 = vst [vmem:[#allocation18_spill] sm:$0xff] %v12905_v22 }
 0x5a1   : > { %3015 = vadd.xlane.f32.xlu0 %v3014_v61  ;;  %v2717_v61 = vmul.f32 %v12905_v22, %v12905_v22 }
 0x5a5   : > { %2238 = vadd.xlane.f32.xlu0 %v2237_v20  ;;  %v3017_v20 = vsel %vm702_vm0, %v12703_v39, 0.0  ;;  %v12933_v39 = vpop.permute.xlu0 %2841 }
 0x5a8   : > { %2875 = vrot.lane.b32.xlu1 %v2716_v40, %s10901_s22  ;;  %v2111_v40 = vmul.f32 %v12915_v51, %v12915_v51 }
 0x5a9   : > { %v3628_v44 = vpop.permute.xlu0 %3627 }
 0x5ac   : > { %3645 = vrot.lane.b32.xlu1 %v3565_v29, %s10902_s23  ;;  %v17370_v29 = vld [vmem:[#allocation19_spill] sm:$0xff] }
 0x5ad   : > { %v12923_v55 = vadd.f32 %v17370_v29, %v12032_v2 }
 0x5af   : > { %17371 = vst [vmem:[#allocation19_spill] sm:$0xff] %v12923_v55  ;;  %v2718_v49 = vmul.f32 %v12923_v55, %v12923_v55 }
 0x5bb   : > { %2877 = vrot.lane.b32.xlu0 %v2717_v61, %s10901_s22  ;;  %v2243_v61 = vsel %vm702_vm0, %v2111_v40, 0.0 }
 0x5d0   : > { %2241 = vadd.xlane.f32.xlu1 %v2240_v25  ;;  %v12931_v25 = vpop.xlane.xlu1 %2229 }
 0x5d4   : > { %v12935_v50 = vpop.permute.xlu1 %2871 }
 0x5d5   : > { %17372 = vst [vmem:[#allocation135_spill] sm:$0xff] %v12935_v50  ;;  %v17376_v50 = vld [vmem:[#allocation21_spill] sm:$0xff] }
 0x5da   : > { %3018 = vadd.xlane.f32.xlu0 %v3017_v20  ;;  %v17373_v20 = vld [vmem:[#allocation22_spill] sm:$0xff] }
 0x5db   : > { %v12939_v29 = vadd.f32 %v17373_v20, %v11998_v38  ;;  %v3020_v20 = vsel %vm702_vm0, %v12566_v48, 0.0  ;;  %v3026_v48 = vsel %vm702_vm0, %v12577_v59, 0.0 }
 0x5dd   : > { %17374 = vst [vmem:[#allocation22_spill] sm:$0xff] %v12939_v29 }
 0x5de   : > { %2244 = vadd.xlane.f32.xlu0 %v2243_v61  ;;  %v3566_v61 = vpack.c.bf16 %v12939_v29, %v12915_v51  ;;  %v17421_v51 = vld [vmem:[#allocation56_spill] sm:$0xff] }
 0x5e1   : > { %2879 = vrot.lane.b32.xlu1 %v2718_v49, %s10901_s22  ;;  %v3693_v49 = vsel %vm702_vm0, %v3628_v44, 1065369472  ;;  %v12958_v44 = vadd.f32 %v12253_v53, %v11998_v38  ;;  %v17379_v53 = vld [vmem:[#allocation24_spill] sm:$0xff] }
 0x5e2   : > { %v3758_v55 = vsel %vm3742_vm1, %v3693_v49, 0  ;;  %v17381_v49 = vld [vmem:[#allocation25_spill] sm:$0xff] }
 0x5e3   : > { %17378 = vst [vmem:[#allocation137_spill] sm:$0xff] %v12958_v44 }
 0x5ef   : > { %v12941_v40 = vpop.xlane.xlu1 %3009 }
 0x5f0   : > { %17375 = vst [vmem:[#allocation136_spill] sm:$0xff] %v12941_v40  ;;  %v12954_v40 = vadd.f32 %v17376_v50, %v12032_v2  ;;  %v2113_v50 = vmul.f32 %v12958_v44, %v12958_v44 }
 0x5f2   : > { %17377 = vst [vmem:[#allocation21_spill] sm:$0xff] %v12954_v40 }
 0x5f3   : > { %v3644_v32 = vpop.permute.xlu1 %3643 }
 0x5f4   : > { %v3709_v22 = vsel %vm702_vm0, %v3644_v32, 1065369472  ;;  %3647 = vrot.lane.b32.xlu0 %v3566_v61, %s10902_s23  ;;  %v3023_v32 = vsel %vm702_vm0, %v12746_v60, 0.0  ;;  %v12972_v61 = vadd.f32 %v17379_v53, %v12032_v2  ;;  %v17385_v53 = vld [vmem:[#allocation27_spill] sm:$0xff] }
 0x5f5   : > { %10043 = vmatprep.subr.msk.bf16.mxu0 %vm3742_vm1, %v3709_v22  ;;  %v2719_v22 = vmul.f32 %v12954_v40, %v12954_v40 }
 0x5f6   : > { %9561 = vmatpush3.bf16.msra.mxu0 %v3758_v55  ;;  %v2249_v55 = vsel %vm702_vm0, %v2113_v50, 0.0  ;;  %17380 = vst [vmem:[#allocation24_spill] sm:$0xff] %v12972_v61  ;;  %v2721_v60 = vmul.f32 %v12972_v61, %v12972_v61 }
 0x605   : > { %3021 = vadd.xlane.f32.xlu1 %v3020_v20  ;;  %v12978_v20 = vadd.f32 %v17381_v49, %v11998_v38  ;;  %v3029_v49 = vsel %vm702_vm0, %v12793_v24, 0.0 }
 0x607   : > { %17382 = vst [vmem:[#allocation25_spill] sm:$0xff] %v12978_v20  ;;  %v3567_v59 = vpack.c.bf16 %v12978_v20, %v12958_v44 }
 0x613   : > { %3024 = vadd.xlane.f32.xlu0 %v3023_v32  ;;  %v2112_v32 = vmul.f32 %v12939_v29, %v12939_v29 }
 0x616   : > { %2881 = vrot.lane.b32.xlu1 %v2719_v22, %s10901_s22  ;;  %v2246_v22 = vsel %vm702_vm0, %v2112_v32, 0.0 }
 0x617   : > { %3027 = vadd.xlane.f32.xlu0 %v3026_v48  ;;  %v17383_v48 = vld [vmem:[#allocation23_spill] sm:$0xff] }
 0x618   : > { %v12989_v50 = vadd.f32 %v17383_v48, %v12032_v2 }
 0x61a   : > { %17384 = vst [vmem:[#allocation23_spill] sm:$0xff] %v12989_v50 }
 0x61b   : > { %2250 = vadd.xlane.f32.xlu0 %v2249_v55  ;;  %v2720_v55 = vmul.f32 %v12989_v50, %v12989_v50 }
 0x631   : > { %2885 = vrot.lane.b32.xlu0 %v2721_v60, %s10901_s22  ;;  %v12996_v60 = vadd.f32 %v17385_v53, %v11998_v38 }
 0x633   : > { %17386 = vst [vmem:[#allocation27_spill] sm:$0xff] %v12996_v60 }
 0x635   : > { %3649 = vrot.lane.b32.xlu0 %v3567_v59, %s10902_s23  ;;  %v2115_v59 = vmul.f32 %v12996_v60, %v12996_v60 }
 0x637   : > { %v2255_v32 = vsel %vm702_vm0, %v2115_v59, 0.0 }
 0x63a   : > { %2247 = vadd.xlane.f32.xlu1 %v2246_v22  ;;  %v17387_v22 = vld [vmem:[#allocation29_spill] sm:$0xff] }
 0x63b   : > { %v13005_v48 = vadd.f32 %v17387_v22, %v11998_v38 }
 0x63d   : > { %17388 = vst [vmem:[#allocation29_spill] sm:$0xff] %v13005_v48  ;;  %v3568_v53 = vpack.c.bf16 %v13005_v48, %v12996_v60 }
 0x64b   : > { %2883 = vrot.lane.b32.xlu1 %v2720_v55, %s10901_s22  ;;  %v2114_v55 = vmul.f32 %v12978_v20, %v12978_v20  ;;  %v3035_v20 = vsel %vm702_vm0, %v12828_v57, 0.0 }
 0x64d   : > { %v2252_v24 = vsel %vm702_vm0, %v2114_v55, 0.0  ;;  %v3038_v55 = vsel %vm702_vm0, %v12592_v18, 0.0  ;;  %v17395_v18 = vld [vmem:[#allocation34_spill] sm:$0xff] }
 0x654   : > { %3030 = vadd.xlane.f32.xlu0 %v3029_v49  ;;  %v17389_v49 = vld [vmem:[#allocation26_spill] sm:$0xff] }
 0x655   : > { %v13015_v29 = vadd.f32 %v17389_v49, %v12032_v2  ;;  %v3032_v49 = vsel %vm702_vm0, %v12584_v14, 0.0 }
 0x657   : > { %17390 = vst [vmem:[#allocation26_spill] sm:$0xff] %v13015_v29  ;;  %v2722_v59 = vmul.f32 %v13015_v29, %v13015_v29 }
 0x658   : > { %2256 = vadd.xlane.f32.xlu0 %v2255_v32  ;;  %v17391_v32 = vld [vmem:[#allocation32_spill] sm:$0xff] }
 0x659   : > { %v13022_v22 = vadd.f32 %v17391_v32, %v11998_v38 }
 0x65b   : > { %17392 = vst [vmem:[#allocation32_spill] sm:$0xff] %v13022_v22 }
 0x66e   : > { %3651 = vrot.lane.b32.xlu0 %v3568_v53, %s10902_s23  ;;  %v2117_v53 = vmul.f32 %v13022_v22, %v13022_v22 }
 0x66f   : > { %2253 = vadd.xlane.f32.xlu1 %v2252_v24 }
 0x670   : > { %v2261_v24 = vsel %vm702_vm0, %v2117_v53, 0.0  ;;  %v17397_v53 = vld [vmem:[#allocation28_spill] sm:$0xff] }
 0x671   : > { %v13048_v14 = vadd.f32 %v17397_v53, %v12032_v2  ;;  %v17400_v53 = vld [vmem:[#allocation38_spill] sm:$0xff] }
 0x672   : > { %v13066_v60 = vadd.f32 %v17400_v53, %v11998_v38 }
 0x673   : > { %17398 = vst [vmem:[#allocation28_spill] sm:$0xff] %v13048_v14 }
 0x674   : > { %17401 = vst [vmem:[#allocation38_spill] sm:$0xff] %v13066_v60 }
 0x680   : > { %2887 = vrot.lane.b32.xlu1 %v2722_v59, %s10901_s22  ;;  %v17393_v59 = vld [vmem:[#allocation33_spill] sm:$0xff] }
 0x681   : > { %v13035_v32 = vadd.f32 %v17393_v59, %v12032_v2 }
 0x683   : > { %17394 = vst [vmem:[#allocation33_spill] sm:$0xff] %v13035_v32  ;;  %v2725_v57 = vmul.f32 %v13035_v32, %v13035_v32 }
 0x68d   : > { %3036 = vadd.xlane.f32.xlu0 %v3035_v20  ;;  %v13041_v20 = vadd.f32 %v17395_v18, %v11998_v38  ;;  %v2116_v18 = vmul.f32 %v13005_v48, %v13005_v48 }
 0x68f   : > { %17396 = vst [vmem:[#allocation34_spill] sm:$0xff] %v13041_v20 }
 0x691   : > { %3039 = vadd.xlane.f32.xlu0 %v3038_v55  ;;  %v3569_v55 = vpack.c.bf16 %v13041_v20, %v13022_v22 }
 0x695   : > { %2262 = vadd.xlane.f32.xlu0 %v2261_v24  ;;  %v2723_v24 = vmul.f32 %v13048_v14, %v13048_v14 }
 0x6a4   : > { %3033 = vadd.xlane.f32.xlu1 %v3032_v49  ;;  %v13056_v49 = vadd.f32 %v12289_v56, %v11998_v38 }
 0x6a6   : > { %17399 = vst [vmem:[#allocation138_spill] sm:$0xff] %v13056_v49  ;;  %v2119_v59 = vmul.f32 %v13056_v49, %v13056_v49  ;;  %v3570_v56 = vpack.c.bf16 %v13066_v60, %v13056_v49  ;;  %v17406_v49 = vld [vmem:[#allocation43_spill] sm:$0xff] }
 0x6a7   : > { %v13090_v48 = vadd.f32 %v17406_v49, %v11998_v38 }
 0x6a9   : > { %17407 = vst [vmem:[#allocation43_spill] sm:$0xff] %v13090_v48 }
 0x6ab   : > { %2893 = vrot.lane.b32.xlu0 %v2725_v57, %s10901_s22  ;;  %v2267_v57 = vsel %vm702_vm0, %v2119_v59, 0.0 }
 0x6af   : > { %3653 = vrot.lane.b32.xlu0 %v3569_v55, %s10902_s23  ;;  %v2258_v55 = vsel %vm702_vm0, %v2116_v18, 0.0 }
 0x6b5   : > { %2889 = vrot.lane.b32.xlu1 %v2723_v24, %s10901_s22  ;;  %v17402_v24 = vld [vmem:[#allocation30_spill] sm:$0xff] }
 0x6b6   : > { %v13072_v22 = vadd.f32 %v17402_v24, %v12032_v2  ;;  %v2118_v24 = vmul.f32 %v13041_v20, %v13041_v20  ;;  %v13121_v20 = vadd.f32 %v12319_v63, %v11998_v38 }
 0x6b8   : > { %17403 = vst [vmem:[#allocation30_spill] sm:$0xff] %v13072_v22  ;;  %v2724_v59 = vmul.f32 %v13072_v22, %v13072_v22  ;;  %17413 = vst [vmem:[#allocation140_spill] sm:$0xff] %v13121_v20 }
 0x6ce   : > { %2268 = vadd.xlane.f32.xlu0 %v2267_v57  ;;  %v17404_v57 = vld [vmem:[#allocation40_spill] sm:$0xff] }
 0x6cf   : > { %v13080_v18 = vadd.f32 %v17404_v57, %v11998_v38  ;;  %v17408_v57 = vld [vmem:[#allocation35_spill] sm:$0xff] }
 0x6d0   : > { %v13096_v44 = vadd.f32 %v17408_v57, %v12032_v2 }
 0x6d1   : > { %17405 = vst [vmem:[#allocation40_spill] sm:$0xff] %v13080_v18 }
 0x6d2   : > { %17409 = vst [vmem:[#allocation35_spill] sm:$0xff] %v13096_v44 }
 0x6d9   : > { %2259 = vadd.xlane.f32.xlu1 %v2258_v55  ;;  %v2121_v55 = vmul.f32 %v13080_v18, %v13080_v18 }
 0x6db   : > { %v2273_v53 = vsel %vm702_vm0, %v2121_v55, 0.0  ;;  %v2726_v55 = vmul.f32 %v13096_v44, %v13096_v44 }
 0x6e4   : > { %3655 = vrot.lane.b32.xlu0 %v3570_v56, %s10902_s23  ;;  %v2264_v56 = vsel %vm702_vm0, %v2118_v24, 0.0 }
 0x6ea   : > { %2891 = vrot.lane.b32.xlu1 %v2724_v59, %s10901_s22  ;;  %v3571_v59 = vpack.c.bf16 %v13090_v48, %v13080_v18 }
 0x703   : > { %2274 = vadd.xlane.f32.xlu0 %v2273_v53  ;;  %v17410_v53 = vld [vmem:[#allocation37_spill] sm:$0xff] }
 0x704   : > { %v13103_v24 = vadd.f32 %v17410_v53, %v12032_v2  ;;  %v2120_v53 = vmul.f32 %v13066_v60, %v13066_v60 }
 0x706   : > { %17411 = vst [vmem:[#allocation37_spill] sm:$0xff] %v13103_v24  ;;  %v2727_v49 = vmul.f32 %v13103_v24, %v13103_v24 }
 0x70e   : > { %2265 = vadd.xlane.f32.xlu1 %v2264_v56  ;;  %v13111_v56 = vadd.f32 %v12315_v16, %v11998_v38 }
 0x710   : > { %17412 = vst [vmem:[#allocation139_spill] sm:$0xff] %v13111_v56  ;;  %v3572_v16 = vpack.c.bf16 %v13121_v20, %v13111_v56 }
 0x719   : > { %3657 = vrot.lane.b32.xlu0 %v3571_v59, %s10902_s23  ;;  %v2123_v59 = vmul.f32 %v13111_v56, %v13111_v56 }
 0x71b   : > { %v2279_v57 = vsel %vm702_vm0, %v2123_v59, 0.0 }
 0x71f   : > { %2895 = vrot.lane.b32.xlu1 %v2726_v55, %s10901_s22  ;;  %v2270_v55 = vsel %vm702_vm0, %v2120_v53, 0.0 }
 0x723   : > { %2897 = vrot.lane.b32.xlu1 %v2727_v49, %s10901_s22  ;;  %v17414_v49 = vld [vmem:[#allocation39_spill] sm:$0xff] }
 0x724   : > { %v13128_v18 = vadd.f32 %v17414_v49, %v12032_v2  ;;  %v2338_v2 = vmul.f32 0.5, %v12564_v31 }
 0x726   : > { %17415 = vst [vmem:[#allocation39_spill] sm:$0xff] %v13128_v18  ;;  %v2728_v59 = vmul.f32 %v13128_v18, %v13128_v18 }
 0x738   : > { %2280 = vadd.xlane.f32.xlu0 %v2279_v57  ;;  %v13132_v57 = vpop.xlane.xlu0 %2190 }
 0x73c   : > { %v13135_v53 = vpop.permute.xlu0 %2845 }
 0x73d   : > { %17416 = vst [vmem:[#allocation141_spill] sm:$0xff] %v13135_v53 }
 0x740   : > { %v13137_v63 = vpop.xlane.xlu0 %2196 }
 0x744   : > { %v13147_v49 = vpop.permute.xlu0 %2849 }
 0x745   : > { %17420 = vst [vmem:[#allocation143_spill] sm:$0xff] %v13147_v49  ;;  %v2337_v49 = vmul.f32 0.5, %v12700_v0  ;;  %v17435_v0 = vld [vmem:[#allocation15_spill] sm:$0xff] }
 0x747   : > { %2271 = vadd.xlane.f32.xlu1 %v2270_v55  ;;  %v13141_v55 = vadd.f32 %v12323_v26, %v11998_v38 }
 0x748   : > { %v13155_v24 = vpop.xlane.xlu0 %2202 }
 0x749   : > { %17417 = vst [vmem:[#allocation142_spill] sm:$0xff] %v13141_v55  ;;  %v2125_v60 = vmul.f32 %v13141_v55, %v13141_v55 }
 0x74b   : > { %v2285_v18 = vsel %vm702_vm0, %v2125_v60, 0.0 }
 0x74e   : > { %3659 = vrot.lane.b32.xlu0 %v3572_v16, %s10902_s23  ;;  %v17418_v16 = vld [vmem:[#allocation52_spill] sm:$0xff] }
 0x74f   : > { %v13145_v56 = vadd.f32 %v17418_v16, %v11998_v38  ;;  %v17423_v16 = vld [vmem:[#allocation61_spill] sm:$0xff] }
 0x750   : > { %v13162_v32 = vadd.f32 %v17423_v16, %v11998_v38 }
 0x751   : > { %17419 = vst [vmem:[#allocation52_spill] sm:$0xff] %v13145_v56  ;;  %v2127_v26 = vmul.f32 %v13145_v56, %v13145_v56 }
 0x752   : > { %17424 = vst [vmem:[#allocation61_spill] sm:$0xff] %v13162_v32  ;;  %v2131_v60 = vmul.f32 %v13162_v32, %v13162_v32 }
 0x753   : > { %v2291_v44 = vsel %vm702_vm0, %v2127_v26, 0.0 }
 0x754   : > { %v2303_v16 = vsel %vm702_vm0, %v2131_v60, 0.0  ;;  %v2333_v60 = vmul.f32 0.5, %v12611_v52 }
 0x758   : > { %2899 = vrot.lane.b32.xlu1 %v2728_v59, %s10901_s22  ;;  %v13153_v59 = vadd.f32 %v17421_v51, %v11998_v38  ;;  %v13167_v51 = vpop.permute.xlu0 %2853 }
 0x759   : > { %17425 = vst [vmem:[#allocation144_spill] sm:$0xff] %v13167_v51 }
 0x75a   : > { %17422 = vst [vmem:[#allocation56_spill] sm:$0xff] %v13153_v59  ;;  %v2129_v14 = vmul.f32 %v13153_v59, %v13153_v59 }
 0x75c   : > { %v2297_v22 = vsel %vm702_vm0, %v2129_v14, 0.0  ;;  %v13172_v61 = vpop.xlane.xlu0 %2208 }
 0x760   : > { %v13180_v29 = vpop.permute.xlu0 %2857 }
 0x761   : > { %17426 = vst [vmem:[#allocation145_spill] sm:$0xff] %v13180_v29 }
 0x764   : > { %v13183_v40 = vpop.xlane.xlu0 %2214 }
 0x76d   : > { %2286 = vadd.xlane.f32.xlu0 %v2285_v18  ;;  %v2122_v18 = vmul.f32 %v13090_v48, %v13090_v48  ;;  %v2334_v48 = vmul.f32 0.5, %v12539_v37 }
 0x76f   : > { %v2276_v26 = vsel %vm702_vm0, %v2122_v18, 0.0  ;;  %v17428_v18 = vld [vmem:[#allocation6_spill] sm:$0xff] }
 0x770   : > { %v2398_v50 = vsub.f32 %v17428_v18, %v2334_v48  ;;  %v17433_v18 = vld [vmem:[#allocation10_spill] sm:$0xff] }
 0x771   : > { %2292 = vadd.xlane.f32.xlu0 %v2291_v44  ;;  %v2124_v44 = vmul.f32 %v13121_v20, %v13121_v20  ;;  %v17429_v20 = vld [vmem:[#allocation49_spill] sm:$0xff] }
 0x772   : > { %v13194_v34 = vadd.f32 %v17429_v20, %v11998_v38  ;;  %v2463_v51 = vmul.f32 1.442695, %v2398_v50 }
 0x773   : > { %v2282_v14 = vsel %vm702_vm0, %v2124_v44, 0.0  ;;  %v17431_v44 = vld [vmem:[#allocation5_spill] sm:$0xff] }
 0x774   : > { %17430 = vst [vmem:[#allocation49_spill] sm:$0xff] %v13194_v34  ;;  %v2397_v29 = vsub.f32 %v17431_v44, %v2333_v60  ;;  %v3573_v37 = vpack.c.bf16 %v13194_v34, %v13141_v55  ;;  %10251 = vpow2.f32 %v2463_v51  ;;  %v2339_v60 = vmul.f32 0.5, %v12743_v33 }
 0x775   : > { %2298 = vadd.xlane.f32.xlu0 %v2297_v22  ;;  %v13185_v22 = vpop.permute.xlu0 %2861  ;;  %v2342_v33 = vmul.f32 0.5, %v12581_v17 }
 0x776   : > { %17427 = vst [vmem:[#allocation146_spill] sm:$0xff] %v13185_v22  ;;  %v17432_v22 = vld [vmem:[#allocation9_spill] sm:$0xff]  ;;  %v2461_v48 = vmul.f32 1.442695, %v2397_v29  ;;  %v2340_v29 = vmul.f32 0.5, %v12572_v21  ;;  %v2343_v21 = vmul.f32 0.5, %v12823_v23 }
 0x778   : > { %10253 = vpow2.f32 %v2461_v48 }
 0x779   : > { %2304 = vadd.xlane.f32.xlu0 %v2303_v16  ;;  %v13189_v16 = vpop.xlane.xlu0 %2220 }
 0x77c   : > { %2277 = vadd.xlane.f32.xlu1 %v2276_v26  ;;  %v2335_v26 = vmul.f32 0.5, %v12657_v7 }
 0x77d   : > { %v13203_v53 = vpop.permute.xlu0 %2865 }
 0x77e   : > { %v2399_v52 = vsub.f32 %v17432_v22, %v2335_v26  ;;  %v2402_v22 = vsub.f32 %v17435_v0, %v2338_v2 }
 0x780   : > { %2283 = vadd.xlane.f32.xlu1 %v2282_v14  ;;  %v2336_v14 = vmul.f32 0.5, %v12559_v8  ;;  %v2465_v7 = vmul.f32 1.442695, %v2399_v52  ;;  %v17434_v8 = vld [vmem:[#allocation20_spill] sm:$0xff]  ;;  %v2471_v51 = vmul.f32 1.442695, %v2402_v22 }
 0x781   : > { %v2401_v50 = vsub.f32 %v17434_v8, %v2337_v49  ;;  %v13210_v55 = vpop.xlane.xlu0 %2226  ;;  %v17437_v52 = vld [vmem:[#allocation42_spill] sm:$0xff] }
 0x782   : > { %v2400_v20 = vsub.f32 %v17433_v18, %v2336_v14  ;;  %10255 = vpow2.f32 %v2465_v7  ;;  %v17436_v18 = vld [vmem:[#allocation47_spill] sm:$0xff]  ;;  %v2404_v49 = vsub.f32 %v17437_v52, %v2340_v29  ;;  %v2345_v29 = vmul.f32 0.5, %v12860_v19 }
 0x783   : > { %v2469_v14 = vmul.f32 1.442695, %v2401_v50  ;;  %v2403_v31 = vsub.f32 %v17436_v18, %v2339_v60  ;;  %v2406_v50 = vsub.f32 %v12376_v62, %v2342_v33  ;;  %v2351_v62 = vmul.f32 0.5, %v13137_v63  ;;  %v17461_v63 = vld [vmem:[#allocation58_spill] sm:$0xff] }
 0x784   : > { %v2467_v26 = vmul.f32 1.442695, %v2400_v20  ;;  %v10252_v20 = vpop.eup %10251  ;;  %v2475_v7 = vmul.f32 1.442695, %v2404_v49  ;;  %v2409_v18 = vsub.f32 %v12482_v30, %v2345_v29 }
 0x785   : > { %v13218_v8 = vpop.permute.xlu0 %2869  ;;  %v2473_v48 = vmul.f32 1.442695, %v2403_v31  ;;  %v10254_v60 = vpop.eup %10253  ;;  %v2479_v23 = vmul.f32 1.442695, %v2406_v50 }
 0x786   : > { %10257 = vpow2.f32 %v2467_v26  ;;  %v2407_v26 = vsub.f32 %v12451_v6, %v2343_v21  ;;  %v2589_v49 = vmul.f32 0.17677669, %v10254_v60 }
 0x787   : > { %10259 = vpow2.f32 %v2469_v14  ;;  %v2590_v14 = vmul.f32 0.17677669, %v10252_v20 }
 0x788   : > { %10261 = vpow2.f32 %v2471_v51  ;;  %v2346_v51 = vmul.f32 0.5, %v12604_v47  ;;  %v2348_v47 = vmul.f32 0.5, %v12619_v3 }
 0x789   : > { %v13224_v22 = vpop.xlane.xlu0 %3006  ;;  %10263 = vpow2.f32 %v2473_v48  ;;  %v2347_v48 = vmul.f32 0.5, %v12929_v58  ;;  %v2653_v19 = vpack.c.bf16 %v2590_v14, %v2589_v49 }
 0x78a   : > { %10265 = vpow2.f32 %v2475_v7 }
 0x78b   : > { %v2411_v58 = vsub.f32 %v12524_v28, %v2347_v48 }
 0x78c   : > { %v10256_v31 = vpop.eup %10255 }
 0x78d   : > { %v13234_v21 = vpop.xlane.xlu0 %2232  ;;  %v2591_v20 = vmul.f32 0.17677669, %v10256_v31  ;;  %v2412_v31 = vsub.f32 %v12499_v41, %v2348_v47  ;;  %v2489_v49 = vmul.f32 1.442695, %v2411_v58  ;;  %v2126_v47 = vmul.f32 %v13194_v34, %v13194_v34 }
 0x78f   : > { %v2491_v48 = vmul.f32 1.442695, %v2412_v31 }
 0x790   : > { %v10258_v33 = vpop.eup %10257 }
 0x791   : > { %3661 = vrot.lane.b32.xlu1 %v3573_v37, %s10902_s23  ;;  %v2341_v37 = vmul.f32 0.5, %v12786_v12  ;;  %v2344_v12 = vmul.f32 0.5, %v12586_v1  ;;  %v2481_v1 = vmul.f32 1.442695, %v2407_v26  ;;  %v10260_v7 = vpop.eup %10259  ;;  %v2592_v60 = vmul.f32 0.17677669, %v10258_v33 }
 0x792   : > { %v2485_v26 = vmul.f32 1.442695, %v2409_v18  ;;  %v2593_v6 = vmul.f32 0.17677669, %v10260_v7 }
 0x793   : > { %v2405_v2 = vsub.f32 %v12404_v13, %v2341_v37  ;;  %v2408_v37 = vsub.f32 %v12441_v35, %v2344_v12  ;;  %v2410_v12 = vsub.f32 %v12468_v15, %v2346_v51  ;;  %v2654_v29 = vpack.c.bf16 %v2592_v60, %v2591_v20 }
 0x795   : > { %v2477_v17 = vmul.f32 1.442695, %v2405_v2  ;;  %v13232_v2 = vpop.xlane.xlu1 %2235  ;;  %v2483_v50 = vmul.f32 1.442695, %v2408_v37  ;;  %v2487_v14 = vmul.f32 1.442695, %v2410_v12  ;;  %v13242_v37 = vpop.permute.xlu0 %2873 }
 0x797   : > { %10267 = vpow2.f32 %v2477_v17  ;;  %v10262_v17 = vpop.eup %10261 }
 0x798   : > { %10269 = vpow2.f32 %v2479_v23  ;;  %v10264_v35 = vpop.eup %10263  ;;  %v2594_v3 = vmul.f32 0.17677669, %v10262_v17 }
 0x799   : > { %10271 = vpow2.f32 %v2481_v1  ;;  %v13240_v23 = vpop.permute.xlu1 %2875  ;;  %v10266_v51 = vpop.eup %10265  ;;  %v2595_v18 = vmul.f32 0.17677669, %v10264_v35 }
 0x79a   : > { %10273 = vpow2.f32 %v2483_v50  ;;  %v2655_v33 = vpack.c.bf16 %v2594_v3, %v2593_v6  ;;  %v2596_v20 = vmul.f32 0.17677669, %v10266_v51 }
 0x79b   : > { %10275 = vpow2.f32 %v2485_v26 }
 0x79c   : > { %10277 = vpow2.f32 %v2487_v14  ;;  %v2656_v12 = vpack.c.bf16 %v2596_v20, %v2595_v18 }
 0x79d   : > { %10279 = vpow2.f32 %v2489_v49  ;;  %v13246_v50 = vpop.permute.xlu1 %3645 }
 0x79e   : > { %10281 = vpow2.f32 %v2491_v48 }
 0x7a1   : > { %v10268_v1 = vpop.eup %10267  ;;  %v13250_v26 = vpop.xlane.xlu1 %2241 }
 0x7a2   : > { %v10270_v7 = vpop.eup %10269  ;;  %v2597_v60 = vmul.f32 0.17677669, %v10268_v1 }
 0x7a3   : > { %v10272_v17 = vpop.eup %10271  ;;  %v2598_v35 = vmul.f32 0.17677669, %v10270_v7 }
 0x7a4   : > { %v10274_v6 = vpop.eup %10273  ;;  %v2599_v31 = vmul.f32 0.17677669, %v10272_v17  ;;  %v17442_v17 = vld [vmem:[#allocation54_spill] sm:$0xff] }
 0x7a5   : > { %v2657_v14 = vpack.c.bf16 %v2598_v35, %v2597_v60  ;;  %v10276_v3 = vpop.eup %10275  ;;  %v2600_v51 = vmul.f32 0.17677669, %v10274_v6  ;;  %v13255_v48 = vpop.permute.xlu1 %2879  ;;  %v13263_v35 = vadd.f32 %v17442_v17, %v11998_v38 }
 0x7a6   : > { %3808 = vxpose.xlu0.c.b16.start [1/8] (narrow) %v2653_v19, 32  ;;  %v13244_v19 = vpop.xlane.xlu0 %3012  ;;  %v10278_v49 = vpop.eup %10277  ;;  %v2601_v18 = vmul.f32 0.17677669, %v10276_v3  ;;  %17440 = vst [vmem:[#allocation149_spill] sm:$0xff] %v13255_v48  ;;  %v17458_v48 = vld [vmem:[#allocation100_spill] sm:$0xff] }
 0x7a7   : > { %17438 = vst [vmem:[#allocation147_spill] sm:$0xff] %v13244_v19  ;;  %v10280_v1 = vpop.eup %10279  ;;  %v2602_v7 = vmul.f32 0.17677669, %v10278_v49  ;;  %17443 = vst [vmem:[#allocation54_spill] sm:$0xff] %v13263_v35 }
 0x7a8   : > { %v2603_v28 = vmul.f32 0.17677669, %v10280_v1 }
 0x7a9   : > { %v2659_v34 = vpack.c.bf16 %v2602_v7, %v2601_v18 }
 0x7aa   : > { %3809 = vxpose.xlu0.c.b16.cont [2/8] (narrow) %v2654_v29, 32  ;;  %v13252_v58 = vpop.xlane.xlu0 %3015  ;;  %v2288_v29 = vsel %vm702_vm0, %v2126_v47, 0.0  ;;  %v13259_v47 = vpop.xlane.xlu1 %3021 }
 0x7ab   : > { %17439 = vst [vmem:[#allocation148_spill] sm:$0xff] %v13252_v58  ;;  %17441 = vst [vmem:[#allocation150_spill] sm:$0xff] %v13259_v47  ;;  %v17460_v47 = vld [vmem:[#allocation101_spill] sm:$0xff] }
 0x7ae   : > { %3810 = vxpose.xlu0.c.b16.cont [3/8] (narrow) %v2655_v33, 32  ;;  %v2658_v33 = vpack.c.bf16 %v2600_v51, %v2599_v31  ;;  %v13257_v20 = vpop.xlane.xlu0 %2238  ;;  %v3574_v31 = vpack.c.bf16 %v13263_v35, %v13145_v56  ;;  %v17445_v51 = vld [vmem:[#allocation66_spill] sm:$0xff] }
 0x7af   : > { %v13275_v49 = vadd.f32 %v17445_v51, %v11998_v38 }
 0x7b1   : > { %17446 = vst [vmem:[#allocation66_spill] sm:$0xff] %v13275_v49  ;;  %v2133_v1 = vmul.f32 %v13275_v49, %v13275_v49 }
 0x7b2   : > { %3811 = vxpose.xlu0.c.b16.cont [4/8] (narrow) %v2656_v12, 32  ;;  %v10282_v12 = vpop.eup %10281  ;;  %v13265_v6 = vpop.permute.xlu0 %2877 }
 0x7b3   : > { %v2604_v60 = vmul.f32 0.17677669, %v10282_v12  ;;  %v17449_v12 = vld [vmem:[#allocation75_spill] sm:$0xff]  ;;  %v2309_v17 = vsel %vm702_vm0, %v2133_v1, 0.0 }
 0x7b5   : > { %2289 = vadd.xlane.f32.xlu1 %v2288_v29  ;;  %v2660_v29 = vpack.c.bf16 %v2604_v60, %v2603_v28  ;;  %v13292_v60 = vadd.f32 %v17449_v12, %v11998_v38 }
 0x7b6   : > { %3812 = vxpose.xlu0.c.b16.cont [5/8] (narrow) %v2657_v14, 32  ;;  %v13267_v14 = vpop.permute.xlu1 %2881  ;;  %v13271_v3 = vpop.xlane.xlu0 %3018 }
 0x7b7   : > { %17444 = vst [vmem:[#allocation151_spill] sm:$0xff] %v13271_v3  ;;  %17450 = vst [vmem:[#allocation75_spill] sm:$0xff] %v13292_v60  ;;  %v2137_v12 = vmul.f32 %v13292_v60, %v13292_v60 }
 0x7b9   : > { %v2321_v1 = vsel %vm702_vm0, %v2137_v12, 0.0  ;;  %v2128_v12 = vmul.f32 %v13263_v35, %v13263_v35  ;;  %v2352_v35 = vmul.f32 0.5, %v12705_v42 }
 0x7ba   : > { %3813 = vxpose.xlu0.c.b16.cont [6/8] (narrow) %v2658_v33, 32  ;;  %v17447_v33 = vld [vmem:[#allocation70_spill] sm:$0xff]  ;;  %v13284_v28 = vpop.xlane.xlu0 %2244 }
 0x7bb   : > { %v13282_v18 = vadd.f32 %v17447_v33, %v11998_v38  ;;  %v17451_v33 = vld [vmem:[#allocation79_spill] sm:$0xff]  ;;  %v2416_v44 = vsub.f32 %v17460_v47, %v2352_v35 }
 0x7bc   : > { %v13303_v56 = vadd.f32 %v17451_v33, %v11998_v38 }
 0x7bd   : > { %17448 = vst [vmem:[#allocation70_spill] sm:$0xff] %v13282_v18 }
 0x7be   : > { %3814 = vxpose.xlu0.c.b16.cont [7/8] (narrow) %v2659_v34, 32  ;;  %v13278_v34 = vpop.xlane.xlu1 %2247  ;;  %17452 = vst [vmem:[#allocation79_spill] sm:$0xff] %v13303_v56 }
 0x7c2   : > { %3815 = vxpose.xlu0.c.b16.end [8/8] (narrow) %v2660_v29, 32  ;;  %v13288_v7 = vpop.permute.xlu1 %2883  ;;  %v2135_v29 = vmul.f32 %v13282_v18, %v13282_v18 }
 0x7c4   : > { %v2315_v41 = vsel %vm702_vm0, %v2135_v29, 0.0 }
 0x7c6   : > { %3663 = vrot.lane.b32.xlu1 %v3574_v31, %s10902_s23  ;;  %v13297_v31 = vpop.permute.xlu0 %3647  ;;  %v13299_v51 = vpop.xlane.xlu1 %2253 }
 0x7ca   : > { %v13308_v52 = vpop.xlane.xlu0 %3024  ;;  %v13313_v30 = vpop.permute.xlu1 %2887 }
 0x7cb   : > { %17453 = vst [vmem:[#allocation152_spill] sm:$0xff] %v13308_v52  ;;  %17454 = vst [vmem:[#allocation153_spill] sm:$0xff] %v13313_v30 }
 0x7ce   : > { %v13315_v15 = vpop.xlane.xlu0 %3027  ;;  %v13318_v19 = vpop.xlane.xlu1 %3033 }
 0x7cf   : > { %2310 = vadd.xlane.f32.xlu0 %v2309_v17  ;;  %v2139_v17 = vmul.f32 %v13303_v56, %v13303_v56  ;;  %17455 = vst [vmem:[#allocation154_spill] sm:$0xff] %v13315_v15  ;;  %17456 = vst [vmem:[#allocation155_spill] sm:$0xff] %v13318_v19  ;;  %v2294_v15 = vsel %vm702_vm0, %v2128_v12, 0.0  ;;  %v17459_v19 = vld [vmem:[#allocation97_spill] sm:$0xff] }
 0x7d1   : > { %v2327_v33 = vsel %vm702_vm0, %v2139_v17, 0.0  ;;  %v2350_v17 = vmul.f32 0.5, %v12662_v11  ;;  %v2353_v11 = vmul.f32 0.5, %v13155_v24  ;;  %v2499_v24 = vmul.f32 1.442695, %v2416_v44 }
 0x7d2   : > { %v13320_v29 = vpop.xlane.xlu0 %2250 }
 0x7d3   : > { %2316 = vadd.xlane.f32.xlu0 %v2315_v41  ;;  %v13322_v41 = vpop.permute.xlu1 %2889  ;;  %v2414_v0 = vsub.f32 %v17459_v19, %v2350_v17  ;;  %v2417_v17 = vsub.f32 %v12668_v4, %v2353_v11  ;;  %v2355_v19 = vmul.f32 0.5, %v13172_v61  ;;  %v2357_v11 = vmul.f32 0.5, %v13183_v40  ;;  %v17464_v4 = vld [vmem:[#allocation112_spill] sm:$0xff] }
 0x7d6   : > { %v13328_v58 = vpop.permute.xlu0 %2885 }
 0x7d7   : > { %2322 = vadd.xlane.f32.xlu0 %v2321_v1  ;;  %v13324_v52 = vpop.xlane.xlu1 %2259  ;;  %v2349_v1 = vmul.f32 0.5, %v13132_v57 }
 0x7d9   : > { %v2413_v13 = vsub.f32 %v17458_v48, %v2349_v1  ;;  %v2354_v1 = vmul.f32 0.5, %v12752_v9  ;;  %v13351_v48 = vadd.f32 %v17461_v63, %v11998_v38  ;;  %v2356_v9 = vmul.f32 0.5, %v12797_v43 }
 0x7db   : > { %2328 = vadd.xlane.f32.xlu0 %v2327_v33  ;;  %v13333_v30 = vpop.permute.xlu1 %2891  ;;  %v13335_v33 = vpop.permute.xlu0 %3649  ;;  %v2493_v12 = vmul.f32 1.442695, %v2413_v13  ;;  %17462 = vst [vmem:[#allocation58_spill] sm:$0xff] %v13351_v48  ;;  %v3575_v35 = vpack.c.bf16 %v13351_v48, %v13153_v59 }
 0x7dc   : > { %17457 = vst [vmem:[#allocation156_spill] sm:$0xff] %v13333_v30  ;;  %v2495_v30 = vmul.f32 1.442695, %v2414_v0  ;;  %v2418_v0 = vsub.f32 %v12639_v10, %v2354_v1 }
 0x7dd   : > { %10283 = vpow2.f32 %v2493_v12  ;;  %v2501_v12 = vmul.f32 1.442695, %v2417_v17 }
 0x7de   : > { %10285 = vpow2.f32 %v2495_v30  ;;  %v2503_v61 = vmul.f32 1.442695, %v2418_v0  ;;  %v2358_v30 = vmul.f32 0.5, %v12830_v45 }
 0x7df   : > { %v13341_v3 = vpop.xlane.xlu1 %2265  ;;  %v13343_v57 = vpop.xlane.xlu0 %3030 }
 0x7e3   : > { %v13355_v13 = vpop.permute.xlu1 %2895 }
 0x7e7   : > { %v13367_v44 = vpop.permute.xlu1 %2897  ;;  %v10284_v17 = vpop.eup %10283 }
 0x7ea   : > { %2295 = vadd.xlane.f32.xlu1 %v2294_v15  ;;  %v2415_v15 = vsub.f32 %v12629_v54, %v2351_v62  ;;  %v13357_v62 = vpop.xlane.xlu0 %2256  ;;  %v2420_v54 = vsub.f32 %v17464_v4, %v2356_v9  ;;  %v2360_v9 = vmul.f32 0.5, %v12867_v5 }
 0x7eb   : > { %v13376_v45 = vpop.xlane.xlu1 %2271 }
 0x7ec   : > { %v2497_v42 = vmul.f32 1.442695, %v2415_v15  ;;  %v17463_v15 = vld [vmem:[#allocation115_spill] sm:$0xff]  ;;  %v2507_v40 = vmul.f32 1.442695, %v2420_v54  ;;  %v17467_v54 = vld [vmem:[#allocation122_spill] sm:$0xff] }
 0x7ed   : > { %v2419_v63 = vsub.f32 %v17463_v15, %v2355_v19  ;;  %v2359_v19 = vmul.f32 0.5, %v13189_v16  ;;  %v2424_v4 = vsub.f32 %v17467_v54, %v2360_v9  ;;  %v17470_v9 = vld [vmem:[#allocation127_spill] sm:$0xff] }
 0x7ee   : > { %10287 = vpow2.f32 %v2497_v42  ;;  %v13370_v43 = vpop.permute.xlu0 %3651  ;;  %v2421_v42 = vsub.f32 %v12750_v36, %v2357_v11  ;;  %v2605_v11 = vmul.f32 0.17677669, %v10284_v17 }
 0x7ef   : > { %10289 = vpow2.f32 %v2499_v24  ;;  %v2505_v1 = vmul.f32 1.442695, %v2419_v63  ;;  %v17465_v24 = vld [vmem:[#allocation117_spill] sm:$0xff]  ;;  %v2361_v63 = vmul.f32 0.5, %v13210_v55 }
 0x7f0   : > { %10291 = vpow2.f32 %v2501_v12  ;;  %v2422_v0 = vsub.f32 %v17465_v24, %v2358_v30  ;;  %v2509_v15 = vmul.f32 1.442695, %v2421_v42  ;;  %v2423_v12 = vsub.f32 %v12791_v46, %v2359_v19  ;;  %v13386_v42 = vpop.permute.xlu1 %2899 }
 0x7f1   : > { %10293 = vpow2.f32 %v2503_v61  ;;  %v2362_v30 = vmul.f32 0.5, %v12931_v25  ;;  %v2363_v25 = vmul.f32 0.5, %v13234_v21 }
 0x7f2   : > { %v13378_v59 = vpop.xlane.xlu0 %3036  ;;  %10295 = vpow2.f32 %v2505_v1  ;;  %v2511_v61 = vmul.f32 1.442695, %v2422_v0  ;;  %v2513_v47 = vmul.f32 1.442695, %v2423_v12  ;;  %v2364_v1 = vmul.f32 0.5, %v13232_v2 }
 0x7f3   : > { %17466 = vst [vmem:[#allocation157_spill] sm:$0xff] %v13378_v59  ;;  %10297 = vpow2.f32 %v2507_v40  ;;  %v17468_v59 = vld [vmem:[#allocation128_spill] sm:$0xff]  ;;  %v2515_v0 = vmul.f32 1.442695, %v2424_v4  ;;  %v2426_v46 = vsub.f32 %v17470_v9, %v2362_v30 }
 0x7f4   : > { %10299 = vpow2.f32 %v2509_v15  ;;  %v2425_v36 = vsub.f32 %v17468_v59, %v2361_v63  ;;  %v2428_v2 = vsub.f32 %v12890_v27, %v2364_v1 }
 0x7f5   : > { %10301 = vpow2.f32 %v2511_v61  ;;  %v17471_v61 = vld [vmem:[#allocation14_spill] sm:$0xff] }
 0x7f6   : > { %v13388_v55 = vpop.xlane.xlu0 %3039  ;;  %10303 = vpow2.f32 %v2513_v47  ;;  %v2517_v12 = vmul.f32 1.442695, %v2425_v36  ;;  %v2427_v4 = vsub.f32 %v17471_v61, %v2363_v25  ;;  %v2523_v21 = vmul.f32 1.442695, %v2428_v2 }
 0x7f7   : > { %17469 = vst [vmem:[#allocation158_spill] sm:$0xff] %v13388_v55  ;;  %10305 = vpow2.f32 %v2515_v0 }
 0x7f8   : > { %10307 = vpow2.f32 %v2517_v12 }
 0x7fa   : > { %v13396_v30 = vpop.xlane.xlu0 %2262 }
 0x7fb   : > { %3665 = vrot.lane.b32.xlu1 %v3575_v35, %s10902_s23  ;;  %v10286_v35 = vpop.eup %10285 }
 0x7fc   : > { %v10288_v16 = vpop.eup %10287  ;;  %v2606_v5 = vmul.f32 0.17677669, %v10286_v35 }
 0x7fd   : > { %v10290_v10 = vpop.eup %10289  ;;  %v2607_v19 = vmul.f32 0.17677669, %v10288_v16 }
 0x7fe   : > { %v2661_v17 = vpack.c.bf16 %v2606_v5, %v2605_v11  ;;  %v10292_v40 = vpop.eup %10291  ;;  %v2608_v35 = vmul.f32 0.17677669, %v10290_v10  ;;  %v2519_v11 = vmul.f32 1.442695, %v2426_v46  ;;  %v3711_v46 = vsel %vm702_vm0, %v13246_v50, 1065369472 }
 0x7ff   : > { %v10294_v15 = vpop.eup %10293  ;;  %v2609_v16 = vmul.f32 0.17677669, %v10292_v40  ;;  %v2521_v40 = vmul.f32 1.442695, %v2427_v4 }
 0x800   : > { %v2662_v54 = vpack.c.bf16 %v2608_v35, %v2607_v19  ;;  %v10296_v55 = vpop.eup %10295  ;;  %v2610_v5 = vmul.f32 0.17677669, %v10294_v15  ;;  %10309 = vpow2.f32 %v2519_v11 }
 0x801   : > { %v10298_v10 = vpop.eup %10297  ;;  %v2611_v36 = vmul.f32 0.17677669, %v10296_v55  ;;  %10311 = vpow2.f32 %v2523_v21  ;;  %v3776_v55 = vsel %vm3742_vm1, %v3711_v46, 0 }
 0x802   : > { %v2663_v1 = vpack.c.bf16 %v2610_v5, %v2609_v16  ;;  %v2612_v19 = vmul.f32 0.17677669, %v10298_v10  ;;  %10313 = vpow2.f32 %v2521_v40  ;;  %v2130_v40 = vmul.f32 %v13351_v48, %v13351_v48 }
 0x804   : > { %v2664_v12 = vpack.c.bf16 %v2612_v19, %v2611_v36 }
 0x808   : > { %3824 = vxpose.xlu0.c.b16.start [1/8] (narrow) %v2661_v17, 32  ;;  %v10300_v17 = vpop.eup %10299 }
 0x809   : > { %v13393_v63 = vpop.xlane.xlu1 %2277  ;;  %v10302_v0 = vpop.eup %10301  ;;  %v2613_v35 = vmul.f32 0.17677669, %v10300_v17 }
 0x80a   : > { %v10304_v2 = vpop.eup %10303  ;;  %v2614_v16 = vmul.f32 0.17677669, %v10302_v0 }
 0x80b   : > { %v10306_v11 = vpop.eup %10305  ;;  %v2615_v50 = vmul.f32 0.17677669, %v10304_v2 }
 0x80c   : > { %3825 = vxpose.xlu0.c.b16.cont [2/8] (narrow) %v2662_v54, 32  ;;  %v13402_v54 = vpop.permute.xlu0 %2893  ;;  %v2665_v4 = vpack.c.bf16 %v2614_v16, %v2613_v35  ;;  %v10308_v5 = vpop.eup %10307  ;;  %v2616_v10 = vmul.f32 0.17677669, %v10306_v11  ;;  %v2300_v35 = vsel %vm702_vm0, %v2130_v40, 0.0  ;;  %v3047_v40 = vsel %vm702_vm0, %v12933_v39, 0.0 }
 0x80d   : > { %v13398_v47 = vpop.xlane.xlu1 %2283  ;;  %v2617_v17 = vmul.f32 0.17677669, %v10308_v5 }
 0x80e   : > { %v2666_v36 = vpack.c.bf16 %v2616_v10, %v2615_v50  ;;  %v17472_v50 = vld [vmem:[#allocation64_spill] sm:$0xff] }
 0x810   : > { %3826 = vxpose.xlu0.c.b16.cont [3/8] (narrow) %v2663_v1, 32  ;;  %v13407_v21 = vpop.permute.xlu0 %3653  ;;  %v10310_v1 = vpop.eup %10309 }
 0x811   : > { %v3662_v25 = vpop.permute.xlu1 %3661  ;;  %v10312_v19 = vpop.eup %10311 }
 0x812   : > { %v3727_v15 = vsel %vm702_vm0, %v3662_v25, 1065369472  ;;  %v2618_v25 = vmul.f32 0.17677669, %v10310_v1  ;;  %v10314_v0 = vpop.eup %10313 }
 0x813   : > { %10044 = vmatprep.subr.msk.bf16.mxu1 %vm3742_vm1, %v3727_v15  ;;  %v2620_v15 = vmul.f32 0.17677669, %v10312_v19  ;;  %v2619_v2 = vmul.f32 0.17677669, %v10314_v0 }
 0x814   : > { %9575 = vmatpush3.bf16.msra.mxu1 %v3776_v55  ;;  %3827 = vxpose.xlu0.c.b16.cont [4/8] (narrow) %v2664_v12, 32  ;;  %v13411_v46 = vpop.xlane.xlu0 %2268  ;;  %v2667_v12 = vpack.c.bf16 %v2618_v25, %v2617_v17  ;;  %v17474_v17 = vld [vmem:[#allocation131_spill] sm:$0xff]  ;;  %v17475_v25 = vld [vmem:[#allocation105_spill] sm:$0xff] }
 0x815   : > { %v2668_v16 = vpack.c.bf16 %v2620_v15, %v2619_v2  ;;  %v3050_v0 = vsel %vm702_vm0, %v17475_v25, 0.0  ;;  %v3713_v2 = vsel %vm702_vm0, %v13297_v31, 1065369472 }
 0x818   : > { %3828 = vxpose.xlu0.c.b16.cont [5/8] (narrow) %v2665_v4, 32  ;;  %v13414_v55 = vpop.permute.xlu0 %3655  ;;  %v13420_v4 = vadd.f32 %v17472_v50, %v11998_v38 }
 0x81a   : > { %17473 = vst [vmem:[#allocation64_spill] sm:$0xff] %v13420_v4  ;;  %v3576_v10 = vpack.c.bf16 %v13420_v4, %v13162_v32  ;;  %v2132_v31 = vmul.f32 %v13420_v4, %v13420_v4 }
 0x81c   : > { %3829 = vxpose.xlu0.c.b16.cont [6/8] (narrow) %v2666_v36, 32  ;;  %v13416_v11 = vpop.xlane.xlu0 %2274  ;;  %v3041_v36 = vsel %vm702_vm0, %v17474_v17, 0.0  ;;  %v17476_v17 = vld [vmem:[#allocation3_spill] sm:$0xff] }
 0x81f   : > { %2301 = vadd.xlane.f32.xlu1 %v2300_v35 }
 0x820   : > { %3830 = vxpose.xlu0.c.b16.cont [7/8] (narrow) %v2667_v12, 32  ;;  %v13422_v5 = vpop.permute.xlu0 %3657 }
 0x824   : > { %3831 = vxpose.xlu0.c.b16.end [8/8] (narrow) %v2668_v16, 32  ;;  %v13426_v1 = vpop.xlane.xlu0 %2280 }
 0x828   : > { %v13433_v19 = vpop.permute.xlu0 %3659 }
 0x82c   : > { %v13437_v15 = vpop.xlane.xlu0 %2286 }
 0x830   : > { %3667 = vrot.lane.b32.xlu1 %v3576_v10, %s10902_s23  ;;  %v13439_v35 = vpop.xlane.xlu0 %2292  ;;  %v3778_v10 = vsel %vm3742_vm1, %v3713_v2, 0 }
 0x831   : > { %3042 = vadd.xlane.f32.xlu0 %v3041_v36  ;;  %v17477_v36 = vld [vmem:[#allocation41_spill] sm:$0xff] }
 0x834   : > { %v13445_v16 = vpop.xlane.xlu0 %2298 }
 0x835   : > { %3048 = vadd.xlane.f32.xlu0 %v3047_v40  ;;  %v13452_v40 = vadd.f32 %v17477_v36, %v17476_v17  ;;  %v17478_v36 = vld [vmem:[#allocation68_spill] sm:$0xff] }
 0x838   : > { %v13454_v25 = vpop.xlane.xlu0 %2304 }
 0x839   : > { %3051 = vadd.xlane.f32.xlu0 %v3050_v0  ;;  %v2729_v0 = vmul.f32 %v13452_v40, %v13452_v40 }
 0x842   : > { %v13441_v12 = vpop.xlane.xlu1 %2289 }
 0x846   : > { %v3664_v50 = vpop.permute.xlu1 %3663 }
 0x847   : > { %v3729_v39 = vsel %vm702_vm0, %v3664_v50, 1065369472  ;;  %v3816_v50 = vpop.trf.xlu0 }
 0x848   : > { %10045 = vmatprep.subr.msk.bf16.mxu1 %vm3742_vm1, %v3729_v39  ;;  %v2306_v39 = vsel %vm702_vm0, %v2132_v31, 0.0  ;;  %v17480_v31 = vld [vmem:[#allocation141_spill] sm:$0xff] }
 0x849   : > { %9577 = vmatpush3.bf16.msra.mxu1 %v3778_v10  ;;  %v13466_v10 = vadd.f32 %v17478_v36, %v11998_v38  ;;  %v17481_v36 = vld [vmem:[#allocation143_spill] sm:$0xff] }
 0x84a   : > { %v3059_v59 = vsel %vm702_vm0, %v17481_v36, 0.0 }
 0x84b   : > { %v3817_v2 = vpop.trf.xlu0  ;;  %17479 = vst [vmem:[#allocation131_spill] sm:$0xff] %v13466_v10  ;;  %v3577_v61 = vpack.c.bf16 %v13466_v10, %v13275_v49  ;;  %v17482_v49 = vld [vmem:[#allocation116_spill] sm:$0xff] }
 0x84c   : > { %v3062_v24 = vsel %vm702_vm0, %v17482_v49, 0.0  ;;  %v17483_v49 = vld [vmem:[#allocation48_spill] sm:$0xff] }
 0x84f   : > { %2901 = vrot.lane.b32.xlu0 %v2729_v0, %s10901_s22 }
 0x854   : > { %2307 = vadd.xlane.f32.xlu1 %v2306_v39  ;;  %v3053_v39 = vsel %vm702_vm0, %v17480_v31, 0.0  ;;  %v3715_v31 = vsel %vm702_vm0, %v13335_v33, 1065369472 }
 0x85c   : > { %v13462_v32 = vpop.xlane.xlu0 %2310 }
 0x860   : > { %v13468_v48 = vpop.xlane.xlu0 %2316 }
 0x864   : > { %v13472_v0 = vpop.xlane.xlu0 %2322 }
 0x865   : > { %3669 = vrot.lane.b32.xlu1 %v3577_v61, %s10902_s23 }
 0x868   : > { %v13475_v4 = vpop.xlane.xlu0 %2328 }
 0x86e   : > { %3054 = vadd.xlane.f32.xlu0 %v3053_v39  ;;  %v3832_v27 = vpop.trf.xlu0 }
 0x86f   : > { %3904 = vmatprep.mubr.bf16.mxu0 %v3832_v27 }
 0x870   : > { %3905 = vmatmul.mubr.bf16.vlgmr.msra.gmra.mrb[128].mxu0 %v3816_v50  ;;  %v3780_v50 = vsel %vm3742_vm1, %v3715_v31, 0 }
 0x872   : > { %3060 = vadd.xlane.f32.xlu0 %v3059_v59  ;;  %v3833_v9 = vpop.trf.xlu0  ;;  %v2134_v59 = vmul.f32 %v13466_v10, %v13466_v10  ;;  %v17517_v10 = vld [vmem:[#allocation23_spill] sm:$0xff] }
 0x873   : > { %3912 = vmatprep.mubr.bf16.mxu0 %v3833_v9 }
 0x874   : > { %v2312_v9 = vsel %vm702_vm0, %v2134_v59, 0.0  ;;  %v17487_v59 = vld [vmem:[#allocation145_spill] sm:$0xff] }
 0x876   : > { %3063 = vadd.xlane.f32.xlu0 %v3062_v24  ;;  %v13494_v24 = vadd.f32 %v17483_v49, %v17476_v17  ;;  %v3071_v49 = vsel %vm702_vm0, %v17487_v59, 0.0 }
 0x877   : > { %v13483_v61 = vpop.xlane.xlu1 %2295 }
 0x878   : > { %3913 = vmatmul.mubr.bf16.gmra.mrb[132].mxu0 %v3817_v2  ;;  %v2733_v33 = vmul.f32 %v13494_v24, %v13494_v24  ;;  %v17484_v2 = vld [vmem:[#allocation72_spill] sm:$0xff] }
 0x879   : > { %v13502_v36 = vadd.f32 %v17484_v2, %v11998_v38 }
 0x87b   : > { %v3666_v39 = vpop.permute.xlu1 %3665  ;;  %17485 = vst [vmem:[#allocation105_spill] sm:$0xff] %v13502_v36  ;;  %v3578_v31 = vpack.c.bf16 %v13502_v36, %v13282_v18  ;;  %v17488_v18 = vld [vmem:[#allocation126_spill] sm:$0xff] }
 0x87c   : > { %v3731_v27 = vsel %vm702_vm0, %v3666_v39, 1065369472  ;;  %v17486_v39 = vld [vmem:[#allocation144_spill] sm:$0xff] }
 0x87d   : > { %10046 = vmatprep.subr.msk.bf16.mxu1 %vm3742_vm1, %v3731_v27  ;;  %v3065_v27 = vsel %vm702_vm0, %v17486_v39, 0.0 }
 0x87e   : > { %9579 = vmatpush3.bf16.msra.mxu1 %v3780_v50 }
 0x889   : > { %2313 = vadd.xlane.f32.xlu1 %v2312_v9  ;;  %v3717_v9 = vsel %vm702_vm0, %v13370_v43, 1065369472  ;;  %v17489_v43 = vld [vmem:[#allocation57_spill] sm:$0xff] }
 0x88a   : > { %v3782_v39 = vsel %vm3742_vm1, %v3717_v9, 0 }
 0x88c   : > { %2909 = vrot.lane.b32.xlu0 %v2733_v33, %s10901_s22 }
 0x89a   : > { %3671 = vrot.lane.b32.xlu1 %v3578_v31, %s10902_s23  ;;  %v3074_v31 = vsel %vm702_vm0, %v17488_v18, 0.0 }
 0x8ab   : > { %3066 = vadd.xlane.f32.xlu0 %v3065_v27  ;;  %v2136_v27 = vmul.f32 %v13502_v36, %v13502_v36 }
 0x8ac   : > { %v13509_v50 = vpop.xlane.xlu1 %2301 }
 0x8ad   : > { %v2318_v59 = vsel %vm702_vm0, %v2136_v27, 0.0 }
 0x8af   : > { %3072 = vadd.xlane.f32.xlu0 %v3071_v49  ;;  %v13525_v49 = vadd.f32 %v17489_v43, %v17476_v17  ;;  %v17493_v43 = vld [vmem:[#allocation146_spill] sm:$0xff] }
 0x8b0   : > { %v3668_v33 = vpop.permute.xlu1 %3667 }
 0x8b1   : > { %v3733_v2 = vsel %vm702_vm0, %v3668_v33, 1065369472  ;;  %17490 = vst [vmem:[#allocation3_spill] sm:$0xff] %v13525_v49  ;;  %v2737_v33 = vmul.f32 %v13525_v49, %v13525_v49 }
 0x8b2   : > { %10047 = vmatprep.subr.msk.bf16.mxu1 %vm3742_vm1, %v3733_v2  ;;  %v17491_v2 = vld [vmem:[#allocation77_spill] sm:$0xff] }
 0x8b3   : > { %3075 = vadd.xlane.f32.xlu0 %v3074_v31  ;;  %9581 = vmatpush3.bf16.msra.mxu1 %v3782_v39  ;;  %v13531_v18 = vadd.f32 %v17491_v2, %v11998_v38  ;;  %v3719_v39 = vsel %vm702_vm0, %v13407_v21, 1065369472  ;;  %v3077_v2 = vsel %vm702_vm0, %v17493_v43, 0.0  ;;  %v17494_v21 = vld [vmem:[#allocation132_spill] sm:$0xff] }
 0x8b4   : > { %v3086_v36 = vsel %vm702_vm0, %v17494_v21, 0.0 }
 0x8b5   : > { %17492 = vst [vmem:[#allocation41_spill] sm:$0xff] %v13531_v18  ;;  %v3579_v9 = vpack.c.bf16 %v13531_v18, %v13292_v60  ;;  %v2138_v60 = vmul.f32 %v13531_v18, %v13531_v18 }
 0x8be   : > { %2319 = vadd.xlane.f32.xlu1 %v2318_v59 }
 0x8c9   : > { %2917 = vrot.lane.b32.xlu0 %v2737_v33, %s10901_s22  ;;  %v3784_v33 = vsel %vm3742_vm1, %v3719_v39, 0  ;;  %v17497_v39 = vld [vmem:[#allocation67_spill] sm:$0xff] }
 0x8cf   : > { %3673 = vrot.lane.b32.xlu1 %v3579_v9, %s10902_s23  ;;  %v3083_v9 = vsel %vm702_vm0, %v13203_v53, 0.0 }
 0x8e1   : > { %v13537_v31 = vpop.xlane.xlu1 %2307 }
 0x8e5   : > { %v3670_v27 = vpop.permute.xlu1 %3669 }
 0x8e6   : > { %v3735_v59 = vsel %vm702_vm0, %v3670_v27, 1065369472  ;;  %v2324_v27 = vsel %vm702_vm0, %v2138_v60, 0.0 }
 0x8e7   : > { %10048 = vmatprep.subr.msk.bf16.mxu1 %vm3742_vm1, %v3735_v59  ;;  %v17495_v59 = vld [vmem:[#allocation81_spill] sm:$0xff] }
 0x8e8   : > { %3078 = vadd.xlane.f32.xlu0 %v3077_v2  ;;  %9583 = vmatpush3.bf16.msra.mxu1 %v3784_v33  ;;  %v13555_v43 = vadd.f32 %v17495_v59, %v11998_v38  ;;  %v13559_v2 = vadd.f32 %v17497_v39, %v17476_v17  ;;  %v3721_v38 = vsel %vm702_vm0, %v13414_v55, 1065369472  ;;  %v3089_v59 = vsel %vm702_vm0, %v13218_v8, 0.0 }
 0x8e9   : > { %v3786_v21 = vsel %vm3742_vm1, %v3721_v38, 0  ;;  %v3095_v55 = vsel %vm702_vm0, %v13242_v37, 0.0  ;;  %v3098_v38 = vsel %vm702_vm0, %v13240_v23, 0.0  ;;  %v17503_v37 = vld [vmem:[#allocation76_spill] sm:$0xff] }
 0x8ea   : > { %17496 = vst [vmem:[#allocation68_spill] sm:$0xff] %v13555_v43  ;;  %17498 = vst [vmem:[#allocation141_spill] sm:$0xff] %v13559_v2  ;;  %v3580_v53 = vpack.c.bf16 %v13555_v43, %v13303_v56  ;;  %v2741_v33 = vmul.f32 %v13559_v2, %v13559_v2 }
 0x8ec   : > { %3084 = vadd.xlane.f32.xlu0 %v3083_v9 }
 0x8f0   : > { %3087 = vadd.xlane.f32.xlu0 %v3086_v36 }
 0x8f3   : > { %2325 = vadd.xlane.f32.xlu1 %v2324_v27  ;;  %v2140_v27 = vmul.f32 %v13555_v43, %v13555_v43  ;;  %v2368_v43 = vmul.f32 0.5, %v13278_v34  ;;  %v2372_v34 = vmul.f32 0.5, %v13324_v52 }
 0x8f5   : > { %v2330_v39 = vsel %vm702_vm0, %v2140_v27, 0.0 }
 0x904   : > { %3675 = vrot.lane.b32.xlu1 %v3580_v53, %s10902_s23  ;;  %v17499_v53 = vld [vmem:[#allocation104_spill] sm:$0xff] }
 0x906   : > { %2925 = vrot.lane.b32.xlu0 %v2741_v33, %s10901_s22  ;;  %v3044_v33 = vsel %vm702_vm0, %v17499_v53, 0.0 }
 0x916   : > { %v13567_v60 = vpop.xlane.xlu1 %2313 }
 0x91a   : > { %v3672_v36 = vpop.permute.xlu1 %3671 }
 0x91b   : > { %v3737_v9 = vsel %vm702_vm0, %v3672_v36, 1065369472  ;;  %v17500_v36 = vld [vmem:[#allocation44_spill] sm:$0xff] }
 0x91c   : > { %10049 = vmatprep.subr.msk.bf16.mxu1 %vm3742_vm1, %v3737_v9  ;;  %v13587_v9 = vadd.f32 %v17500_v36, %v17476_v17  ;;  %v3723_v36 = vsel %vm702_vm0, %v13422_v5, 1065369472 }
 0x91d   : > { %9585 = vmatpush3.bf16.msra.mxu1 %v3786_v21  ;;  %v17501_v21 = vld [vmem:[#allocation45_spill] sm:$0xff] }
 0x91e   : > { %v2730_v8 = vmul.f32 %v13587_v9, %v13587_v9  ;;  %v13593_v27 = vadd.f32 %v17501_v21, %v17476_v17 }
 0x920   : > { %17502 = vst [vmem:[#allocation143_spill] sm:$0xff] %v13593_v27  ;;  %v2731_v23 = vmul.f32 %v13593_v27, %v13593_v27 }
 0x925   : > { %3090 = vadd.xlane.f32.xlu0 %v3089_v59  ;;  %v13597_v59 = vadd.f32 %v17503_v37, %v17476_v17  ;;  %v3788_v37 = vsel %vm3742_vm1, %v3723_v36, 0  ;;  %v3113_v36 = vsel %vm702_vm0, %v13328_v58, 0.0 }
 0x927   : > { %17504 = vst [vmem:[#allocation116_spill] sm:$0xff] %v13597_v59  ;;  %v2745_v53 = vmul.f32 %v13597_v59, %v13597_v59 }
 0x928   : > { %2331 = vadd.xlane.f32.xlu1 %v2330_v39  ;;  %v17505_v39 = vld [vmem:[#allocation46_spill] sm:$0xff] }
 0x929   : > { %3096 = vadd.xlane.f32.xlu0 %v3095_v55  ;;  %v13604_v55 = vadd.f32 %v17505_v39, %v17476_v17  ;;  %v3107_v39 = vsel %vm702_vm0, %v13267_v14, 0.0  ;;  %v17509_v14 = vld [vmem:[#allocation50_spill] sm:$0xff] }
 0x92b   : > { %17506 = vst [vmem:[#allocation48_spill] sm:$0xff] %v13604_v55 }
 0x92c   : > { %3045 = vadd.xlane.f32.xlu1 %v3044_v33  ;;  %v2732_v33 = vmul.f32 %v13604_v55, %v13604_v55 }
 0x92d   : > { %3099 = vadd.xlane.f32.xlu0 %v3098_v38 }
 0x93d   : > { %2903 = vrot.lane.b32.xlu1 %v2730_v8, %s10901_s22 }
 0x941   : > { %2905 = vrot.lane.b32.xlu1 %v2731_v23, %s10901_s22  ;;  %v3101_v23 = vsel %vm702_vm0, %v13265_v6, 0.0  ;;  %v3119_v6 = vsel %vm702_vm0, %v13322_v41, 0.0  ;;  %v3131_v41 = vsel %vm702_vm0, %v13367_v44, 0.0 }
 0x943   : > { %2933 = vrot.lane.b32.xlu0 %v2745_v53, %s10901_s22  ;;  %v13624_v53 = vpop.xlane.xlu0 %3042 }
 0x945   : > { %2907 = vrot.lane.b32.xlu1 %v2732_v33, %s10901_s22  ;;  %v17507_v33 = vld [vmem:[#allocation110_spill] sm:$0xff] }
 0x946   : > { %v3056_v5 = vsel %vm702_vm0, %v17507_v33, 0.0 }
 0x94b   : > { %v13613_v38 = vpop.xlane.xlu1 %2319 }
 0x94f   : > { %v3674_v8 = vpop.permute.xlu1 %3673 }
 0x950   : > { %v3739_v21 = vsel %vm702_vm0, %v3674_v8, 1065369472  ;;  %v3110_v8 = vsel %vm702_vm0, %v13288_v7, 0.0  ;;  %v3125_v7 = vsel %vm702_vm0, %v13402_v54, 0.0  ;;  %v17513_v54 = vld [vmem:[#allocation55_spill] sm:$0xff] }
 0x951   : > { %10050 = vmatprep.subr.msk.bf16.mxu1 %vm3742_vm1, %v3739_v21  ;;  %v13632_v21 = vpop.xlane.xlu0 %3048 }
 0x952   : > { %9587 = vmatpush3.bf16.msra.mxu1 %v3788_v37  ;;  %17508 = vst [vmem:[#allocation72_spill] sm:$0xff] %v13632_v21  ;;  %v13638_v37 = vadd.f32 %v17509_v14, %v17476_v17 }
 0x954   : > { %v2734_v58 = vmul.f32 %v13638_v37, %v13638_v37 }
 0x962   : > { %3102 = vadd.xlane.f32.xlu0 %v3101_v23  ;;  %v13640_v23 = vpop.xlane.xlu0 %3051 }
 0x963   : > { %17510 = vst [vmem:[#allocation144_spill] sm:$0xff] %v13640_v23 }
 0x966   : > { %3108 = vadd.xlane.f32.xlu0 %v3107_v39  ;;  %v17511_v39 = vld [vmem:[#allocation53_spill] sm:$0xff] }
 0x967   : > { %v13648_v33 = vadd.f32 %v17511_v39, %v17476_v17 }
 0x969   : > { %3057 = vadd.xlane.f32.xlu1 %v3056_v5  ;;  %17512 = vst [vmem:[#allocation145_spill] sm:$0xff] %v13648_v33  ;;  %v2902_v5 = vpop.permute.xlu0 %2901 }
 0x96a   : > { %3111 = vadd.xlane.f32.xlu0 %v3110_v8  ;;  %v2735_v8 = vmul.f32 %v13648_v33, %v13648_v33 }
 0x96e   : > { %3114 = vadd.xlane.f32.xlu0 %v3113_v36  ;;  %v13657_v36 = vadd.f32 %v17513_v54, %v17476_v17  ;;  %v17515_v54 = vld [vmem:[#allocation19_spill] sm:$0xff] }
 0x970   : > { %17514 = vst [vmem:[#allocation126_spill] sm:$0xff] %v13657_v36  ;;  %v2736_v14 = vmul.f32 %v13657_v36, %v13657_v36 }
 0x972   : > { %3120 = vadd.xlane.f32.xlu0 %v3119_v6  ;;  %v3137_v6 = vsel %vm702_vm0, %v2902_v5, 0.0 }
 0x976   : > { %3126 = vadd.xlane.f32.xlu0 %v3125_v7  ;;  %v3725_v7 = vsel %vm702_vm0, %v13433_v19, 1065369472  ;;  %v2367_v19 = vmul.f32 0.5, %v13284_v28 }
 0x977   : > { %v3790_v5 = vsel %vm3742_vm1, %v3725_v7, 0  ;;  %v2369_v7 = vmul.f32 0.5, %v13320_v29 }
 0x97a   : > { %2911 = vrot.lane.b32.xlu1 %v2734_v58, %s10901_s22  ;;  %3132 = vadd.xlane.f32.xlu0 %v3131_v41  ;;  %v2366_v41 = vmul.f32 0.5, %v13250_v26  ;;  %v2370_v26 = vmul.f32 0.5, %v13299_v51  ;;  %v17521_v51 = vld [vmem:[#allocation30_spill] sm:$0xff] }
 0x97e   : > { %2913 = vrot.lane.b32.xlu1 %v2735_v8, %s10901_s22  ;;  %3138 = vadd.xlane.f32.xlu0 %v3137_v6  ;;  %v2365_v8 = vmul.f32 0.5, %v13257_v20  ;;  %v2430_v6 = vsub.f32 %v17515_v54, %v2366_v41  ;;  %v17520_v54 = vld [vmem:[#allocation24_spill] sm:$0xff] }
 0x97f   : > { %v2433_v28 = vsub.f32 %v17520_v54, %v2369_v7  ;;  %v2376_v7 = vmul.f32 0.5, %v13376_v45 }
 0x980   : > { %v13663_v44 = vpop.xlane.xlu1 %2325  ;;  %v2527_v18 = vmul.f32 1.442695, %v2430_v6  ;;  %v2371_v6 = vmul.f32 0.5, %v13357_v62 }
 0x981   : > { %v2533_v29 = vmul.f32 1.442695, %v2433_v28  ;;  %v17525_v28 = vld [vmem:[#allocation39_spill] sm:$0xff] }
 0x982   : > { %2915 = vrot.lane.b32.xlu1 %v2736_v14, %s10901_s22  ;;  %v17516_v14 = vld [vmem:[#allocation18_spill] sm:$0xff]  ;;  %10315 = vpow2.f32 %v2527_v18  ;;  %v17522_v18 = vld [vmem:[#allocation28_spill] sm:$0xff] }
 0x983   : > { %v2429_v56 = vsub.f32 %v17516_v14, %v2365_v8 }
 0x984   : > { %v3676_v58 = vpop.permute.xlu1 %3675 }
 0x985   : > { %v3741_v39 = vsel %vm702_vm0, %v3676_v58, 1065369472  ;;  %v2432_v58 = vsub.f32 %v17517_v10, %v2368_v43  ;;  %v2525_v21 = vmul.f32 1.442695, %v2429_v56  ;;  %v2436_v56 = vsub.f32 %v17521_v51, %v2372_v34 }
 0x986   : > { %10051 = vmatprep.subr.msk.bf16.mxu1 %vm3742_vm1, %v3741_v39  ;;  %v17518_v39 = vld [vmem:[#allocation21_spill] sm:$0xff]  ;;  %v2375_v34 = vmul.f32 0.5, %v13411_v46 }
 0x987   : > { %9589 = vmatpush3.bf16.msra.mxu1 %v3790_v5  ;;  %v2431_v23 = vsub.f32 %v17518_v39, %v2367_v19  ;;  %v2531_v20 = vmul.f32 1.442695, %v2432_v58  ;;  %v17519_v5 = vld [vmem:[#allocation26_spill] sm:$0xff]  ;;  %10317 = vpow2.f32 %v2525_v21  ;;  %v2374_v19 = vmul.f32 0.5, %v13341_v3  ;;  %v17523_v21 = vld [vmem:[#allocation35_spill] sm:$0xff] }
 0x988   : > { %v2434_v41 = vsub.f32 %v17519_v5, %v2370_v26  ;;  %v2435_v58 = vsub.f32 %v17522_v18, %v2371_v6  ;;  %v2373_v26 = vmul.f32 0.5, %v13396_v30  ;;  %v2539_v52 = vmul.f32 1.442695, %v2436_v56  ;;  %v17526_v18 = vld [vmem:[#allocation37_spill] sm:$0xff] }
 0x989   : > { %v2529_v8 = vmul.f32 1.442695, %v2431_v23  ;;  %10319 = vpow2.f32 %v2531_v20  ;;  %v2438_v23 = vsub.f32 %v17523_v21, %v2374_v19  ;;  %v17524_v20 = vld [vmem:[#allocation33_spill] sm:$0xff]  ;;  %v2440_v6 = vsub.f32 %v17525_v28, %v2376_v7 }
 0x98a   : > { %v2535_v43 = vmul.f32 1.442695, %v2434_v41  ;;  %v2537_v62 = vmul.f32 1.442695, %v2435_v58  ;;  %v2437_v41 = vsub.f32 %v17524_v20, %v2373_v26  ;;  %v2378_v30 = vmul.f32 0.5, %v13393_v63 }
 0x98b   : > { %10321 = vpow2.f32 %v2529_v8  ;;  %v2543_v8 = vmul.f32 1.442695, %v2438_v23  ;;  %v2439_v45 = vsub.f32 %v17526_v18, %v2375_v34  ;;  %v2547_v26 = vmul.f32 1.442695, %v2440_v6 }
 0x98c   : > { %10323 = vpow2.f32 %v2535_v43  ;;  %v10316_v39 = vpop.eup %10315  ;;  %v2541_v19 = vmul.f32 1.442695, %v2437_v41  ;;  %v2442_v46 = vsub.f32 %v13587_v9, %v2378_v30 }
 0x98d   : > { %10325 = vpow2.f32 %v2533_v29  ;;  %v2622_v43 = vmul.f32 0.17677669, %v10316_v39  ;;  %v2377_v29 = vmul.f32 0.5, %v13416_v11  ;;  %v2545_v63 = vmul.f32 1.442695, %v2439_v45 }
 0x98e   : > { %10327 = vpow2.f32 %v2539_v52  ;;  %v2380_v52 = vmul.f32 0.5, %v13398_v47  ;;  %v2551_v34 = vmul.f32 1.442695, %v2442_v46 }
 0x98f   : > { %10329 = vpow2.f32 %v2537_v62  ;;  %v2441_v39 = vsub.f32 %v13452_v40, %v2377_v29  ;;  %v2379_v62 = vmul.f32 0.5, %v13426_v1 }
 0x990   : > { %10331 = vpow2.f32 %v2543_v8  ;;  %v2382_v8 = vmul.f32 0.5, %v13441_v12 }
 0x991   : > { %v10318_v3 = vpop.eup %10317  ;;  %10333 = vpow2.f32 %v2541_v19  ;;  %v2381_v19 = vmul.f32 0.5, %v13437_v15 }
 0x992   : > { %v2621_v58 = vmul.f32 0.17677669, %v10318_v3  ;;  %10335 = vpow2.f32 %v2547_v26  ;;  %v2444_v3 = vsub.f32 %v13604_v55, %v2380_v52  ;;  %v2446_v29 = vsub.f32 %v13638_v37, %v2382_v8 }
 0x993   : > { %v10320_v56 = vpop.eup %10319  ;;  %10337 = vpow2.f32 %v2545_v63  ;;  %v2445_v52 = vsub.f32 %v13494_v24, %v2381_v19  ;;  %v17529_v19 = vld [vmem:[#allocation65_spill] sm:$0xff] }
 0x994   : > { %v2669_v23 = vpack.c.bf16 %v2622_v43, %v2621_v58  ;;  %v2624_v7 = vmul.f32 0.17677669, %v10320_v56  ;;  %v2549_v43 = vmul.f32 1.442695, %v2441_v39  ;;  %v2443_v56 = vsub.f32 %v13593_v27, %v2379_v62 }
 0x995   : > { %v10322_v51 = vpop.eup %10321  ;;  %10339 = vpow2.f32 %v2551_v34  ;;  %v2384_v58 = vmul.f32 0.5, %v13483_v61  ;;  %v2559_v63 = vmul.f32 1.442695, %v2446_v29  ;;  %v2386_v62 = vmul.f32 0.5, %v13509_v50  ;;  %v17527_v61 = vld [vmem:[#allocation59_spill] sm:$0xff] }
 0x996   : > { %v10324_v28 = vpop.eup %10323  ;;  %v2623_v41 = vmul.f32 0.17677669, %v10322_v51  ;;  %v2555_v51 = vmul.f32 1.442695, %v2444_v3  ;;  %10341 = vpow2.f32 %v2549_v43  ;;  %v2557_v8 = vmul.f32 1.442695, %v2445_v52 }
 0x997   : > { %v10326_v11 = vpop.eup %10325  ;;  %v2626_v47 = vmul.f32 0.17677669, %v10324_v28  ;;  %v2553_v28 = vmul.f32 1.442695, %v2443_v56  ;;  %v2448_v39 = vsub.f32 %v13657_v36, %v2384_v58  ;;  %v2388_v56 = vmul.f32 0.5, %v13537_v31  ;;  %v17531_v31 = vld [vmem:[#allocation62_spill] sm:$0xff] }
 0x998   : > { %v2670_v6 = vpack.c.bf16 %v2624_v7, %v2623_v41  ;;  %v10328_v30 = vpop.eup %10327  ;;  %v2625_v1 = vmul.f32 0.17677669, %v10326_v11  ;;  %10343 = vpow2.f32 %v2555_v51  ;;  %v13713_v41 = vadd.f32 %v17527_v61, %v17476_v17  ;;  %v17557_v36 = vld [vmem:[#allocation63_spill] sm:$0xff] }
 0x999   : > { %v10330_v45 = vpop.eup %10329  ;;  %v2628_v12 = vmul.f32 0.17677669, %v10328_v30  ;;  %10345 = vpow2.f32 %v2553_v28  ;;  %v2563_v43 = vmul.f32 1.442695, %v2448_v39 }
 0x99a   : > { %v2671_v26 = vpack.c.bf16 %v2626_v47, %v2625_v1  ;;  %v10332_v46 = vpop.eup %10331  ;;  %v2627_v15 = vmul.f32 0.17677669, %v10330_v45  ;;  %17528 = vst [vmem:[#allocation57_spill] sm:$0xff] %v13713_v41  ;;  %10347 = vpow2.f32 %v2559_v63  ;;  %v2450_v50 = vsub.f32 %v13713_v41, %v2386_v62  ;;  %v17533_v63 = vld [vmem:[#allocation69_spill] sm:$0xff] }
 0x99b   : > { %v10334_v7 = vpop.eup %10333  ;;  %v2630_v34 = vmul.f32 0.17677669, %v10332_v46  ;;  %v13721_v1 = vadd.f32 %v17529_v19, %v17476_v17  ;;  %10349 = vpow2.f32 %v2557_v8  ;;  %v13733_v39 = vadd.f32 %v17533_v63, %v17476_v17  ;;  %v17537_v19 = vld [vmem:[#allocation136_spill] sm:$0xff] }
 0x99c   : > { %v2672_v11 = vpack.c.bf16 %v2628_v12, %v2627_v15  ;;  %v10336_v3 = vpop.eup %10335  ;;  %v2629_v47 = vmul.f32 0.17677669, %v10334_v7  ;;  %v2390_v12 = vmul.f32 0.5, %v13567_v60  ;;  %10351 = vpow2.f32 %v2563_v43 }
 0x99d   : > { %v10338_v30 = vpop.eup %10337  ;;  %17530 = vst [vmem:[#allocation77_spill] sm:$0xff] %v13721_v1  ;;  %v2632_v51 = vmul.f32 0.17677669, %v10336_v3  ;;  %v2567_v15 = vmul.f32 1.442695, %v2450_v50  ;;  %v2452_v7 = vsub.f32 %v13721_v1, %v2388_v56  ;;  %17534 = vst [vmem:[#allocation132_spill] sm:$0xff] %v13733_v39 }
 0x99e   : > { %v2673_v45 = vpack.c.bf16 %v2630_v34, %v2629_v47  ;;  %v2631_v28 = vmul.f32 0.17677669, %v10338_v30  ;;  %v2389_v34 = vmul.f32 0.5, %v13462_v32  ;;  %v3197_v3 = vmul.f32 0.5, %v13224_v22  ;;  %v17535_v50 = vld [vmem:[#allocation73_spill] sm:$0xff] }
 0x99f   : > { %v10340_v29 = vpop.eup %10339  ;;  %v2454_v8 = vsub.f32 %v13733_v39, %v2390_v12  ;;  %v2571_v30 = vmul.f32 1.442695, %v2452_v7  ;;  %v2392_v43 = vmul.f32 0.5, %v13613_v38  ;;  %v13744_v56 = vadd.f32 %v17535_v50, %v17476_v17 }
 0x9a0   : > { %v10342_v52 = vpop.eup %10341  ;;  %v2674_v62 = vpack.c.bf16 %v2632_v51, %v2631_v28 }
 0x9a1   : > { %17536 = vst [vmem:[#allocation81_spill] sm:$0xff] %v13744_v56  ;;  %v2575_v28 = vmul.f32 1.442695, %v2454_v8  ;;  %v2456_v63 = vsub.f32 %v13744_v56, %v2392_v43 }
 0x9a2   : > { %v10344_v61 = vpop.eup %10343 }
 0x9a3   : > { %v10346_v47 = vpop.eup %10345  ;;  %v2636_v51 = vmul.f32 0.17677669, %v10344_v61  ;;  %v17543_v61 = vld [vmem:[#allocation6_spill] sm:$0xff] }
 0x9a4   : > { %v10348_v22 = vpop.eup %10347  ;;  %v2635_v38 = vmul.f32 0.17677669, %v10346_v47  ;;  %v2393_v47 = vmul.f32 0.5, %v13472_v0 }
 0x9a5   : > { %3840 = vxpose.xlu1.c.b16.start [1/8] (narrow) %v2669_v23, 32  ;;  %v2383_v23 = vmul.f32 0.5, %v13439_v35 }
 0x9a7   : > { %v2447_v35 = vsub.f32 %v13648_v33, %v2383_v23  ;;  %v13728_v23 = vadd.f32 %v17531_v31, %v17476_v17  ;;  %v10350_v31 = vpop.eup %10349  ;;  %v17556_v33 = vld [vmem:[#allocation155_spill] sm:$0xff] }
 0x9a9   : > { %3841 = vxpose.xlu1.c.b16.cont [2/8] (narrow) %v2670_v6, 32  ;;  %v2385_v6 = vmul.f32 0.5, %v13445_v16  ;;  %v2561_v58 = vmul.f32 1.442695, %v2447_v35  ;;  %17532 = vst [vmem:[#allocation146_spill] sm:$0xff] %v13728_v23 }
 0x9ab   : > { %v2449_v16 = vsub.f32 %v13525_v49, %v2385_v6  ;;  %10353 = vpow2.f32 %v2561_v58  ;;  %v2633_v6 = vmul.f32 0.17677669, %v10342_v52  ;;  %v2453_v58 = vsub.f32 %v13559_v2, %v2389_v34 }
 0x9ac   : > { %10355 = vpow2.f32 %v2567_v15  ;;  %v17539_v15 = vld [vmem:[#allocation71_spill] sm:$0xff]  ;;  %v2638_v34 = vmul.f32 0.17677669, %v10348_v22  ;;  %v3206_v49 = vmul.f32 0.5, %v17556_v33 }
 0x9ad   : > { %3842 = vxpose.xlu1.c.b16.cont [3/8] (narrow) %v2671_v26, 32  ;;  %v2387_v26 = vmul.f32 0.5, %v13454_v25  ;;  %v2634_v25 = vmul.f32 0.17677669, %v10340_v29  ;;  %v2565_v60 = vmul.f32 1.442695, %v2449_v16  ;;  %v13754_v7 = vadd.f32 %v17539_v15, %v17476_v17 }
 0x9ae   : > { %v2391_v16 = vmul.f32 0.5, %v13468_v48  ;;  %v2573_v8 = vmul.f32 1.442695, %v2453_v58  ;;  %v17546_v15 = vld [vmem:[#allocation80_spill] sm:$0xff]  ;;  %v3270_v27 = vsub.f32 %v17557_v36, %v3206_v49  ;;  %v17559_v36 = vld [vmem:[#allocation149_spill] sm:$0xff] }
 0x9af   : > { %v2675_v32 = vpack.c.bf16 %v2634_v25, %v2633_v6  ;;  %10357 = vpow2.f32 %v2565_v60  ;;  %17540 = vst [vmem:[#allocation67_spill] sm:$0xff] %v13754_v7  ;;  %v17541_v25 = vld [vmem:[#allocation78_spill] sm:$0xff] }
 0x9b0   : > { %10359 = vpow2.f32 %v2571_v30  ;;  %v13760_v48 = vadd.f32 %v17541_v25, %v17476_v17  ;;  %v2455_v6 = vsub.f32 %v13754_v7, %v2391_v16 }
 0x9b1   : > { %3843 = vxpose.xlu1.c.b16.cont [4/8] (narrow) %v2672_v11, 32  ;;  %v2451_v11 = vsub.f32 %v13728_v23, %v2387_v26  ;;  %v17538_v26 = vld [vmem:[#allocation5_spill] sm:$0xff] }
 0x9b2   : > { %v3261_v12 = vsub.f32 %v17538_v26, %v3197_v3  ;;  %17542 = vst [vmem:[#allocation104_spill] sm:$0xff] %v13760_v48  ;;  %v10352_v3 = vpop.eup %10351 }
 0x9b3   : > { %v2569_v29 = vmul.f32 1.442695, %v2451_v11  ;;  %v2676_v11 = vpack.c.bf16 %v2636_v51, %v2635_v38  ;;  %v17544_v51 = vld [vmem:[#allocation83_spill] sm:$0xff]  ;;  %v2640_v0 = vmul.f32 0.17677669, %v10352_v3  ;;  %v2395_v38 = vmul.f32 0.5, %v13475_v4 }
 0x9b4   : > { %v3325_v30 = vmul.f32 1.442695, %v3261_v12  ;;  %v13769_v22 = vadd.f32 %v17544_v51, %v17476_v17  ;;  %v2577_v12 = vmul.f32 1.442695, %v2455_v6  ;;  %v13779_v6 = vpop.xlane.xlu0 %3054 }
 0x9b5   : > { %v2332_v46 = vpop.xlane.xlu1 %2331  ;;  %3844 = vxpose.xlu1.c.b16.cont [5/8] (narrow) %v2673_v45, 32  ;;  %v3198_v45 = vmul.f32 0.5, %v17537_v19  ;;  %10361 = vpow2.f32 %v2569_v29  ;;  %v10354_v50 = vpop.eup %10353  ;;  %v2579_v19 = vmul.f32 1.442695, %v2456_v63  ;;  %v13775_v63 = vadd.f32 %v17546_v15, %v17476_v17 }
 0x9b6   : > { %10363 = vpow2.f32 %v2575_v28  ;;  %v2396_v26 = vmul.f32 0.5, %v2332_v46  ;;  %17545 = vst [vmem:[#allocation44_spill] sm:$0xff] %v13769_v22  ;;  %v10356_v16 = vpop.eup %10355  ;;  %v2457_v28 = vsub.f32 %v13597_v59, %v2393_v47  ;;  %v2639_v46 = vmul.f32 0.17677669, %v10354_v50 }
 0x9b7   : > { %v3262_v60 = vsub.f32 %v17543_v61, %v3198_v45  ;;  %10365 = vpow2.f32 %v2573_v8  ;;  %17547 = vst [vmem:[#allocation45_spill] sm:$0xff] %v13775_v63  ;;  %v2459_v4 = vsub.f32 %v13775_v63, %v2395_v38 }
 0x9b8   : > { %10367 = vpow2.f32 %v3325_v30  ;;  %v2460_v25 = vsub.f32 %v13769_v22, %v2396_v26  ;;  %v2678_v61 = vpack.c.bf16 %v2640_v0, %v2639_v46 }
 0x9b9   : > { %v13739_v35 = vpop.xlane.xlu1 %3045  ;;  %3845 = vxpose.xlu1.c.b16.cont [6/8] (narrow) %v2674_v62, 32  ;;  %v2394_v62 = vmul.f32 0.5, %v13663_v44  ;;  %v2637_v44 = vmul.f32 0.17677669, %v10350_v31  ;;  %v3327_v29 = vmul.f32 1.442695, %v3262_v60  ;;  %v10358_v31 = vpop.eup %10357  ;;  %10369 = vpow2.f32 %v2579_v19 }
 0x9ba   : > { %v2642_v60 = vmul.f32 0.17677669, %v10356_v16  ;;  %v2641_v3 = vmul.f32 0.17677669, %v10358_v31  ;;  %v2587_v17 = vmul.f32 1.442695, %v2460_v25 }
 0x9bb   : > { %v2677_v58 = vpack.c.bf16 %v2638_v34, %v2637_v44  ;;  %10371 = vpow2.f32 %v3327_v29  ;;  %v2581_v34 = vmul.f32 1.442695, %v2457_v28  ;;  %v2585_v44 = vmul.f32 1.442695, %v2459_v4  ;;  %v13781_v29 = vpop.xlane.xlu0 %3060 }
 0x9bc   : > { %10373 = vpow2.f32 %v2577_v12  ;;  %v2679_v30 = vpack.c.bf16 %v2642_v60, %v2641_v3 }
 0x9bd   : > { %v13750_v52 = vpop.permute.xlu1 %2903  ;;  %3846 = vxpose.xlu1.c.b16.cont [7/8] (narrow) %v2675_v32, 32  ;;  %v2458_v32 = vsub.f32 %v13760_v48, %v2394_v62 }
 0x9bf   : > { %v2583_v62 = vmul.f32 1.442695, %v2458_v32  ;;  %v13783_v25 = vpop.xlane.xlu0 %3063 }
 0x9c1   : > { %v2906_v43 = vpop.permute.xlu1 %2905  ;;  %3847 = vxpose.xlu1.c.b16.end [8/8] (narrow) %v2676_v11, 32  ;;  %v10360_v11 = vpop.eup %10359  ;;  %10375 = vpow2.f32 %v2583_v62 }
 0x9c2   : > { %v3143_v45 = vsel %vm702_vm0, %v2906_v43, 0.0  ;;  %v10362_v8 = vpop.eup %10361  ;;  %v2644_v43 = vmul.f32 0.17677669, %v10360_v11  ;;  %10377 = vpow2.f32 %v2581_v34 }
 0x9c3   : > { %3144 = vadd.xlane.f32.xlu0 %v3143_v45  ;;  %v10364_v47 = vpop.eup %10363  ;;  %v2643_v50 = vmul.f32 0.17677669, %v10362_v8  ;;  %10379 = vpow2.f32 %v2587_v17 }
 0x9c4   : > { %v10366_v19 = vpop.eup %10365  ;;  %v2646_v45 = vmul.f32 0.17677669, %v10364_v47  ;;  %10381 = vpow2.f32 %v2585_v44  ;;  %v13786_v47 = vpop.permute.xlu0 %2909 }
 0x9c5   : > { %3856 = vxpose.xlu1.c.b16.start [1/8] (narrow) %v2677_v58, 32  ;;  %v10368_v32 = vpop.eup %10367  ;;  %v2680_v26 = vpack.c.bf16 %v2644_v43, %v2643_v50  ;;  %v2645_v0 = vmul.f32 0.17677669, %v10366_v19 }
 0x9c6   : > { %v10370_v51 = vpop.eup %10369  ;;  %v3453_v12 = vmul.f32 0.17677669, %v10368_v32  ;;  %v17548_v32 = vld [vmem:[#allocation121_spill] sm:$0xff] }
 0x9c7   : > { %v10372_v58 = vpop.eup %10371  ;;  %v2681_v28 = vpack.c.bf16 %v2646_v45, %v2645_v0  ;;  %v2648_v38 = vmul.f32 0.17677669, %v10370_v51  ;;  %v13798_v51 = vpop.permute.xlu1 %2907 }
 0x9c8   : > { %v10374_v16 = vpop.eup %10373  ;;  %v3454_v31 = vmul.f32 0.17677669, %v10372_v58  ;;  %v13788_v44 = vpop.xlane.xlu0 %3066 }
 0x9c9   : > { %3857 = vxpose.xlu1.c.b16.cont [2/8] (narrow) %v2678_v61, 32  ;;  %v2647_v15 = vmul.f32 0.17677669, %v10374_v16  ;;  %v17549_v16 = vld [vmem:[#allocation150_spill] sm:$0xff] }
 0x9ca   : > { %v3517_v60 = vpack.c.bf16 %v3454_v31, %v3453_v12  ;;  %v3202_v12 = vmul.f32 0.5, %v17549_v16  ;;  %v17551_v31 = vld [vmem:[#allocation15_spill] sm:$0xff]  ;;  %v9562_v16 = vpop.f32.mrb[128].mxu0 }
 0x9cb   : > { %v10376_v46 = vpop.eup %10375  ;;  %v2682_v61 = vpack.c.bf16 %v2648_v38, %v2647_v15 }
 0x9cc   : > { %v10378_v62 = vpop.eup %10377  ;;  %v2650_v11 = vmul.f32 0.17677669, %v10376_v46  ;;  %v13790_v50 = vpop.xlane.xlu0 %3072  ;;  %v3266_v15 = vsub.f32 %v17551_v31, %v3202_v12 }
 0x9cd   : > { %3858 = vxpose.xlu1.c.b16.cont [3/8] (narrow) %v2679_v30, 32  ;;  %v10380_v34 = vpop.eup %10379  ;;  %v2649_v4 = vmul.f32 0.17677669, %v10378_v62 }
 0x9ce   : > { %v10382_v3 = vpop.eup %10381  ;;  %v2652_v17 = vmul.f32 0.17677669, %v10380_v34 }
 0x9cf   : > { %v2683_v8 = vpack.c.bf16 %v2650_v11, %v2649_v4  ;;  %v2651_v30 = vmul.f32 0.17677669, %v10382_v3  ;;  %v17552_v11 = vld [vmem:[#allocation20_spill] sm:$0xff]  ;;  %v3335_v3 = vmul.f32 1.442695, %v3266_v15 }
 0x9d0   : > { %v13792_v19 = vpop.xlane.xlu0 %3075 }
 0x9d1   : > { %3859 = vxpose.xlu1.c.b16.cont [4/8] (narrow) %v2680_v26, 32  ;;  %v2684_v43 = vpack.c.bf16 %v2652_v17, %v2651_v30  ;;  %v3068_v26 = vsel %vm702_vm0, %v17548_v32, 0.0  ;;  %v2739_v17 = vmul.f32 %v13728_v23, %v13728_v23  ;;  %10383 = vpow2.f32 %v3335_v3 }
 0x9d2   : > { %v2740_v32 = vmul.f32 %v13721_v1, %v13721_v1 }
 0x9d4   : > { %v13796_v45 = vpop.permute.xlu0 %2917 }
 0x9d5   : > { %3860 = vxpose.xlu1.c.b16.cont [5/8] (narrow) %v2681_v28, 32  ;;  %v17550_v28 = vld [vmem:[#allocation151_spill] sm:$0xff] }
 0x9d6   : > { %v3201_v38 = vmul.f32 0.5, %v17550_v28  ;;  %v9563_v28 = vpop.f32.mrb[129].mxu0 }
 0x9d7   : > { %v9565_v31 = vpop.f32.mrb[130].mxu0 }
 0x9d8   : > { %v13800_v58 = vpop.xlane.xlu0 %3078  ;;  %v3265_v34 = vsub.f32 %v17552_v11, %v3201_v38  ;;  %v9566_v15 = vpop.f32.mrb[131].mxu0 }
 0x9d9   : > { %3861 = vxpose.xlu1.c.b16.cont [6/8] (narrow) %v2682_v61, 32  ;;  %4004 = vrot.lane.b32.xlu0 %v3517_v60, %s10903_s24  ;;  %v2738_v60 = vmul.f32 %v13713_v41, %v13713_v41  ;;  %v9568_v11 = vpop.f32.mrb[132].mxu0  ;;  %v3343_v41 = vmul.f32 1.442695, %v3270_v27 }
 0x9da   : > { %v3333_v30 = vmul.f32 1.442695, %v3265_v34 }
 0x9db   : > { %v10384_v38 = vpop.eup %10383 }
 0x9dc   : > { %v13808_v61 = vpop.xlane.xlu0 %3084  ;;  %10385 = vpow2.f32 %v3333_v30  ;;  %v3458_v34 = vmul.f32 0.17677669, %v10384_v38 }
 0x9dd   : > { %3862 = vxpose.xlu1.c.b16.cont [7/8] (narrow) %v2683_v8, 32  ;;  %10387 = vpow2.f32 %v3343_v41  ;;  %v17562_v41 = vld [vmem:[#allocation148_spill] sm:$0xff] }
 0x9e1   : > { %3863 = vxpose.xlu1.c.b16.end [8/8] (narrow) %v2684_v43, 32  ;;  %v13817_v43 = vpop.xlane.xlu0 %3087 }
 0x9ee   : > { %3069 = vadd.xlane.f32.xlu1 %v3068_v26  ;;  %v13823_v26 = vpop.permute.xlu0 %2925 }
 0x9f2   : > { %v13825_v12 = vpop.xlane.xlu0 %3090 }
 0x9f6   : > { %v13802_v0 = vpop.xlane.xlu1 %3057 }
 0x9fa   : > { %v2912_v46 = vpop.permute.xlu1 %2911 }
 0x9fb   : > { %v3152_v62 = vsel %vm702_vm0, %v2912_v46, 0.0  ;;  %v13827_v46 = vadd.f32 %v9563_v28, %v9562_v16 }
 0x9fc   : > { %3153 = vadd.xlane.f32.xlu0 %v3152_v62  ;;  %v10386_v62 = vpop.eup %10385 }
 0x9fe   : > { %v2914_v4 = vpop.permute.xlu1 %2913 }
 0x9ff   : > { %2919 = vrot.lane.b32.xlu1 %v2738_v60, %s10901_s22  ;;  %v3155_v8 = vsel %vm702_vm0, %v2914_v4, 0.0  ;;  %v13829_v60 = vadd.f32 %v9566_v15, %v9565_v31  ;;  %v9569_v4 = vpop.f32.mrb[133].mxu0 }
 0xa00   : > { %3156 = vadd.xlane.f32.xlu0 %v3155_v8  ;;  %v9571_v3 = vpop.f32.mrb[134].mxu0  ;;  %v3457_v8 = vmul.f32 0.17677669, %v10386_v62  ;;  %v13833_v30 = vadd.f32 %v9569_v4, %v9568_v11  ;;  %v17553_v11 = vld [vmem:[#allocation129_spill] sm:$0xff] }
 0xa01   : > { %v3080_v4 = vsel %vm702_vm0, %v17553_v11, 0.0  ;;  %v2743_v11 = vmul.f32 %v13754_v7, %v13754_v7  ;;  %v17555_v7 = vld [vmem:[#allocation135_spill] sm:$0xff] }
 0xa02   : > { %v3519_v2 = vpack.c.bf16 %v3458_v34, %v3457_v8  ;;  %v13840_v28 = vpop.permute.xlu1 %2915 }
 0xa03   : > { %2921 = vrot.lane.b32.xlu1 %v2739_v17, %s10901_s22  ;;  %v13831_v17 = vpop.xlane.xlu0 %3096 }
 0xa07   : > { %2923 = vrot.lane.b32.xlu1 %v2740_v32, %s10901_s22  ;;  %v9572_v32 = vpop.f32.mrb[135].mxu0  ;;  %v13838_v16 = vpop.xlane.xlu0 %3099 }
 0xa08   : > { %v13835_v59 = vadd.f32 %v9572_v32, %v9571_v3  ;;  %v2742_v32 = vmul.f32 %v13733_v39, %v13733_v39  ;;  %v3092_v39 = vsel %vm702_vm0, %v17555_v7, 0.0  ;;  %v2748_v7 = vmul.f32 %v13769_v22, %v13769_v22 }
 0xa0b   : > { %v13842_v31 = vpop.permute.xlu0 %2933  ;;  %v3848_v38 = vpop.trf.xlu1 }
 0xa0f   : > { %v13844_v15 = vpop.xlane.xlu0 %3102  ;;  %v3849_v62 = vpop.trf.xlu1 }
 0xa13   : > { %v13846_v23 = vpop.xlane.xlu0 %3108 }
 0xa16   : > { %4008 = vrot.lane.b32.xlu0 %v3519_v2, %s10903_s24 }
 0xa17   : > { %v13850_v2 = vpop.xlane.xlu0 %3111 }
 0xa1b   : > { %v13852_v8 = vpop.xlane.xlu0 %3114 }
 0xa1f   : > { %v13856_v1 = vpop.xlane.xlu0 %3120 }
 0xa2b   : > { %3081 = vadd.xlane.f32.xlu1 %v3080_v4  ;;  %v3864_v3 = vpop.trf.xlu1  ;;  %v13861_v4 = vpop.xlane.xlu0 %3126 }
 0xa2c   : > { %3953 = vmatprep.mubr.bf16.mxu1 %v3864_v3 }
 0xa2d   : > { %3954 = vmatmul.mubr.bf16.vlgmr.msra.gmra.mrb[0].mxu1 %v3848_v38  ;;  %v2744_v38 = vmul.f32 %v13744_v56, %v13744_v56 }
 0xa2f   : > { %v3865_v34 = vpop.trf.xlu1 }
 0xa30   : > { %3961 = vmatprep.mubr.bf16.mxu1 %v3865_v34 }
 0xa35   : > { %3962 = vmatmul.mubr.bf16.gmra.mrb[4].mxu1 %v3849_v62  ;;  %v13867_v62 = vpop.xlane.xlu0 %3132 }
 0xa39   : > { %v13869_v3 = vpop.xlane.xlu0 %3138 }
 0xa3c   : > { %2927 = vrot.lane.b32.xlu1 %v2742_v32, %s10901_s22 }
 0xa40   : > { %2929 = vrot.lane.b32.xlu1 %v2743_v11, %s10901_s22  ;;  %v2746_v11 = vmul.f32 %v13760_v48, %v13760_v48 }
 0xa44   : > { %2931 = vrot.lane.b32.xlu1 %v2744_v38, %s10901_s22  ;;  %v2747_v38 = vmul.f32 %v13775_v63, %v13775_v63 }
 0xa50   : > { %v13871_v34 = vpop.xlane.xlu0 %3144 }
 0xa51   : > { %17554 = vst [vmem:[#allocation76_spill] sm:$0xff] %v13871_v34 }
 0xa54   : > { %v4005_v32 = vpop.permute.xlu0 %4004 }
 0xa55   : > { %9748 = vmatprep.mubr.msk.bf16.mxu1 %vm4068_vm2, %v4005_v32  ;;  %v3205_v32 = vmul.f32 0.5, %v13343_v57  ;;  %v10388_v57 = vpop.eup %10387 }
 0xa56   : > { %v3462_v34 = vmul.f32 0.17677669, %v10388_v57  ;;  %v17565_v57 = vld [vmem:[#allocation9_spill] sm:$0xff] }
 0xa68   : > { %3093 = vadd.xlane.f32.xlu1 %v3092_v39 }
 0xa79   : > { %2935 = vrot.lane.b32.xlu1 %v2746_v11, %s10901_s22  ;;  %v17558_v11 = vld [vmem:[#allocation74_spill] sm:$0xff] }
 0xa7a   : > { %v3269_v63 = vsub.f32 %v17558_v11, %v3205_v32  ;;  %v17560_v32 = vld [vmem:[#allocation153_spill] sm:$0xff] }
 0xa7b   : > { %v13881_v56 = vpop.xlane.xlu1 %3069  ;;  %v3116_v27 = vsel %vm702_vm0, %v17560_v32, 0.0  ;;  %v3140_v32 = vsel %vm702_vm0, %v13750_v52, 0.0 }
 0xa7d   : > { %2937 = vrot.lane.b32.xlu1 %v2747_v38, %s10901_s22  ;;  %v3341_v38 = vmul.f32 1.442695, %v3269_v63 }
 0xa7f   : > { %v2920_v39 = vpop.permute.xlu1 %2919  ;;  %10389 = vpow2.f32 %v3341_v38  ;;  %v3134_v38 = vsel %vm702_vm0, %v13386_v42, 0.0  ;;  %v17566_v42 = vld [vmem:[#allocation88_spill] sm:$0xff] }
 0xa80   : > { %v3164_v48 = vsel %vm702_vm0, %v2920_v39, 0.0  ;;  %v17564_v39 = vld [vmem:[#allocation10_spill] sm:$0xff] }
 0xa81   : > { %2939 = vrot.lane.b32.xlu1 %v2748_v7, %s10901_s22  ;;  %3165 = vadd.xlane.f32.xlu0 %v3164_v48  ;;  %v3104_v48 = vsel %vm702_vm0, %v17559_v36, 0.0  ;;  %v3200_v7 = vmul.f32 0.5, %v17562_v41  ;;  %v3146_v41 = vsel %vm702_vm0, %v13798_v51, 0.0 }
 0xa83   : > { %v2922_v55 = vpop.permute.xlu1 %2921  ;;  %v3264_v11 = vsub.f32 %v17564_v39, %v3200_v7 }
 0xa84   : > { %v3167_v33 = vsel %vm702_vm0, %v2922_v55, 0.0  ;;  %v17561_v55 = vld [vmem:[#allocation156_spill] sm:$0xff] }
 0xa85   : > { %3168 = vadd.xlane.f32.xlu0 %v3167_v33  ;;  %v3122_v63 = vsel %vm702_vm0, %v17561_v55, 0.0  ;;  %v3331_v36 = vmul.f32 1.442695, %v3264_v11  ;;  %v3209_v55 = vmul.f32 0.5, %v13624_v53 }
 0xa87   : > { %v13905_v33 = vpop.permute.xlu1 %2923  ;;  %10391 = vpow2.f32 %v3331_v36 }
 0xa89   : > { %v10390_v22 = vpop.eup %10389 }
 0xa8a   : > { %v3461_v18 = vmul.f32 0.17677669, %v10390_v22  ;;  %v3128_v22 = vsel %vm702_vm0, %v13355_v13, 0.0  ;;  %v3210_v13 = vmul.f32 0.5, %v13739_v35 }
 0xa8c   : > { %v3521_v49 = vpack.c.bf16 %v3462_v34, %v3461_v18  ;;  %v17563_v18 = vld [vmem:[#allocation147_spill] sm:$0xff]  ;;  %v3274_v7 = vsub.f32 %v17566_v42, %v3210_v13  ;;  %v17569_v42 = vld [vmem:[#allocation152_spill] sm:$0xff] }
 0xa8d   : > { %v3199_v34 = vmul.f32 0.5, %v17563_v18  ;;  %v17567_v18 = vld [vmem:[#allocation90_spill] sm:$0xff] }
 0xa8e   : > { %v3273_v52 = vsub.f32 %v17567_v18, %v3209_v55  ;;  %v3351_v39 = vmul.f32 1.442695, %v3274_v7  ;;  %v3203_v7 = vmul.f32 0.5, %v17569_v42 }
 0xa90   : > { %v3349_v11 = vmul.f32 1.442695, %v3273_v52  ;;  %v17571_v52 = vld [vmem:[#allocation47_spill] sm:$0xff] }
 0xa91   : > { %v10392_v53 = vpop.eup %10391 }
 0xa92   : > { %v3456_v51 = vmul.f32 0.17677669, %v10392_v53 }
 0xa9b   : > { %4012 = vrot.lane.b32.xlu0 %v3521_v49, %s10903_s24  ;;  %v3263_v49 = vsub.f32 %v17565_v57, %v3199_v34 }
 0xaa5   : > { %3105 = vadd.xlane.f32.xlu1 %v3104_v48 }
 0xaa9   : > { %3117 = vadd.xlane.f32.xlu1 %v3116_v27  ;;  %v3329_v27 = vmul.f32 1.442695, %v3263_v49 }
 0xaab   : > { %10393 = vpow2.f32 %v3329_v27 }
 0xaac   : > { %10395 = vpow2.f32 %v3351_v39 }
 0xaad   : > { %3123 = vadd.xlane.f32.xlu1 %v3122_v63  ;;  %10397 = vpow2.f32 %v3349_v11  ;;  %v3149_v11 = vsel %vm702_vm0, %v13786_v47, 0.0  ;;  %v17573_v47 = vld [vmem:[#allocation100_spill] sm:$0xff] }
 0xab1   : > { %3129 = vadd.xlane.f32.xlu1 %v3128_v22 }
 0xab5   : > { %3135 = vadd.xlane.f32.xlu1 %v3134_v38  ;;  %v10394_v38 = vpop.eup %10393 }
 0xab6   : > { %v3455_v57 = vmul.f32 0.17677669, %v10394_v38  ;;  %v10396_v36 = vpop.eup %10395 }
 0xab7   : > { %v3466_v27 = vmul.f32 0.17677669, %v10396_v36 }
 0xab8   : > { %v3082_v48 = vpop.xlane.xlu1 %3081  ;;  %v3518_v49 = vpack.c.bf16 %v3456_v51, %v3455_v57  ;;  %v3158_v51 = vsel %vm702_vm0, %v13840_v28, 0.0  ;;  %v3214_v57 = vmul.f32 0.5, %v13802_v0 }
 0xab9   : > { %3141 = vadd.xlane.f32.xlu1 %v3140_v32  ;;  %v10398_v32 = vpop.eup %10397 }
 0xaba   : > { %v3465_v13 = vmul.f32 0.17677669, %v10398_v32  ;;  %v17572_v32 = vld [vmem:[#allocation97_spill] sm:$0xff] }
 0xabc   : > { %v2928_v63 = vpop.permute.xlu1 %2927  ;;  %v3523_v55 = vpack.c.bf16 %v3466_v27, %v3465_v13  ;;  %v3278_v27 = vsub.f32 %v17572_v32, %v3214_v57  ;;  %v3222_v13 = vmul.f32 0.5, %v3082_v48 }
 0xabd   : > { %3147 = vadd.xlane.f32.xlu1 %v3146_v41  ;;  %v3176_v22 = vsel %vm702_vm0, %v2928_v63, 0.0  ;;  %v17568_v63 = vld [vmem:[#allocation154_spill] sm:$0xff] }
 0xabe   : > { %3177 = vadd.xlane.f32.xlu0 %v3176_v22  ;;  %v3204_v41 = vmul.f32 0.5, %v17568_v63  ;;  %v17570_v22 = vld [vmem:[#allocation42_spill] sm:$0xff]  ;;  %v3359_v28 = vmul.f32 1.442695, %v3278_v27 }
 0xac0   : > { %v2930_v34 = vpop.permute.xlu1 %2929  ;;  %v3268_v18 = vsub.f32 %v17570_v22, %v3204_v41  ;;  %v3221_v41 = vmul.f32 0.5, %v13800_v58  ;;  %v17574_v22 = vld [vmem:[#allocation117_spill] sm:$0xff] }
 0xac1   : > { %v3179_v35 = vsel %vm702_vm0, %v2930_v34, 0.0  ;;  %v3267_v34 = vsub.f32 %v17571_v52, %v3203_v7 }
 0xac2   : > { %3180 = vadd.xlane.f32.xlu0 %v3179_v35  ;;  %v3339_v39 = vmul.f32 1.442695, %v3268_v18  ;;  %v3286_v18 = vsub.f32 %v17574_v22, %v3222_v13 }
 0xac3   : > { %v3337_v53 = vmul.f32 1.442695, %v3267_v34 }
 0xac4   : > { %v13926_v35 = vpop.permute.xlu1 %2931  ;;  %10399 = vpow2.f32 %v3339_v39  ;;  %v17575_v39 = vld [vmem:[#allocation120_spill] sm:$0xff]  ;;  %v3375_v58 = vmul.f32 1.442695, %v3286_v18 }
 0xac5   : > { %10401 = vpow2.f32 %v3337_v53  ;;  %v3285_v48 = vsub.f32 %v17575_v39, %v3221_v41 }
 0xac6   : > { %10403 = vpow2.f32 %v3359_v28 }
 0xace   : > { %4006 = vrot.lane.b32.xlu1 %v3518_v49, %s10903_s24  ;;  %v3213_v49 = vmul.f32 0.5, %v13779_v6  ;;  %v10400_v7 = vpop.eup %10399 }
 0xacf   : > { %v10402_v34 = vpop.eup %10401 }
 0xad0   : > { %v3277_v63 = vsub.f32 %v17573_v47, %v3213_v49  ;;  %v17576_v49 = vld [vmem:[#allocation127_spill] sm:$0xff]  ;;  %v3459_v13 = vmul.f32 0.17677669, %v10402_v34  ;;  %v17577_v47 = vld [vmem:[#allocation128_spill] sm:$0xff] }
 0xad2   : > { %v3357_v6 = vmul.f32 1.442695, %v3277_v63 }
 0xad4   : > { %10405 = vpow2.f32 %v3357_v6 }
 0xad5   : > { %10407 = vpow2.f32 %v3375_v58 }
 0xad8   : > { %4016 = vrot.lane.b32.xlu0 %v3523_v55, %s10903_s24 }
 0xaf2   : > { %3150 = vadd.xlane.f32.xlu1 %v3149_v11  ;;  %v3225_v11 = vmul.f32 0.5, %v13825_v12 }
 0xaf4   : > { %v3289_v63 = vsub.f32 %v17577_v47, %v3225_v11 }
 0xaf5   : > { %v3094_v38 = vpop.xlane.xlu1 %3093 }
 0xaf6   : > { %3159 = vadd.xlane.f32.xlu1 %v3158_v51  ;;  %v3226_v0 = vmul.f32 0.5, %v3094_v38  ;;  %v3460_v51 = vmul.f32 0.17677669, %v10400_v7  ;;  %v3381_v28 = vmul.f32 1.442695, %v3289_v63 }
 0xaf8   : > { %v3520_v22 = vpack.c.bf16 %v3460_v51, %v3459_v13 }
 0xaf9   : > { %v2936_v36 = vpop.permute.xlu1 %2935 }
 0xafa   : > { %v3188_v55 = vsel %vm702_vm0, %v2936_v36, 0.0  ;;  %v3290_v36 = vsub.f32 %v17576_v49, %v3226_v0 }
 0xafb   : > { %3189 = vadd.xlane.f32.xlu0 %v3188_v55  ;;  %v3373_v55 = vmul.f32 1.442695, %v3285_v48 }
 0xafc   : > { %v3383_v12 = vmul.f32 1.442695, %v3290_v36 }
 0xafd   : > { %v2938_v42 = vpop.permute.xlu1 %2937  ;;  %10409 = vpow2.f32 %v3373_v55 }
 0xafe   : > { %v3191_v52 = vsel %vm702_vm0, %v2938_v42, 0.0  ;;  %10411 = vpow2.f32 %v3383_v12 }
 0xaff   : > { %3192 = vadd.xlane.f32.xlu0 %v3191_v52  ;;  %10413 = vpow2.f32 %v3381_v28 }
 0xb00   : > { %v9590_v53 = vpop.f32.mrb[0].mxu1 }
 0xb01   : > { %v9591_v57 = vpop.f32.mrb[1].mxu1 }
 0xb02   : > { %v9592_v32 = vadd.f32 %v9591_v57, %v9590_v53  ;;  %v9593_v27 = vpop.f32.mrb[2].mxu1 }
 0xb03   : > { %v9594_v38 = vpop.f32.mrb[3].mxu1 }
 0xb04   : > { %v3956_v42 = vadd.f32 %v9592_v32, %v13827_v46  ;;  %v9595_v41 = vadd.f32 %v9594_v38, %v9593_v27  ;;  %v10404_v46 = vpop.eup %10403 }
 0xb05   : > { %v10406_v53 = vpop.eup %10405  ;;  %v3470_v51 = vmul.f32 0.17677669, %v10404_v46 }
 0xb06   : > { %v3959_v7 = vadd.f32 %v9595_v41, %v13829_v60  ;;  %v10408_v57 = vpop.eup %10407  ;;  %v3469_v49 = vmul.f32 0.17677669, %v10406_v53  ;;  %v3233_v53 = vmul.f32 0.5, %v13852_v8 }
 0xb07   : > { %4010 = vrot.lane.b32.xlu1 %v3520_v22, %s10903_s24  ;;  %v10410_v36 = vpop.eup %10409  ;;  %v3478_v32 = vmul.f32 0.17677669, %v10408_v57  ;;  %v17579_v22 = vld [vmem:[#allocation157_spill] sm:$0xff] }
 0xb08   : > { %v9596_v18 = vpop.f32.mrb[4].mxu1  ;;  %v3970_v0 = vpack.c.bf16 %v3959_v7, %v3956_v42  ;;  %v3525_v27 = vpack.c.bf16 %v3470_v51, %v3469_v49  ;;  %v10412_v13 = vpop.eup %10411  ;;  %v3477_v38 = vmul.f32 0.17677669, %v10410_v36  ;;  %v17578_v42 = vld [vmem:[#allocation158_spill] sm:$0xff]  ;;  %v3207_v12 = vmul.f32 0.5, %v17579_v22  ;;  %v17580_v7 = vld [vmem:[#allocation85_spill] sm:$0xff] }
 0xb09   : > { %v9597_v52 = vpop.f32.mrb[5].mxu1  ;;  %v10414_v55 = vpop.eup %10413  ;;  %v3482_v47 = vmul.f32 0.17677669, %v10412_v13  ;;  %v3208_v41 = vmul.f32 0.5, %v17578_v42 }
 0xb0a   : > { %v9598_v6 = vadd.f32 %v9597_v52, %v9596_v18  ;;  %v9599_v34 = vpop.f32.mrb[6].mxu1  ;;  %9744 = vmatprep.subr.bf16.mxu1 %v3970_v0  ;;  %v3481_v63 = vmul.f32 0.17677669, %v10414_v55  ;;  %v17581_v18 = vld [vmem:[#allocation86_spill] sm:$0xff] }
 0xb0b   : > { %v9600_v39 = vpop.f32.mrb[7].mxu1  ;;  %9745 = vmatpush3.bf16.msra.mxu1 %v3970_v0  ;;  %v3272_v28 = vsub.f32 %v17580_v7, %v3208_v41  ;;  %v3271_v0 = vsub.f32 %v17581_v18, %v3207_v12 }
 0xb0c   : > { %v3964_v48 = vadd.f32 %v9598_v6, %v13833_v30  ;;  %v9601_v11 = vadd.f32 %v9600_v39, %v9599_v34  ;;  %v3529_v30 = vpack.c.bf16 %v3478_v32, %v3477_v38  ;;  %v3229_v6 = vmul.f32 0.5, %v13844_v15 }
 0xb0d   : > { %v3347_v52 = vmul.f32 1.442695, %v3272_v28  ;;  %v3161_v34 = vsel %vm702_vm0, %v13796_v45, 0.0  ;;  %v3345_v39 = vmul.f32 1.442695, %v3271_v0  ;;  %v3297_v15 = vsub.f32 %v17520_v54, %v3233_v53  ;;  %v17582_v45 = vld [vmem:[#allocation19_spill] sm:$0xff]  ;;  %v3154_v28 = vpop.xlane.xlu0 %3153 }
 0xb0e   : > { %v3967_v60 = vadd.f32 %v9601_v11, %v13835_v59  ;;  %v3531_v59 = vpack.c.bf16 %v3482_v47, %v3481_v63  ;;  %v3293_v46 = vsub.f32 %v17516_v14, %v3229_v6  ;;  %v3170_v11 = vsel %vm702_vm0, %v13905_v33, 0.0 }
 0xb0f   : > { %10415 = vpow2.f32 %v3347_v52  ;;  %v3397_v14 = vmul.f32 1.442695, %v3297_v15  ;;  %v3237_v32 = vmul.f32 0.5, %v13861_v4  ;;  %v3241_v4 = vmul.f32 0.5, %v13869_v3 }
 0xb10   : > { %v3971_v58 = vpack.c.bf16 %v3967_v60, %v3964_v48  ;;  %v13960_v48 = vpop.permute.xlu1 %2939  ;;  %10417 = vpow2.f32 %v3345_v39  ;;  %v3389_v60 = vmul.f32 1.442695, %v3293_v46 }
 0xb11   : > { %v3301_v54 = vsub.f32 %v17524_v20, %v3237_v32  ;;  %v3305_v20 = vsub.f32 %v13452_v40, %v3241_v4  ;;  %v17586_v4 = vld [vmem:[#allocation96_spill] sm:$0xff] }
 0xb12   : > { %9746 = vmatprep.subr.bf16.mxu1 %v3971_v58  ;;  %10419 = vpow2.f32 %v3389_v60 }
 0xb13   : > { %9747 = vmatpush3.bf16.msra.mxu1 %v3971_v58  ;;  %v3405_v42 = vmul.f32 1.442695, %v3301_v54  ;;  %v3413_v46 = vmul.f32 1.442695, %v3305_v20  ;;  %v3182_v20 = vsel %vm702_vm0, %v13926_v35, 0.0 }
 0xb15   : > { %4020 = vrot.lane.b32.xlu0 %v3525_v27, %s10903_s24 }
 0xb19   : > { %4028 = vrot.lane.b32.xlu0 %v3529_v30, %s10903_s24  ;;  %v10416_v36 = vpop.eup %10415 }
 0xb1a   : > { %v10418_v33 = vpop.eup %10417  ;;  %v3464_v38 = vmul.f32 0.17677669, %v10416_v36 }
 0xb1b   : > { %v3463_v30 = vmul.f32 0.17677669, %v10418_v33 }
 0xb1c   : > { %v10420_v22 = vpop.eup %10419 }
 0xb1d   : > { %4032 = vrot.lane.b32.xlu0 %v3531_v59, %s10903_s24  ;;  %v3522_v59 = vpack.c.bf16 %v3464_v38, %v3463_v30  ;;  %v3485_v0 = vmul.f32 0.17677669, %v10420_v22  ;;  %v17583_v38 = vld [vmem:[#allocation144_spill] sm:$0xff] }
 0xb1e   : > { %v3212_v54 = vmul.f32 0.5, %v17583_v38  ;;  %v17584_v30 = vld [vmem:[#allocation72_spill] sm:$0xff] }
 0xb2b   : > { %3162 = vadd.xlane.f32.xlu1 %v3161_v34 }
 0xb2f   : > { %3171 = vadd.xlane.f32.xlu1 %v3170_v11 }
 0xb32   : > { %v3106_v51 = vpop.xlane.xlu1 %3105 }
 0xb33   : > { %v3230_v57 = vmul.f32 0.5, %v3106_v51 }
 0xb35   : > { %v3294_v58 = vsub.f32 %v17582_v45, %v3230_v57 }
 0xb36   : > { %v3118_v49 = vpop.xlane.xlu1 %3117 }
 0xb37   : > { %v3391_v27 = vmul.f32 1.442695, %v3294_v58  ;;  %v3234_v13 = vmul.f32 0.5, %v3118_v49 }
 0xb39   : > { %10421 = vpow2.f32 %v3391_v27  ;;  %v3298_v8 = vsub.f32 %v17519_v5, %v3234_v13 }
 0xb3a   : > { %v13969_v55 = vpop.xlane.xlu1 %3123  ;;  %10423 = vpow2.f32 %v3397_v14 }
 0xb3b   : > { %v3399_v47 = vmul.f32 1.442695, %v3298_v8 }
 0xb3d   : > { %10425 = vpow2.f32 %v3399_v47 }
 0xb3e   : > { %v3130_v63 = vpop.xlane.xlu1 %3129  ;;  %10427 = vpow2.f32 %v3405_v42 }
 0xb3f   : > { %v3238_v41 = vmul.f32 0.5, %v3130_v63  ;;  %v3211_v63 = vmul.f32 0.5, %v17584_v30 }
 0xb40   : > { %4014 = vrot.lane.b32.xlu1 %v3522_v59, %s10903_s24  ;;  %v17585_v59 = vld [vmem:[#allocation92_spill] sm:$0xff] }
 0xb41   : > { %v3302_v5 = vsub.f32 %v17523_v21, %v3238_v41  ;;  %v13979_v21 = vpop.xlane.xlu0 %3156  ;;  %v3276_v42 = vsub.f32 %v17585_v59, %v3212_v54  ;;  %v3275_v41 = vsub.f32 %v17586_v4, %v3211_v63  ;;  %v3220_v54 = vmul.f32 0.5, %v13792_v19  ;;  %v17591_v4 = vld [vmem:[#allocation112_spill] sm:$0xff] }
 0xb42   : > { %v13975_v12 = vpop.xlane.xlu1 %3135  ;;  %v3194_v19 = vsel %vm702_vm0, %v13960_v48, 0.0  ;;  %v17595_v48 = vld [vmem:[#allocation16_spill] sm:$0xff] }
 0xb43   : > { %v10422_v7 = vpop.eup %10421  ;;  %v3407_v18 = vmul.f32 1.442695, %v3302_v5  ;;  %v3355_v22 = vmul.f32 1.442695, %v3276_v42  ;;  %v3173_v5 = vsel %vm702_vm0, %v13823_v26, 0.0  ;;  %v3219_v42 = vmul.f32 0.5, %v13790_v50 }
 0xb44   : > { %v3486_v52 = vmul.f32 0.17677669, %v10422_v7  ;;  %v10424_v6 = vpop.eup %10423  ;;  %v3353_v7 = vmul.f32 1.442695, %v3275_v41  ;;  %v3284_v41 = vsub.f32 %v17591_v4, %v3220_v54  ;;  %v17602_v4 = vld [vmem:[#allocation76_spill] sm:$0xff] }
 0xb45   : > { %10429 = vpow2.f32 %v3407_v18  ;;  %v3489_v53 = vmul.f32 0.17677669, %v10424_v6  ;;  %v4009_v36 = vpop.permute.xlu0 %4008 }
 0xb46   : > { %v3142_v34 = vpop.xlane.xlu1 %3141  ;;  %v3533_v3 = vpack.c.bf16 %v3486_v52, %v3485_v0  ;;  %10431 = vpow2.f32 %v3413_v46  ;;  %v3371_v50 = vmul.f32 1.442695, %v3284_v41  ;;  %v3243_v41 = vmul.f32 0.5, %v17602_v4 }
 0xb47   : > { %v10426_v39 = vpop.eup %10425  ;;  %v3242_v11 = vmul.f32 0.5, %v3142_v34 }
 0xb48   : > { %v3490_v60 = vmul.f32 0.17677669, %v10426_v39  ;;  %4036 = vrot.lane.b32.xlu0 %v3533_v3, %s10903_s24  ;;  %v10428_v45 = vpop.eup %10427  ;;  %v3246_v3 = vmul.f32 0.5, %v3154_v28 }
 0xb49   : > { %v3306_v51 = vsub.f32 %v13587_v9, %v3242_v11  ;;  %v3493_v14 = vmul.f32 0.17677669, %v10428_v45  ;;  %v13999_v46 = vpop.xlane.xlu0 %3165 }
 0xb4a   : > { %v13982_v40 = vpop.xlane.xlu1 %3147  ;;  %v3535_v15 = vpack.c.bf16 %v3490_v60, %v3489_v53  ;;  %v3310_v39 = vsub.f32 %v13638_v37, %v3246_v3 }
 0xb4b   : > { %v3415_v57 = vmul.f32 1.442695, %v3306_v51 }
 0xb4c   : > { %4040 = vrot.lane.b32.xlu0 %v3535_v15, %s10903_s24  ;;  %v3423_v11 = vmul.f32 1.442695, %v3310_v39  ;;  %v3232_v39 = vmul.f32 0.5, %v13850_v2 }
 0xb4d   : > { %10433 = vpow2.f32 %v3415_v57  ;;  %v14001_v60 = vpop.xlane.xlu0 %3168 }
 0xb4e   : > { %v4007_v58 = vpop.permute.xlu1 %4006  ;;  %10435 = vpow2.f32 %v3355_v22  ;;  %v3223_v22 = vmul.f32 0.5, %v13808_v61  ;;  %v3227_v61 = vmul.f32 0.5, %v13831_v17  ;;  %v3236_v17 = vmul.f32 0.5, %v13969_v55 }
 0xb4f   : > { %v10430_v49 = vpop.eup %10429  ;;  %9749 = vmatmul.mubr.msk.bf16.vlgmr.msra.gmra.mrb[8].mxu1 %vm4068_vm2, %v4007_v58  ;;  %10437 = vpow2.f32 %v3353_v7 }
 0xb50   : > { %v3494_v32 = vmul.f32 0.17677669, %v10430_v49  ;;  %9752 = vmatprep.mubr.msk.bf16.mxu1 %vm4068_vm2, %v4009_v36  ;;  %v10432_v9 = vpop.eup %10431  ;;  %10439 = vpow2.f32 %v3423_v11  ;;  %v3216_v36 = vmul.f32 0.5, %v13783_v25  ;;  %v3185_v25 = vsel %vm702_vm0, %v13842_v31, 0.0  ;;  %v17592_v31 = vld [vmem:[#allocation115_spill] sm:$0xff] }
 0xb51   : > { %v3497_v33 = vmul.f32 0.17677669, %v10432_v9  ;;  %v4013_v28 = vpop.permute.xlu0 %4012  ;;  %v3218_v9 = vmul.f32 0.5, %v13881_v56  ;;  %v3224_v56 = vmul.f32 0.5, %v13817_v43  ;;  %v3283_v7 = vsub.f32 %v17592_v31, %v3219_v42  ;;  %v17594_v43 = vld [vmem:[#allocation125_spill] sm:$0xff] }
 0xb52   : > { %v3537_v27 = vpack.c.bf16 %v3494_v32, %v3493_v14  ;;  %v17587_v32 = vld [vmem:[#allocation101_spill] sm:$0xff] }
 0xb53   : > { %v17601_v42 = vld [vmem:[#allocation37_spill] sm:$0xff] }
 0xb54   : > { %4044 = vrot.lane.b32.xlu0 %v3537_v27, %s10903_s24  ;;  %v3280_v27 = vsub.f32 %v17587_v32, %v3216_v36  ;;  %v3235_v36 = vmul.f32 0.5, %v13856_v1 }
 0xb56   : > { %v3363_v38 = vmul.f32 1.442695, %v3280_v27 }
 0xb57   : > { %v10434_v13 = vpop.eup %10433 }
 0xb58   : > { %v3498_v8 = vmul.f32 0.17677669, %v10434_v13  ;;  %v10436_v18 = vpop.eup %10435  ;;  %v17588_v13 = vld [vmem:[#allocation106_spill] sm:$0xff] }
 0xb59   : > { %v10438_v0 = vpop.eup %10437  ;;  %v3468_v52 = vmul.f32 0.17677669, %v10436_v18 }
 0xb5a   : > { %v3539_v47 = vpack.c.bf16 %v3498_v8, %v3497_v33  ;;  %v3467_v6 = vmul.f32 0.17677669, %v10438_v0  ;;  %v10440_v37 = vpop.eup %10439  ;;  %v3217_v8 = vmul.f32 0.5, %v13788_v44  ;;  %v3228_v0 = vmul.f32 0.5, %v13838_v16 }
 0xb5b   : > { %v3502_v58 = vmul.f32 0.17677669, %v10440_v37  ;;  %v3231_v16 = vmul.f32 0.5, %v13846_v23  ;;  %v17598_v23 = vld [vmem:[#allocation30_spill] sm:$0xff] }
 0xb5c   : > { %4048 = vrot.lane.b32.xlu0 %v3539_v47, %s10903_s24  ;;  %v3524_v34 = vpack.c.bf16 %v3468_v52, %v3467_v6  ;;  %v17589_v47 = vld [vmem:[#allocation107_spill] sm:$0xff]  ;;  %v3287_v52 = vsub.f32 %v17594_v43, %v3223_v22  ;;  %v3369_v6 = vmul.f32 1.442695, %v3283_v7  ;;  %v3292_v3 = vsub.f32 %v17595_v48, %v3228_v0  ;;  %v17604_v7 = vld [vmem:[#allocation48_spill] sm:$0xff] }
 0xb5d   : > { %v3282_v30 = vsub.f32 %v17589_v47, %v3218_v9  ;;  %v3300_v27 = vsub.f32 %v17598_v23, %v3236_v17  ;;  %v3240_v9 = vmul.f32 0.5, %v13975_v12  ;;  %v3250_v47 = vmul.f32 0.5, %v13999_v46  ;;  %v17600_v12 = vld [vmem:[#allocation39_spill] sm:$0xff]  ;;  %v17603_v46 = vld [vmem:[#allocation57_spill] sm:$0xff] }
 0xb5f   : > { %v3367_v44 = vmul.f32 1.442695, %v3282_v30  ;;  %v3244_v30 = vmul.f32 0.5, %v13982_v40 }
 0xb64   : > { %3174 = vadd.xlane.f32.xlu1 %v3173_v5 }
 0xb68   : > { %3183 = vadd.xlane.f32.xlu1 %v3182_v20  ;;  %v17593_v20 = vld [vmem:[#allocation122_spill] sm:$0xff] }
 0xb69   : > { %v3288_v18 = vsub.f32 %v17593_v20, %v3224_v56  ;;  %v3308_v20 = vsub.f32 %v17604_v7, %v3244_v30 }
 0xb79   : > { %4018 = vrot.lane.b32.xlu1 %v3524_v34, %s10903_s24  ;;  %v3379_v34 = vmul.f32 1.442695, %v3288_v18 }
 0xb7f   : > { %v3151_v26 = vpop.xlane.xlu1 %3150 }
 0xb80   : > { %v3245_v53 = vmul.f32 0.5, %v3151_v26  ;;  %v3377_v26 = vmul.f32 1.442695, %v3287_v52  ;;  %v17605_v52 = vld [vmem:[#allocation143_spill] sm:$0xff] }
 0xb82   : > { %v3309_v35 = vsub.f32 %v13494_v24, %v3245_v53  ;;  %v3215_v24 = vmul.f32 0.5, %v13781_v29  ;;  %v17590_v29 = vld [vmem:[#allocation111_spill] sm:$0xff]  ;;  %v17596_v53 = vld [vmem:[#allocation14_spill] sm:$0xff] }
 0xb83   : > { %v14004_v51 = vpop.xlane.xlu1 %3159  ;;  %v3281_v59 = vsub.f32 %v17590_v29, %v3217_v8  ;;  %v3304_v29 = vsub.f32 %v17600_v12, %v3240_v9  ;;  %v17609_v9 = vld [vmem:[#allocation77_spill] sm:$0xff] }
 0xb84   : > { %v3421_v15 = vmul.f32 1.442695, %v3309_v35  ;;  %v3279_v33 = vsub.f32 %v17588_v13, %v3215_v24  ;;  %v3291_v35 = vsub.f32 %v17596_v53, %v3227_v61  ;;  %v3248_v0 = vmul.f32 0.5, %v14004_v51  ;;  %v17606_v51 = vld [vmem:[#allocation126_spill] sm:$0xff] }
 0xb85   : > { %v3365_v5 = vmul.f32 1.442695, %v3281_v59  ;;  %v3247_v61 = vmul.f32 0.5, %v13979_v21  ;;  %v3419_v53 = vmul.f32 1.442695, %v3308_v20 }
 0xb86   : > { %10441 = vpow2.f32 %v3421_v15  ;;  %v3361_v63 = vmul.f32 1.442695, %v3279_v33 }
 0xb87   : > { %v4011_v57 = vpop.permute.xlu1 %4010  ;;  %10443 = vpow2.f32 %v3363_v38  ;;  %v17599_v38 = vld [vmem:[#allocation28_spill] sm:$0xff] }
 0xb88   : > { %9753 = vmatmul.mubr.msk.bf16.gmra.mrb[12].mxu1 %vm4068_vm2, %v4011_v57  ;;  %10445 = vpow2.f32 %v3361_v63  ;;  %v3387_v57 = vmul.f32 1.442695, %v3292_v3  ;;  %v3299_v54 = vsub.f32 %v17599_v38, %v3235_v36  ;;  %v3403_v63 = vmul.f32 1.442695, %v3300_v27 }
 0xb89   : > { %9756 = vmatprep.mubr.msk.bf16.mxu1 %vm4068_vm2, %v4013_v28  ;;  %10447 = vpow2.f32 %v3367_v44  ;;  %v3296_v28 = vsub.f32 %v17517_v10, %v3232_v39  ;;  %v3239_v10 = vmul.f32 0.5, %v13867_v62  ;;  %v3251_v36 = vmul.f32 0.5, %v14001_v60 }
 0xb8a   : > { %10449 = vpow2.f32 %v3365_v5  ;;  %v3401_v22 = vmul.f32 1.442695, %v3299_v54  ;;  %v14050_v5 = vpop.xlane.xlu0 %3177  ;;  %v17610_v54 = vld [vmem:[#allocation146_spill] sm:$0xff] }
 0xb8b   : > { %10451 = vpow2.f32 %v3371_v50  ;;  %v3395_v32 = vmul.f32 1.442695, %v3296_v28  ;;  %v3303_v56 = vsub.f32 %v17601_v42, %v3239_v10  ;;  %v3411_v50 = vmul.f32 1.442695, %v3304_v29 }
 0xb8c   : > { %10453 = vpow2.f32 %v3369_v6  ;;  %v3307_v6 = vsub.f32 %v17605_v52, %v3243_v41 }
 0xb8d   : > { %10455 = vpow2.f32 %v3379_v34  ;;  %v3409_v43 = vmul.f32 1.442695, %v3303_v56 }
 0xb8e   : > { %10457 = vpow2.f32 %v3377_v26 }
 0xb8f   : > { %10459 = vpow2.f32 %v3387_v57  ;;  %v17607_v57 = vld [vmem:[#allocation3_spill] sm:$0xff] }
 0xb90   : > { %v10442_v45 = vpop.eup %10441 }
 0xb91   : > { %v3501_v49 = vmul.f32 0.17677669, %v10442_v45  ;;  %v10444_v11 = vpop.eup %10443 }
 0xb92   : > { %v10446_v15 = vpop.eup %10445  ;;  %v3472_v37 = vmul.f32 0.17677669, %v10444_v11 }
 0xb93   : > { %v3541_v14 = vpack.c.bf16 %v3502_v58, %v3501_v49  ;;  %v10448_v45 = vpop.eup %10447  ;;  %v3385_v58 = vmul.f32 1.442695, %v3291_v35  ;;  %v17597_v49 = vld [vmem:[#allocation21_spill] sm:$0xff] }
 0xb94   : > { %v3295_v2 = vsub.f32 %v17597_v49, %v3231_v16  ;;  %v10450_v24 = vpop.eup %10449  ;;  %v3474_v13 = vmul.f32 0.17677669, %v10448_v45  ;;  %v14058_v16 = vpop.xlane.xlu0 %3180  ;;  %v17608_v45 = vld [vmem:[#allocation145_spill] sm:$0xff] }
 0xb95   : > { %4052 = vrot.lane.b32.xlu0 %v3541_v14, %s10903_s24  ;;  %v3471_v14 = vmul.f32 0.17677669, %v10446_v15  ;;  %v10452_v33 = vpop.eup %10451  ;;  %10461 = vpow2.f32 %v3385_v58  ;;  %v3473_v1 = vmul.f32 0.17677669, %v10450_v24  ;;  %v3312_v15 = vsub.f32 %v17606_v51, %v3248_v0  ;;  %v17611_v51 = vld [vmem:[#allocation132_spill] sm:$0xff] }
 0xb96   : > { %v3393_v8 = vmul.f32 1.442695, %v3295_v2  ;;  %10463 = vpow2.f32 %v3395_v32  ;;  %v3476_v59 = vmul.f32 0.17677669, %v10452_v33  ;;  %v3311_v58 = vsub.f32 %v17608_v45, %v3247_v61 }
 0xb97   : > { %v3526_v55 = vpack.c.bf16 %v3472_v37, %v3471_v14  ;;  %v3527_v44 = vpack.c.bf16 %v3474_v13, %v3473_v1  ;;  %v3417_v37 = vmul.f32 1.442695, %v3307_v6  ;;  %v3427_v27 = vmul.f32 1.442695, %v3312_v15 }
 0xb98   : > { %10465 = vpow2.f32 %v3393_v8  ;;  %v3425_v38 = vmul.f32 1.442695, %v3311_v58  ;;  %v4017_v60 = vpop.permute.xlu0 %4016 }
 0xb99   : > { %10467 = vpow2.f32 %v3403_v63  ;;  %v10904_v63 = vmov 64  }
 0xb9a   : > { %10469 = vpow2.f32 %v3401_v22  ;;  %10066 = vset.pattern.permute.xlu0 %v10904_v63  ;;  %10065 = vset.pattern.permute.xlu1 %v10904_v63 }
 0xb9b   : > { %10471 = vpow2.f32 %v3411_v50 }
 0xb9c   : > { %10473 = vpow2.f32 %v3409_v43 }
 0xb9d   : > { %3186 = vadd.xlane.f32.xlu1 %v3185_v25  ;;  %v10454_v25 = vpop.eup %10453 }
 0xb9e   : > { %v10456_v62 = vpop.eup %10455  ;;  %v3475_v31 = vmul.f32 0.17677669, %v10454_v25 }
 0xb9f   : > { %v10458_v40 = vpop.eup %10457  ;;  %v3480_v18 = vmul.f32 0.17677669, %v10456_v62 }
 0xba0   : > { %v3528_v48 = vpack.c.bf16 %v3476_v59, %v3475_v31  ;;  %v10460_v3 = vpop.eup %10459  ;;  %v3479_v39 = vmul.f32 0.17677669, %v10458_v40 }
 0xba1   : > { %3195 = vadd.xlane.f32.xlu1 %v3194_v19  ;;  %v3314_v19 = vsub.f32 %v17603_v46, %v3250_v47  ;;  %v10462_v35 = vpop.eup %10461  ;;  %v3484_v21 = vmul.f32 0.17677669, %v10460_v3  ;;  %v3315_v47 = vsub.f32 %v17610_v54, %v3251_v36 }
 0xba2   : > { %v3530_v17 = vpack.c.bf16 %v3480_v18, %v3479_v39  ;;  %v10464_v2 = vpop.eup %10463  ;;  %v3483_v32 = vmul.f32 0.17677669, %v10462_v35  ;;  %v3254_v35 = vmul.f32 0.5, %v14050_v5  ;;  %v17614_v5 = vld [vmem:[#allocation81_spill] sm:$0xff] }
 0xba3   : > { %v3431_v26 = vmul.f32 1.442695, %v3314_v19  ;;  %v10466_v23 = vpop.eup %10465  ;;  %v3488_v13 = vmul.f32 0.17677669, %v10464_v2  ;;  %v3433_v59 = vmul.f32 1.442695, %v3315_v47 }
 0xba4   : > { %v3532_v33 = vpack.c.bf16 %v3484_v21, %v3483_v32  ;;  %v10468_v8 = vpop.eup %10467  ;;  %v3487_v1 = vmul.f32 0.17677669, %v10466_v23  ;;  %v3318_v15 = vsub.f32 %v17611_v51, %v3254_v35  ;;  %v17613_v2 = vld [vmem:[#allocation141_spill] sm:$0xff] }
 0xba5   : > { %10475 = vpow2.f32 %v3431_v26  ;;  %v10470_v30 = vpop.eup %10469  ;;  %v3492_v12 = vmul.f32 0.17677669, %v10468_v8 }
 0xba6   : > { %10477 = vpow2.f32 %v3419_v53  ;;  %v3534_v29 = vpack.c.bf16 %v3488_v13, %v3487_v1  ;;  %v10472_v62 = vpop.eup %10471  ;;  %v3491_v56 = vmul.f32 0.17677669, %v10470_v30  ;;  %v3439_v21 = vmul.f32 1.442695, %v3318_v15 }
 0xba7   : > { %v10474_v42 = vpop.eup %10473 }
 0xba8   : > { %v3536_v22 = vpack.c.bf16 %v3492_v12, %v3491_v56  ;;  %v3495_v19 = vmul.f32 0.17677669, %v10474_v42 }
 0xbaf   : > { %v10476_v4 = vpop.eup %10475 }
 0xbb0   : > { %v10478_v41 = vpop.eup %10477  ;;  %v3506_v40 = vmul.f32 0.17677669, %v10476_v4 }
 0xbb1   : > { %v3500_v20 = vmul.f32 0.17677669, %v10478_v41 }
 0xbb2   : > { %4022 = vrot.lane.b32.xlu1 %v3526_v55, %s10903_s24 }
 0xbb6   : > { %4024 = vrot.lane.b32.xlu1 %v3527_v44, %s10903_s24  ;;  %v3496_v44 = vmul.f32 0.17677669, %v10472_v62 }
 0xbb8   : > { %v3163_v34 = vpop.xlane.xlu1 %3162  ;;  %v3538_v18 = vpack.c.bf16 %v3496_v44, %v3495_v19  ;;  %v17616_v44 = vld [vmem:[#allocation45_spill] sm:$0xff]  ;;  %v17617_v19 = vld [vmem:[#allocation116_spill] sm:$0xff] }
 0xbb9   : > { %v3249_v11 = vmul.f32 0.5, %v3163_v34 }
 0xbba   : > { %4026 = vrot.lane.b32.xlu1 %v3528_v48, %s10903_s24 }
 0xbbb   : > { %v3313_v28 = vsub.f32 %v17607_v57, %v3249_v11  ;;  %v3255_v57 = vmul.f32 0.5, %v14058_v16 }
 0xbbc   : > { %v3172_v49 = vpop.xlane.xlu1 %3171 }
 0xbbd   : > { %v3429_v14 = vmul.f32 1.442695, %v3313_v28  ;;  %v3252_v24 = vmul.f32 0.5, %v3172_v49  ;;  %v3190_v28 = vpop.xlane.xlu0 %3189 }
 0xbbe   : > { %4030 = vrot.lane.b32.xlu1 %v3530_v17, %s10903_s24  ;;  %v3258_v63 = vmul.f32 0.5, %v3190_v28 }
 0xbbf   : > { %10479 = vpow2.f32 %v3429_v14  ;;  %v3316_v10 = vsub.f32 %v17609_v9, %v3252_v24 }
 0xbc0   : > { %v4015_v55 = vpop.permute.xlu1 %4014  ;;  %10481 = vpow2.f32 %v3417_v37  ;;  %v17612_v37 = vld [vmem:[#allocation67_spill] sm:$0xff] }
 0xbc1   : > { %9757 = vmatmul.mubr.msk.bf16.gmra.mrb[16].mxu1 %vm4068_vm2, %v4015_v55  ;;  %10483 = vpow2.f32 %v3427_v27  ;;  %v3435_v25 = vmul.f32 1.442695, %v3316_v10  ;;  %v3319_v45 = vsub.f32 %v17612_v37, %v3255_v57  ;;  %v3193_v49 = vpop.xlane.xlu0 %3192 }
 0xbc2   : > { %4034 = vrot.lane.b32.xlu1 %v3532_v33, %s10903_s24  ;;  %9760 = vmatprep.mubr.msk.bf16.mxu1 %vm4068_vm2, %v4017_v60  ;;  %10485 = vpow2.f32 %v3425_v38  ;;  %v3259_v56 = vmul.f32 0.5, %v3193_v49 }
 0xbc3   : > { %10487 = vpow2.f32 %v3435_v25  ;;  %v3441_v24 = vmul.f32 1.442695, %v3319_v45 }
 0xbc4   : > { %10489 = vpow2.f32 %v3433_v59  ;;  %v17615_v59 = vld [vmem:[#allocation104_spill] sm:$0xff] }
 0xbc5   : > { %10491 = vpow2.f32 %v3439_v21  ;;  %v4021_v16 = vpop.permute.xlu0 %4020  ;;  %v3322_v42 = vsub.f32 %v17615_v59, %v3258_v63 }
 0xbc6   : > { %4038 = vrot.lane.b32.xlu1 %v3534_v29, %s10903_s24 }
 0xbc7   : > { %v3447_v41 = vmul.f32 1.442695, %v3322_v42 }
 0xbc9   : > { %v10480_v46 = vpop.eup %10479 }
 0xbca   : > { %v3505_v31 = vmul.f32 0.17677669, %v10480_v46  ;;  %4042 = vrot.lane.b32.xlu1 %v3536_v22, %s10903_s24  ;;  %v10482_v7 = vpop.eup %10481  ;;  %v3323_v22 = vsub.f32 %v17616_v44, %v3259_v56 }
 0xbcb   : > { %v10484_v0 = vpop.eup %10483  ;;  %v3499_v43 = vmul.f32 0.17677669, %v10482_v7 }
 0xbcc   : > { %v3543_v50 = vpack.c.bf16 %v3506_v40, %v3505_v31  ;;  %v10486_v52 = vpop.eup %10485  ;;  %v3504_v6 = vmul.f32 0.17677669, %v10484_v0  ;;  %v3449_v7 = vmul.f32 1.442695, %v3323_v22 }
 0xbcd   : > { %v3540_v61 = vpack.c.bf16 %v3500_v20, %v3499_v43  ;;  %v10488_v34 = vpop.eup %10487  ;;  %v3503_v48 = vmul.f32 0.17677669, %v10486_v52 }
 0xbce   : > { %4046 = vrot.lane.b32.xlu1 %v3538_v18, %s10903_s24  ;;  %4056 = vrot.lane.b32.xlu0 %v3543_v50, %s10903_s24  ;;  %v10490_v3 = vpop.eup %10489  ;;  %v3508_v39 = vmul.f32 0.17677669, %v10488_v34  ;;  %v17618_v50 = vld [vmem:[#allocation44_spill] sm:$0xff] }
 0xbcf   : > { %v3542_v26 = vpack.c.bf16 %v3504_v6, %v3503_v48  ;;  %v3507_v11 = vmul.f32 0.17677669, %v10490_v3  ;;  %v10492_v13 = vpop.eup %10491 }
 0xbd0   : > { %v3510_v33 = vmul.f32 0.17677669, %v10492_v13 }
 0xbd1   : > { %v3544_v53 = vpack.c.bf16 %v3508_v39, %v3507_v11 }
 0xbd2   : > { %4050 = vrot.lane.b32.xlu1 %v3540_v61, %s10903_s24 }
 0xbd6   : > { %4054 = vrot.lane.b32.xlu1 %v3542_v26, %s10903_s24  ;;  %v4029_v26 = vpop.permute.xlu0 %4028 }
 0xbda   : > { %4058 = vrot.lane.b32.xlu1 %v3544_v53, %s10903_s24  ;;  %v4033_v49 = vpop.permute.xlu0 %4032 }
 0xbf1   : > { %v3175_v17 = vpop.xlane.xlu1 %3174 }
 0xbf2   : > { %v3253_v58 = vmul.f32 0.5, %v3175_v17 }
 0xbf4   : > { %v3317_v36 = vsub.f32 %v17613_v2, %v3253_v58  ;;  %v10111_v2 = vld [vmem:[%s16809_s4] sm:$0xff]  }
 0xbf5   : > { %v3184_v14 = vpop.xlane.xlu1 %3183  ;;  %9812 = vmatprep.subr.bf16.mxu1 %v10111_v2 }
 0xbf6   : > { %v3437_v32 = vmul.f32 1.442695, %v3317_v36  ;;  %v3256_v23 = vmul.f32 0.5, %v3184_v14  ;;  %v9466_v36 = vld [vmem:[%s16810_s5] ss:$0 sm:$0xff]  ;;  %9813 = vmatpush3.bf16.msra.mxu1 %v10111_v2 }
 0xbf8   : > { %10493 = vpow2.f32 %v3437_v32  ;;  %v3320_v27 = vsub.f32 %v17614_v5, %v3256_v23  ;;  %v4037_v5 = vpop.permute.xlu0 %4036 }
 0xbf9   : > { %v4019_v9 = vpop.permute.xlu1 %4018  ;;  %10495 = vpow2.f32 %v3441_v24  ;;  %v10112_v24 = vld [vmem:[%s16809_s4 + $0x8] sm:$0xff]  }
 0xbfa   : > { %v3443_v10 = vmul.f32 1.442695, %v3320_v27  ;;  %9761 = vmatmul.mubr.msk.bf16.gmra.mrb[20].mxu1 %vm4068_vm2, %v4019_v9  ;;  %9814 = vmatprep.subr.bf16.mxu1 %v10112_v24  ;;  %v10113_v27 = vld [vmem:[%s16809_s4 + $0x10] sm:$0xff]  }
 0xbfb   : > { %9764 = vmatprep.mubr.msk.bf16.mxu1 %vm4068_vm2, %v4021_v16  ;;  %9815 = vmatpush3.bf16.msra.mxu1 %v10112_v24  ;;  %v10114_v16 = vld [vmem:[%s16809_s4 + $0x18] sm:$0xff]  }
 0xbfc   : > { %10497 = vpow2.f32 %v3443_v10  ;;  %9816 = vmatprep.subr.bf16.mxu1 %v10113_v27  ;;  %v4041_v13 = vpop.permute.xlu0 %4040 }
 0xbfd   : > { %10499 = vpow2.f32 %v3447_v41 }
 0xbff   : > { %9817 = vmatpush3.bf16.msra.mxu1 %v10113_v27 }
 0xc00   : > { %9818 = vmatprep.subr.bf16.mxu1 %v10114_v16 }
 0xc02   : > { %v10494_v55 = vpop.eup %10493 }
 0xc03   : > { %v3509_v8 = vmul.f32 0.17677669, %v10494_v55  ;;  %v10496_v38 = vpop.eup %10495  ;;  %9819 = vmatpush3.bf16.msra.mxu1 %v10114_v16 }
 0xc04   : > { %v3511_v60 = vmul.f32 0.17677669, %v10496_v38 }
 0xc05   : > { %v3545_v54 = vpack.c.bf16 %v3510_v33, %v3509_v8  ;;  %v4045_v33 = vpop.permute.xlu0 %4044 }
 0xc06   : > { %v10498_v47 = vpop.eup %10497 }
 0xc07   : > { %v3512_v1 = vmul.f32 0.17677669, %v10498_v47  ;;  %4060 = vrot.lane.b32.xlu0 %v3545_v54, %s10903_s24  ;;  %v10500_v34 = vpop.eup %10499 }
 0xc08   : > { %v3514_v11 = vmul.f32 0.17677669, %v10500_v34 }
 0xc09   : > { %v3546_v30 = vpack.c.bf16 %v3512_v1, %v3511_v60  ;;  %v4049_v42 = vpop.permute.xlu0 %4048 }
 0xc0b   : > { %4062 = vrot.lane.b32.xlu1 %v3546_v30, %s10903_s24 }
 0xc0d   : > { %v4053_v44 = vpop.permute.xlu0 %4052 }
 0xc22   : > { %v14087_v25 = vpop.f32.mrb[8].mxu1 }
 0xc23   : > { %v14089_v12 = vpop.f32.mrb[9].mxu1  ;;  %v4456_v51 = vadd.f32 1e-08, %v14087_v25 }
 0xc24   : > { %v14091_v29 = vpop.f32.mrb[10].mxu1  ;;  %v4454_v6 = vadd.f32 1e-08, %v14089_v12 }
 0xc25   : > { %v14093_v62 = vpop.f32.mrb[11].mxu1  ;;  %v4457_v48 = vadd.f32 1e-08, %v14091_v29 }
 0xc26   : > { %v4455_v21 = vadd.f32 1e-08, %v14093_v62 }
 0xc2a   : > { %v3187_v4 = vpop.xlane.xlu1 %3186 }
 0xc2b   : > { %v3257_v46 = vmul.f32 0.5, %v3187_v4 }
 0xc2d   : > { %v3321_v40 = vsub.f32 %v17617_v19, %v3257_v46 }
 0xc2e   : > { %v3196_v31 = vpop.xlane.xlu1 %3195 }
 0xc2f   : > { %v3445_v20 = vmul.f32 1.442695, %v3321_v40  ;;  %v3260_v18 = vmul.f32 0.5, %v3196_v31 }
 0xc31   : > { %10501 = vpow2.f32 %v3445_v20  ;;  %v3324_v0 = vsub.f32 %v17618_v50, %v3260_v18 }
 0xc32   : > { %v4023_v43 = vpop.permute.xlu1 %4022  ;;  %10503 = vpow2.f32 %v3449_v7 }
 0xc33   : > { %v3451_v52 = vmul.f32 1.442695, %v3324_v0  ;;  %9765 = vmatmul.mubr.msk.bf16.gmra.mrb[24].mxu1 %vm4068_vm2, %v4023_v43 }
 0xc35   : > { %10505 = vpow2.f32 %v3451_v52 }
 0xc36   : > { %v4025_v61 = vpop.permute.xlu1 %4024  ;;  %10507 = vrcp.f32 %v4454_v6 }
 0xc37   : > { %9768 = vmatprep.mubr.msk.bf16.mxu1 %vm4068_vm2, %v4025_v61  ;;  %10509 = vrcp.f32 %v4457_v48 }
 0xc38   : > { %10511 = vrcp.f32 %v4456_v51 }
 0xc39   : > { %10513 = vrcp.f32 %v4455_v21 }
 0xc3a   : > { %v4027_v3 = vpop.permute.xlu1 %4026 }
 0xc3b   : > { %v10502_v39 = vpop.eup %10501  ;;  %9769 = vmatmul.mubr.msk.bf16.gmra.mrb[28].mxu1 %vm4068_vm2, %v4027_v3 }
 0xc3c   : > { %v3513_v53 = vmul.f32 0.17677669, %v10502_v39  ;;  %9772 = vmatprep.mubr.msk.bf16.mxu1 %vm4068_vm2, %v4029_v26  ;;  %v10504_v35 = vpop.eup %10503 }
 0xc3d   : > { %v3515_v28 = vmul.f32 0.17677669, %v10504_v35 }
 0xc3e   : > { %v3547_v15 = vpack.c.bf16 %v3514_v11, %v3513_v53  ;;  %v4031_v37 = vpop.permute.xlu1 %4030 }
 0xc3f   : > { %v10506_v57 = vpop.eup %10505 }
 0xc40   : > { %v3516_v17 = vmul.f32 0.17677669, %v10506_v57  ;;  %4064 = vrot.lane.b32.xlu0 %v3547_v15, %s10903_s24  ;;  %v10508_v58 = vpop.eup %10507  ;;  %v4057_v40 = vpop.permute.xlu0 %4056 }
 0xc41   : > { %v10510_v14 = vpop.eup %10509 }
 0xc42   : > { %v3548_v45 = vpack.c.bf16 %v3516_v17, %v3515_v28  ;;  %v4035_v32 = vpop.permute.xlu1 %4034  ;;  %v10512_v23 = vpop.eup %10511 }
 0xc43   : > { %9773 = vmatmul.mubr.msk.bf16.gmra.mrb[32].mxu1 %vm4068_vm2, %v4031_v37  ;;  %v10514_v9 = vpop.eup %10513 }
 0xc44   : > { %4584 = vperm.xlu0 %10066, %v10508_v58   ;;  %4066 = vrot.lane.b32.xlu1 %v3548_v45, %s10903_s24 }
 0xc45   : > { %9776 = vmatprep.mubr.msk.bf16.mxu1 %vm4068_vm2, %v4033_v49 }
 0xc46   : > { %v4039_v10 = vpop.permute.xlu1 %4038 }
 0xc48   : > { %4599 = vperm.xlu0 %10066, %v10510_v14   ;;  %5741 = vrot.lane.b32.xlu1 %v9466_v36, %s10902_s23 }
 0xc4a   : > { %v4043_v55 = vpop.permute.xlu1 %4042 }
 0xc4b   : > { %9777 = vmatmul.mubr.msk.bf16.gmra.mrb[36].mxu1 %vm4068_vm2, %v4035_v32 }
 0xc4c   : > { %4594 = vperm.xlu1 %10065, %v10512_v23   ;;  %9780 = vmatprep.mubr.msk.bf16.mxu1 %vm4068_vm2, %v4037_v5 }
 0xc4e   : > { %v4047_v59 = vpop.permute.xlu1 %4046 }
 0xc50   : > { %4589 = vperm.xlu1 %10065, %v10514_v9  }
 0xc52   : > { %v4051_v41 = vpop.permute.xlu1 %4050 }
 0xc53   : > { %9781 = vmatmul.mubr.msk.bf16.gmra.mrb[40].mxu1 %vm4068_vm2, %v4039_v10 }
 0xc54   : > { %9784 = vmatprep.mubr.msk.bf16.mxu1 %vm4068_vm2, %v4041_v13 }
 0xc56   : > { %v4055_v19 = vpop.permute.xlu1 %4054 }
 0xc5a   : > { %v4059_v31 = vpop.permute.xlu1 %4058 }
 0xc5b   : > { %v14131_v8 = vpop.f32.mrb[12].mxu1  ;;  %9785 = vmatmul.mubr.msk.bf16.gmra.mrb[44].mxu1 %vm4068_vm2, %v4043_v55 }
 0xc5c   : > { %v4460_v38 = vadd.f32 1e-08, %v14131_v8  ;;  %v14135_v54 = vpop.f32.mrb[13].mxu1  ;;  %9788 = vmatprep.mubr.msk.bf16.mxu1 %vm4068_vm2, %v4045_v33 }
 0xc5d   : > { %v14138_v47 = vpop.f32.mrb[14].mxu1  ;;  %v4458_v60 = vadd.f32 1e-08, %v14135_v54 }
 0xc5e   : > { %10515 = vrcp.f32 %v4460_v38  ;;  %v4461_v1 = vadd.f32 1e-08, %v14138_v47  ;;  %v14142_v30 = vpop.f32.mrb[15].mxu1 }
 0xc5f   : > { %v4459_v63 = vadd.f32 1e-08, %v14142_v30 }
 0xc60   : > { %10517 = vrcp.f32 %v4461_v1 }
 0xc61   : > { %10519 = vrcp.f32 %v4458_v60 }
 0xc62   : > { %10521 = vrcp.f32 %v4459_v63 }
 0xc63   : > { %9789 = vmatmul.mubr.msk.bf16.gmra.mrb[48].mxu1 %vm4068_vm2, %v4047_v59 }
 0xc64   : > { %9792 = vmatprep.mubr.msk.bf16.mxu1 %vm4068_vm2, %v4049_v42 }
 0xc68   : > { %v10516_v56 = vpop.eup %10515 }
 0xc69   : > { %4614 = vperm.xlu1 %10065, %v10516_v56  }
 0xc6a   : > { %v10518_v4 = vpop.eup %10517 }
 0xc6b   : > { %4619 = vperm.xlu0 %10066, %v10518_v4   ;;  %9793 = vmatmul.mubr.msk.bf16.gmra.mrb[52].mxu1 %vm4068_vm2, %v4051_v41  ;;  %v10520_v22 = vpop.eup %10519 }
 0xc6c   : > { %9796 = vmatprep.mubr.msk.bf16.mxu1 %vm4068_vm2, %v4053_v44  ;;  %v10522_v46 = vpop.eup %10521 }
 0xc6d   : > { %4604 = vperm.xlu1 %10065, %v10520_v22  }
 0xc6f   : > { %4609 = vperm.xlu0 %10066, %v10522_v46  }
 0xc73   : > { %9797 = vmatmul.mubr.msk.bf16.gmra.mrb[56].mxu1 %vm4068_vm2, %v4055_v19 }
 0xc74   : > { %9800 = vmatprep.mubr.msk.bf16.mxu1 %vm4068_vm2, %v4057_v40 }
 0xc79   : > { %v4061_v7 = vpop.permute.xlu0 %4060 }
 0xc7b   : > { %9801 = vmatmul.mubr.msk.bf16.gmra.mrb[60].mxu1 %vm4068_vm2, %v4059_v31 }
 0xc7c   : > { %9804 = vmatprep.mubr.msk.bf16.mxu1 %vm4068_vm2, %v4061_v7 }
 0xc7d   : > { %v4063_v20 = vpop.permute.xlu1 %4062 }
 0xc83   : > { %9805 = vmatmul.mubr.msk.bf16.gmra.mrb[64].mxu1 %vm4068_vm2, %v4063_v20 }
 0xc94   : > { %v14154_v18 = vpop.f32.mrb[16].mxu1 }
 0xc95   : > { %v4464_v50 = vadd.f32 1e-08, %v14154_v18  ;;  %v14157_v0 = vpop.f32.mrb[17].mxu1 }
 0xc96   : > { %v14159_v43 = vpop.f32.mrb[18].mxu1  ;;  %v4462_v52 = vadd.f32 1e-08, %v14157_v0 }
 0xc97   : > { %10523 = vrcp.f32 %v4464_v50  ;;  %v4465_v6 = vadd.f32 1e-08, %v14159_v43  ;;  %v14163_v61 = vpop.f32.mrb[19].mxu1 }
 0xc98   : > { %v4463_v34 = vadd.f32 1e-08, %v14163_v61 }
 0xc99   : > { %10525 = vrcp.f32 %v4465_v6 }
 0xc9a   : > { %10527 = vrcp.f32 %v4462_v52 }
 0xc9b   : > { %10529 = vrcp.f32 %v4463_v34 }
 0xca1   : > { %v10524_v48 = vpop.eup %10523 }
 0xca2   : > { %4634 = vperm.xlu1 %10065, %v10524_v48  }
 0xca3   : > { %v10526_v3 = vpop.eup %10525 }
 0xca4   : > { %4639 = vperm.xlu0 %10066, %v10526_v3   ;;  %v10528_v39 = vpop.eup %10527 }
 0xca5   : > { %v10530_v26 = vpop.eup %10529 }
 0xca6   : > { %4624 = vperm.xlu1 %10065, %v10528_v39  }
 0xca8   : > { %4629 = vperm.xlu0 %10066, %v10530_v26  }
 0xcb2   : > { %v4065_v11 = vpop.permute.xlu0 %4064 }
 0xcb3   : > { %9808 = vmatprep.mubr.msk.bf16.mxu1 %vm4068_vm2, %v4065_v11 }
 0xcb6   : > { %v4067_v53 = vpop.permute.xlu1 %4066 }
 0xcb7   : > { %9809 = vmatmul.mubr.msk.bf16.gmra.mrb[68].mxu1 %vm4068_vm2, %v4067_v53 }
 0xcba   : > { %v14168_v51 = vpop.permute.xlu1 %5741 }
 0xcbb   : > { %17619 = vst [vmem:[#allocation46_spill] sm:$0xff] %v14168_v51 }
 0xcc3   : > { %v4585_v35 = vpop.permute.xlu0 %4584 }
 0xcc4   : > { %v4902_v49 = vmul.f32 %v4585_v35, %v14089_v12 }
 0xcc7   : > { %v4600_v15 = vpop.permute.xlu0 %4599 }
 0xcc8   : > { %v4905_v28 = vmul.f32 %v14091_v29, %v4600_v15 }
 0xccb   : > { %v4595_v57 = vpop.permute.xlu1 %4594 }
 0xccc   : > { %v4904_v17 = vmul.f32 %v14087_v25, %v4595_v57 }
 0xccd   : > { %v14172_v21 = vpop.f32.mrb[20].mxu1 }
 0xcce   : > { %v4967_v37 = vpack.c.bf16 %v4905_v28, %v4904_v17  ;;  %v4468_v45 = vadd.f32 1e-08, %v14172_v21  ;;  %v14175_v58 = vpop.f32.mrb[21].mxu1 }
 0xccf   : > { %v14178_v2 = vpop.f32.mrb[22].mxu1  ;;  %v4590_v36 = vpop.permute.xlu1 %4589  ;;  %v4466_v14 = vadd.f32 1e-08, %v14175_v58 }
 0xcd0   : > { %10531 = vrcp.f32 %v4468_v45  ;;  %v4469_v24 = vadd.f32 1e-08, %v14178_v2  ;;  %v4903_v29 = vmul.f32 %v4590_v36, %v14093_v62  ;;  %v14183_v25 = vpop.f32.mrb[23].mxu1 }
 0xcd1   : > { %v4467_v23 = vadd.f32 1e-08, %v14183_v25 }
 0xcd2   : > { %10533 = vrcp.f32 %v4469_v24  ;;  %v4966_v32 = vpack.c.bf16 %v4903_v29, %v4902_v49 }
 0xcd3   : > { %10535 = vrcp.f32 %v4466_v14 }
 0xcd4   : > { %9820 = vmatprep.mubr.msk.bf16.mxu1 %vm702_vm0, %v4966_v32  ;;  %10537 = vrcp.f32 %v4467_v23 }
 0xcd5   : > { %9821 = vmatmul.mubr.msk.bf16.vlgmr.msra.gmra.mrb[72].mxu1 %vm702_vm0, %v4967_v37 }
 0xcda   : > { %v10532_v12 = vpop.eup %10531 }
 0xcdb   : > { %4654 = vperm.xlu1 %10065, %v10532_v12  }
 0xcdc   : > { %v10534_v5 = vpop.eup %10533 }
 0xcdd   : > { %4659 = vperm.xlu0 %10066, %v10534_v5   ;;  %v10536_v27 = vpop.eup %10535 }
 0xcde   : > { %v10538_v9 = vpop.eup %10537 }
 0xcdf   : > { %4644 = vperm.xlu1 %10065, %v10536_v27  }
 0xce1   : > { %4649 = vperm.xlu0 %10066, %v10538_v9  }
 0xce8   : > { %v4615_v62 = vpop.permute.xlu1 %4614 }
 0xce9   : > { %v4908_v10 = vmul.f32 %v14131_v8, %v4615_v62 }
 0xcea   : > { %v4620_v16 = vpop.permute.xlu0 %4619 }
 0xceb   : > { %v4909_v13 = vmul.f32 %v14138_v47, %v4620_v16 }
 0xcec   : > { %v4605_v55 = vpop.permute.xlu1 %4604 }
 0xced   : > { %v4969_v33 = vpack.c.bf16 %v4909_v13, %v4908_v10  ;;  %v4906_v60 = vmul.f32 %v4605_v55, %v14135_v54 }
 0xcee   : > { %v4610_v38 = vpop.permute.xlu0 %4609 }
 0xcef   : > { %v4907_v1 = vmul.f32 %v4610_v38, %v14142_v30 }
 0xcf1   : > { %v4968_v63 = vpack.c.bf16 %v4907_v1, %v4906_v60 }
 0xcf3   : > { %9824 = vmatprep.mubr.msk.bf16.mxu1 %vm702_vm0, %v4968_v63 }
 0xcf4   : > { %9825 = vmatmul.mubr.msk.bf16.gmra.mrb[76].mxu1 %vm702_vm0, %v4969_v33 }
 0xd06   : > { %v14194_v59 = vpop.f32.mrb[24].mxu1 }
 0xd07   : > { %v4472_v42 = vadd.f32 1e-08, %v14194_v59  ;;  %v14197_v56 = vpop.f32.mrb[25].mxu1 }
 0xd08   : > { %v14199_v8 = vpop.f32.mrb[26].mxu1  ;;  %v4470_v47 = vadd.f32 1e-08, %v14197_v56 }
 0xd09   : > { %10539 = vrcp.f32 %v4472_v42  ;;  %v4473_v54 = vadd.f32 1e-08, %v14199_v8  ;;  %v14203_v4 = vpop.f32.mrb[27].mxu1 }
 0xd0a   : > { %v4471_v30 = vadd.f32 1e-08, %v14203_v4 }
 0xd0b   : > { %10541 = vrcp.f32 %v4473_v54 }
 0xd0c   : > { %10543 = vrcp.f32 %v4470_v47 }
 0xd0d   : > { %10545 = vrcp.f32 %v4471_v30 }
 0xd0e   : > { %v14206_v41 = vpop.f32.mrb[28].mxu1 }
 0xd0f   : > { %v4476_v44 = vadd.f32 1e-08, %v14206_v41  ;;  %v14209_v22 = vpop.f32.mrb[29].mxu1 }
 0xd10   : > { %v14211_v46 = vpop.f32.mrb[30].mxu1  ;;  %v4474_v19 = vadd.f32 1e-08, %v14209_v22 }
 0xd11   : > { %10547 = vrcp.f32 %v4476_v44  ;;  %v4477_v40 = vadd.f32 1e-08, %v14211_v46  ;;  %v14215_v31 = vpop.f32.mrb[31].mxu1 }
 0xd12   : > { %v4475_v20 = vadd.f32 1e-08, %v14215_v31 }
 0xd13   : > { %v10540_v7 = vpop.eup %10539  ;;  %10549 = vrcp.f32 %v4477_v40 }
 0xd14   : > { %4674 = vperm.xlu1 %10065, %v10540_v7   ;;  %10551 = vrcp.f32 %v4474_v19 }
 0xd15   : > { %v10542_v50 = vpop.eup %10541  ;;  %10553 = vrcp.f32 %v4475_v20 }
 0xd16   : > { %4679 = vperm.xlu0 %10066, %v10542_v50   ;;  %v14218_v52 = vpop.f32.mrb[32].mxu1  ;;  %v10544_v6 = vpop.eup %10543 }
 0xd17   : > { %v4480_v34 = vadd.f32 1e-08, %v14218_v52  ;;  %v14221_v48 = vpop.f32.mrb[33].mxu1  ;;  %v10546_v39 = vpop.eup %10545 }
 0xd18   : > { %4664 = vperm.xlu1 %10065, %v10544_v6   ;;  %v14223_v3 = vpop.f32.mrb[34].mxu1  ;;  %v4478_v26 = vadd.f32 1e-08, %v14221_v48 }
 0xd19   : > { %10555 = vrcp.f32 %v4480_v34  ;;  %v4481_v11 = vadd.f32 1e-08, %v14223_v3  ;;  %v14227_v53 = vpop.f32.mrb[35].mxu1 }
 0xd1a   : > { %4669 = vperm.xlu0 %10066, %v10546_v39   ;;  %v4479_v15 = vadd.f32 1e-08, %v14227_v53 }
 0xd1b   : > { %v10548_v35 = vpop.eup %10547  ;;  %10557 = vrcp.f32 %v4481_v11 }
 0xd1c   : > { %4694 = vperm.xlu1 %10065, %v10548_v35   ;;  %10559 = vrcp.f32 %v4478_v26 }
 0xd1d   : > { %v10550_v57 = vpop.eup %10549  ;;  %10561 = vrcp.f32 %v4479_v15 }
 0xd1e   : > { %4699 = vperm.xlu0 %10066, %v10550_v57   ;;  %v14230_v28 = vpop.f32.mrb[36].mxu1  ;;  %v10552_v17 = vpop.eup %10551 }
 0xd1f   : > { %v4484_v37 = vadd.f32 1e-08, %v14230_v28  ;;  %v14233_v45 = vpop.f32.mrb[37].mxu1  ;;  %v10554_v36 = vpop.eup %10553 }
 0xd20   : > { %4684 = vperm.xlu1 %10065, %v10552_v17   ;;  %v14235_v49 = vpop.f32.mrb[38].mxu1  ;;  %v4482_v14 = vadd.f32 1e-08, %v14233_v45 }
 0xd21   : > { %10563 = vrcp.f32 %v4484_v37  ;;  %v4485_v24 = vadd.f32 1e-08, %v14235_v49  ;;  %v4635_v29 = vpop.permute.xlu1 %4634  ;;  %v14239_v32 = vpop.f32.mrb[39].mxu1 }
 0xd22   : > { %4689 = vperm.xlu0 %10066, %v10554_v36   ;;  %v4483_v12 = vadd.f32 1e-08, %v14239_v32  ;;  %v4912_v27 = vmul.f32 %v14154_v18, %v4635_v29 }
 0xd23   : > { %v10556_v23 = vpop.eup %10555  ;;  %10565 = vrcp.f32 %v4485_v24  ;;  %v4640_v5 = vpop.permute.xlu0 %4639 }
 0xd24   : > { %v4913_v9 = vmul.f32 %v14159_v43, %v4640_v5  ;;  %4714 = vperm.xlu1 %10065, %v10556_v23   ;;  %10567 = vrcp.f32 %v4482_v14 }
 0xd25   : > { %v10558_v62 = vpop.eup %10557  ;;  %v4625_v16 = vpop.permute.xlu1 %4624  ;;  %10569 = vrcp.f32 %v4483_v12 }
 0xd26   : > { %v4971_v10 = vpack.c.bf16 %v4913_v9, %v4912_v27  ;;  %4719 = vperm.xlu0 %10066, %v10558_v62   ;;  %v14244_v13 = vpop.f32.mrb[40].mxu1  ;;  %v10560_v55 = vpop.eup %10559  ;;  %v4910_v1 = vmul.f32 %v4625_v16, %v14157_v0 }
 0xd27   : > { %v4488_v33 = vadd.f32 1e-08, %v14244_v13  ;;  %v14247_v38 = vpop.f32.mrb[41].mxu1  ;;  %v4630_v60 = vpop.permute.xlu0 %4629 }
 0xd28   : > { %v4911_v18 = vmul.f32 %v4630_v60, %v14163_v61  ;;  %4704 = vperm.xlu1 %10065, %v10560_v55   ;;  %v14251_v43 = vpop.f32.mrb[42].mxu1  ;;  %v10562_v63 = vpop.eup %10561  ;;  %v4486_v42 = vadd.f32 1e-08, %v14247_v38 }
 0xd29   : > { %10571 = vrcp.f32 %v4488_v33  ;;  %v4489_v47 = vadd.f32 1e-08, %v14251_v43  ;;  %v14255_v54 = vpop.f32.mrb[43].mxu1 }
 0xd2a   : > { %v4970_v30 = vpack.c.bf16 %v4911_v18, %v4910_v1  ;;  %4709 = vperm.xlu0 %10066, %v10562_v63   ;;  %v4487_v19 = vadd.f32 1e-08, %v14255_v54 }
 0xd2b   : > { %v10564_v44 = vpop.eup %10563  ;;  %10573 = vrcp.f32 %v4489_v47 }
 0xd2c   : > { %4734 = vperm.xlu1 %10065, %v10564_v44   ;;  %9828 = vmatprep.mubr.msk.bf16.mxu1 %vm702_vm0, %v4970_v30  ;;  %10575 = vrcp.f32 %v4486_v42 }
 0xd2d   : > { %v10566_v0 = vpop.eup %10565  ;;  %9829 = vmatmul.mubr.msk.bf16.gmra.mrb[80].mxu1 %vm702_vm0, %v4971_v10  ;;  %10577 = vrcp.f32 %v4487_v19 }
 0xd2e   : > { %4739 = vperm.xlu0 %10066, %v10566_v0   ;;  %v14260_v61 = vpop.f32.mrb[44].mxu1  ;;  %v10568_v40 = vpop.eup %10567 }
 0xd2f   : > { %v4492_v7 = vadd.f32 1e-08, %v14260_v61  ;;  %v14263_v20 = vpop.f32.mrb[45].mxu1  ;;  %v10570_v6 = vpop.eup %10569 }
 0xd30   : > { %4724 = vperm.xlu1 %10065, %v10568_v40   ;;  %v14265_v50 = vpop.f32.mrb[46].mxu1  ;;  %v4490_v34 = vadd.f32 1e-08, %v14263_v20 }
 0xd31   : > { %10579 = vrcp.f32 %v4492_v7  ;;  %v4493_v39 = vadd.f32 1e-08, %v14265_v50  ;;  %v14269_v26 = vpop.f32.mrb[47].mxu1 }
 0xd32   : > { %4729 = vperm.xlu0 %10066, %v10570_v6   ;;  %v4491_v35 = vadd.f32 1e-08, %v14269_v26 }
 0xd33   : > { %v10572_v11 = vpop.eup %10571  ;;  %10581 = vrcp.f32 %v4493_v39 }
 0xd34   : > { %4754 = vperm.xlu1 %10065, %v10572_v11   ;;  %10583 = vrcp.f32 %v4490_v34 }
 0xd35   : > { %v10574_v15 = vpop.eup %10573  ;;  %10585 = vrcp.f32 %v4491_v35 }
 0xd36   : > { %4759 = vperm.xlu0 %10066, %v10574_v15   ;;  %v14272_v57 = vpop.f32.mrb[48].mxu1  ;;  %v10576_v17 = vpop.eup %10575 }
 0xd37   : > { %v4496_v37 = vadd.f32 1e-08, %v14272_v57  ;;  %v14275_v36 = vpop.f32.mrb[49].mxu1  ;;  %v10578_v24 = vpop.eup %10577 }
 0xd38   : > { %4744 = vperm.xlu1 %10065, %v10576_v17   ;;  %v14277_v14 = vpop.f32.mrb[50].mxu1  ;;  %v4494_v29 = vadd.f32 1e-08, %v14275_v36 }
 0xd39   : > { %10587 = vrcp.f32 %v4496_v37  ;;  %v4497_v23 = vadd.f32 1e-08, %v14277_v14  ;;  %v14281_v12 = vpop.f32.mrb[51].mxu1 }
 0xd3a   : > { %4749 = vperm.xlu0 %10066, %v10578_v24   ;;  %v4495_v27 = vadd.f32 1e-08, %v14281_v12 }
 0xd3b   : > { %v10580_v5 = vpop.eup %10579  ;;  %10589 = vrcp.f32 %v4497_v23 }
 0xd3c   : > { %4774 = vperm.xlu1 %10065, %v10580_v5   ;;  %10591 = vrcp.f32 %v4494_v29 }
 0xd3d   : > { %v10582_v9 = vpop.eup %10581  ;;  %10593 = vrcp.f32 %v4495_v27 }
 0xd3e   : > { %4779 = vperm.xlu0 %10066, %v10582_v9   ;;  %v14284_v62 = vpop.f32.mrb[52].mxu1  ;;  %v10584_v16 = vpop.eup %10583 }
 0xd3f   : > { %v4500_v10 = vadd.f32 1e-08, %v14284_v62  ;;  %v14287_v55 = vpop.f32.mrb[53].mxu1  ;;  %v10586_v60 = vpop.eup %10585 }
 0xd40   : > { %4764 = vperm.xlu1 %10065, %v10584_v16   ;;  %v14289_v33 = vpop.f32.mrb[54].mxu1  ;;  %v4498_v1 = vadd.f32 1e-08, %v14287_v55 }
 0xd41   : > { %10595 = vrcp.f32 %v4500_v10  ;;  %v4501_v18 = vadd.f32 1e-08, %v14289_v33  ;;  %v14293_v63 = vpop.f32.mrb[55].mxu1 }
 0xd42   : > { %4769 = vperm.xlu0 %10066, %v10586_v60   ;;  %v4499_v47 = vadd.f32 1e-08, %v14293_v63 }
 0xd43   : > { %v10588_v42 = vpop.eup %10587  ;;  %10597 = vrcp.f32 %v4501_v18 }
 0xd44   : > { %4794 = vperm.xlu1 %10065, %v10588_v42   ;;  %10599 = vrcp.f32 %v4498_v1 }
 0xd45   : > { %v10590_v30 = vpop.eup %10589  ;;  %10601 = vrcp.f32 %v4499_v47 }
 0xd46   : > { %4799 = vperm.xlu0 %10066, %v10590_v30   ;;  %v14296_v44 = vpop.f32.mrb[56].mxu1  ;;  %v10592_v19 = vpop.eup %10591 }
 0xd47   : > { %v4504_v0 = vadd.f32 1e-08, %v14296_v44  ;;  %v14299_v40 = vpop.f32.mrb[57].mxu1  ;;  %v10594_v6 = vpop.eup %10593 }
 0xd48   : > { %4784 = vperm.xlu1 %10065, %v10592_v19   ;;  %v14301_v7 = vpop.f32.mrb[58].mxu1  ;;  %v4502_v34 = vadd.f32 1e-08, %v14299_v40 }
 0xd49   : > { %10603 = vrcp.f32 %v4504_v0  ;;  %v4505_v39 = vadd.f32 1e-08, %v14301_v7  ;;  %v14305_v11 = vpop.f32.mrb[59].mxu1 }
 0xd4a   : > { %4789 = vperm.xlu0 %10066, %v10594_v6   ;;  %v4503_v15 = vadd.f32 1e-08, %v14305_v11 }
 0xd4b   : > { %v10596_v35 = vpop.eup %10595  ;;  %10605 = vrcp.f32 %v4505_v39 }
 0xd4c   : > { %4814 = vperm.xlu1 %10065, %v10596_v35   ;;  %10607 = vrcp.f32 %v4502_v34 }
 0xd4d   : > { %v10598_v17 = vpop.eup %10597  ;;  %10609 = vrcp.f32 %v4503_v15 }
 0xd4e   : > { %4819 = vperm.xlu0 %10066, %v10598_v17   ;;  %v14308_v37 = vpop.f32.mrb[60].mxu1  ;;  %v10600_v24 = vpop.eup %10599 }
 0xd4f   : > { %v4508_v29 = vadd.f32 1e-08, %v14308_v37  ;;  %v14311_v23 = vpop.f32.mrb[61].mxu1  ;;  %v10602_v27 = vpop.eup %10601 }
 0xd50   : > { %4804 = vperm.xlu1 %10065, %v10600_v24   ;;  %v14313_v5 = vpop.f32.mrb[62].mxu1  ;;  %v4506_v9 = vadd.f32 1e-08, %v14311_v23 }
 0xd51   : > { %10611 = vrcp.f32 %v4508_v29  ;;  %v4509_v16 = vadd.f32 1e-08, %v14313_v5  ;;  %v14317_v10 = vpop.f32.mrb[63].mxu1 }
 0xd52   : > { %4809 = vperm.xlu0 %10066, %v10602_v27   ;;  %v4507_v1 = vadd.f32 1e-08, %v14317_v10 }
 0xd53   : > { %v10604_v60 = vpop.eup %10603  ;;  %10613 = vrcp.f32 %v4509_v16 }
 0xd54   : > { %4834 = vperm.xlu1 %10065, %v10604_v60   ;;  %10615 = vrcp.f32 %v4506_v9 }
 0xd55   : > { %v10606_v18 = vpop.eup %10605  ;;  %10617 = vrcp.f32 %v4507_v1 }
 0xd56   : > { %4839 = vperm.xlu0 %10066, %v10606_v18   ;;  %v14320_v42 = vpop.f32.mrb[64].mxu1  ;;  %v10608_v47 = vpop.eup %10607 }
 0xd57   : > { %v4512_v30 = vadd.f32 1e-08, %v14320_v42  ;;  %v14323_v19 = vpop.f32.mrb[65].mxu1  ;;  %v10610_v6 = vpop.eup %10609 }
 0xd58   : > { %4824 = vperm.xlu1 %10065, %v10608_v47   ;;  %v14325_v0 = vpop.f32.mrb[66].mxu1  ;;  %v4510_v34 = vadd.f32 1e-08, %v14323_v19 }
 0xd59   : > { %10619 = vrcp.f32 %v4512_v30  ;;  %v4513_v39 = vadd.f32 1e-08, %v14325_v0  ;;  %v14329_v35 = vpop.f32.mrb[67].mxu1 }
 0xd5a   : > { %v4655_v15 = vpop.permute.xlu1 %4654  ;;  %4829 = vperm.xlu0 %10066, %v10610_v6   ;;  %v4511_v24 = vadd.f32 1e-08, %v14329_v35 }
 0xd5b   : > { %v10612_v17 = vpop.eup %10611  ;;  %10621 = vrcp.f32 %v4513_v39  ;;  %v4916_v9 = vmul.f32 %v14172_v21, %v4655_v15 }
 0xd5c   : > { %4854 = vperm.xlu1 %10065, %v10612_v17   ;;  %v4660_v29 = vpop.permute.xlu0 %4659  ;;  %10623 = vrcp.f32 %v4510_v34 }
 0xd5d   : > { %v10614_v27 = vpop.eup %10613  ;;  %v4917_v16 = vmul.f32 %v14178_v2, %v4660_v29  ;;  %10625 = vrcp.f32 %v4511_v24 }
 0xd5e   : > { %v4645_v60 = vpop.permute.xlu1 %4644  ;;  %4859 = vperm.xlu0 %10066, %v10614_v27   ;;  %v10616_v1 = vpop.eup %10615 }
 0xd5f   : > { %v4973_v18 = vpack.c.bf16 %v4917_v16, %v4916_v9  ;;  %v10618_v30 = vpop.eup %10617  ;;  %v4914_v6 = vmul.f32 %v4645_v60, %v14175_v58 }
 0xd60   : > { %4844 = vperm.xlu1 %10065, %v10616_v1   ;;  %v4650_v47 = vpop.permute.xlu0 %4649 }
 0xd61   : > { %v4915_v39 = vmul.f32 %v4650_v47, %v14183_v25 }
 0xd62   : > { %4849 = vperm.xlu0 %10066, %v10618_v30  }
 0xd63   : > { %v10620_v17 = vpop.eup %10619  ;;  %v4972_v51 = vpack.c.bf16 %v4915_v39, %v4914_v6 }
 0xd64   : > { %4874 = vperm.xlu1 %10065, %v10620_v17  }
 0xd65   : > { %v10622_v34 = vpop.eup %10621  ;;  %9832 = vmatprep.mubr.msk.bf16.mxu1 %vm702_vm0, %v4972_v51 }
 0xd66   : > { %4879 = vperm.xlu0 %10066, %v10622_v34   ;;  %9833 = vmatmul.mubr.msk.bf16.gmra.mrb[84].mxu1 %vm702_vm0, %v4973_v18  ;;  %v10624_v21 = vpop.eup %10623 }
 0xd67   : > { %v10626_v2 = vpop.eup %10625 }
 0xd68   : > { %4864 = vperm.xlu1 %10065, %v10624_v21  }
 0xd6a   : > { %4869 = vperm.xlu0 %10066, %v10626_v2  }
 0xd8a   : > { %v14338_v15 = vpop.f32.mrb[68].mxu1 }
 0xd8b   : > { %v4516_v58 = vadd.f32 1e-08, %v14338_v15  ;;  %v14341_v24 = vpop.f32.mrb[69].mxu1 }
 0xd8c   : > { %v14343_v25 = vpop.f32.mrb[70].mxu1  ;;  %v4514_v29 = vadd.f32 1e-08, %v14341_v24 }
 0xd8d   : > { %10627 = vrcp.f32 %v4516_v58  ;;  %v4517_v51 = vadd.f32 1e-08, %v14343_v25  ;;  %v14347_v27 = vpop.f32.mrb[71].mxu1 }
 0xd8e   : > { %v4515_v9 = vadd.f32 1e-08, %v14347_v27 }
 0xd8f   : > { %10629 = vrcp.f32 %v4517_v51 }
 0xd90   : > { %10631 = vrcp.f32 %v4514_v29 }
 0xd91   : > { %10633 = vrcp.f32 %v4515_v9 }
 0xd93   : > { %v4675_v16 = vpop.permute.xlu1 %4674 }
 0xd94   : > { %v4920_v1 = vmul.f32 %v14194_v59, %v4675_v16 }
 0xd95   : > { %v4680_v60 = vpop.permute.xlu0 %4679 }
 0xd96   : > { %v4921_v18 = vmul.f32 %v14199_v8, %v4680_v60 }
 0xd97   : > { %v10628_v47 = vpop.eup %10627  ;;  %v4665_v30 = vpop.permute.xlu1 %4664 }
 0xd98   : > { %v4975_v6 = vpack.c.bf16 %v4921_v18, %v4920_v1  ;;  %4894 = vperm.xlu1 %10065, %v10628_v47   ;;  %v4918_v34 = vmul.f32 %v4665_v30, %v14197_v56 }
 0xd99   : > { %v10630_v39 = vpop.eup %10629  ;;  %v4670_v17 = vpop.permute.xlu0 %4669 }
 0xd9a   : > { %v4919_v21 = vmul.f32 %v4670_v17, %v14203_v4  ;;  %4899 = vperm.xlu0 %10066, %v10630_v39   ;;  %v10632_v2 = vpop.eup %10631 }
 0xd9b   : > { %v4695_v58 = vpop.permute.xlu1 %4694  ;;  %v10634_v51 = vpop.eup %10633 }
 0xd9c   : > { %v4974_v29 = vpack.c.bf16 %v4919_v21, %v4918_v34  ;;  %4884 = vperm.xlu1 %10065, %v10632_v2   ;;  %v4924_v59 = vmul.f32 %v14206_v41, %v4695_v58 }
 0xd9d   : > { %v4700_v9 = vpop.permute.xlu0 %4699 }
 0xd9e   : > { %v4925_v8 = vmul.f32 %v14211_v46, %v4700_v9  ;;  %4889 = vperm.xlu0 %10066, %v10634_v51   ;;  %9836 = vmatprep.mubr.msk.bf16.mxu1 %vm702_vm0, %v4974_v29 }
 0xd9f   : > { %v4685_v16 = vpop.permute.xlu1 %4684  ;;  %9837 = vmatmul.mubr.msk.bf16.gmra.mrb[88].mxu1 %vm702_vm0, %v4975_v6 }
 0xda0   : > { %v4977_v56 = vpack.c.bf16 %v4925_v8, %v4924_v59  ;;  %v4922_v4 = vmul.f32 %v4685_v16, %v14209_v22 }
 0xda1   : > { %v4690_v60 = vpop.permute.xlu0 %4689 }
 0xda2   : > { %v4923_v1 = vmul.f32 %v4690_v60, %v14215_v31 }
 0xda3   : > { %v4715_v18 = vpop.permute.xlu1 %4714 }
 0xda4   : > { %v4976_v47 = vpack.c.bf16 %v4923_v1, %v4922_v4  ;;  %v4928_v39 = vmul.f32 %v14218_v52, %v4715_v18 }
 0xda5   : > { %v4720_v30 = vpop.permute.xlu0 %4719 }
 0xda6   : > { %v4929_v41 = vmul.f32 %v14223_v3, %v4720_v30  ;;  %9840 = vmatprep.mubr.msk.bf16.mxu1 %vm702_vm0, %v4976_v47 }
 0xda7   : > { %v4705_v46 = vpop.permute.xlu1 %4704  ;;  %9841 = vmatmul.mubr.msk.bf16.gmra.mrb[92].mxu1 %vm702_vm0, %v4977_v56 }
 0xda8   : > { %v4979_v17 = vpack.c.bf16 %v4929_v41, %v4928_v39  ;;  %v9822_v6 = vpop.f32.mrb[72].mxu1  ;;  %v4926_v31 = vmul.f32 %v4705_v46, %v14221_v48 }
 0xda9   : > { %5483 = vrot.lane.b32.xlu1 %v9822_v6, %s10902_s23  ;;  %v5160_v34 = vpop.f32.mrb[73].mxu1  ;;  %v4710_v22 = vpop.permute.xlu0 %4709 }
 0xdaa   : > { %v4927_v21 = vmul.f32 %v4710_v22, %v14227_v53  ;;  %v9823_v2 = vpop.f32.mrb[74].mxu1 }
 0xdab   : > { %v4735_v58 = vpop.permute.xlu1 %4734  ;;  %5485 = vrot.lane.b32.xlu0 %v9823_v2, %s10902_s23  ;;  %v5163_v52 = vpop.f32.mrb[75].mxu1 }
 0xdac   : > { %v4978_v3 = vpack.c.bf16 %v4927_v21, %v4926_v31  ;;  %v4932_v51 = vmul.f32 %v14230_v28, %v4735_v58 }
 0xdad   : > { %5479 = vrot.lane.b32.xlu1 %v5160_v34, %s10902_s23  ;;  %v4740_v29 = vpop.permute.xlu0 %4739 }
 0xdae   : > { %v4933_v9 = vmul.f32 %v14235_v49, %v4740_v29  ;;  %9844 = vmatprep.mubr.msk.bf16.mxu1 %vm702_vm0, %v4978_v3 }
 0xdaf   : > { %v4725_v59 = vpop.permute.xlu1 %4724  ;;  %5481 = vrot.lane.b32.xlu0 %v5163_v52, %s10902_s23  ;;  %9845 = vmatmul.mubr.msk.bf16.gmra.mrb[96].mxu1 %vm702_vm0, %v4979_v17 }
 0xdb0   : > { %v4981_v48 = vpack.c.bf16 %v4933_v9, %v4932_v51  ;;  %v4930_v8 = vmul.f32 %v4725_v59, %v14233_v45 }
 0xdb1   : > { %v4730_v53 = vpop.permute.xlu0 %4729 }
 0xdb2   : > { %v4931_v16 = vmul.f32 %v4730_v53, %v14239_v32 }
 0xdb3   : > { %v4755_v56 = vpop.permute.xlu1 %4754 }
 0xdb4   : > { %v4980_v60 = vpack.c.bf16 %v4931_v16, %v4930_v8  ;;  %v4936_v28 = vmul.f32 %v14244_v13, %v4755_v56 }
 0xdb5   : > { %v4760_v4 = vpop.permute.xlu0 %4759 }
 0xdb6   : > { %v4937_v49 = vmul.f32 %v14251_v43, %v4760_v4  ;;  %9848 = vmatprep.mubr.msk.bf16.mxu1 %vm702_vm0, %v4980_v60 }
 0xdb7   : > { %v4745_v1 = vpop.permute.xlu1 %4744  ;;  %9849 = vmatmul.mubr.msk.bf16.gmra.mrb[100].mxu1 %vm702_vm0, %v4981_v48 }
 0xdb8   : > { %v4983_v18 = vpack.c.bf16 %v4937_v49, %v4936_v28  ;;  %v4934_v30 = vmul.f32 %v4745_v1, %v14247_v38 }
 0xdb9   : > { %v4750_v47 = vpop.permute.xlu0 %4749 }
 0xdba   : > { %v4935_v45 = vmul.f32 %v4750_v47, %v14255_v54 }
 0xdbb   : > { %v4775_v39 = vpop.permute.xlu1 %4774 }
 0xdbc   : > { %v4982_v32 = vpack.c.bf16 %v4935_v45, %v4934_v30  ;;  %v4940_v46 = vmul.f32 %v14260_v61, %v4775_v39 }
 0xdbd   : > { %v4780_v41 = vpop.permute.xlu0 %4779 }
 0xdbe   : > { %v4941_v13 = vmul.f32 %v14265_v50, %v4780_v41  ;;  %9852 = vmatprep.mubr.msk.bf16.mxu1 %vm702_vm0, %v4982_v32 }
 0xdbf   : > { %v4765_v43 = vpop.permute.xlu1 %4764  ;;  %9853 = vmatmul.mubr.msk.bf16.gmra.mrb[104].mxu1 %vm702_vm0, %v4983_v18 }
 0xdc0   : > { %v4985_v17 = vpack.c.bf16 %v4941_v13, %v4940_v46  ;;  %v4938_v34 = vmul.f32 %v4765_v43, %v14263_v20 }
 0xdc1   : > { %v4770_v6 = vpop.permute.xlu0 %4769 }
 0xdc2   : > { %v4939_v38 = vmul.f32 %v4770_v6, %v14269_v26 }
 0xdc3   : > { %v4795_v22 = vpop.permute.xlu1 %4794 }
 0xdc4   : > { %v4984_v54 = vpack.c.bf16 %v4939_v38, %v4938_v34  ;;  %v4944_v21 = vmul.f32 %v14272_v57, %v4795_v22 }
 0xdc5   : > { %v4800_v31 = vpop.permute.xlu0 %4799 }
 0xdc6   : > { %v4945_v61 = vmul.f32 %v14277_v14, %v4800_v31  ;;  %9856 = vmatprep.mubr.msk.bf16.mxu1 %vm702_vm0, %v4984_v54 }
 0xdc7   : > { %v4785_v50 = vpop.permute.xlu1 %4784  ;;  %v9826_v2 = vpop.f32.mrb[76].mxu1  ;;  %9857 = vmatmul.mubr.msk.bf16.gmra.mrb[108].mxu1 %vm702_vm0, %v4985_v17 }
 0xdc8   : > { %v4987_v58 = vpack.c.bf16 %v4945_v61, %v4944_v21  ;;  %5491 = vrot.lane.b32.xlu0 %v9826_v2, %s10902_s23  ;;  %v5176_v52 = vpop.f32.mrb[77].mxu1  ;;  %v4942_v26 = vmul.f32 %v4785_v50, %v14275_v36 }
 0xdc9   : > { %v9827_v20 = vpop.f32.mrb[78].mxu1  ;;  %v4790_v3 = vpop.permute.xlu0 %4789 }
 0xdca   : > { %v4943_v29 = vmul.f32 %v4790_v3, %v14281_v12  ;;  %5493 = vrot.lane.b32.xlu1 %v9827_v20, %s10902_s23  ;;  %v5179_v57 = vpop.f32.mrb[79].mxu1 }
 0xdcb   : > { %v4815_v14 = vpop.permute.xlu1 %4814 }
 0xdcc   : > { %v4986_v51 = vpack.c.bf16 %v4943_v29, %v4942_v26  ;;  %5487 = vrot.lane.b32.xlu0 %v5176_v52, %s10902_s23  ;;  %v4948_v59 = vmul.f32 %v14284_v62, %v4815_v14 }
 0xdcd   : > { %v4820_v9 = vpop.permute.xlu0 %4819 }
 0xdce   : > { %v4949_v48 = vmul.f32 %v14289_v33, %v4820_v9  ;;  %5489 = vrot.lane.b32.xlu1 %v5179_v57, %s10902_s23  ;;  %9860 = vmatprep.mubr.msk.bf16.mxu1 %vm702_vm0, %v4986_v51 }
 0xdcf   : > { %v4805_v53 = vpop.permute.xlu1 %4804  ;;  %9861 = vmatmul.mubr.msk.bf16.gmra.mrb[112].mxu1 %vm702_vm0, %v4987_v58 }
 0xdd0   : > { %v4989_v36 = vpack.c.bf16 %v4949_v48, %v4948_v59  ;;  %v4946_v8 = vmul.f32 %v4805_v53, %v14287_v55 }
 0xdd1   : > { %v4810_v12 = vpop.permute.xlu0 %4809 }
 0xdd2   : > { %v4947_v16 = vmul.f32 %v4810_v12, %v14293_v63 }
 0xdd3   : > { %v4835_v56 = vpop.permute.xlu1 %4834 }
 0xdd4   : > { %v4988_v60 = vpack.c.bf16 %v4947_v16, %v4946_v8  ;;  %v4952_v62 = vmul.f32 %v14296_v44, %v4835_v56 }
 0xdd5   : > { %v4840_v4 = vpop.permute.xlu0 %4839 }
 0xdd6   : > { %v4953_v33 = vmul.f32 %v14301_v7, %v4840_v4  ;;  %9864 = vmatprep.mubr.msk.bf16.mxu1 %vm702_vm0, %v4988_v60 }
 0xdd7   : > { %v4825_v28 = vpop.permute.xlu1 %4824  ;;  %9865 = vmatmul.mubr.msk.bf16.gmra.mrb[116].mxu1 %vm702_vm0, %v4989_v36 }
 0xdd8   : > { %v4991_v49 = vpack.c.bf16 %v4953_v33, %v4952_v62  ;;  %v4950_v18 = vmul.f32 %v4825_v28, %v14299_v40 }
 0xdd9   : > { %v4830_v1 = vpop.permute.xlu0 %4829 }
 0xdda   : > { %v4951_v55 = vmul.f32 %v4830_v1, %v14305_v11 }
 0xddb   : > { %v4855_v47 = vpop.permute.xlu1 %4854 }
 0xddc   : > { %v4990_v63 = vpack.c.bf16 %v4951_v55, %v4950_v18  ;;  %v4956_v45 = vmul.f32 %v14308_v37, %v4855_v47 }
 0xddd   : > { %v4860_v30 = vpop.permute.xlu0 %4859 }
 0xdde   : > { %v4957_v44 = vmul.f32 %v14313_v5, %v4860_v30  ;;  %9868 = vmatprep.mubr.msk.bf16.mxu1 %vm702_vm0, %v4990_v63 }
 0xddf   : > { %v4845_v7 = vpop.permute.xlu1 %4844  ;;  %9869 = vmatmul.mubr.msk.bf16.gmra.mrb[120].mxu1 %vm702_vm0, %v4991_v49 }
 0xde0   : > { %v4993_v39 = vpack.c.bf16 %v4957_v44, %v4956_v45  ;;  %v4954_v41 = vmul.f32 %v4845_v7, %v14311_v23 }
 0xde1   : > { %v4850_v32 = vpop.permute.xlu0 %4849 }
 0xde2   : > { %v4955_v40 = vmul.f32 %v4850_v32, %v14317_v10 }
 0xde3   : > { %v4875_v46 = vpop.permute.xlu1 %4874 }
 0xde4   : > { %v4992_v11 = vpack.c.bf16 %v4955_v40, %v4954_v41  ;;  %v4960_v43 = vmul.f32 %v14320_v42, %v4875_v46 }
 0xde5   : > { %v4880_v13 = vpop.permute.xlu0 %4879 }
 0xde6   : > { %v4961_v37 = vmul.f32 %v14325_v0, %v4880_v13  ;;  %9872 = vmatprep.mubr.msk.bf16.mxu1 %vm702_vm0, %v4992_v11 }
 0xde7   : > { %v4865_v5 = vpop.permute.xlu1 %4864  ;;  %9873 = vmatmul.mubr.msk.bf16.gmra.mrb[124].mxu1 %vm702_vm0, %v4993_v39 }
 0xde8   : > { %v4995_v17 = vpack.c.bf16 %v4961_v37, %v4960_v43  ;;  %v4958_v34 = vmul.f32 %v4865_v5, %v14323_v19 }
 0xde9   : > { %v4870_v6 = vpop.permute.xlu0 %4869 }
 0xdea   : > { %v4959_v23 = vmul.f32 %v4870_v6, %v14329_v35 }
 0xdec   : > { %v4994_v38 = vpack.c.bf16 %v4959_v23, %v4958_v34 }
 0xdee   : > { %9876 = vmatprep.mubr.msk.bf16.mxu1 %vm702_vm0, %v4994_v38 }
 0xdef   : > { %9877 = vmatmul.mubr.msk.bf16.gmra.mrb[128].mxu1 %vm702_vm0, %v4995_v17 }
 0xe00   : > { %v9830_v10 = vpop.f32.mrb[80].mxu1 }
 0xe01   : > { %5499 = vrot.lane.b32.xlu0 %v9830_v10, %s10902_s23  ;;  %v5192_v42 = vpop.f32.mrb[81].mxu1  ;;  %v17620_v10 = vld [vmem:[#allocation7_spill] sm:$0xff] }
 0xe02   : > { %v9831_v0 = vpop.f32.mrb[82].mxu1 }
 0xe03   : > { %5501 = vrot.lane.b32.xlu1 %v9831_v0, %s10902_s23  ;;  %v5195_v22 = vpop.f32.mrb[83].mxu1 }
 0xe05   : > { %5495 = vrot.lane.b32.xlu0 %v5192_v42, %s10902_s23 }
 0xe07   : > { %5497 = vrot.lane.b32.xlu1 %v5195_v22, %s10902_s23 }
 0xe17   : > { %v4895_v19 = vpop.permute.xlu1 %4894 }
 0xe18   : > { %v4964_v35 = vmul.f32 %v14338_v15, %v4895_v19  ;;  %v17621_v19 = vld [vmem:[#allocation8_spill] sm:$0xff] }
 0xe19   : > { %v4900_v54 = vpop.permute.xlu0 %4899 }
 0xe1a   : > { %v4965_v31 = vmul.f32 %v14343_v25, %v4900_v54 }
 0xe1b   : > { %v4885_v21 = vpop.permute.xlu1 %4884 }
 0xe1c   : > { %v4997_v61 = vpack.c.bf16 %v4965_v31, %v4964_v35  ;;  %v4962_v2 = vmul.f32 %v4885_v21, %v14341_v24  ;;  %v17622_v31 = vld [vmem:[#allocation46_spill] sm:$0xff] }
 0xe1d   : > { %v4890_v50 = vpop.permute.xlu0 %4889 }
 0xe1e   : > { %v4963_v58 = vmul.f32 %v4890_v50, %v14347_v27 }
 0xe1f   : > { %v5484_v17 = vpop.permute.xlu1 %5483 }
 0xe20   : > { %v4996_v52 = vpack.c.bf16 %v4963_v58, %v4962_v2  ;;  %v5673_v42 = vadd.f32 %v5484_v17, %v17620_v10 }
 0xe21   : > { %v5486_v37 = vpop.permute.xlu0 %5485 }
 0xe22   : > { %9880 = vmatprep.mubr.msk.bf16.mxu1 %vm702_vm0, %v4996_v52  ;;  %v5674_v54 = vadd.f32 %v5486_v37, %v17621_v19  ;;  %v14484_v21 = vadd.f32 %v17622_v31, %v5673_v42  ;;  %v17626_v52 = vld [vmem:[#allocation4_spill] sm:$0xff] }
 0xe23   : > { %9881 = vmatmul.mubr.msk.bf16.gmra.mrb[132].mxu1 %vm702_vm0, %v4997_v61  ;;  %v5480_v0 = vpop.permute.xlu1 %5479  ;;  %v17624_v61 = vld [vmem:[#allocation2_spill] sm:$0xff] }
 0xe24   : > { %17623 = vst [vmem:[#allocation110_spill] sm:$0xff] %v14484_v21  ;;  %v5671_v50 = vadd.f32 %v5480_v0, %v17624_v61  ;;  %v14489_v58 = vadd.f32 %v17622_v31, %v5674_v54  ;;  %v17642_v0 = vld [vmem:[#allocation51_spill] sm:$0xff]  ;;  %v17644_v61 = vld [vmem:[#allocation94_spill] sm:$0xff] }
 0xe25   : > { %v5482_v34 = vpop.permute.xlu0 %5481 }
 0xe26   : > { %17625 = vst [vmem:[#allocation50_spill] sm:$0xff] %v14489_v58 }
 0xe39   : > { %v9834_v20 = vpop.f32.mrb[84].mxu1 }
 0xe3a   : > { %5507 = vrot.lane.b32.xlu0 %v9834_v20, %s10902_s23  ;;  %v5208_v3 = vpop.f32.mrb[85].mxu1  ;;  %v5492_v35 = vpop.permute.xlu0 %5491  ;;  %v5672_v20 = vadd.f32 %v5482_v34, %v17626_v52  ;;  %v17646_v52 = vld [vmem:[#allocation91_spill] sm:$0xff] }
 0xe3b   : > { %v9835_v26 = vpop.f32.mrb[86].mxu1 }
 0xe3c   : > { %5509 = vrot.lane.b32.xlu1 %v9835_v26, %s10902_s23  ;;  %v5211_v15 = vpop.f32.mrb[87].mxu1  ;;  %v5494_v2 = vpop.permute.xlu1 %5493 }
 0xe3e   : > { %5503 = vrot.lane.b32.xlu0 %v5208_v3, %s10902_s23  ;;  %v14495_v3 = vadd.f32 %v17622_v31, %v5671_v50  ;;  %v5488_v26 = vpop.permute.xlu0 %5487 }
 0xe40   : > { %5505 = vrot.lane.b32.xlu1 %v5211_v15, %s10902_s23  ;;  %17627 = vst [vmem:[#allocation53_spill] sm:$0xff] %v14495_v3  ;;  %v14500_v15 = vadd.f32 %v17622_v31, %v5672_v20 }
 0xe42   : > { %17628 = vst [vmem:[#allocation55_spill] sm:$0xff] %v14500_v15 }
 0xe72   : > { %v9838_v24 = vpop.f32.mrb[88].mxu1 }
 0xe73   : > { %5515 = vrot.lane.b32.xlu0 %v9838_v24, %s10902_s23  ;;  %v5224_v25 = vpop.f32.mrb[89].mxu1  ;;  %v5490_v24 = vpop.permute.xlu1 %5489 }
 0xe74   : > { %v9839_v27 = vpop.f32.mrb[90].mxu1 }
 0xe75   : > { %5517 = vrot.lane.b32.xlu1 %v9839_v27, %s10902_s23  ;;  %v5227_v29 = vpop.f32.mrb[91].mxu1 }
 0xe77   : > { %5511 = vrot.lane.b32.xlu0 %v5224_v25, %s10902_s23  ;;  %v5500_v25 = vpop.permute.xlu0 %5499  ;;  %v5502_v27 = vpop.permute.xlu1 %5501 }
 0xe79   : > { %5513 = vrot.lane.b32.xlu1 %v5227_v29, %s10902_s23 }
 0xe7a   : > { %v9842_v57 = vpop.f32.mrb[92].mxu1 }
 0xe7b   : > { %5523 = vrot.lane.b32.xlu0 %v9842_v57, %s10902_s23  ;;  %v5240_v14 = vpop.f32.mrb[93].mxu1  ;;  %v5496_v29 = vpop.permute.xlu0 %5495 }
 0xe7c   : > { %v9843_v51 = vpop.f32.mrb[94].mxu1  ;;  %v5498_v57 = vpop.permute.xlu1 %5497 }
 0xe7d   : > { %5525 = vrot.lane.b32.xlu1 %v9843_v51, %s10902_s23  ;;  %v5243_v9 = vpop.f32.mrb[95].mxu1 }
 0xe7f   : > { %5519 = vrot.lane.b32.xlu0 %v5240_v14, %s10902_s23 }
 0xe81   : > { %5521 = vrot.lane.b32.xlu1 %v5243_v9, %s10902_s23 }
 0xe82   : > { %v9846_v59 = vpop.f32.mrb[96].mxu1 }
 0xe83   : > { %5531 = vrot.lane.b32.xlu0 %v9846_v59, %s10902_s23  ;;  %v5256_v48 = vpop.f32.mrb[97].mxu1 }
 0xe84   : > { %v9847_v53 = vpop.f32.mrb[98].mxu1 }
 0xe85   : > { %5533 = vrot.lane.b32.xlu1 %v9847_v53, %s10902_s23  ;;  %v5259_v36 = vpop.f32.mrb[99].mxu1 }
 0xe87   : > { %5527 = vrot.lane.b32.xlu0 %v5256_v48, %s10902_s23 }
 0xe89   : > { %5529 = vrot.lane.b32.xlu1 %v5259_v36, %s10902_s23 }
 0xe8a   : > { %v9850_v12 = vpop.f32.mrb[100].mxu1 }
 0xe8b   : > { %5539 = vrot.lane.b32.xlu0 %v9850_v12, %s10902_s23  ;;  %v5272_v8 = vpop.f32.mrb[101].mxu1 }
 0xe8c   : > { %v9851_v16 = vpop.f32.mrb[102].mxu1 }
 0xe8d   : > { %5541 = vrot.lane.b32.xlu1 %v9851_v16, %s10902_s23  ;;  %v5275_v56 = vpop.f32.mrb[103].mxu1 }
 0xe8f   : > { %5535 = vrot.lane.b32.xlu0 %v5272_v8, %s10902_s23 }
 0xe91   : > { %5537 = vrot.lane.b32.xlu1 %v5275_v56, %s10902_s23 }
 0xe92   : > { %v9854_v60 = vpop.f32.mrb[104].mxu1 }
 0xe93   : > { %5547 = vrot.lane.b32.xlu0 %v9854_v60, %s10902_s23  ;;  %v5288_v4 = vpop.f32.mrb[105].mxu1 }
 0xe94   : > { %v9855_v62 = vpop.f32.mrb[106].mxu1 }
 0xe95   : > { %5549 = vrot.lane.b32.xlu1 %v9855_v62, %s10902_s23  ;;  %v5291_v33 = vpop.f32.mrb[107].mxu1 }
 0xe97   : > { %5543 = vrot.lane.b32.xlu0 %v5288_v4, %s10902_s23 }
 0xe99   : > { %5545 = vrot.lane.b32.xlu1 %v5291_v33, %s10902_s23 }
 0xe9a   : > { %v9858_v28 = vpop.f32.mrb[108].mxu1 }
 0xe9b   : > { %5555 = vrot.lane.b32.xlu0 %v9858_v28, %s10902_s23  ;;  %v5304_v49 = vpop.f32.mrb[109].mxu1 }
 0xe9c   : > { %v9859_v1 = vpop.f32.mrb[110].mxu1 }
 0xe9d   : > { %5557 = vrot.lane.b32.xlu1 %v9859_v1, %s10902_s23  ;;  %v5307_v18 = vpop.f32.mrb[111].mxu1  ;;  %v17629_v1 = vld [vmem:[#allocation36_spill] sm:$0xff] }
 0xe9f   : > { %5551 = vrot.lane.b32.xlu0 %v5304_v49, %s10902_s23 }
 0xea1   : > { %5553 = vrot.lane.b32.xlu1 %v5307_v18, %s10902_s23  ;;  %v5677_v18 = vadd.f32 %v5492_v35, %v17629_v1  ;;  %v17654_v1 = vld [vmem:[#allocation98_spill] sm:$0xff] }
 0xea2   : > { %v9862_v55 = vpop.f32.mrb[112].mxu1 }
 0xea3   : > { %5563 = vrot.lane.b32.xlu0 %v9862_v55, %s10902_s23  ;;  %v5320_v47 = vpop.f32.mrb[113].mxu1 }
 0xea4   : > { %v9863_v63 = vpop.f32.mrb[114].mxu1 }
 0xea5   : > { %5565 = vrot.lane.b32.xlu1 %v9863_v63, %s10902_s23  ;;  %v5323_v30 = vpop.f32.mrb[115].mxu1  ;;  %v17630_v63 = vld [vmem:[#allocation31_spill] sm:$0xff] }
 0xea7   : > { %5559 = vrot.lane.b32.xlu0 %v5320_v47, %s10902_s23 }
 0xea9   : > { %5561 = vrot.lane.b32.xlu1 %v5323_v30, %s10902_s23  ;;  %v5678_v30 = vadd.f32 %v5494_v2, %v17630_v63 }
 0xeaa   : > { %v9866_v45 = vpop.f32.mrb[116].mxu1 }
 0xeab   : > { %5571 = vrot.lane.b32.xlu0 %v9866_v45, %s10902_s23  ;;  %v5336_v44 = vpop.f32.mrb[117].mxu1 }
 0xeac   : > { %v9867_v7 = vpop.f32.mrb[118].mxu1  ;;  %v5508_v14 = vpop.permute.xlu0 %5507 }
 0xead   : > { %5573 = vrot.lane.b32.xlu1 %v9867_v7, %s10902_s23  ;;  %v5339_v39 = vpop.f32.mrb[119].mxu1  ;;  %v17632_v7 = vld [vmem:[#allocation11_spill] sm:$0xff]  ;;  %v5685_v50 = vadd.f32 %v5508_v14, %v17644_v61 }
 0xeae   : > { %v5510_v51 = vpop.permute.xlu1 %5509  ;;  %v17650_v14 = vld [vmem:[#allocation87_spill] sm:$0xff] }
 0xeaf   : > { %5567 = vrot.lane.b32.xlu0 %v5336_v44, %s10902_s23  ;;  %v14532_v44 = vadd.f32 %v17622_v31, %v5677_v18  ;;  %v5686_v20 = vadd.f32 %v5510_v51, %v17646_v52 }
 0xeb0   : > { %v5504_v9 = vpop.permute.xlu0 %5503 }
 0xeb1   : > { %5569 = vrot.lane.b32.xlu1 %v5339_v39, %s10902_s23  ;;  %17631 = vst [vmem:[#allocation18_spill] sm:$0xff] %v14532_v44  ;;  %v5675_v39 = vadd.f32 %v5488_v26, %v17632_v7  ;;  %v14589_v26 = vadd.f32 %v17622_v31, %v5685_v50 }
 0xeb2   : > { %v9870_v32 = vpop.f32.mrb[120].mxu1  ;;  %v5506_v59 = vpop.permute.xlu1 %5505 }
 0xeb3   : > { %5579 = vrot.lane.b32.xlu0 %v9870_v32, %s10902_s23  ;;  %v5352_v41 = vpop.f32.mrb[121].mxu1  ;;  %17647 = vst [vmem:[#allocation62_spill] sm:$0xff] %v14589_v26  ;;  %v5684_v51 = vadd.f32 %v5506_v59, %v17650_v14 }
 0xeb4   : > { %v9871_v40 = vpop.f32.mrb[122].mxu1 }
 0xeb5   : > { %5581 = vrot.lane.b32.xlu1 %v9871_v40, %s10902_s23  ;;  %v5355_v46 = vpop.f32.mrb[123].mxu1  ;;  %v17634_v40 = vld [vmem:[#allocation12_spill] sm:$0xff] }
 0xeb7   : > { %5575 = vrot.lane.b32.xlu0 %v5352_v41, %s10902_s23  ;;  %v14539_v41 = vadd.f32 %v17622_v31, %v5678_v30  ;;  %v17656_v30 = vld [vmem:[#allocation95_spill] sm:$0xff] }
 0xeb9   : > { %5577 = vrot.lane.b32.xlu1 %v5355_v46, %s10902_s23  ;;  %17633 = vst [vmem:[#allocation23_spill] sm:$0xff] %v14539_v41  ;;  %v5676_v46 = vadd.f32 %v5490_v24, %v17634_v40  ;;  %v17648_v24 = vld [vmem:[#allocation89_spill] sm:$0xff] }
 0xeba   : > { %v9874_v11 = vpop.f32.mrb[124].mxu1 }
 0xebb   : > { %5587 = vrot.lane.b32.xlu0 %v9874_v11, %s10902_s23  ;;  %v5368_v13 = vpop.f32.mrb[125].mxu1  ;;  %v14545_v11 = vadd.f32 %v17622_v31, %v5675_v39  ;;  %v14555_v17 = vadd.f32 %v17622_v31, %v5676_v46  ;;  %v17660_v46 = vld [vmem:[#allocation109_spill] sm:$0xff] }
 0xebc   : > { %v9875_v43 = vpop.f32.mrb[126].mxu1 }
 0xebd   : > { %5589 = vrot.lane.b32.xlu1 %v9875_v43, %s10902_s23  ;;  %v5371_v5 = vpop.f32.mrb[127].mxu1  ;;  %17635 = vst [vmem:[#allocation26_spill] sm:$0xff] %v14545_v11  ;;  %17637 = vst [vmem:[#allocation24_spill] sm:$0xff] %v14555_v17 }
 0xebf   : > { %5583 = vrot.lane.b32.xlu0 %v5368_v13, %s10902_s23  ;;  %v17636_v13 = vld [vmem:[#allocation84_spill] sm:$0xff] }
 0xec0   : > { %v5681_v43 = vadd.f32 %v5500_v25, %v17636_v13  ;;  %v5683_v25 = vadd.f32 %v5504_v9, %v17648_v24 }
 0xec1   : > { %5585 = vrot.lane.b32.xlu1 %v5371_v5, %s10902_s23 }
 0xec2   : > { %v9878_v6 = vpop.f32.mrb[128].mxu1 }
 0xec3   : > { %5595 = vrot.lane.b32.xlu0 %v9878_v6, %s10902_s23  ;;  %v5384_v23 = vpop.f32.mrb[129].mxu1  ;;  %v17638_v6 = vld [vmem:[#allocation82_spill] sm:$0xff] }
 0xec4   : > { %v9879_v38 = vpop.f32.mrb[130].mxu1  ;;  %v5682_v34 = vadd.f32 %v5502_v27, %v17638_v6 }
 0xec5   : > { %5597 = vrot.lane.b32.xlu1 %v9879_v38, %s10902_s23  ;;  %v5387_v22 = vpop.f32.mrb[131].mxu1  ;;  %v17640_v38 = vld [vmem:[#allocation60_spill] sm:$0xff] }
 0xec6   : > { %v5679_v10 = vadd.f32 %v5496_v29, %v17640_v38  ;;  %v14567_v42 = vadd.f32 %v17622_v31, %v5682_v34  ;;  %v17662_v34 = vld [vmem:[#allocation108_spill] sm:$0xff] }
 0xec7   : > { %5591 = vrot.lane.b32.xlu0 %v5384_v23, %s10902_s23  ;;  %v14561_v23 = vadd.f32 %v17622_v31, %v5681_v43 }
 0xec8   : > { %17641 = vst [vmem:[#allocation33_spill] sm:$0xff] %v14567_v42  ;;  %v14577_v35 = vadd.f32 %v17622_v31, %v5679_v10  ;;  %v17664_v10 = vld [vmem:[#allocation103_spill] sm:$0xff] }
 0xec9   : > { %5593 = vrot.lane.b32.xlu1 %v5387_v22, %s10902_s23  ;;  %17639 = vst [vmem:[#allocation35_spill] sm:$0xff] %v14561_v23  ;;  %v5680_v22 = vadd.f32 %v5498_v57, %v17642_v0  ;;  %v14599_v57 = vadd.f32 %v17622_v31, %v5686_v20 }
 0xeca   : > { %17643 = vst [vmem:[#allocation59_spill] sm:$0xff] %v14577_v35 }
 0xecb   : > { %5876 = vrot.lane.b32.xlu0 %v14484_v21, %s10902_s23  ;;  %v14583_v2 = vadd.f32 %v17622_v31, %v5680_v22  ;;  %17649 = vst [vmem:[#allocation69_spill] sm:$0xff] %v14599_v57  ;;  %v17666_v22 = vld [vmem:[#allocation102_spill] sm:$0xff] }
 0xecd   : > { %5878 = vrot.lane.b32.xlu1 %v14489_v58, %s10902_s23  ;;  %17645 = vst [vmem:[#allocation65_spill] sm:$0xff] %v14583_v2 }
 0xecf   : > { %5872 = vrot.lane.b32.xlu0 %v14495_v3, %s10902_s23 }
 0xed1   : > { %5874 = vrot.lane.b32.xlu1 %v14500_v15, %s10902_s23 }
 0xee5   : > { %v5516_v48 = vpop.permute.xlu0 %5515 }
 0xee7   : > { %v5518_v53 = vpop.permute.xlu1 %5517 }
 0xee8   : > { %v5690_v18 = vadd.f32 %v5518_v53, %v17654_v1  ;;  %v17658_v53 = vld [vmem:[#allocation93_spill] sm:$0xff] }
 0xee9   : > { %v14506_v36 = vpop.permute.xlu0 %5511 }
 0xeea   : > { %v14628_v7 = vadd.f32 %v17622_v31, %v5690_v18  ;;  %v17674_v18 = vld [vmem:[#allocation113_spill] sm:$0xff] }
 0xeeb   : > { %v14508_v12 = vpop.permute.xlu1 %5513 }
 0xeec   : > { %17657 = vst [vmem:[#allocation71_spill] sm:$0xff] %v14628_v7  ;;  %v5688_v39 = vadd.f32 %v14508_v12, %v17658_v53 }
 0xeed   : > { %v14510_v8 = vpop.permute.xlu0 %5523 }
 0xeee   : > { %v5693_v13 = vadd.f32 %v14510_v8, %v17660_v46  ;;  %v14644_v6 = vadd.f32 %v17622_v31, %v5688_v39  ;;  %v17678_v39 = vld [vmem:[#allocation13_spill] sm:$0xff] }
 0xeef   : > { %v14512_v16 = vpop.permute.xlu1 %5525 }
 0xef0   : > { %17661 = vst [vmem:[#allocation6_spill] sm:$0xff] %v14644_v6  ;;  %v5694_v12 = vadd.f32 %v14512_v16, %v17662_v34  ;;  %v14651_v38 = vadd.f32 %v17622_v31, %v5693_v13 }
 0xef1   : > { %v14514_v56 = vpop.permute.xlu0 %5519 }
 0xef2   : > { %17663 = vst [vmem:[#allocation83_spill] sm:$0xff] %v14651_v38  ;;  %v5691_v8 = vadd.f32 %v14514_v56, %v17664_v10  ;;  %v14658_v0 = vadd.f32 %v17622_v31, %v5694_v12  ;;  %v17668_v56 = vld [vmem:[#allocation119_spill] sm:$0xff] }
 0xef3   : > { %v14516_v60 = vpop.permute.xlu1 %5521 }
 0xef4   : > { %17665 = vst [vmem:[#allocation80_spill] sm:$0xff] %v14658_v0  ;;  %v5692_v61 = vadd.f32 %v14516_v60, %v17666_v22  ;;  %v14669_v52 = vadd.f32 %v17622_v31, %v5691_v8  ;;  %v17670_v60 = vld [vmem:[#allocation118_spill] sm:$0xff] }
 0xef5   : > { %v14518_v4 = vpop.permute.xlu0 %5531 }
 0xef6   : > { %v9882_v62 = vpop.f32.mrb[132].mxu1  ;;  %17667 = vst [vmem:[#allocation121_spill] sm:$0xff] %v14669_v52  ;;  %v5697_v20 = vadd.f32 %v14518_v4, %v17668_v56  ;;  %v14676_v24 = vadd.f32 %v17622_v31, %v5692_v61  ;;  %v17684_v61 = vld [vmem:[#allocation17_spill] sm:$0xff] }
 0xef7   : > { %v14520_v33 = vpop.permute.xlu1 %5533  ;;  %5603 = vrot.lane.b32.xlu0 %v9882_v62, %s10902_s23  ;;  %v5400_v28 = vpop.f32.mrb[133].mxu1  ;;  %v14605_v62 = vadd.f32 %v17622_v31, %v5683_v25 }
 0xef8   : > { %v9883_v49 = vpop.f32.mrb[134].mxu1  ;;  %17669 = vst [vmem:[#allocation150_spill] sm:$0xff] %v14676_v24  ;;  %v5698_v25 = vadd.f32 %v14520_v33, %v17670_v60  ;;  %v14683_v14 = vadd.f32 %v17622_v31, %v5697_v20 }
 0xef9   : > { %v5403_v55 = vpop.f32.mrb[135].mxu1  ;;  %5605 = vrot.lane.b32.xlu1 %v9883_v49, %s10902_s23  ;;  %v14525_v47 = vpop.permute.xlu0 %5527  ;;  %17651 = vst [vmem:[#allocation73_spill] sm:$0xff] %v14605_v62  ;;  %v14611_v49 = vadd.f32 %v17622_v31, %v5684_v51  ;;  %v17672_v51 = vld [vmem:[#allocation114_spill] sm:$0xff] }
 0xefa   : > { %17671 = vst [vmem:[#allocation151_spill] sm:$0xff] %v14683_v14  ;;  %v14692_v1 = vadd.f32 %v17622_v31, %v5698_v25  ;;  %v17686_v25 = vld [vmem:[#allocation134_spill] sm:$0xff] }
 0xefb   : > { %v14528_v45 = vpop.permute.xlu1 %5529  ;;  %5599 = vrot.lane.b32.xlu0 %v5400_v28, %s10902_s23  ;;  %v17652_v28 = vld [vmem:[#allocation99_spill] sm:$0xff]  ;;  %17653 = vst [vmem:[#allocation136_spill] sm:$0xff] %v14611_v49 }
 0xefc   : > { %v5689_v9 = vadd.f32 %v5516_v48, %v17652_v28  ;;  %v5687_v48 = vadd.f32 %v14506_v36, %v17656_v30  ;;  %v5695_v28 = vadd.f32 %v14525_v47, %v17672_v51  ;;  %17673 = vst [vmem:[#allocation15_spill] sm:$0xff] %v14692_v1  ;;  %v5696_v33 = vadd.f32 %v14528_v45, %v17674_v18 }
 0xefd   : > { %5601 = vrot.lane.b32.xlu1 %v5403_v55, %s10902_s23  ;;  %v14536_v32 = vpop.permute.xlu0 %5539 }
 0xefe   : > { %v14621_v63 = vadd.f32 %v17622_v31, %v5689_v9  ;;  %v14635_v40 = vadd.f32 %v17622_v31, %v5687_v48  ;;  %v14699_v30 = vadd.f32 %v17622_v31, %v5695_v28  ;;  %v17676_v48 = vld [vmem:[#allocation130_spill] sm:$0xff]  ;;  %v14706_v53 = vadd.f32 %v17622_v31, %v5696_v33  ;;  %v17688_v28 = vld [vmem:[#allocation137_spill] sm:$0xff] }
 0xeff   : > { %5884 = vrot.lane.b32.xlu0 %v14532_v44, %s10902_s23  ;;  %v14548_v37 = vpop.permute.xlu1 %5541  ;;  %v5701_v47 = vadd.f32 %v14536_v32, %v17676_v48  ;;  %v17680_v32 = vld [vmem:[#allocation124_spill] sm:$0xff]  ;;  %v17690_v33 = vld [vmem:[#allocation22_spill] sm:$0xff] }
 0xf00   : > { %17655 = vst [vmem:[#allocation5_spill] sm:$0xff] %v14621_v63  ;;  %17659 = vst [vmem:[#allocation78_spill] sm:$0xff] %v14635_v40  ;;  %v5702_v46 = vadd.f32 %v14548_v37, %v17678_v39  ;;  %v17682_v37 = vld [vmem:[#allocation123_spill] sm:$0xff] }
 0xf01   : > { %5886 = vrot.lane.b32.xlu1 %v14539_v41, %s10902_s23  ;;  %v14552_v5 = vpop.permute.xlu0 %5535  ;;  %17675 = vst [vmem:[#allocation20_spill] sm:$0xff] %v14699_v30  ;;  %17677 = vst [vmem:[#allocation129_spill] sm:$0xff] %v14706_v53  ;;  %v14717_v34 = vadd.f32 %v17622_v31, %v5701_v47 }
 0xf02   : > { %v5699_v12 = vadd.f32 %v14552_v5, %v17680_v32  ;;  %v14724_v10 = vadd.f32 %v17622_v31, %v5702_v46  ;;  %v17692_v46 = vld [vmem:[#allocation32_spill] sm:$0xff] }
 0xf03   : > { %5880 = vrot.lane.b32.xlu0 %v14545_v11, %s10902_s23  ;;  %v14570_v19 = vpop.permute.xlu1 %5537  ;;  %17679 = vst [vmem:[#allocation135_spill] sm:$0xff] %v14717_v34 }
 0xf04   : > { %17681 = vst [vmem:[#allocation155_spill] sm:$0xff] %v14724_v10  ;;  %v5700_v8 = vadd.f32 %v14570_v19, %v17682_v37  ;;  %v14731_v22 = vadd.f32 %v17622_v31, %v5699_v12  ;;  %v17694_v12 = vld [vmem:[#allocation133_spill] sm:$0xff] }
 0xf05   : > { %5882 = vrot.lane.b32.xlu1 %v14555_v17, %s10902_s23  ;;  %v14574_v54 = vpop.permute.xlu0 %5547 }
 0xf06   : > { %17683 = vst [vmem:[#allocation63_spill] sm:$0xff] %v14731_v22  ;;  %v14738_v60 = vadd.f32 %v17622_v31, %v5700_v8  ;;  %v5705_v19 = vadd.f32 %v14574_v54, %v17686_v25  ;;  %v17696_v8 = vld [vmem:[#allocation40_spill] sm:$0xff] }
 0xf07   : > { %5892 = vrot.lane.b32.xlu0 %v14561_v23, %s10902_s23  ;;  %v14592_v27 = vpop.permute.xlu1 %5549 }
 0xf08   : > { %17685 = vst [vmem:[#allocation74_spill] sm:$0xff] %v14738_v60  ;;  %v5706_v48 = vadd.f32 %v14592_v27, %v17690_v33 }
 0xf09   : > { %5894 = vrot.lane.b32.xlu1 %v14567_v42, %s10902_s23  ;;  %v14596_v29 = vpop.permute.xlu0 %5543 }
 0xf0a   : > { %v5703_v56 = vadd.f32 %v14596_v29, %v17684_v61  ;;  %v14751_v29 = vadd.f32 %v17622_v31, %v5705_v19  ;;  %v17698_v19 = vld [vmem:[#allocation27_spill] sm:$0xff] }
 0xf0b   : > { %5888 = vrot.lane.b32.xlu0 %v14577_v35, %s10902_s23  ;;  %v14614_v55 = vpop.permute.xlu1 %5545 }
 0xf0c   : > { %v14745_v51 = vadd.f32 %v17622_v31, %v5703_v56  ;;  %17689 = vst [vmem:[#allocation153_spill] sm:$0xff] %v14751_v29  ;;  %v5704_v37 = vadd.f32 %v14614_v55, %v17694_v12 }
 0xf0d   : > { %5890 = vrot.lane.b32.xlu1 %v14583_v2, %s10902_s23  ;;  %v14618_v59 = vpop.permute.xlu0 %5555 }
 0xf0e   : > { %17687 = vst [vmem:[#allocation149_spill] sm:$0xff] %v14745_v51  ;;  %v14777_v25 = vadd.f32 %v17622_v31, %v5704_v37  ;;  %v17705_v37 = vld [vmem:[#allocation25_spill] sm:$0xff] }
 0xf0f   : > { %5900 = vrot.lane.b32.xlu0 %v14589_v26, %s10902_s23  ;;  %v14639_v43 = vpop.permute.xlu1 %5557 }
 0xf10   : > { %17697 = vst [vmem:[#allocation10_spill] sm:$0xff] %v14777_v25 }
 0xf11   : > { %5902 = vrot.lane.b32.xlu1 %v14599_v57, %s10902_s23  ;;  %v5552_v36 = vpop.permute.xlu0 %5551 }
 0xf12   : > { %v5707_v18 = vadd.f32 %v5552_v36, %v17688_v28  ;;  %v14764_v36 = vadd.f32 %v17622_v31, %v5706_v48  ;;  %v5709_v28 = vadd.f32 %v14618_v59, %v17698_v19  ;;  %v17702_v48 = vld [vmem:[#allocation29_spill] sm:$0xff]  ;;  %v17707_v19 = vld [vmem:[#allocation138_spill] sm:$0xff] }
 0xf13   : > { %5896 = vrot.lane.b32.xlu0 %v14605_v62, %s10902_s23  ;;  %v14662_v50 = vpop.permute.xlu1 %5553 }
 0xf14   : > { %v14758_v39 = vadd.f32 %v17622_v31, %v5707_v18  ;;  %17693 = vst [vmem:[#allocation148_spill] sm:$0xff] %v14764_v36  ;;  %v17700_v18 = vld [vmem:[#allocation142_spill] sm:$0xff] }
 0xf15   : > { %5898 = vrot.lane.b32.xlu1 %v14611_v49, %s10902_s23  ;;  %v14666_v16 = vpop.permute.xlu0 %5563 }
 0xf16   : > { %17691 = vst [vmem:[#allocation156_spill] sm:$0xff] %v14758_v39 }
 0xf17   : > { %5908 = vrot.lane.b32.xlu0 %v14621_v63, %s10902_s23  ;;  %v14687_v9 = vpop.permute.xlu1 %5565 }
 0xf19   : > { %5910 = vrot.lane.b32.xlu1 %v14628_v7, %s10902_s23  ;;  %v5560_v4 = vpop.permute.xlu0 %5559 }
 0xf1a   : > { %v5711_v32 = vadd.f32 %v5560_v4, %v17692_v46  ;;  %v5710_v46 = vadd.f32 %v14639_v43, %v17702_v48 }
 0xf1b   : > { %5904 = vrot.lane.b32.xlu0 %v14635_v40, %s10902_s23  ;;  %v14710_v13 = vpop.permute.xlu1 %5561 }
 0xf1c   : > { %v14771_v27 = vadd.f32 %v17622_v31, %v5711_v32  ;;  %v14802_v12 = vadd.f32 %v17622_v31, %v5710_v46 }
 0xf1d   : > { %5906 = vrot.lane.b32.xlu1 %v14644_v6, %s10902_s23  ;;  %v14714_v45 = vpop.permute.xlu0 %5571 }
 0xf1e   : > { %17695 = vst [vmem:[#allocation147_spill] sm:$0xff] %v14771_v27  ;;  %17704 = vst [vmem:[#allocation154_spill] sm:$0xff] %v14802_v12 }
 0xf1f   : > { %5916 = vrot.lane.b32.xlu0 %v14651_v38, %s10902_s23  ;;  %v5574_v20 = vpop.permute.xlu1 %5573 }
 0xf21   : > { %5918 = vrot.lane.b32.xlu1 %v14658_v0, %s10902_s23  ;;  %v5568_v5 = vpop.permute.xlu0 %5567 }
 0xf22   : > { %v5715_v61 = vadd.f32 %v5568_v5, %v17696_v8  ;;  %v14790_v5 = vadd.f32 %v17622_v31, %v5709_v28  ;;  %v5708_v8 = vadd.f32 %v14662_v50, %v17705_v37  ;;  %v5713_v28 = vadd.f32 %v14666_v16, %v17707_v19  ;;  %v17711_v16 = vld [vmem:[#allocation34_spill] sm:$0xff] }
 0xf23   : > { %5912 = vrot.lane.b32.xlu0 %v14669_v52, %s10902_s23  ;;  %v5570_v47 = vpop.permute.xlu1 %5569 }
 0xf24   : > { %v14784_v55 = vadd.f32 %v17622_v31, %v5715_v61  ;;  %17701 = vst [vmem:[#allocation88_spill] sm:$0xff] %v14790_v5  ;;  %v14824_v50 = vadd.f32 %v17622_v31, %v5713_v28  ;;  %v17713_v28 = vld [vmem:[#allocation139_spill] sm:$0xff] }
 0xf25   : > { %5914 = vrot.lane.b32.xlu1 %v14676_v24, %s10902_s23  ;;  %v5580_v54 = vpop.permute.xlu0 %5579 }
 0xf26   : > { %17699 = vst [vmem:[#allocation9_spill] sm:$0xff] %v14784_v55  ;;  %17708 = vst [vmem:[#allocation42_spill] sm:$0xff] %v14824_v50 }
 0xf27   : > { %5924 = vrot.lane.b32.xlu0 %v14683_v14, %s10902_s23  ;;  %v5582_v56 = vpop.permute.xlu1 %5581 }
 0xf29   : > { %5926 = vrot.lane.b32.xlu1 %v14692_v1, %s10902_s23  ;;  %v5576_v4 = vpop.permute.xlu0 %5575 }
 0xf2a   : > { %v5719_v33 = vadd.f32 %v5576_v4, %v17700_v18  ;;  %v14815_v4 = vadd.f32 %v17622_v31, %v5708_v8  ;;  %v5712_v8 = vadd.f32 %v14710_v13, %v17711_v16 }
 0xf2b   : > { %5920 = vrot.lane.b32.xlu0 %v14699_v30, %s10902_s23  ;;  %v5578_v32 = vpop.permute.xlu1 %5577 }
 0xf2c   : > { %v14797_v59 = vadd.f32 %v17622_v31, %v5719_v33  ;;  %17706 = vst [vmem:[#allocation152_spill] sm:$0xff] %v14815_v4  ;;  %v17709_v33 = vld [vmem:[#allocation38_spill] sm:$0xff] }
 0xf2d   : > { %5922 = vrot.lane.b32.xlu1 %v14706_v53, %s10902_s23  ;;  %v14806_v61 = vpop.permute.xlu0 %5587  ;;  %v5714_v48 = vadd.f32 %v14687_v9, %v17709_v33  ;;  %v14844_v9 = vadd.f32 %v17622_v31, %v5712_v8  ;;  %v5717_v33 = vadd.f32 %v14714_v45, %v17713_v28 }
 0xf2e   : > { %17703 = vst [vmem:[#allocation90_spill] sm:$0xff] %v14797_v59 }
 0xf2f   : > { %5932 = vrot.lane.b32.xlu0 %v14717_v34, %s10902_s23  ;;  %v14810_v43 = vpop.permute.xlu1 %5589  ;;  %v14833_v37 = vadd.f32 %v17622_v31, %v5714_v48  ;;  %17712 = vst [vmem:[#allocation97_spill] sm:$0xff] %v14844_v9  ;;  %v14853_v13 = vadd.f32 %v17622_v31, %v5717_v33  ;;  %v17715_v48 = vld [vmem:[#allocation140_spill] sm:$0xff] }
 0xf30   : > { %v5718_v16 = vadd.f32 %v5574_v20, %v17715_v48 }
 0xf31   : > { %5934 = vrot.lane.b32.xlu1 %v14724_v10, %s10902_s23  ;;  %v14819_v18 = vpop.permute.xlu0 %5583  ;;  %17710 = vst [vmem:[#allocation47_spill] sm:$0xff] %v14833_v37  ;;  %17714 = vst [vmem:[#allocation100_spill] sm:$0xff] %v14853_v13 }
 0xf32   : > { %v14861_v8 = vadd.f32 %v17622_v31, %v5718_v16 }
 0xf33   : > { %5928 = vrot.lane.b32.xlu0 %v14731_v22, %s10902_s23  ;;  %v14828_v46 = vpop.permute.xlu1 %5585 }
 0xf34   : > { %17716 = vst [vmem:[#allocation117_spill] sm:$0xff] %v14861_v8 }
 0xf35   : > { %5930 = vrot.lane.b32.xlu1 %v14738_v60, %s10902_s23  ;;  %v14837_v19 = vpop.permute.xlu0 %5595 }
 0xf37   : > { %5936 = vrot.lane.b32.xlu0 %v14745_v51, %s10902_s23 }
 0xf39   : > { %5940 = vrot.lane.b32.xlu1 %v14751_v29, %s10902_s23 }
 0xf3b   : > { %5944 = vrot.lane.b32.xlu0 %v14758_v39, %s10902_s23 }
 0xf3d   : > { %5942 = vrot.lane.b32.xlu1 %v14764_v36, %s10902_s23 }
 0xf3f   : > { %5952 = vrot.lane.b32.xlu0 %v14771_v27, %s10902_s23 }
 0xf41   : > { %5938 = vrot.lane.b32.xlu1 %v14777_v25, %s10902_s23 }
 0xf43   : > { %5960 = vrot.lane.b32.xlu0 %v14784_v55, %s10902_s23  ;;  %v14848_v55 = vpop.permute.xlu0 %5591 }
 0xf45   : > { %5948 = vrot.lane.b32.xlu1 %v14790_v5, %s10902_s23 }
 0xf47   : > { %5968 = vrot.lane.b32.xlu0 %v14797_v59, %s10902_s23  ;;  %v14839_v59 = vpop.permute.xlu1 %5597  ;;  %v5877_v28 = vpop.permute.xlu0 %5876 }
 0xf49   : > { %5950 = vrot.lane.b32.xlu1 %v14802_v12, %s10902_s23 }
 0xf4b   : > { %v14856_v27 = vpop.permute.xlu1 %5593  ;;  %v5873_v48 = vpop.permute.xlu0 %5872 }
 0xf4d   : > { %5946 = vrot.lane.b32.xlu1 %v14815_v4, %s10902_s23 }
 0xf51   : > { %5956 = vrot.lane.b32.xlu1 %v14824_v50, %s10902_s23  ;;  %v5879_v50 = vpop.permute.xlu1 %5878 }
 0xf55   : > { %5958 = vrot.lane.b32.xlu1 %v14833_v37, %s10902_s23  ;;  %v17717_v37 = vld [vmem:[#allocation43_spill] sm:$0xff]  ;;  %v5875_v12 = vpop.permute.xlu1 %5874 }
 0xf56   : > { %v5716_v45 = vadd.f32 %v5570_v47, %v17717_v37  ;;  %v17721_v47 = vld [vmem:[#allocation54_spill] sm:$0xff] }
 0xf57   : > { %v5722_v37 = vadd.f32 %v5582_v56, %v17721_v47 }
 0xf58   : > { %v14867_v33 = vadd.f32 %v17622_v31, %v5716_v45 }
 0xf59   : > { %5954 = vrot.lane.b32.xlu1 %v14844_v9, %s10902_s23  ;;  %v17719_v9 = vld [vmem:[#allocation52_spill] sm:$0xff] }
 0xf5a   : > { %17718 = vst [vmem:[#allocation120_spill] sm:$0xff] %v14867_v33  ;;  %v5721_v20 = vadd.f32 %v5580_v54, %v17719_v9  ;;  %v6064_v54 = vsel %vm702_vm0, %v5873_v48, 0.0  ;;  %v14883_v9 = vadd.f32 %v17622_v31, %v5722_v37 }
 0xf5c   : > { %v14874_v16 = vadd.f32 %v17622_v31, %v5721_v20  ;;  %17722 = vst [vmem:[#allocation128_spill] sm:$0xff] %v14883_v9  ;;  %v6073_v20 = vsel %vm702_vm0, %v5879_v50, 0.0 }
 0xf5d   : > { %5964 = vrot.lane.b32.xlu1 %v14853_v13, %s10902_s23  ;;  %v6070_v13 = vsel %vm702_vm0, %v5877_v28, 0.0 }
 0xf5e   : > { %17720 = vst [vmem:[#allocation127_spill] sm:$0xff] %v14874_v16 }
 0xf61   : > { %5966 = vrot.lane.b32.xlu1 %v14861_v8, %s10902_s23  ;;  %v17723_v8 = vld [vmem:[#allocation49_spill] sm:$0xff] }
 0xf62   : > { %v5720_v28 = vadd.f32 %v5578_v32, %v17723_v8 }
 0xf64   : > { %v14894_v47 = vadd.f32 %v17622_v31, %v5720_v28 }
 0xf65   : > { %5962 = vrot.lane.b32.xlu1 %v14867_v33, %s10902_s23 }
 0xf66   : > { %6071 = vadd.xlane.f32.xlu0 %v6070_v13  ;;  %17724 = vst [vmem:[#allocation158_spill] sm:$0xff] %v14894_v47 }
 0xf69   : > { %5972 = vrot.lane.b32.xlu1 %v14874_v16, %s10902_s23  ;;  %v14879_v45 = vpop.permute.xlu0 %5603 }
 0xf6a   : > { %6065 = vadd.xlane.f32.xlu0 %v6064_v54 }
 0xf6b   : > { %v14886_v13 = vpop.permute.xlu1 %5605 }
 0xf6d   : > { %5974 = vrot.lane.b32.xlu1 %v14883_v9, %s10902_s23  ;;  %v14890_v56 = vpop.permute.xlu0 %5599 }
 0xf6e   : > { %6074 = vadd.xlane.f32.xlu0 %v6073_v20 }
 0xf6f   : > { %v14896_v48 = vpop.permute.xlu1 %5601 }
 0xf71   : > { %5970 = vrot.lane.b32.xlu1 %v14894_v47, %s10902_s23  ;;  %v5885_v37 = vpop.permute.xlu0 %5884 }
 0xf72   : > { %v6082_v32 = vsel %vm702_vm0, %v5885_v37, 0.0 }
 0xf73   : > { %v5887_v8 = vpop.permute.xlu1 %5886  ;;  %6083 = vadd.xlane.f32.xlu0 %v6082_v32 }
 0xf74   : > { %v6085_v20 = vsel %vm702_vm0, %v5887_v8, 0.0 }
 0xf75   : > { %v5881_v54 = vpop.permute.xlu0 %5880 }
 0xf76   : > { %v6076_v9 = vsel %vm702_vm0, %v5881_v54, 0.0 }
 0xf77   : > { %v5883_v16 = vpop.permute.xlu1 %5882  ;;  %6077 = vadd.xlane.f32.xlu0 %v6076_v9 }
 0xf79   : > { %v5893_v50 = vpop.permute.xlu0 %5892 }
 0xf7a   : > { %v6094_v39 = vsel %vm702_vm0, %v5893_v50, 0.0 }
 0xf7b   : > { %v5895_v28 = vpop.permute.xlu1 %5894  ;;  %6086 = vadd.xlane.f32.xlu0 %v6085_v20 }
 0xf7c   : > { %v6097_v32 = vsel %vm702_vm0, %v5895_v28, 0.0 }
 0xf7d   : > { %v5889_v33 = vpop.permute.xlu0 %5888 }
 0xf7e   : > { %v6088_v37 = vsel %vm702_vm0, %v5889_v33, 0.0  ;;  %v6067_v33 = vsel %vm702_vm0, %v5875_v12, 0.0 }
 0xf7f   : > { %6095 = vadd.xlane.f32.xlu0 %v6094_v39  ;;  %v5891_v47 = vpop.permute.xlu1 %5890 }
 0xf81   : > { %v5901_v5 = vpop.permute.xlu0 %5900 }
 0xf82   : > { %v6106_v9 = vsel %vm702_vm0, %v5901_v5, 0.0 }
 0xf83   : > { %6089 = vadd.xlane.f32.xlu0 %v6088_v37  ;;  %v5903_v4 = vpop.permute.xlu1 %5902  ;;  %v6079_v37 = vsel %vm702_vm0, %v5883_v16, 0.0 }
 0xf84   : > { %v6109_v39 = vsel %vm702_vm0, %v5903_v4, 0.0 }
 0xf85   : > { %v5897_v54 = vpop.permute.xlu0 %5896 }
 0xf86   : > { %v6100_v20 = vsel %vm702_vm0, %v5897_v54, 0.0  ;;  %v6091_v54 = vsel %vm702_vm0, %v5891_v47, 0.0 }
 0xf87   : > { %6098 = vadd.xlane.f32.xlu0 %v6097_v32  ;;  %v5899_v8 = vpop.permute.xlu1 %5898 }
 0xf88   : > { %v6103_v12 = vsel %vm702_vm0, %v5899_v8, 0.0 }
 0xf89   : > { %v5909_v36 = vpop.permute.xlu0 %5908 }
 0xf8a   : > { %v6118_v28 = vsel %vm702_vm0, %v5909_v36, 0.0 }
 0xf8b   : > { %6107 = vadd.xlane.f32.xlu0 %v6106_v9  ;;  %v5911_v50 = vpop.permute.xlu1 %5910 }
 0xf8c   : > { %v6121_v4 = vsel %vm702_vm0, %v5911_v50, 0.0 }
 0xf8d   : > { %v5905_v51 = vpop.permute.xlu0 %5904 }
 0xf8e   : > { %v6112_v9 = vsel %vm702_vm0, %v5905_v51, 0.0 }
 0xf8f   : > { %6101 = vadd.xlane.f32.xlu0 %v6100_v20  ;;  %v5907_v5 = vpop.permute.xlu1 %5906 }
 0xf90   : > { %v6115_v16 = vsel %vm702_vm0, %v5907_v5, 0.0  ;;  %v17728_v5 = vld [vmem:[#allocation56_spill] sm:$0xff] }
 0xf91   : > { %v5917_v32 = vpop.permute.xlu0 %5916 }
 0xf92   : > { %v6130_v51 = vsel %vm702_vm0, %v5917_v32, 0.0  ;;  %v5723_v32 = vadd.f32 %v14819_v18, %v17728_v5  ;;  %v17736_v5 = vld [vmem:[#allocation66_spill] sm:$0xff] }
 0xf93   : > { %6110 = vadd.xlane.f32.xlu0 %v6109_v39  ;;  %v5919_v20 = vpop.permute.xlu1 %5918 }
 0xf94   : > { %v6133_v50 = vsel %vm702_vm0, %v5919_v20, 0.0  ;;  %v17730_v20 = vld [vmem:[#allocation64_spill] sm:$0xff] }
 0xf95   : > { %6068 = vadd.xlane.f32.xlu1 %v6067_v33  ;;  %v5913_v39 = vpop.permute.xlu0 %5912 }
 0xf96   : > { %v6124_v36 = vsel %vm702_vm0, %v5913_v39, 0.0  ;;  %v5726_v39 = vadd.f32 %v14810_v43, %v17730_v20 }
 0xf97   : > { %6119 = vadd.xlane.f32.xlu0 %v6118_v28  ;;  %v5915_v33 = vpop.permute.xlu1 %5914  ;;  %v17725_v28 = vld [vmem:[#allocation58_spill] sm:$0xff] }
 0xf98   : > { %v6127_v47 = vsel %vm702_vm0, %v5915_v33, 0.0  ;;  %v5724_v8 = vadd.f32 %v14828_v46, %v17725_v28  ;;  %v14943_v46 = vadd.f32 %v17622_v31, %v5726_v39  ;;  %v17738_v39 = vld [vmem:[#allocation105_spill] sm:$0xff] }
 0xf99   : > { %6080 = vadd.xlane.f32.xlu1 %v6079_v37  ;;  %v17726_v37 = vld [vmem:[#allocation61_spill] sm:$0xff]  ;;  %v5925_v18 = vpop.permute.xlu0 %5924 }
 0xf9a   : > { %17732 = vst [vmem:[#allocation19_spill] sm:$0xff] %v14943_v46  ;;  %v6142_v33 = vsel %vm702_vm0, %v5925_v18, 0.0  ;;  %v5730_v18 = vadd.f32 %v14839_v59, %v17738_v39  ;;  %v17742_v39 = vld [vmem:[#allocation79_spill] sm:$0xff] }
 0xf9b   : > { %6113 = vadd.xlane.f32.xlu0 %v6112_v9  ;;  %v5725_v9 = vadd.f32 %v14806_v61, %v17726_v37  ;;  %v14940_v61 = vadd.f32 %v17622_v31, %v5723_v32  ;;  %v5727_v32 = vadd.f32 %v14848_v55, %v17736_v5  ;;  %v17741_v5 = vld [vmem:[#allocation41_spill] sm:$0xff] }
 0xf9d   : > { %6092 = vadd.xlane.f32.xlu1 %v6091_v54  ;;  %v14926_v54 = vadd.f32 %v17622_v31, %v5724_v8  ;;  %17731 = vst [vmem:[#allocation86_spill] sm:$0xff] %v14940_v61  ;;  %v17734_v8 = vld [vmem:[#allocation70_spill] sm:$0xff] }
 0xf9e   : > { %v5729_v37 = vadd.f32 %v14837_v19, %v17734_v8  ;;  %v14975_v19 = vadd.f32 %v17622_v31, %v5730_v18  ;;  %v5733_v18 = vadd.f32 %v14879_v45, %v17742_v39 }
 0xf9f   : > { %6122 = vadd.xlane.f32.xlu0 %v6121_v4  ;;  %17727 = vst [vmem:[#allocation157_spill] sm:$0xff] %v14926_v54  ;;  %v14933_v4 = vadd.f32 %v17622_v31, %v5725_v9 }
 0xfa0   : > { %v14965_v20 = vadd.f32 %v17622_v31, %v5729_v37  ;;  %17740 = vst [vmem:[#allocation96_spill] sm:$0xff] %v14975_v19 }
 0xfa1   : > { %6104 = vadd.xlane.f32.xlu1 %v6103_v12  ;;  %17729 = vst [vmem:[#allocation85_spill] sm:$0xff] %v14933_v4  ;;  %v5927_v12 = vpop.permute.xlu1 %5926 }
 0xfa2   : > { %17737 = vst [vmem:[#allocation72_spill] sm:$0xff] %v14965_v20 }
 0xfa3   : > { %6125 = vadd.xlane.f32.xlu0 %v6124_v36  ;;  %v5921_v36 = vpop.permute.xlu0 %5920 }
 0xfa4   : > { %v6136_v43 = vsel %vm702_vm0, %v5921_v36, 0.0 }
 0xfa5   : > { %6116 = vadd.xlane.f32.xlu1 %v6115_v16  ;;  %v5923_v16 = vpop.permute.xlu1 %5922 }
 0xfa7   : > { %6131 = vadd.xlane.f32.xlu0 %v6130_v51  ;;  %v6139_v51 = vsel %vm702_vm0, %v5923_v16, 0.0  ;;  %v5933_v36 = vpop.permute.xlu0 %5932 }
 0xfa9   : > { %6128 = vadd.xlane.f32.xlu1 %v6127_v47  ;;  %v6145_v47 = vsel %vm702_vm0, %v5927_v12, 0.0  ;;  %v5935_v55 = vpop.permute.xlu1 %5934 }
 0xfab   : > { %6134 = vadd.xlane.f32.xlu0 %v6133_v50  ;;  %v17733_v50 = vld [vmem:[#allocation131_spill] sm:$0xff]  ;;  %v5929_v59 = vpop.permute.xlu0 %5928 }
 0xfac   : > { %v5728_v28 = vadd.f32 %v14856_v27, %v17733_v50  ;;  %v14972_v27 = vadd.f32 %v17622_v31, %v5727_v32  ;;  %v5732_v32 = vadd.f32 %v14896_v48, %v17741_v5 }
 0xfad   : > { %v5931_v12 = vpop.permute.xlu1 %5930 }
 0xfae   : > { %v14958_v9 = vadd.f32 %v17622_v31, %v5728_v28  ;;  %17739 = vst [vmem:[#allocation92_spill] sm:$0xff] %v14972_v27  ;;  %v6151_v50 = vsel %vm702_vm0, %v5931_v12, 0.0  ;;  %v6157_v28 = vsel %vm702_vm0, %v5935_v55, 0.0  ;;  %v17744_v12 = vld [vmem:[#allocation75_spill] sm:$0xff]  ;;  %v14997_v55 = vadd.f32 %v17622_v31, %v5733_v18 }
 0xfb0   : > { %17735 = vst [vmem:[#allocation144_spill] sm:$0xff] %v14958_v9  ;;  %17745 = vst [vmem:[#allocation106_spill] sm:$0xff] %v14997_v55 }
 0xfba   : > { %5978 = vrot.lane.b32.xlu1 %v14926_v54, %s10902_s23 }
 0xfbe   : > { %5980 = vrot.lane.b32.xlu1 %v14933_v4, %s10902_s23 }
 0xfc1   : > { %5976 = vrot.lane.b32.xlu0 %v14940_v61, %s10902_s23 }
 0xfc2   : > { %5982 = vrot.lane.b32.xlu1 %v14943_v46, %s10902_s23 }
 0xfe0   : > { %6137 = vadd.xlane.f32.xlu0 %v6136_v43  ;;  %v5941_v43 = vpop.permute.xlu1 %5940 }
 0xfe4   : > { %6143 = vadd.xlane.f32.xlu0 %v6142_v33  ;;  %v5943_v16 = vpop.permute.xlu1 %5942  ;;  %v6148_v33 = vsel %vm702_vm0, %v5929_v59, 0.0  ;;  %v14990_v59 = vadd.f32 %v17622_v31, %v5732_v32 }
 0xfe6   : > { %6140 = vadd.xlane.f32.xlu1 %v6139_v51  ;;  %17743 = vst [vmem:[#allocation101_spill] sm:$0xff] %v14990_v59 }
 0xfe8   : > { %6146 = vadd.xlane.f32.xlu0 %v6145_v47  ;;  %v5939_v51 = vpop.permute.xlu1 %5938  ;;  %v6154_v47 = vsel %vm702_vm0, %v5933_v36, 0.0  ;;  %v5731_v36 = vadd.f32 %v14890_v56, %v17744_v12 }
 0xfea   : > { %v15004_v45 = vadd.f32 %v17622_v31, %v5731_v36 }
 0xfec   : > { %v5949_v8 = vpop.permute.xlu1 %5948  ;;  %17747 = vst [vmem:[#allocation107_spill] sm:$0xff] %v15004_v45 }
 0xff0   : > { %v5951_v37 = vpop.permute.xlu1 %5950 }
 0xff7   : > { %5986 = vrot.lane.b32.xlu1 %v14958_v9, %s10902_s23 }
 0xffb   : > { %5988 = vrot.lane.b32.xlu1 %v14965_v20, %s10902_s23 }
 0xffe   : > { %5984 = vrot.lane.b32.xlu0 %v14972_v27, %s10902_s23 }
 0xfff   : > { %5990 = vrot.lane.b32.xlu1 %v14975_v19, %s10902_s23 }
0x101d   : > { %6149 = vadd.xlane.f32.xlu0 %v6148_v33  ;;  %v5947_v33 = vpop.permute.xlu1 %5946 }
0x101e   : > { %v6175_v19 = vsel %vm702_vm0, %v5947_v33, 0.0 }
0x1021   : > { %6155 = vadd.xlane.f32.xlu0 %v6154_v47  ;;  %v17746_v47 = vld [vmem:[#allocation68_spill] sm:$0xff]  ;;  %v5957_v48 = vpop.permute.xlu1 %5956 }
0x1023   : > { %6152 = vadd.xlane.f32.xlu1 %v6151_v50  ;;  %v5734_v50 = vadd.f32 %v14886_v13, %v17746_v47  ;;  %v5937_v13 = vpop.permute.xlu0 %5936 }
0x1025   : > { %6158 = vadd.xlane.f32.xlu0 %v6157_v28  ;;  %v15007_v28 = vadd.f32 %v17622_v31, %v5734_v50  ;;  %v5959_v56 = vpop.permute.xlu1 %5958  ;;  %v6160_v31 = vsel %vm702_vm0, %v5937_v13, 0.0  ;;  %v6166_v50 = vsel %vm702_vm0, %v5941_v43, 0.0  ;;  %v6181_v43 = vsel %vm702_vm0, %v5951_v37, 0.0 }
0x1027   : > { %17748 = vst [vmem:[#allocation111_spill] sm:$0xff] %v15007_v28  ;;  %v5945_v18 = vpop.permute.xlu0 %5944 }
0x1028   : > { %v6172_v13 = vsel %vm702_vm0, %v5945_v18, 0.0 }
0x1029   : > { %v5955_v5 = vpop.permute.xlu1 %5954 }
0x102b   : > { %v5953_v36 = vpop.permute.xlu0 %5952 }
0x102d   : > { %v15013_v32 = vpop.permute.xlu1 %5964 }
0x1031   : > { %v15015_v39 = vpop.permute.xlu1 %5966 }
0x1034   : > { %5994 = vrot.lane.b32.xlu1 %v14990_v59, %s10902_s23 }
0x1035   : > { %v15017_v12 = vpop.permute.xlu1 %5962 }
0x1038   : > { %5996 = vrot.lane.b32.xlu1 %v14997_v55, %s10902_s23  ;;  %v6169_v55 = vsel %vm702_vm0, %v5943_v16, 0.0 }
0x1039   : > { %v15020_v47 = vpop.permute.xlu1 %5972 }
0x103b   : > { %5992 = vrot.lane.b32.xlu0 %v15004_v45, %s10902_s23  ;;  %v15023_v45 = vpop.permute.xlu0 %5960 }
0x103c   : > { %5998 = vrot.lane.b32.xlu1 %v15007_v28, %s10902_s23  ;;  %v6163_v28 = vsel %vm702_vm0, %v5939_v51, 0.0  ;;  %v6178_v51 = vsel %vm702_vm0, %v5949_v8, 0.0 }
0x103d   : > { %v15027_v59 = vpop.permute.xlu1 %5974 }
0x103f   : > { %v15030_v27 = vpop.permute.xlu0 %5968 }
0x105a   : > { %6161 = vadd.xlane.f32.xlu0 %v6160_v31  ;;  %v15034_v31 = vpop.permute.xlu1 %5970 }
0x105e   : > { %6167 = vadd.xlane.f32.xlu0 %v6166_v50  ;;  %v6072_v50 = vpop.xlane.xlu0 %6071  ;;  %v6069_v16 = vpop.xlane.xlu1 %6068 }
0x105f   : > { %v6258_v20 = vmul.f32 0.015625, %v6072_v50 }
0x1060   : > { %6164 = vadd.xlane.f32.xlu1 %v6163_v28 }
0x1061   : > { %v15041_v18 = vsub.f32 %v14484_v21, %v6258_v20  ;;  %v17765_v21 = vld [vmem:[#allocation88_spill] sm:$0xff] }
0x1062   : > { %6170 = vadd.xlane.f32.xlu0 %v6169_v55  ;;  %v6066_v28 = vpop.xlane.xlu0 %6065  ;;  %v6257_v55 = vmul.f32 0.015625, %v6069_v16  ;;  %v6190_v16 = vsel %vm702_vm0, %v5957_v48, 0.0 }
0x1063   : > { %v6256_v9 = vmul.f32 0.015625, %v6066_v28  ;;  %v6187_v28 = vsel %vm702_vm0, %v5955_v5, 0.0 }
0x1064   : > { %6176 = vadd.xlane.f32.xlu1 %v6175_v19  ;;  %v15038_v33 = vsub.f32 %v14500_v15, %v6257_v55  ;;  %v17771_v15 = vld [vmem:[#allocation97_spill] sm:$0xff] }
0x1065   : > { %v15047_v8 = vsub.f32 %v14495_v3, %v6256_v9  ;;  %v6184_v9 = vsel %vm702_vm0, %v5953_v36, 0.0 }
0x1066   : > { %6173 = vadd.xlane.f32.xlu0 %v6172_v13  ;;  %v6075_v19 = vpop.xlane.xlu0 %6074  ;;  %v6385_v13 = vmul.f32 %v15038_v33, %v15038_v33 }
0x1067   : > { %v6259_v37 = vmul.f32 0.015625, %v6075_v19  ;;  %v6384_v20 = vmul.f32 %v15047_v8, %v15047_v8  ;;  %v6193_v19 = vsel %vm702_vm0, %v5959_v56, 0.0 }
0x1068   : > { %6182 = vadd.xlane.f32.xlu1 %v6181_v43  ;;  %v6386_v43 = vmul.f32 %v15041_v18, %v15041_v18 }
0x1069   : > { %v15052_v50 = vsub.f32 %v14489_v58, %v6259_v37  ;;  %v6081_v37 = vpop.xlane.xlu1 %6080 }
0x106a   : > { %6179 = vadd.xlane.f32.xlu0 %v6178_v51  ;;  %v6084_v55 = vpop.xlane.xlu0 %6083 }
0x106b   : > { %v6387_v51 = vmul.f32 %v15052_v50, %v15052_v50  ;;  %v6262_v58 = vmul.f32 0.015625, %v6084_v55 }
0x1079   : > { %6514 = vrot.lane.b32.xlu1 %v6385_v13, %s10902_s23  ;;  %v6078_v13 = vpop.xlane.xlu0 %6077 }
0x107a   : > { %v6260_v36 = vmul.f32 0.015625, %v6078_v13  ;;  %v6199_v13 = vsel %vm702_vm0, %v15017_v12, 0.0 }
0x107c   : > { %v15075_v56 = vsub.f32 %v14545_v11, %v6260_v36  ;;  %v6093_v36 = vpop.xlane.xlu1 %6092 }
0x107d   : > { %6516 = vrot.lane.b32.xlu1 %v6386_v43, %s10902_s23  ;;  %v6261_v43 = vmul.f32 0.015625, %v6081_v37  ;;  %v6202_v37 = vsel %vm702_vm0, %v15013_v32, 0.0 }
0x1080   : > { %6512 = vrot.lane.b32.xlu0 %v6384_v20, %s10902_s23  ;;  %v15066_v20 = vsub.f32 %v14555_v17, %v6261_v43 }
0x1081   : > { %6518 = vrot.lane.b32.xlu1 %v6387_v51, %s10902_s23  ;;  %v6087_v51 = vpop.xlane.xlu0 %6086 }
0x1082   : > { %v6263_v48 = vmul.f32 0.015625, %v6087_v51  ;;  %v6389_v5 = vmul.f32 %v15066_v20, %v15066_v20  ;;  %v6205_v51 = vsel %vm702_vm0, %v15015_v39, 0.0 }
0x1085   : > { %v6096_v43 = vpop.xlane.xlu0 %6095 }
0x109f   : > { %6185 = vadd.xlane.f32.xlu0 %v6184_v9  ;;  %v15069_v9 = vsub.f32 %v14532_v44, %v6262_v58  ;;  %v6388_v58 = vmul.f32 %v15075_v56, %v15075_v56 }
0x10a3   : > { %6191 = vadd.xlane.f32.xlu0 %v6190_v16  ;;  %v6390_v16 = vmul.f32 %v15069_v9, %v15069_v9 }
0x10a5   : > { %6188 = vadd.xlane.f32.xlu1 %v6187_v28  ;;  %v15080_v28 = vsub.f32 %v14539_v41, %v6263_v48  ;;  %v6090_v48 = vpop.xlane.xlu0 %6089 }
0x10a7   : > { %6194 = vadd.xlane.f32.xlu0 %v6193_v19  ;;  %v6391_v55 = vmul.f32 %v15080_v28, %v15080_v28  ;;  %v6196_v19 = vsel %vm702_vm0, %v15023_v45, 0.0 }
0x10b6   : > { %6522 = vrot.lane.b32.xlu1 %v6389_v5, %s10902_s23  ;;  %v6265_v5 = vmul.f32 0.015625, %v6093_v36  ;;  %v6208_v36 = vsel %vm702_vm0, %v15030_v27, 0.0 }
0x10b8   : > { %v15098_v45 = vsub.f32 %v14583_v2, %v6265_v5  ;;  %v6214_v5 = vsel %vm702_vm0, %v15020_v47, 0.0 }
0x10ba   : > { %6524 = vrot.lane.b32.xlu1 %v6390_v16, %s10902_s23  ;;  %v6266_v16 = vmul.f32 0.015625, %v6096_v43  ;;  %v6393_v12 = vmul.f32 %v15098_v45, %v15098_v45 }
0x10bc   : > { %v15101_v32 = vsub.f32 %v14561_v23, %v6266_v16  ;;  %v6211_v16 = vsel %vm702_vm0, %v15034_v31, 0.0 }
0x10bd   : > { %6520 = vrot.lane.b32.xlu0 %v6388_v58, %s10902_s23  ;;  %v6099_v58 = vpop.xlane.xlu0 %6098 }
0x10be   : > { %6526 = vrot.lane.b32.xlu1 %v6391_v55, %s10902_s23  ;;  %v6264_v55 = vmul.f32 0.015625, %v6090_v48 }
0x10c0   : > { %v15107_v39 = vsub.f32 %v14577_v35, %v6264_v55 }
0x10c1   : > { %v6108_v48 = vpop.xlane.xlu0 %6107 }
0x10c2   : > { %v6392_v43 = vmul.f32 %v15107_v39, %v15107_v39 }
0x10c5   : > { %v6102_v55 = vpop.xlane.xlu0 %6101 }
0x10dc   : > { %6197 = vadd.xlane.f32.xlu0 %v6196_v19  ;;  %v6267_v19 = vmul.f32 0.015625, %v6099_v58  ;;  %v6217_v58 = vsel %vm702_vm0, %v15027_v59, 0.0 }
0x10e0   : > { %6203 = vadd.xlane.f32.xlu0 %v6202_v37  ;;  %v6394_v37 = vmul.f32 %v15101_v32, %v15101_v32 }
0x10e2   : > { %6200 = vadd.xlane.f32.xlu1 %v6199_v13  ;;  %v15112_v13 = vsub.f32 %v14567_v42, %v6267_v19  ;;  %v6105_v19 = vpop.xlane.xlu1 %6104 }
0x10e4   : > { %6206 = vadd.xlane.f32.xlu0 %v6205_v51  ;;  %v6395_v51 = vmul.f32 %v15112_v13, %v15112_v13 }
0x10f3   : > { %6530 = vrot.lane.b32.xlu1 %v6393_v12, %s10902_s23  ;;  %v6269_v12 = vmul.f32 0.015625, %v6105_v19 }
0x10f5   : > { %v15130_v27 = vsub.f32 %v14611_v49, %v6269_v12 }
0x10f7   : > { %6532 = vrot.lane.b32.xlu1 %v6394_v37, %s10902_s23  ;;  %v6111_v37 = vpop.xlane.xlu0 %6110  ;;  %v6397_v31 = vmul.f32 %v15130_v27, %v15130_v27 }
0x10fa   : > { %6528 = vrot.lane.b32.xlu0 %v6392_v43, %s10902_s23  ;;  %v6270_v43 = vmul.f32 0.015625, %v6108_v48 }
0x10fb   : > { %6534 = vrot.lane.b32.xlu1 %v6395_v51, %s10902_s23  ;;  %v6268_v51 = vmul.f32 0.015625, %v6102_v55 }
0x10fc   : > { %v15133_v47 = vsub.f32 %v14589_v26, %v6270_v43  ;;  %v6117_v43 = vpop.xlane.xlu1 %6116 }
0x10fd   : > { %v15139_v59 = vsub.f32 %v14605_v62, %v6268_v51  ;;  %v6273_v23 = vmul.f32 0.015625, %v6117_v43 }
0x10fe   : > { %v6398_v48 = vmul.f32 %v15133_v47, %v15133_v47 }
0x10ff   : > { %v6396_v55 = vmul.f32 %v15139_v59, %v15139_v59  ;;  %v15158_v35 = vsub.f32 %v14644_v6, %v6273_v23 }
0x1119   : > { %6209 = vadd.xlane.f32.xlu0 %v6208_v36  ;;  %v6271_v36 = vmul.f32 0.015625, %v6111_v37 }
0x111d   : > { %6215 = vadd.xlane.f32.xlu0 %v6214_v5  ;;  %v6120_v5 = vpop.xlane.xlu0 %6119 }
0x111e   : > { %v6274_v2 = vmul.f32 0.015625, %v6120_v5 }
0x111f   : > { %6212 = vadd.xlane.f32.xlu1 %v6211_v16  ;;  %v15144_v16 = vsub.f32 %v14599_v57, %v6271_v36 }
0x1120   : > { %v15161_v44 = vsub.f32 %v14621_v63, %v6274_v2 }
0x1121   : > { %6218 = vadd.xlane.f32.xlu0 %v6217_v58  ;;  %v6114_v58 = vpop.xlane.xlu0 %6113  ;;  %v6399_v19 = vmul.f32 %v15144_v16, %v15144_v16 }
0x1122   : > { %v6272_v41 = vmul.f32 0.015625, %v6114_v58 }
0x1125   : > { %v6123_v12 = vpop.xlane.xlu0 %6122 }
0x1129   : > { %v6126_v37 = vpop.xlane.xlu0 %6125 }
0x112a   : > { %v6276_v6 = vmul.f32 0.015625, %v6126_v37 }
0x112d   : > { %v6132_v51 = vpop.xlane.xlu0 %6131 }
0x1130   : > { %6538 = vrot.lane.b32.xlu1 %v6397_v31, %s10902_s23  ;;  %v6129_v31 = vpop.xlane.xlu1 %6128 }
0x1131   : > { %v6135_v36 = vpop.xlane.xlu0 %6134 }
0x1134   : > { %6540 = vrot.lane.b32.xlu1 %v6398_v48, %s10902_s23  ;;  %v5979_v57 = vpop.permute.xlu1 %5978 }
0x1135   : > { %v5977_v26 = vpop.permute.xlu0 %5976 }
0x1136   : > { %v6220_v48 = vsel %vm702_vm0, %v5977_v26, 0.0  ;;  %v6275_v26 = vmul.f32 0.015625, %v6123_v12 }
0x1137   : > { %6536 = vrot.lane.b32.xlu0 %v6396_v55, %s10902_s23  ;;  %v6223_v55 = vsel %vm702_vm0, %v5979_v57, 0.0  ;;  %v15167_v57 = vsub.f32 %v14635_v40, %v6272_v41 }
0x1138   : > { %6542 = vrot.lane.b32.xlu1 %v6399_v19, %s10902_s23  ;;  %v5981_v49 = vpop.permute.xlu1 %5980 }
0x1139   : > { %v6226_v62 = vsel %vm702_vm0, %v5981_v49, 0.0  ;;  %v6401_v49 = vmul.f32 %v15158_v35, %v15158_v35  ;;  %v6400_v23 = vmul.f32 %v15167_v57, %v15167_v57  ;;  %v6138_v41 = vpop.xlane.xlu0 %6137 }
0x113c   : > { %v5983_v42 = vpop.permute.xlu1 %5982 }
0x113d   : > { %v6229_v19 = vsel %vm702_vm0, %v5983_v42, 0.0  ;;  %v6402_v42 = vmul.f32 %v15161_v44, %v15161_v44  ;;  %v6144_v5 = vpop.xlane.xlu0 %6143 }
0x1140   : > { %v6141_v58 = vpop.xlane.xlu1 %6140 }
0x1141   : > { %v6147_v12 = vpop.xlane.xlu0 %6146 }
0x1144   : > { %v5987_v43 = vpop.permute.xlu1 %5986 }
0x1156   : > { %6221 = vadd.xlane.f32.xlu0 %v6220_v48  ;;  %v5985_v48 = vpop.permute.xlu0 %5984 }
0x115a   : > { %6227 = vadd.xlane.f32.xlu0 %v6226_v62  ;;  %v15172_v62 = vsub.f32 %v14628_v7, %v6275_v26  ;;  %v6278_v7 = vmul.f32 0.015625, %v6132_v51 }
0x115c   : > { %6224 = vadd.xlane.f32.xlu1 %v6223_v55  ;;  %v6403_v2 = vmul.f32 %v15172_v62, %v15172_v62  ;;  %v5989_v55 = vpop.permute.xlu1 %5988  ;;  %v15189_v40 = vsub.f32 %v14651_v38, %v6278_v7 }
0x115d   : > { %v6238_v26 = vsel %vm702_vm0, %v5989_v55, 0.0  ;;  %v6279_v55 = vmul.f32 0.015625, %v6135_v36 }
0x115e   : > { %6230 = vadd.xlane.f32.xlu0 %v6229_v19  ;;  %v6232_v19 = vsel %vm702_vm0, %v5985_v48, 0.0 }
0x115f   : > { %v15200_v51 = vsub.f32 %v14658_v0, %v6279_v55  ;;  %v6282_v0 = vmul.f32 0.015625, %v6144_v5 }
0x1161   : > { %v6407_v37 = vmul.f32 %v15200_v51, %v15200_v51 }
0x116d   : > { %6546 = vrot.lane.b32.xlu1 %v6401_v49, %s10902_s23  ;;  %v5991_v49 = vpop.permute.xlu1 %5990 }
0x1171   : > { %6548 = vrot.lane.b32.xlu1 %v6402_v42, %s10902_s23  ;;  %v6235_v42 = vsel %vm702_vm0, %v5987_v43, 0.0  ;;  %v15195_v43 = vsub.f32 %v14669_v52, %v6276_v6  ;;  %v6150_v6 = vpop.xlane.xlu0 %6149  ;;  %v15217_v52 = vsub.f32 %v14683_v14, %v6282_v0 }
0x1173   : > { %v6404_v7 = vmul.f32 %v15195_v43, %v15195_v43  ;;  %17750 = vst [vmem:[#allocation115_spill] sm:$0xff] %v15217_v52  ;;  %v6410_v5 = vmul.f32 %v15217_v52, %v15217_v52 }
0x1174   : > { %6544 = vrot.lane.b32.xlu0 %v6400_v23, %s10902_s23  ;;  %v6241_v23 = vsel %vm702_vm0, %v5991_v49, 0.0 }
0x1175   : > { %6550 = vrot.lane.b32.xlu1 %v6403_v2, %s10902_s23  ;;  %v6277_v2 = vmul.f32 0.015625, %v6129_v31  ;;  %v6406_v31 = vmul.f32 %v15189_v40, %v15189_v40  ;;  %v6156_v36 = vpop.xlane.xlu0 %6155 }
0x1177   : > { %v15186_v63 = vsub.f32 %v14676_v24, %v6277_v2  ;;  %v6280_v24 = vmul.f32 0.015625, %v6138_v41 }
0x1179   : > { %v6405_v48 = vmul.f32 %v15186_v63, %v15186_v63 }
0x1193   : > { %6233 = vadd.xlane.f32.xlu0 %v6232_v19  ;;  %v6153_v19 = vpop.xlane.xlu1 %6152 }
0x1194   : > { %v6285_v41 = vmul.f32 0.015625, %v6153_v19 }
0x1197   : > { %6239 = vadd.xlane.f32.xlu0 %v6238_v26  ;;  %v6159_v26 = vpop.xlane.xlu0 %6158  ;;  %v5995_v49 = vpop.permute.xlu1 %5994 }
0x1199   : > { %6236 = vadd.xlane.f32.xlu1 %v6235_v42 }
0x119b   : > { %6242 = vadd.xlane.f32.xlu0 %v6241_v23  ;;  %v5993_v42 = vpop.permute.xlu0 %5992  ;;  %v5997_v23 = vpop.permute.xlu1 %5996 }
0x119c   : > { %v6244_v2 = vsel %vm702_vm0, %v5993_v42, 0.0 }
0x119f   : > { %v5999_v55 = vpop.permute.xlu1 %5998 }
0x11aa   : > { %6554 = vrot.lane.b32.xlu1 %v6405_v48, %s10902_s23  ;;  %v6250_v48 = vsel %vm702_vm0, %v5997_v23, 0.0  ;;  %v6283_v23 = vmul.f32 0.015625, %v6147_v12 }
0x11ae   : > { %6556 = vrot.lane.b32.xlu1 %v6406_v31, %s10902_s23  ;;  %v6247_v31 = vsel %vm702_vm0, %v5995_v49, 0.0  ;;  %v15223_v49 = vsub.f32 %v14699_v30, %v6280_v24 }
0x11b0   : > { %17751 = vst [vmem:[#allocation122_spill] sm:$0xff] %v15223_v49  ;;  %v6408_v0 = vmul.f32 %v15223_v49, %v15223_v49 }
0x11b1   : > { %6552 = vrot.lane.b32.xlu0 %v6404_v7, %s10902_s23  ;;  %v6253_v7 = vsel %vm702_vm0, %v5999_v55, 0.0  ;;  %v6287_v55 = vmul.f32 0.015625, %v6159_v26 }
0x11b2   : > { %6558 = vrot.lane.b32.xlu1 %v6407_v37, %s10902_s23  ;;  %v6281_v37 = vmul.f32 0.015625, %v6141_v58  ;;  %v15228_v58 = vsub.f32 %v14692_v1, %v6283_v23 }
0x11b4   : > { %v15214_v38 = vsub.f32 %v14706_v53, %v6281_v37  ;;  %17752 = vst [vmem:[#allocation125_spill] sm:$0xff] %v15228_v58  ;;  %v6411_v24 = vmul.f32 %v15228_v58, %v15228_v58  ;;  %v6162_v37 = vpop.xlane.xlu0 %6161 }
0x11b5   : > { %v6288_v53 = vmul.f32 0.015625, %v6162_v37 }
0x11b6   : > { %17749 = vst [vmem:[#allocation112_spill] sm:$0xff] %v15214_v38  ;;  %v6409_v42 = vmul.f32 %v15214_v38, %v15214_v38 }
0x11b8   : > { %v6168_v23 = vpop.xlane.xlu0 %6167 }
0x11b9   : > { %v6290_v1 = vmul.f32 0.015625, %v6168_v23  ;;  %v17761_v23 = vld [vmem:[#allocation148_spill] sm:$0xff] }
0x11bb   : > { %v15269_v30 = vsub.f32 %v14751_v29, %v6290_v1 }
0x11bd   : > { %17758 = vst [vmem:[#allocation39_spill] sm:$0xff] %v15269_v30 }
0x11d0   : > { %6245 = vadd.xlane.f32.xlu0 %v6244_v2  ;;  %v6284_v2 = vmul.f32 0.015625, %v6150_v6  ;;  %v15239_v6 = vsub.f32 %v14738_v60, %v6285_v41 }
0x11d2   : > { %v15234_v12 = vsub.f32 %v14731_v22, %v6284_v2  ;;  %17754 = vst [vmem:[#allocation14_spill] sm:$0xff] %v15239_v6  ;;  %v6165_v2 = vpop.xlane.xlu1 %6164 }
0x11d3   : > { %v6289_v22 = vmul.f32 0.015625, %v6165_v2 }
0x11d4   : > { %6251 = vadd.xlane.f32.xlu0 %v6250_v48  ;;  %17753 = vst [vmem:[#allocation16_spill] sm:$0xff] %v15234_v12  ;;  %v6286_v48 = vmul.f32 0.015625, %v6156_v36  ;;  %v6412_v19 = vmul.f32 %v15234_v12, %v15234_v12  ;;  %v6413_v36 = vmul.f32 %v15239_v6, %v15239_v6 }
0x11d5   : > { %v15266_v14 = vsub.f32 %v14777_v25, %v6289_v22  ;;  %v17763_v25 = vld [vmem:[#allocation152_spill] sm:$0xff] }
0x11d6   : > { %6248 = vadd.xlane.f32.xlu1 %v6247_v31  ;;  %v15246_v31 = vsub.f32 %v14717_v34, %v6286_v48  ;;  %v6177_v41 = vpop.xlane.xlu1 %6176 }
0x11d7   : > { %17757 = vst [vmem:[#allocation28_spill] sm:$0xff] %v15266_v14 }
0x11d8   : > { %6254 = vadd.xlane.f32.xlu0 %v6253_v7  ;;  %17755 = vst [vmem:[#allocation21_spill] sm:$0xff] %v15246_v31  ;;  %v15251_v7 = vsub.f32 %v14724_v10, %v6287_v55  ;;  %v6414_v26 = vmul.f32 %v15246_v31, %v15246_v31 }
0x11da   : > { %17756 = vst [vmem:[#allocation30_spill] sm:$0xff] %v15251_v7  ;;  %v6183_v48 = vpop.xlane.xlu1 %6182 }
0x11de   : > { %v6515_v55 = vpop.permute.xlu1 %6514 }
0x11e7   : > { %6562 = vrot.lane.b32.xlu1 %v6409_v42, %s10902_s23  ;;  %v6415_v42 = vmul.f32 %v15251_v7, %v15251_v7 }
0x11eb   : > { %6564 = vrot.lane.b32.xlu1 %v6410_v5, %s10902_s23  ;;  %v6171_v5 = vpop.xlane.xlu0 %6170 }
0x11ee   : > { %6560 = vrot.lane.b32.xlu0 %v6408_v0, %s10902_s23 }
0x11ef   : > { %6566 = vrot.lane.b32.xlu1 %v6411_v24, %s10902_s23  ;;  %v6174_v0 = vpop.xlane.xlu0 %6173 }
0x11f0   : > { %v6292_v11 = vmul.f32 0.015625, %v6174_v0 }
0x11f2   : > { %6568 = vrot.lane.b32.xlu0 %v6412_v19, %s10902_s23 }
0x11f3   : > { %6570 = vrot.lane.b32.xlu1 %v6413_v36, %s10902_s23  ;;  %v6180_v24 = vpop.xlane.xlu0 %6179  ;;  %v6517_v36 = vpop.permute.xlu1 %6516 }
0x11f4   : > { %v6710_v34 = vsel %vm702_vm0, %v6517_v36, 0.0  ;;  %v6294_v17 = vmul.f32 0.015625, %v6180_v24 }
0x11f6   : > { %6572 = vrot.lane.b32.xlu0 %v6414_v26, %s10902_s23  ;;  %v6707_v26 = vsel %vm702_vm0, %v6515_v55, 0.0 }
0x11f7   : > { %6574 = vrot.lane.b32.xlu1 %v6415_v42, %s10902_s23  ;;  %v6513_v19 = vpop.permute.xlu0 %6512  ;;  %v6519_v60 = vpop.permute.xlu1 %6518 }
0x11f8   : > { %v6704_v10 = vsel %vm702_vm0, %v6513_v19, 0.0  ;;  %v6713_v42 = vsel %vm702_vm0, %v6519_v60, 0.0  ;;  %v6291_v19 = vmul.f32 0.015625, %v6171_v5  ;;  %v6418_v60 = vmul.f32 %v15269_v30, %v15269_v30 }
0x11fa   : > { %v15280_v2 = vsub.f32 %v17761_v23, %v6291_v19 }
0x11fb   : > { %v6189_v5 = vpop.xlane.xlu1 %6188 }
0x11fc   : > { %17762 = vst [vmem:[#allocation76_spill] sm:$0xff] %v15280_v2  ;;  %v6419_v22 = vmul.f32 %v15280_v2, %v15280_v2 }
0x1215   : > { %6705 = vadd.xlane.f32.xlu0 %v6704_v10  ;;  %v6417_v10 = vmul.f32 %v15266_v14, %v15266_v14 }
0x1219   : > { %6711 = vadd.xlane.f32.xlu0 %v6710_v34  ;;  %v17759_v34 = vld [vmem:[#allocation149_spill] sm:$0xff] }
0x121a   : > { %v15275_v55 = vsub.f32 %v17759_v34, %v6288_v53  ;;  %v6186_v53 = vpop.xlane.xlu0 %6185 }
0x121b   : > { %6708 = vadd.xlane.f32.xlu1 %v6707_v26  ;;  %v6523_v26 = vpop.permute.xlu1 %6522 }
0x121c   : > { %17760 = vst [vmem:[#allocation37_spill] sm:$0xff] %v15275_v55  ;;  %v6416_v1 = vmul.f32 %v15275_v55, %v15275_v55  ;;  %v6719_v29 = vsel %vm702_vm0, %v6523_v26, 0.0  ;;  %v17767_v26 = vld [vmem:[#allocation156_spill] sm:$0xff] }
0x121d   : > { %6714 = vadd.xlane.f32.xlu0 %v6713_v42 }
0x121e   : > { %v6192_v37 = vpop.xlane.xlu0 %6191 }
0x1222   : > { %v6195_v36 = vpop.xlane.xlu0 %6194 }
0x1226   : > { %v6521_v42 = vpop.permute.xlu0 %6520 }
0x1227   : > { %v6716_v19 = vsel %vm702_vm0, %v6521_v42, 0.0 }
0x122c   : > { %6578 = vrot.lane.b32.xlu1 %v6417_v10, %s10902_s23  ;;  %v6525_v10 = vpop.permute.xlu1 %6524 }
0x1230   : > { %6580 = vrot.lane.b32.xlu1 %v6418_v60, %s10902_s23  ;;  %v6722_v60 = vsel %vm702_vm0, %v6525_v10, 0.0  ;;  %v6527_v23 = vpop.permute.xlu1 %6526  ;;  %v15299_v10 = vsub.f32 %v17765_v21, %v6294_v17 }
0x1232   : > { %17766 = vst [vmem:[#allocation48_spill] sm:$0xff] %v15299_v10 }
0x1233   : > { %6576 = vrot.lane.b32.xlu0 %v6416_v1, %s10902_s23  ;;  %v6725_v1 = vsel %vm702_vm0, %v6527_v23, 0.0  ;;  %v17769_v23 = vld [vmem:[#allocation154_spill] sm:$0xff] }
0x1234   : > { %6582 = vrot.lane.b32.xlu1 %v6419_v22, %s10902_s23  ;;  %v6293_v22 = vmul.f32 0.015625, %v6177_v41  ;;  %v6422_v41 = vmul.f32 %v15299_v10, %v15299_v10  ;;  %v6201_v24 = vpop.xlane.xlu1 %6200 }
0x1236   : > { %v15294_v34 = vsub.f32 %v17763_v25, %v6293_v22 }
0x1238   : > { %17764 = vst [vmem:[#allocation57_spill] sm:$0xff] %v15294_v34  ;;  %v6421_v42 = vmul.f32 %v15294_v34, %v15294_v34  ;;  %v6531_v22 = vpop.permute.xlu1 %6530  ;;  %v17773_v34 = vld [vmem:[#allocation42_spill] sm:$0xff] }
0x1239   : > { %v6731_v25 = vsel %vm702_vm0, %v6531_v22, 0.0  ;;  %v17775_v22 = vld [vmem:[#allocation147_spill] sm:$0xff] }
0x1252   : > { %6717 = vadd.xlane.f32.xlu0 %v6716_v19  ;;  %v6295_v19 = vmul.f32 0.015625, %v6183_v48 }
0x1256   : > { %6723 = vadd.xlane.f32.xlu0 %v6722_v60  ;;  %v15306_v60 = vsub.f32 %v17769_v23, %v6295_v19  ;;  %v6533_v19 = vpop.permute.xlu1 %6532 }
0x1258   : > { %6720 = vadd.xlane.f32.xlu1 %v6719_v29  ;;  %v15303_v29 = vsub.f32 %v17767_v26, %v6292_v11  ;;  %17770 = vst [vmem:[#allocation126_spill] sm:$0xff] %v15306_v60  ;;  %v6423_v17 = vmul.f32 %v15306_v60, %v15306_v60  ;;  %v6198_v11 = vpop.xlane.xlu0 %6197  ;;  %v6298_v26 = vmul.f32 0.015625, %v6192_v37  ;;  %v6296_v60 = vmul.f32 0.015625, %v6186_v53  ;;  %v17777_v37 = vld [vmem:[#allocation47_spill] sm:$0xff] }
0x125a   : > { %6726 = vadd.xlane.f32.xlu0 %v6725_v1  ;;  %17768 = vst [vmem:[#allocation143_spill] sm:$0xff] %v15303_v29  ;;  %v6420_v0 = vmul.f32 %v15303_v29, %v15303_v29  ;;  %v6535_v21 = vpop.permute.xlu1 %6534  ;;  %v15325_v10 = vsub.f32 %v17773_v34, %v6298_v26 }
0x125c   : > { %v6204_v48 = vpop.xlane.xlu0 %6203  ;;  %17774 = vst [vmem:[#allocation145_spill] sm:$0xff] %v15325_v10 }
0x1260   : > { %v6207_v1 = vpop.xlane.xlu0 %6206 }
0x1269   : > { %6586 = vrot.lane.b32.xlu1 %v6421_v42, %s10902_s23  ;;  %v6529_v42 = vpop.permute.xlu0 %6528 }
0x126a   : > { %v6728_v23 = vsel %vm702_vm0, %v6529_v42, 0.0  ;;  %v6299_v42 = vmul.f32 0.015625, %v6195_v36 }
0x126d   : > { %6588 = vrot.lane.b32.xlu1 %v6422_v41, %s10902_s23  ;;  %v6734_v41 = vsel %vm702_vm0, %v6533_v19, 0.0  ;;  %v6210_v36 = vpop.xlane.xlu0 %6209  ;;  %v6213_v19 = vpop.xlane.xlu1 %6212 }
0x1270   : > { %6584 = vrot.lane.b32.xlu0 %v6420_v0, %s10902_s23  ;;  %v6737_v0 = vsel %vm702_vm0, %v6535_v21, 0.0  ;;  %v6426_v21 = vmul.f32 %v15325_v10, %v15325_v10  ;;  %v17781_v10 = vld [vmem:[#allocation100_spill] sm:$0xff] }
0x1271   : > { %6590 = vrot.lane.b32.xlu1 %v6423_v17, %s10902_s23  ;;  %v6297_v17 = vmul.f32 0.015625, %v6189_v5  ;;  %v15336_v5 = vsub.f32 %v17777_v37, %v6299_v42 }
0x1273   : > { %v15322_v3 = vsub.f32 %v17771_v15, %v6297_v17  ;;  %17778 = vst [vmem:[#allocation146_spill] sm:$0xff] %v15336_v5  ;;  %v6427_v26 = vmul.f32 %v15336_v5, %v15336_v5  ;;  %v6302_v15 = vmul.f32 0.015625, %v6204_v48  ;;  %v17785_v48 = vld [vmem:[#allocation117_spill] sm:$0xff] }
0x1275   : > { %17772 = vst [vmem:[#allocation3_spill] sm:$0xff] %v15322_v3 }
0x128f   : > { %6729 = vadd.xlane.f32.xlu0 %v6728_v23  ;;  %v6425_v23 = vmul.f32 %v15322_v3, %v15322_v3  ;;  %v6300_v3 = vmul.f32 0.015625, %v6198_v11 }
0x1293   : > { %6735 = vadd.xlane.f32.xlu0 %v6734_v41 }
0x1295   : > { %6732 = vadd.xlane.f32.xlu1 %v6731_v25  ;;  %v15331_v25 = vsub.f32 %v17775_v22, %v6296_v60  ;;  %v6216_v60 = vpop.xlane.xlu0 %6215  ;;  %v17779_v22 = vld [vmem:[#allocation120_spill] sm:$0xff] }
0x1297   : > { %6738 = vadd.xlane.f32.xlu0 %v6737_v0  ;;  %17776 = vst [vmem:[#allocation77_spill] sm:$0xff] %v15331_v25  ;;  %v6424_v53 = vmul.f32 %v15331_v25, %v15331_v25  ;;  %v6539_v0 = vpop.permute.xlu1 %6538  ;;  %v15353_v25 = vsub.f32 %v17781_v10, %v6302_v15 }
0x1298   : > { %v6743_v34 = vsel %vm702_vm0, %v6539_v0, 0.0  ;;  %v17783_v0 = vld [vmem:[#allocation9_spill] sm:$0xff] }
0x1299   : > { %v6219_v41 = vpop.xlane.xlu0 %6218  ;;  %17782 = vst [vmem:[#allocation67_spill] sm:$0xff] %v15353_v25 }
0x129d   : > { %v6537_v17 = vpop.permute.xlu0 %6536 }
0x129e   : > { %v6740_v42 = vsel %vm702_vm0, %v6537_v17, 0.0 }
0x12a6   : > { %6594 = vrot.lane.b32.xlu1 %v6425_v23, %s10902_s23  ;;  %v6541_v23 = vpop.permute.xlu1 %6540 }
0x12aa   : > { %6596 = vrot.lane.b32.xlu1 %v6426_v21, %s10902_s23  ;;  %v6746_v21 = vsel %vm702_vm0, %v6541_v23, 0.0  ;;  %v6543_v37 = vpop.permute.xlu1 %6542  ;;  %v6303_v23 = vmul.f32 0.015625, %v6207_v1 }
0x12ad   : > { %6592 = vrot.lane.b32.xlu0 %v6424_v53, %s10902_s23  ;;  %v6749_v53 = vsel %vm702_vm0, %v6543_v37, 0.0  ;;  %v15364_v37 = vsub.f32 %v17785_v48, %v6303_v23 }
0x12ae   : > { %6598 = vrot.lane.b32.xlu1 %v6427_v26, %s10902_s23  ;;  %v6301_v26 = vmul.f32 0.015625, %v6201_v24  ;;  %v6430_v24 = vmul.f32 %v15353_v25, %v15353_v25  ;;  %v17789_v25 = vld [vmem:[#allocation127_spill] sm:$0xff] }
0x12af   : > { %17786 = vst [vmem:[#allocation81_spill] sm:$0xff] %v15364_v37  ;;  %v6431_v11 = vmul.f32 %v15364_v37, %v15364_v37 }
0x12b0   : > { %v15350_v5 = vsub.f32 %v17779_v22, %v6301_v26  ;;  %v6306_v22 = vmul.f32 0.015625, %v6216_v60  ;;  %v17793_v60 = vld [vmem:[#allocation128_spill] sm:$0xff] }
0x12b2   : > { %17780 = vst [vmem:[#allocation132_spill] sm:$0xff] %v15350_v5  ;;  %v6429_v17 = vmul.f32 %v15350_v5, %v15350_v5  ;;  %v6304_v5 = vmul.f32 0.015625, %v6210_v36 }
0x12cc   : > { %6741 = vadd.xlane.f32.xlu0 %v6740_v42  ;;  %v6225_v42 = vpop.xlane.xlu1 %6224 }
0x12d0   : > { %6747 = vadd.xlane.f32.xlu0 %v6746_v21 }
0x12d2   : > { %6744 = vadd.xlane.f32.xlu1 %v6743_v34  ;;  %v15359_v34 = vsub.f32 %v17783_v0, %v6300_v3  ;;  %v6222_v3 = vpop.xlane.xlu0 %6221  ;;  %v17787_v0 = vld [vmem:[#allocation158_spill] sm:$0xff] }
0x12d4   : > { %6750 = vadd.xlane.f32.xlu0 %v6749_v53  ;;  %17784 = vst [vmem:[#allocation141_spill] sm:$0xff] %v15359_v34  ;;  %v6428_v15 = vmul.f32 %v15359_v34, %v15359_v34  ;;  %v6547_v53 = vpop.permute.xlu1 %6546  ;;  %v15381_v34 = vsub.f32 %v17789_v25, %v6306_v22 }
0x12d5   : > { %v6755_v10 = vsel %vm702_vm0, %v6547_v53, 0.0  ;;  %v17791_v53 = vld [vmem:[#allocation90_spill] sm:$0xff] }
0x12d6   : > { %v6228_v1 = vpop.xlane.xlu0 %6227  ;;  %17790 = vst [vmem:[#allocation45_spill] sm:$0xff] %v15381_v34 }
0x12da   : > { %v6231_v21 = vpop.xlane.xlu0 %6230 }
0x12de   : > { %v6545_v26 = vpop.permute.xlu0 %6544 }
0x12df   : > { %v6752_v23 = vsel %vm702_vm0, %v6545_v26, 0.0 }
0x12e3   : > { %6602 = vrot.lane.b32.xlu1 %v6429_v17, %s10902_s23  ;;  %v6549_v17 = vpop.permute.xlu1 %6548 }
0x12e7   : > { %6604 = vrot.lane.b32.xlu1 %v6430_v24, %s10902_s23  ;;  %v6758_v24 = vsel %vm702_vm0, %v6549_v17, 0.0  ;;  %v6551_v48 = vpop.permute.xlu1 %6550  ;;  %v6307_v17 = vmul.f32 0.015625, %v6219_v41 }
0x12ea   : > { %6600 = vrot.lane.b32.xlu0 %v6428_v15, %s10902_s23  ;;  %v6761_v15 = vsel %vm702_vm0, %v6551_v48, 0.0  ;;  %v15392_v48 = vsub.f32 %v17793_v60, %v6307_v17 }
0x12eb   : > { %6606 = vrot.lane.b32.xlu1 %v6431_v11, %s10902_s23  ;;  %v6305_v11 = vmul.f32 0.015625, %v6213_v19  ;;  %v6434_v19 = vmul.f32 %v15381_v34, %v15381_v34 }
0x12ec   : > { %17794 = vst [vmem:[#allocation44_spill] sm:$0xff] %v15392_v48  ;;  %v6435_v36 = vmul.f32 %v15392_v48, %v15392_v48  ;;  %v6308_v48 = vmul.f32 0.015625, %v6222_v3 }
0x12ed   : > { %v15378_v37 = vsub.f32 %v17787_v0, %v6305_v11  ;;  %v6310_v0 = vmul.f32 0.015625, %v6228_v1 }
0x12ef   : > { %17788 = vst [vmem:[#allocation104_spill] sm:$0xff] %v15378_v37  ;;  %v6433_v26 = vmul.f32 %v15378_v37, %v15378_v37 }
0x1309   : > { %6753 = vadd.xlane.f32.xlu0 %v6752_v23  ;;  %v6237_v23 = vpop.xlane.xlu1 %6236 }
0x130d   : > { %6759 = vadd.xlane.f32.xlu0 %v6758_v24 }
0x130f   : > { %6756 = vadd.xlane.f32.xlu1 %v6755_v10  ;;  %v15387_v10 = vsub.f32 %v17791_v53, %v6304_v5  ;;  %v6234_v5 = vpop.xlane.xlu0 %6233 }
0x1311   : > { %6762 = vadd.xlane.f32.xlu0 %v6761_v15  ;;  %17792 = vst [vmem:[#allocation116_spill] sm:$0xff] %v15387_v10  ;;  %v6432_v22 = vmul.f32 %v15387_v10, %v15387_v10  ;;  %v6555_v15 = vpop.permute.xlu1 %6554  ;;  %v15409_v10 = vsub.f32 %v14933_v4, %v6310_v0  ;;  %v17799_v4 = vld [vmem:[#allocation144_spill] sm:$0xff] }
0x1312   : > { %v6767_v25 = vsel %vm702_vm0, %v6555_v15, 0.0 }
0x1313   : > { %v6240_v41 = vpop.xlane.xlu0 %6239  ;;  %17796 = vst [vmem:[#allocation8_spill] sm:$0xff] %v15409_v10 }
0x1317   : > { %v6243_v24 = vpop.xlane.xlu0 %6242 }
0x131b   : > { %v6553_v11 = vpop.permute.xlu0 %6552 }
0x131c   : > { %v6764_v17 = vsel %vm702_vm0, %v6553_v11, 0.0 }
0x1320   : > { %6610 = vrot.lane.b32.xlu1 %v6433_v26, %s10902_s23  ;;  %v6557_v26 = vpop.permute.xlu1 %6556 }
0x1324   : > { %6612 = vrot.lane.b32.xlu1 %v6434_v19, %s10902_s23  ;;  %v6770_v19 = vsel %vm702_vm0, %v6557_v26, 0.0  ;;  %v6559_v60 = vpop.permute.xlu1 %6558  ;;  %v6311_v26 = vmul.f32 0.015625, %v6231_v21  ;;  %v6246_v21 = vpop.xlane.xlu0 %6245 }
0x1326   : > { %v15420_v1 = vsub.f32 %v14943_v46, %v6311_v26  ;;  %v6314_v46 = vmul.f32 0.015625, %v6240_v41  ;;  %v17805_v41 = vld [vmem:[#allocation96_spill] sm:$0xff] }
0x1327   : > { %6608 = vrot.lane.b32.xlu0 %v6432_v22, %s10902_s23  ;;  %v6773_v22 = vsel %vm702_vm0, %v6559_v60, 0.0 }
0x1328   : > { %6614 = vrot.lane.b32.xlu1 %v6435_v36, %s10902_s23  ;;  %v6309_v36 = vmul.f32 0.015625, %v6225_v42  ;;  %v6438_v42 = vmul.f32 %v15409_v10, %v15409_v10  ;;  %17798 = vst [vmem:[#allocation2_spill] sm:$0xff] %v15420_v1  ;;  %v6439_v3 = vmul.f32 %v15420_v1, %v15420_v1  ;;  %v6252_v60 = vpop.xlane.xlu0 %6251  ;;  %v17801_v1 = vld [vmem:[#allocation72_spill] sm:$0xff] }
0x132a   : > { %v15406_v53 = vsub.f32 %v14926_v54, %v6309_v36 }
0x132c   : > { %17795 = vst [vmem:[#allocation7_spill] sm:$0xff] %v15406_v53  ;;  %v6437_v11 = vmul.f32 %v15406_v53, %v15406_v53  ;;  %v6255_v15 = vpop.xlane.xlu0 %6254 }
0x1346   : > { %6765 = vadd.xlane.f32.xlu0 %v6764_v17 }
0x134a   : > { %6771 = vadd.xlane.f32.xlu0 %v6770_v19  ;;  %v6561_v19 = vpop.permute.xlu0 %6560 }
0x134b   : > { %v6776_v36 = vsel %vm702_vm0, %v6561_v19, 0.0 }
0x134c   : > { %6768 = vadd.xlane.f32.xlu1 %v6767_v25  ;;  %v15415_v25 = vsub.f32 %v14940_v61, %v6308_v48  ;;  %v6249_v48 = vpop.xlane.xlu1 %6248  ;;  %v6312_v61 = vmul.f32 0.015625, %v6234_v5 }
0x134e   : > { %6774 = vadd.xlane.f32.xlu0 %v6773_v22  ;;  %17797 = vst [vmem:[#allocation46_spill] sm:$0xff] %v15415_v25  ;;  %v6436_v0 = vmul.f32 %v15415_v25, %v15415_v25  ;;  %v15437_v25 = vsub.f32 %v17801_v1, %v6314_v46  ;;  %v6317_v1 = vmul.f32 0.015625, %v6249_v48  ;;  %v17811_v48 = vld [vmem:[#allocation107_spill] sm:$0xff] }
0x1350   : > { %v6563_v17 = vpop.permute.xlu1 %6562  ;;  %17802 = vst [vmem:[#allocation36_spill] sm:$0xff] %v15437_v25 }
0x1354   : > { %v6565_v22 = vpop.permute.xlu1 %6564 }
0x1358   : > { %v6567_v26 = vpop.permute.xlu1 %6566 }
0x135d   : > { %6618 = vrot.lane.b32.xlu1 %v6437_v11, %s10902_s23  ;;  %v6782_v11 = vsel %vm702_vm0, %v6565_v22, 0.0  ;;  %v6315_v22 = vmul.f32 0.015625, %v6243_v24  ;;  %v6571_v24 = vpop.permute.xlu1 %6570 }
0x1361   : > { %6620 = vrot.lane.b32.xlu1 %v6438_v42, %s10902_s23  ;;  %v6779_v42 = vsel %vm702_vm0, %v6563_v17, 0.0  ;;  %v17803_v17 = vld [vmem:[#allocation92_spill] sm:$0xff] }
0x1364   : > { %6616 = vrot.lane.b32.xlu0 %v6436_v0, %s10902_s23  ;;  %v6785_v0 = vsel %vm702_vm0, %v6567_v26, 0.0 }
0x1365   : > { %6622 = vrot.lane.b32.xlu1 %v6439_v3, %s10902_s23  ;;  %v6313_v3 = vmul.f32 0.015625, %v6237_v23  ;;  %v6442_v23 = vmul.f32 %v15437_v25, %v15437_v25 }
0x1367   : > { %v15434_v54 = vsub.f32 %v17799_v4, %v6313_v3 }
0x1369   : > { %17800 = vst [vmem:[#allocation4_spill] sm:$0xff] %v15434_v54  ;;  %v6441_v19 = vmul.f32 %v15434_v54, %v15434_v54  ;;  %v6316_v54 = vmul.f32 0.015625, %v6246_v21 }
0x1383   : > { %6777 = vadd.xlane.f32.xlu0 %v6776_v36  ;;  %v15443_v36 = vsub.f32 %v17803_v17, %v6312_v61  ;;  %v6569_v61 = vpop.permute.xlu0 %6568  ;;  %v17807_v17 = vld [vmem:[#allocation101_spill] sm:$0xff] }
0x1385   : > { %17804 = vst [vmem:[#allocation31_spill] sm:$0xff] %v15443_v36  ;;  %v6440_v46 = vmul.f32 %v15443_v36, %v15443_v36 }
0x1387   : > { %6783 = vadd.xlane.f32.xlu0 %v6782_v11  ;;  %v15448_v11 = vsub.f32 %v17805_v41, %v6315_v22  ;;  %v6573_v26 = vpop.permute.xlu0 %6572 }
0x1388   : > { %v6794_v22 = vsel %vm702_vm0, %v6573_v26, 0.0  ;;  %v17809_v26 = vld [vmem:[#allocation106_spill] sm:$0xff] }
0x1389   : > { %6780 = vadd.xlane.f32.xlu1 %v6779_v42  ;;  %17806 = vst [vmem:[#allocation11_spill] sm:$0xff] %v15448_v11  ;;  %v6443_v5 = vmul.f32 %v15448_v11, %v15448_v11  ;;  %v6575_v42 = vpop.permute.xlu1 %6574  ;;  %v15468_v11 = vsub.f32 %v17807_v17, %v6317_v1 }
0x138b   : > { %6786 = vadd.xlane.f32.xlu0 %v6785_v0  ;;  %v6788_v0 = vsel %vm702_vm0, %v6569_v61, 0.0  ;;  %v15458_v3 = vpop.xlane.xlu0 %6705  ;;  %17808 = vst [vmem:[#allocation12_spill] sm:$0xff] %v15468_v11 }
0x139a   : > { %6626 = vrot.lane.b32.xlu1 %v6441_v19, %s10902_s23  ;;  %v15460_v19 = vpop.xlane.xlu1 %6708 }
0x139e   : > { %6628 = vrot.lane.b32.xlu1 %v6442_v23, %s10902_s23  ;;  %v6791_v23 = vsel %vm702_vm0, %v6571_v24, 0.0  ;;  %v6579_v41 = vpop.permute.xlu1 %6578  ;;  %v6445_v24 = vmul.f32 %v15468_v11, %v15468_v11 }
0x139f   : > { %v6803_v37 = vsel %vm702_vm0, %v6579_v41, 0.0 }
0x13a1   : > { %6624 = vrot.lane.b32.xlu0 %v6440_v46, %s10902_s23  ;;  %v15464_v46 = vpop.xlane.xlu0 %6711 }
0x13a2   : > { %6630 = vrot.lane.b32.xlu1 %v6443_v5, %s10902_s23  ;;  %v6797_v5 = vsel %vm702_vm0, %v6575_v42, 0.0  ;;  %v6581_v61 = vpop.permute.xlu1 %6580 }
0x13a5   : > { %v6715_v4 = vpop.xlane.xlu0 %6714 }
0x13a6   : > { %v6583_v36 = vpop.permute.xlu1 %6582 }
0x13a7   : > { %v6809_v30 = vsel %vm702_vm0, %v6583_v36, 0.0 }
0x13a9   : > { %v6577_v25 = vpop.permute.xlu0 %6576 }
0x13ad   : > { %v15475_v42 = vpop.xlane.xlu0 %6717 }
0x13c0   : > { %6789 = vadd.xlane.f32.xlu0 %v6788_v0  ;;  %v6318_v0 = vmul.f32 0.015625, %v6252_v60  ;;  %v17813_v60 = vld [vmem:[#allocation111_spill] sm:$0xff] }
0x13c4   : > { %6795 = vadd.xlane.f32.xlu0 %v6794_v22  ;;  %v15471_v22 = vsub.f32 %v17809_v26, %v6318_v0  ;;  %v15486_v0 = vpop.xlane.xlu1 %6720 }
0x13c6   : > { %6792 = vadd.xlane.f32.xlu1 %v6791_v23  ;;  %17810 = vst [vmem:[#allocation84_spill] sm:$0xff] %v15471_v22  ;;  %v6319_v23 = vmul.f32 0.015625, %v6255_v15  ;;  %v6446_v1 = vmul.f32 %v15471_v22, %v15471_v22 }
0x13c8   : > { %6798 = vadd.xlane.f32.xlu0 %v6797_v5  ;;  %v15479_v5 = vsub.f32 %v17811_v48, %v6316_v54  ;;  %v15484_v21 = vsub.f32 %v17813_v60, %v6319_v23  ;;  %v6587_v54 = vpop.permute.xlu1 %6586 }
0x13c9   : > { %v6815_v2 = vsel %vm702_vm0, %v6587_v54, 0.0 }
0x13ca   : > { %17812 = vst [vmem:[#allocation82_spill] sm:$0xff] %v15479_v5  ;;  %17814 = vst [vmem:[#allocation60_spill] sm:$0xff] %v15484_v21  ;;  %v6444_v15 = vmul.f32 %v15479_v5, %v15479_v5  ;;  %v6447_v26 = vmul.f32 %v15484_v21, %v15484_v21 }
0x13cc   : > { %v6589_v23 = vpop.permute.xlu1 %6588 }
0x13cd   : > { %v6818_v41 = vsel %vm702_vm0, %v6589_v23, 0.0 }
0x13d0   : > { %v6591_v48 = vpop.permute.xlu1 %6590 }
0x13d7   : > { %6634 = vrot.lane.b32.xlu1 %v6445_v24, %s10902_s23  ;;  %v15493_v24 = vpop.xlane.xlu0 %6723 }
0x13db   : > { %6636 = vrot.lane.b32.xlu1 %v6446_v1, %s10902_s23  ;;  %v15497_v17 = vpop.xlane.xlu0 %6726  ;;  %v15501_v1 = vpop.xlane.xlu1 %6732 }
0x13dc   : > { %v6905_v31 = vmul.f32 0.015625, %v15501_v1 }
0x13de   : > { %6632 = vrot.lane.b32.xlu0 %v6444_v15, %s10902_s23  ;;  %v6800_v15 = vsel %vm702_vm0, %v6577_v25, 0.0 }
0x13df   : > { %6638 = vrot.lane.b32.xlu1 %v6447_v26, %s10902_s23  ;;  %v6585_v60 = vpop.permute.xlu0 %6584  ;;  %v6595_v5 = vpop.permute.xlu1 %6594  ;;  %v6806_v26 = vsel %vm702_vm0, %v6581_v61, 0.0  ;;  %v6821_v61 = vsel %vm702_vm0, %v6591_v48, 0.0 }
0x13e0   : > { %v6812_v25 = vsel %vm702_vm0, %v6585_v60, 0.0 }
0x13e3   : > { %v15499_v22 = vpop.xlane.xlu0 %6729  ;;  %v6597_v10 = vpop.permute.xlu1 %6596 }
0x13e4   : > { %v6830_v48 = vsel %vm702_vm0, %v6597_v10, 0.0 }
0x13e7   : > { %v15503_v11 = vpop.xlane.xlu0 %6735  ;;  %v6599_v34 = vpop.permute.xlu1 %6598 }
0x13e8   : > { %v6833_v60 = vsel %vm702_vm0, %v6599_v34, 0.0  ;;  %v6896_v34 = vmul.f32 0.015625, %v15458_v3 }
0x13eb   : > { %v15505_v21 = vpop.xlane.xlu0 %6738  ;;  %v15513_v55 = vpop.xlane.xlu1 %6744 }
0x13ef   : > { %v6593_v53 = vpop.permute.xlu0 %6592 }
0x13f3   : > { %v15510_v29 = vpop.xlane.xlu0 %6741 }
0x13fd   : > { %6801 = vadd.xlane.f32.xlu0 %v6800_v15  ;;  %v15517_v15 = vpop.xlane.xlu0 %6747 }
0x1401   : > { %6807 = vadd.xlane.f32.xlu0 %v6806_v26  ;;  %v6603_v26 = vpop.permute.xlu1 %6602  ;;  %v15522_v36 = vpop.xlane.xlu0 %6750 }
0x1403   : > { %6804 = vadd.xlane.f32.xlu1 %v6803_v37  ;;  %v6827_v37 = vsel %vm702_vm0, %v6595_v5, 0.0  ;;  %v6839_v5 = vsel %vm702_vm0, %v6603_v26, 0.0  ;;  %v6960_v26 = vadd.f32 1e-05, %v6896_v34 }
0x1405   : > { %6810 = vadd.xlane.f32.xlu0 %v6809_v30  ;;  %v6824_v30 = vsel %vm702_vm0, %v6593_v53, 0.0  ;;  %v6605_v54 = vpop.permute.xlu1 %6604  ;;  %v6601_v23 = vpop.permute.xlu0 %6600  ;;  %v6897_v53 = vmul.f32 0.015625, %v15460_v19  ;;  %v10115_v19 = vld [vmem:[%s16811_s6] sm:$0xff]  }
0x1406   : > { %9884 = vmatprep.subr.bf16.mxu0 %v10115_v19 }
0x1407   : > { %6816 = vadd.xlane.f32.xlu1 %v6815_v2  ;;  %v6899_v2 = vmul.f32 0.015625, %v6715_v4  ;;  %v6836_v4 = vsel %vm702_vm0, %v6601_v23, 0.0  ;;  %v6961_v10 = vadd.f32 1e-05, %v6897_v53  ;;  %9885 = vmatpush3.bf16.msra.mxu0 %v10115_v19  ;;  %v10118_v23 = vld [vmem:[%s16811_s6 + $0x18] sm:$0xff]   ;;  %v6902_v19 = vmul.f32 0.015625, %v15493_v24 }
0x1409   : > { %6813 = vadd.xlane.f32.xlu0 %v6812_v25  ;;  %v6898_v25 = vmul.f32 0.015625, %v15464_v46  ;;  %v6607_v14 = vpop.permute.xlu1 %6606 }
0x140a   : > { %v6845_v46 = vsel %vm702_vm0, %v6607_v14, 0.0  ;;  %v10116_v14 = vld [vmem:[%s16811_s6 + $0x8] sm:$0xff]  }
0x140b   : > { %6822 = vadd.xlane.f32.xlu1 %v6821_v61  ;;  %v6963_v61 = vadd.f32 1e-05, %v6899_v2  ;;  %9886 = vmatprep.subr.bf16.mxu0 %v10116_v14 }
0x140c   : > { %9887 = vmatpush3.bf16.msra.mxu0 %v10116_v14 }
0x140d   : > { %6819 = vadd.xlane.f32.xlu0 %v6818_v41  ;;  %v6962_v41 = vadd.f32 1e-05, %v6898_v25  ;;  %10635 = vrsqrt.f32 %v6963_v61 }
0x140f   : > { %6828 = vadd.xlane.f32.xlu1 %v6827_v37  ;;  %10637 = vrsqrt.f32 %v6962_v41  ;;  %v6842_v37 = vsel %vm702_vm0, %v6605_v54, 0.0  ;;  %v15551_v41 = vpop.xlane.xlu0 %6753 }
0x1410   : > { %10639 = vrsqrt.f32 %v6961_v10 }
0x1411   : > { %6825 = vadd.xlane.f32.xlu0 %v6824_v30  ;;  %10641 = vrsqrt.f32 %v6960_v26 }
0x1413   : > { %6834 = vadd.xlane.f32.xlu1 %v6833_v60  ;;  %v10117_v60 = vld [vmem:[%s16811_s6 + $0x10] sm:$0xff]   ;;  %v15554_v53 = vpop.xlane.xlu0 %6759 }
0x1414   : > { %9888 = vmatprep.subr.bf16.mxu0 %v10117_v60 }
0x1415   : > { %6831 = vadd.xlane.f32.xlu0 %v6830_v48  ;;  %9889 = vmatpush3.bf16.msra.mxu0 %v10117_v60  ;;  %v6901_v60 = vmul.f32 0.015625, %v15486_v0 }
0x1416   : > { %9890 = vmatprep.subr.bf16.mxu0 %v10118_v23 }
0x1417   : > { %6840 = vadd.xlane.f32.xlu1 %v6839_v5  ;;  %v10636_v30 = vpop.eup %10635  ;;  %v15558_v34 = vpop.xlane.xlu0 %6762 }
0x1418   : > { %v7091_v2 = vmul.f32 %v10636_v30, %v15052_v50 }
0x1419   : > { %6837 = vadd.xlane.f32.xlu0 %v6836_v4  ;;  %v10638_v3 = vpop.eup %10637  ;;  %9891 = vmatpush3.bf16.msra.mxu0 %v10118_v23  ;;  %v15556_v4 = vpop.xlane.xlu1 %6756  ;;  %v6965_v23 = vadd.f32 1e-05, %v6901_v60 }
0x141a   : > { %v7090_v54 = vmul.f32 %v10638_v3, %v15041_v18  ;;  %v10640_v25 = vpop.eup %10639 }
0x141b   : > { %6846 = vadd.xlane.f32.xlu1 %v6845_v46  ;;  %v10642_v61 = vpop.eup %10641  ;;  %v7089_v50 = vmul.f32 %v10640_v25, %v15038_v33  ;;  %v6609_v10 = vpop.permute.xlu0 %6608  ;;  %v6903_v33 = vmul.f32 0.015625, %v15497_v17  ;;  %v6900_v17 = vmul.f32 0.015625, %v15475_v42 }
0x141c   : > { %v7153_v48 = vpack.c.bf16 %v7091_v2, %v7090_v54  ;;  %v7088_v18 = vmul.f32 %v10642_v61, %v15047_v8  ;;  %v6848_v2 = vsel %vm702_vm0, %v6609_v10, 0.0  ;;  %v6966_v54 = vadd.f32 1e-05, %v6902_v19 }
0x141d   : > { %6843 = vadd.xlane.f32.xlu0 %v6842_v37  ;;  %v6611_v46 = vpop.permute.xlu1 %6610  ;;  %v6967_v30 = vadd.f32 1e-05, %v6903_v33 }
0x141e   : > { %v7152_v5 = vpack.c.bf16 %v7089_v50, %v7088_v18  ;;  %v6851_v25 = vsel %vm702_vm0, %v6611_v46, 0.0  ;;  %v6964_v18 = vadd.f32 1e-05, %v6900_v17 }
0x141f   : > { %v15560_v26 = vpop.xlane.xlu0 %6765  ;;  %10643 = vrsqrt.f32 %v6967_v30 }
0x1420   : > { %10645 = vrsqrt.f32 %v6966_v54 }
0x1421   : > { %v6613_v37 = vpop.permute.xlu1 %6612  ;;  %10647 = vrsqrt.f32 %v6965_v23 }
0x1422   : > { %v6854_v50 = vsel %vm702_vm0, %v6613_v37, 0.0  ;;  %10649 = vrsqrt.f32 %v6964_v18 }
0x1423   : > { %v15564_v14 = vpop.xlane.xlu0 %6771 }
0x1425   : > { %v6615_v8 = vpop.permute.xlu1 %6614 }
0x1427   : > { %v15573_v24 = vpop.xlane.xlu0 %6774 }
0x1429   : > { %v15566_v3 = vpop.xlane.xlu1 %6768  ;;  %v10644_v46 = vpop.eup %10643 }
0x142a   : > { %v10646_v10 = vpop.eup %10645  ;;  %v7095_v42 = vmul.f32 %v10644_v46, %v15080_v28 }
0x142b   : > { %v6617_v0 = vpop.permute.xlu0 %6616  ;;  %v7094_v19 = vmul.f32 %v10646_v10, %v15069_v9  ;;  %v10648_v30 = vpop.eup %10647 }
0x142c   : > { %7233 = vrot.lane.b32.xlu1 %v7153_v48, %s10902_s23  ;;  %v6857_v48 = vsel %vm702_vm0, %v6615_v8, 0.0  ;;  %v10650_v60 = vpop.eup %10649 }
0x142d   : > { %v6619_v61 = vpop.permute.xlu1 %6618  ;;  %v7092_v17 = vmul.f32 %v10650_v60, %v15075_v56 }
0x142e   : > { %v6863_v7 = vsel %vm702_vm0, %v6619_v61, 0.0 }
0x142f   : > { %v15576_v33 = vpop.xlane.xlu0 %6777 }
0x1433   : > { %7231 = vrot.lane.b32.xlu0 %v7152_v5, %s10902_s23  ;;  %v6621_v5 = vpop.permute.xlu1 %6620  ;;  %v15580_v54 = vpop.xlane.xlu0 %6783 }
0x1437   : > { %v6623_v8 = vpop.permute.xlu1 %6622 }
0x1438   : > { %v6869_v6 = vsel %vm702_vm0, %v6623_v8, 0.0 }
0x143b   : > { %v15582_v37 = vpop.xlane.xlu1 %6780 }
0x143f   : > { %v15589_v23 = vpop.permute.xlu1 %6626 }
0x1450   : > { %6849 = vadd.xlane.f32.xlu1 %v6848_v2  ;;  %v7155_v2 = vpack.c.bf16 %v7095_v42, %v7094_v19  ;;  %v6907_v19 = vmul.f32 0.015625, %v15505_v21  ;;  %v6904_v21 = vmul.f32 0.015625, %v15499_v22 }
0x1452   : > { %6852 = vadd.xlane.f32.xlu0 %v6851_v25  ;;  %v7093_v25 = vmul.f32 %v10648_v30, %v15066_v20  ;;  %v6906_v30 = vmul.f32 0.015625, %v15503_v11  ;;  %v6968_v1 = vadd.f32 1e-05, %v6904_v21 }
0x1454   : > { %6858 = vadd.xlane.f32.xlu1 %v6857_v48  ;;  %v15587_v48 = vpop.xlane.xlu0 %6786  ;;  %v7154_v28 = vpack.c.bf16 %v7093_v25, %v7092_v17  ;;  %v6971_v25 = vadd.f32 1e-05, %v6907_v19  ;;  %v6860_v17 = vsel %vm702_vm0, %v6617_v0, 0.0  ;;  %v6969_v19 = vadd.f32 1e-05, %v6905_v31 }
0x1456   : > { %6855 = vadd.xlane.f32.xlu0 %v6854_v50  ;;  %v15594_v50 = vpop.permute.xlu1 %6628  ;;  %10651 = vrsqrt.f32 %v6971_v25 }
0x1458   : > { %v15592_v9 = vpop.permute.xlu0 %6624 }
0x145a   : > { %v15598_v46 = vpop.permute.xlu1 %6630 }
0x145c   : > { %v15596_v18 = vpop.xlane.xlu0 %6789 }
0x145e   : > { %v15602_v20 = vpop.xlane.xlu1 %6792 }
0x1460   : > { %v15600_v10 = vpop.xlane.xlu0 %6795  ;;  %v10652_v22 = vpop.eup %10651 }
0x1461   : > { %v7099_v31 = vmul.f32 %v10652_v22, %v15112_v13 }
0x1462   : > { %v15606_v42 = vpop.permute.xlu1 %6634 }
0x1464   : > { %v15604_v56 = vpop.xlane.xlu0 %6798 }
0x1465   : > { %7237 = vrot.lane.b32.xlu1 %v7155_v2, %s10902_s23 }
0x1466   : > { %v15612_v60 = vpop.permute.xlu1 %6636 }
0x1468   : > { %v15610_v2 = vpop.permute.xlu0 %6632 }
0x146a   : > { %v15620_v11 = vpop.permute.xlu1 %6638 }
0x146c   : > { %7235 = vrot.lane.b32.xlu0 %v7154_v28, %s10902_s23  ;;  %v6970_v28 = vadd.f32 1e-05, %v6906_v30  ;;  %v6866_v30 = vsel %vm702_vm0, %v6621_v5, 0.0 }
0x146e   : > { %10653 = vrsqrt.f32 %v6970_v28 }
0x146f   : > { %10655 = vrsqrt.f32 %v6969_v19 }
0x1470   : > { %10657 = vrsqrt.f32 %v6968_v1 }
0x1478   : > { %v10654_v8 = vpop.eup %10653 }
0x1479   : > { %v7098_v5 = vmul.f32 %v10654_v8, %v15101_v32  ;;  %v10656_v21 = vpop.eup %10655 }
0x147a   : > { %v10658_v52 = vpop.eup %10657  ;;  %v7097_v49 = vmul.f32 %v10656_v21, %v15098_v45  ;;  %v6909_v21 = vmul.f32 0.015625, %v15513_v55 }
0x147b   : > { %v7157_v19 = vpack.c.bf16 %v7099_v31, %v7098_v5  ;;  %v7096_v38 = vmul.f32 %v10658_v52, %v15107_v39  ;;  %v6911_v52 = vmul.f32 0.015625, %v15522_v36  ;;  %v6872_v39 = vsel %vm702_vm0, %v15592_v9, 0.0 }
0x147c   : > { %v6881_v36 = vsel %vm702_vm0, %v15598_v46, 0.0  ;;  %v6878_v9 = vsel %vm702_vm0, %v15594_v50, 0.0 }
0x147d   : > { %v7156_v22 = vpack.c.bf16 %v7097_v49, %v7096_v38  ;;  %v6910_v38 = vmul.f32 0.015625, %v15517_v15  ;;  %v6975_v45 = vadd.f32 1e-05, %v6911_v52  ;;  %v6973_v15 = vadd.f32 1e-05, %v6909_v21 }
0x147f   : > { %v6974_v49 = vadd.f32 1e-05, %v6910_v38  ;;  %10659 = vrsqrt.f32 %v6975_v45 }
0x1481   : > { %10661 = vrsqrt.f32 %v6974_v49 }
0x1482   : > { %10663 = vrsqrt.f32 %v6973_v15  ;;  %v6913_v15 = vmul.f32 0.015625, %v15556_v4 }
0x1489   : > { %6861 = vadd.xlane.f32.xlu1 %v6860_v17  ;;  %v10660_v55 = vpop.eup %10659 }
0x148a   : > { %v15616_v12 = vpop.xlane.xlu0 %6801 }
0x148b   : > { %6864 = vadd.xlane.f32.xlu0 %v6863_v7  ;;  %v10662_v52 = vpop.eup %10661 }
0x148c   : > { %v7102_v38 = vmul.f32 %v10662_v52, %v15133_v47 }
0x148d   : > { %6870 = vadd.xlane.f32.xlu1 %v6869_v6 }
0x148e   : > { %v15623_v0 = vpop.xlane.xlu0 %6807 }
0x148f   : > { %6867 = vadd.xlane.f32.xlu0 %v6866_v30 }
0x1490   : > { %v15626_v17 = vpop.xlane.xlu1 %6804 }
0x1492   : > { %v15628_v61 = vpop.xlane.xlu0 %6810 }
0x1494   : > { %v15630_v7 = vpop.xlane.xlu1 %6816 }
0x1496   : > { %v15632_v25 = vpop.xlane.xlu0 %6813 }
0x1498   : > { %v15634_v6 = vpop.xlane.xlu1 %6822 }
0x1499   : > { %17815 = vst [vmem:[#allocation51_spill] sm:$0xff] %v15634_v6 }
0x149a   : > { %v15637_v28 = vpop.xlane.xlu0 %6819 }
0x149c   : > { %v15640_v30 = vpop.xlane.xlu1 %6828 }
0x149e   : > { %7241 = vrot.lane.b32.xlu1 %v7157_v19, %s10902_s23  ;;  %v15643_v1 = vpop.xlane.xlu0 %6825 }
0x14a0   : > { %v15646_v58 = vpop.xlane.xlu1 %6834 }
0x14a2   : > { %v15649_v13 = vpop.xlane.xlu0 %6831 }
0x14a4   : > { %v15651_v6 = vpop.xlane.xlu1 %6840 }
0x14a5   : > { %7239 = vrot.lane.b32.xlu0 %v7156_v22, %s10902_s23  ;;  %v6875_v22 = vsel %vm702_vm0, %v15589_v23, 0.0  ;;  %v7103_v23 = vmul.f32 %v10660_v55, %v15144_v16  ;;  %v6917_v55 = vmul.f32 0.015625, %v15566_v3  ;;  %v6921_v3 = vmul.f32 0.015625, %v15582_v37 }
0x14a6   : > { %v15654_v32 = vpop.xlane.xlu0 %6837 }
0x14a7   : > { %v7159_v45 = vpack.c.bf16 %v7103_v23, %v7102_v38  ;;  %v6919_v23 = vmul.f32 0.015625, %v15573_v24  ;;  %v6977_v38 = vadd.f32 1e-05, %v6913_v15  ;;  %v6887_v24 = vsel %vm702_vm0, %v15606_v42, 0.0 }
0x14a8   : > { %v15656_v8 = vpop.xlane.xlu1 %6846  ;;  %v6985_v37 = vadd.f32 1e-05, %v6921_v3  ;;  %v6890_v42 = vsel %vm702_vm0, %v15612_v60, 0.0 }
0x14a9   : > { %v6983_v4 = vadd.f32 1e-05, %v6919_v23 }
0x14aa   : > { %v15658_v31 = vpop.xlane.xlu0 %6843 }
0x14ac   : > { %v7234_v19 = vpop.permute.xlu1 %7233 }
0x14ae   : > { %v7232_v5 = vpop.permute.xlu0 %7231 }
0x14af   : > { %9892 = vmatprep.mubr.msk.bf16.mxu0 %vm702_vm0, %v7232_v5  ;;  %v6908_v5 = vmul.f32 0.015625, %v15510_v29  ;;  %v10664_v29 = vpop.eup %10663 }
0x14b0   : > { %9893 = vmatmul.mubr.msk.bf16.vlgmr.msra.gmra.mrb[136].mxu0 %vm702_vm0, %v7234_v19  ;;  %v7101_v46 = vmul.f32 %v10664_v29, %v15130_v27  ;;  %v6912_v27 = vmul.f32 0.015625, %v15551_v41  ;;  %v6916_v29 = vmul.f32 0.015625, %v15560_v26  ;;  %v6981_v41 = vadd.f32 1e-05, %v6917_v55 }
0x14b1   : > { %v6972_v19 = vadd.f32 1e-05, %v6908_v5 }
0x14b3   : > { %10665 = vrsqrt.f32 %v6972_v19  ;;  %v6976_v19 = vadd.f32 1e-05, %v6912_v27 }
0x14b5   : > { %10667 = vrsqrt.f32 %v6976_v19 }
0x14c2   : > { %6873 = vadd.xlane.f32.xlu1 %v6872_v39  ;;  %v10666_v39 = vpop.eup %10665 }
0x14c3   : > { %v7100_v49 = vmul.f32 %v10666_v39, %v15139_v59  ;;  %v6914_v59 = vmul.f32 0.015625, %v15554_v53  ;;  %v6918_v39 = vmul.f32 0.015625, %v15564_v14  ;;  %v6884_v53 = vsel %vm702_vm0, %v15610_v2, 0.0  ;;  %v10668_v27 = vpop.eup %10667 }
0x14c4   : > { %6876 = vadd.xlane.f32.xlu0 %v6875_v22  ;;  %v6920_v14 = vmul.f32 0.015625, %v15576_v33  ;;  %v6893_v2 = vsel %vm702_vm0, %v15620_v11, 0.0  ;;  %v6927_v33 = vmul.f32 0.015625, %v15604_v56  ;;  %v6924_v11 = vmul.f32 0.015625, %v15596_v18 }
0x14c5   : > { %v7158_v50 = vpack.c.bf16 %v7101_v46, %v7100_v49  ;;  %v6978_v52 = vadd.f32 1e-05, %v6914_v59  ;;  %v6982_v26 = vadd.f32 1e-05, %v6918_v39  ;;  %v6923_v46 = vmul.f32 0.015625, %v15587_v48 }
0x14c6   : > { %6882 = vadd.xlane.f32.xlu1 %v6881_v36  ;;  %v6922_v49 = vmul.f32 0.015625, %v15580_v54  ;;  %v6984_v48 = vadd.f32 1e-05, %v6920_v14  ;;  %v6926_v59 = vmul.f32 0.015625, %v15600_v10  ;;  %v6991_v19 = vadd.f32 1e-05, %v6927_v33 }
0x14c7   : > { %10669 = vrsqrt.f32 %v6978_v52  ;;  %v6988_v52 = vadd.f32 1e-05, %v6924_v11  ;;  %v15717_v18 = vmul.f32 %v10668_v27, %v15167_v57  ;;  %v6928_v10 = vmul.f32 0.015625, %v15616_v12  ;;  %v17816_v14 = vld [vmem:[#allocation51_spill] sm:$0xff]  ;;  %v17818_v33 = vld [vmem:[#allocation125_spill] sm:$0xff] }
0x14c8   : > { %6879 = vadd.xlane.f32.xlu0 %v6878_v9  ;;  %v6915_v9 = vmul.f32 0.015625, %v15558_v34  ;;  %10671 = vrsqrt.f32 %v6977_v38  ;;  %v6980_v34 = vadd.f32 1e-05, %v6916_v29  ;;  %v6990_v56 = vadd.f32 1e-05, %v6926_v59 }
0x14c9   : > { %v6931_v38 = vmul.f32 0.015625, %v15628_v61  ;;  %v6932_v57 = vmul.f32 0.015625, %v15632_v25 }
0x14cb   : > { %v6995_v12 = vadd.f32 1e-05, %v6931_v38 }
0x14d1   : > { %v10670_v54 = vpop.eup %10669 }
0x14d2   : > { %v10672_v15 = vpop.eup %10671 }
0x14d7   : > { %7245 = vrot.lane.b32.xlu1 %v7159_v45, %s10902_s23  ;;  %v6979_v45 = vadd.f32 1e-05, %v6915_v9 }
0x14d9   : > { %10673 = vrsqrt.f32 %v6979_v45  ;;  %v7106_v45 = vmul.f32 %v10670_v54, %v15161_v44  ;;  %v6934_v44 = vmul.f32 0.015625, %v15637_v28  ;;  %v6936_v28 = vmul.f32 0.015625, %v15643_v1  ;;  %v17819_v54 = vld [vmem:[#allocation122_spill] sm:$0xff] }
0x14da   : > { %10675 = vrsqrt.f32 %v6981_v41  ;;  %v6939_v1 = vmul.f32 0.015625, %v15646_v58 }
0x14db   : > { %10677 = vrsqrt.f32 %v6983_v4  ;;  %v7105_v4 = vmul.f32 %v10672_v15, %v15158_v35 }
0x14dc   : > { %10679 = vrsqrt.f32 %v6980_v34 }
0x14dd   : > { %v15679_v21 = vpop.xlane.xlu1 %6849  ;;  %10681 = vrsqrt.f32 %v6982_v26 }
0x14de   : > { %7243 = vrot.lane.b32.xlu0 %v7158_v50, %s10902_s23  ;;  %v6987_v50 = vadd.f32 1e-05, %v6923_v46  ;;  %10683 = vrsqrt.f32 %v6985_v37  ;;  %v6996_v37 = vadd.f32 1e-05, %v6932_v57  ;;  %v17823_v57 = vld [vmem:[#allocation16_spill] sm:$0xff] }
0x14df   : > { %v15682_v22 = vpop.xlane.xlu0 %6852 }
0x14e0   : > { %10685 = vrsqrt.f32 %v6987_v50  ;;  %v17817_v50 = vld [vmem:[#allocation112_spill] sm:$0xff] }
0x14e1   : > { %v15684_v5 = vpop.xlane.xlu1 %6858  ;;  %10687 = vrsqrt.f32 %v6984_v48 }
0x14e3   : > { %v15686_v16 = vpop.xlane.xlu0 %6855  ;;  %v10674_v9 = vpop.eup %10673 }
0x14e4   : > { %v10676_v55 = vpop.eup %10675  ;;  %v7107_v39 = vmul.f32 %v10674_v9, %v15172_v62  ;;  %v6940_v9 = vmul.f32 0.015625, %v15654_v32  ;;  %v7003_v32 = vadd.f32 1e-05, %v6939_v1  ;;  %v17828_v1 = vld [vmem:[#allocation39_spill] sm:$0xff] }
0x14e5   : > { %v7238_v36 = vpop.permute.xlu1 %7237  ;;  %v10678_v23 = vpop.eup %10677 }
0x14e6   : > { %v10680_v29 = vpop.eup %10679  ;;  %v7111_v34 = vmul.f32 %v10678_v23, %v15200_v51  ;;  %v7161_v26 = vpack.c.bf16 %v7107_v39, %v7106_v45  ;;  %v7160_v51 = vpack.c.bf16 %v7105_v4, %v15717_v18  ;;  %v17821_v45 = vld [vmem:[#allocation14_spill] sm:$0xff] }
0x14e7   : > { %v7236_v47 = vpop.permute.xlu0 %7235  ;;  %v10682_v41 = vpop.eup %10681  ;;  %v7108_v62 = vmul.f32 %v10680_v29, %v15195_v43 }
0x14e8   : > { %9896 = vmatprep.mubr.msk.bf16.mxu0 %vm702_vm0, %v7236_v47  ;;  %v6925_v47 = vmul.f32 0.015625, %v15602_v20  ;;  %v6929_v20 = vmul.f32 0.015625, %v15626_v17  ;;  %v7109_v17 = vmul.f32 %v10676_v55, %v15186_v63  ;;  %v10684_v3 = vpop.eup %10683  ;;  %v7110_v63 = vmul.f32 %v10682_v41, %v15189_v40 }
0x14e9   : > { %9897 = vmatmul.mubr.msk.bf16.gmra.mrb[140].mxu0 %vm702_vm0, %v7238_v36  ;;  %v6986_v36 = vadd.f32 1e-05, %v6922_v49  ;;  %v6938_v40 = vmul.f32 0.015625, %v15649_v13  ;;  %v7113_v48 = vmul.f32 %v10684_v3, %v17817_v50  ;;  %v17820_v13 = vld [vmem:[#allocation115_spill] sm:$0xff]  ;;  %v7004_v41 = vadd.f32 1e-05, %v6940_v9 }
0x14ea   : > { %v6989_v60 = vadd.f32 1e-05, %v6925_v47  ;;  %v6993_v61 = vadd.f32 1e-05, %v6929_v20  ;;  %v10686_v35 = vpop.eup %10685  ;;  %v7162_v25 = vpack.c.bf16 %v7109_v17, %v7108_v62  ;;  %v7163_v43 = vpack.c.bf16 %v7111_v34, %v7110_v63  ;;  %v17822_v17 = vld [vmem:[#allocation30_spill] sm:$0xff]  ;;  %v17824_v62 = vld [vmem:[#allocation21_spill] sm:$0xff] }
0x14eb   : > { %10689 = vrsqrt.f32 %v6986_v36  ;;  %v10688_v49 = vpop.eup %10687  ;;  %v6937_v36 = vmul.f32 0.015625, %v15640_v30  ;;  %v7115_v27 = vmul.f32 %v10686_v35, %v17818_v33  ;;  %v7002_v30 = vadd.f32 1e-05, %v6938_v40 }
0x14ec   : > { %10691 = vrsqrt.f32 %v6989_v60  ;;  %v7112_v59 = vmul.f32 %v10688_v49, %v17819_v54  ;;  %v7000_v60 = vadd.f32 1e-05, %v6936_v28  ;;  %v17825_v49 = vld [vmem:[#allocation28_spill] sm:$0xff] }
0x14ed   : > { %10693 = vrsqrt.f32 %v6991_v19  ;;  %v7001_v58 = vadd.f32 1e-05, %v6937_v36 }
0x14ee   : > { %10695 = vrsqrt.f32 %v6988_v52  ;;  %v6942_v52 = vmul.f32 0.015625, %v15658_v31  ;;  %v7164_v20 = vpack.c.bf16 %v7113_v48, %v7112_v59  ;;  %v6945_v31 = vmul.f32 0.015625, %v15682_v22 }
0x14ef   : > { %10697 = vrsqrt.f32 %v6990_v56  ;;  %v6941_v56 = vmul.f32 0.015625, %v15651_v6 }
0x14f0   : > { %10699 = vrsqrt.f32 %v6993_v61  ;;  %v7006_v4 = vadd.f32 1e-05, %v6942_v52  ;;  %v6946_v61 = vmul.f32 0.015625, %v15686_v16  ;;  %v7009_v16 = vadd.f32 1e-05, %v6945_v31 }
0x14f1   : > { %10701 = vrsqrt.f32 %v6995_v12  ;;  %v7005_v12 = vadd.f32 1e-05, %v6941_v56 }
0x14fb   : > { %6885 = vadd.xlane.f32.xlu1 %v6884_v53  ;;  %v6930_v53 = vmul.f32 0.015625, %v15623_v0  ;;  %v6933_v0 = vmul.f32 0.015625, %v15630_v7  ;;  %v6998_v7 = vadd.f32 1e-05, %v6934_v44  ;;  %v6944_v44 = vmul.f32 0.015625, %v15679_v21 }
0x14fd   : > { %6888 = vadd.xlane.f32.xlu0 %v6887_v24  ;;  %v6992_v24 = vadd.f32 1e-05, %v6928_v10  ;;  %v6994_v46 = vadd.f32 1e-05, %v6930_v53  ;;  %v6997_v47 = vadd.f32 1e-05, %v6933_v0 }
0x14fe   : > { %v6943_v10 = vmul.f32 0.015625, %v15656_v8  ;;  %v6947_v0 = vmul.f32 0.015625, %v15684_v5  ;;  %v7008_v5 = vadd.f32 1e-05, %v6944_v44 }
0x14ff   : > { %6894 = vadd.xlane.f32.xlu1 %v6893_v2  ;;  %v6935_v2 = vmul.f32 0.015625, %v17816_v14  ;;  %10703 = vrsqrt.f32 %v6992_v24 }
0x1500   : > { %10705 = vrsqrt.f32 %v6994_v46  ;;  %v7007_v22 = vadd.f32 1e-05, %v6943_v10  ;;  %v7011_v50 = vadd.f32 1e-05, %v6947_v0 }
0x1501   : > { %6891 = vadd.xlane.f32.xlu0 %v6890_v42  ;;  %v10690_v42 = vpop.eup %10689  ;;  %v6999_v11 = vadd.f32 1e-05, %v6935_v2  ;;  %10707 = vrsqrt.f32 %v6996_v37 }
0x1502   : > { %v10692_v15 = vpop.eup %10691  ;;  %v7114_v19 = vmul.f32 %v10690_v42, %v17820_v13  ;;  %10709 = vrsqrt.f32 %v6998_v7  ;;  %v17826_v42 = vld [vmem:[#allocation76_spill] sm:$0xff]  ;;  %v17829_v13 = vld [vmem:[#allocation143_spill] sm:$0xff] }
0x1503   : > { %v10694_v55 = vpop.eup %10693  ;;  %10711 = vrsqrt.f32 %v6997_v47  ;;  %v7117_v39 = vmul.f32 %v10692_v15, %v17821_v45  ;;  %v17827_v47 = vld [vmem:[#allocation37_spill] sm:$0xff] }
0x1504   : > { %v10696_v23 = vpop.eup %10695  ;;  %v7165_v18 = vpack.c.bf16 %v7115_v27, %v7114_v19  ;;  %10713 = vrsqrt.f32 %v6999_v11  ;;  %v7119_v6 = vmul.f32 %v10694_v55, %v17822_v17 }
0x1505   : > { %v10698_v29 = vpop.eup %10697  ;;  %10715 = vrsqrt.f32 %v7000_v60  ;;  %v7116_v34 = vmul.f32 %v10696_v23, %v17823_v57  ;;  %v17835_v57 = vld [vmem:[#allocation3_spill] sm:$0xff] }
0x1506   : > { %10717 = vrsqrt.f32 %v7002_v30  ;;  %v10700_v8 = vpop.eup %10699  ;;  %v7118_v3 = vmul.f32 %v10698_v29, %v17824_v62 }
0x1507   : > { %10719 = vrsqrt.f32 %v7001_v58  ;;  %v10702_v24 = vpop.eup %10701  ;;  %v7166_v63 = vpack.c.bf16 %v7117_v39, %v7116_v34  ;;  %v7121_v37 = vmul.f32 %v10700_v8, %v17825_v49 }
0x1508   : > { %10721 = vrsqrt.f32 %v7003_v32  ;;  %v7167_v2 = vpack.c.bf16 %v7119_v6, %v7118_v3  ;;  %v7123_v7 = vmul.f32 %v10702_v24, %v17826_v42  ;;  %v17832_v32 = vld [vmem:[#allocation126_spill] sm:$0xff]  ;;  %v17834_v6 = vld [vmem:[#allocation145_spill] sm:$0xff] }
0x1509   : > { %v10704_v35 = vpop.eup %10703  ;;  %10723 = vrsqrt.f32 %v7004_v41  ;;  %v17833_v41 = vld [vmem:[#allocation77_spill] sm:$0xff] }
0x150a   : > { %v10706_v21 = vpop.eup %10705  ;;  %10725 = vrsqrt.f32 %v7006_v4  ;;  %v7120_v36 = vmul.f32 %v10704_v35, %v17827_v47  ;;  %v17837_v24 = vld [vmem:[#allocation141_spill] sm:$0xff] }
0x150b   : > { %v10708_v28 = vpop.eup %10707  ;;  %10727 = vrsqrt.f32 %v7005_v12  ;;  %v7122_v54 = vmul.f32 %v10706_v21, %v17828_v1  ;;  %v17836_v12 = vld [vmem:[#allocation146_spill] sm:$0xff]  ;;  %v17840_v21 = vld [vmem:[#allocation81_spill] sm:$0xff]  ;;  %v17845_v1 = vld [vmem:[#allocation7_spill] sm:$0xff] }
0x150c   : > { %v10710_v40 = vpop.eup %10709  ;;  %10729 = vrsqrt.f32 %v7007_v22  ;;  %v7168_v9 = vpack.c.bf16 %v7121_v37, %v7120_v36  ;;  %v7124_v19 = vmul.f32 %v10708_v28, %v17829_v13  ;;  %v17841_v37 = vld [vmem:[#allocation104_spill] sm:$0xff]  ;;  %v17842_v42 = vld [vmem:[#allocation45_spill] sm:$0xff] }
0x150d   : > { %v10712_v33 = vpop.eup %10711  ;;  %10731 = vrsqrt.f32 %v7009_v16  ;;  %v7169_v52 = vpack.c.bf16 %v7123_v7, %v7122_v54  ;;  %v17844_v36 = vld [vmem:[#allocation44_spill] sm:$0xff] }
0x150e   : > { %v10714_v59 = vpop.eup %10713 }
0x150f   : > { %v10716_v55 = vpop.eup %10715  ;;  %v7127_v10 = vmul.f32 %v10714_v59, %v17832_v32  ;;  %v10120_v32 = vld [vmem:[%s16813_s8 + $0x8] sm:$0xff]  }
0x1510   : > { %7249 = vrot.lane.b32.xlu1 %v7161_v26, %s10902_s23  ;;  %v10718_v58 = vpop.eup %10717  ;;  %v7128_v31 = vmul.f32 %v10716_v55, %v17833_v41 }
0x1511   : > { %v10720_v29 = vpop.eup %10719  ;;  %v7130_v4 = vmul.f32 %v10718_v58, %v17834_v6 }
0x1512   : > { %v10722_v45 = vpop.eup %10721  ;;  %v7129_v34 = vmul.f32 %v10720_v29, %v17835_v57 }
0x1513   : > { %v7131_v44 = vmul.f32 %v10722_v45, %v17836_v12 }
0x1514   : > { %7251 = vrot.lane.b32.xlu1 %v7162_v25, %s10902_s23  ;;  %v7010_v25 = vadd.f32 1e-05, %v6946_v61  ;;  %v7172_v3 = vpack.c.bf16 %v7129_v34, %v7128_v31 }
0x1516   : > { %v6862_v38 = vpop.xlane.xlu1 %6861  ;;  %10733 = vrsqrt.f32 %v7010_v25 }
0x1517   : > { %7247 = vrot.lane.b32.xlu0 %v7160_v51, %s10902_s23  ;;  %10735 = vrsqrt.f32 %v7008_v5 }
0x1518   : > { %7253 = vrot.lane.b32.xlu1 %v7163_v43, %s10902_s23  ;;  %v6865_v53 = vpop.xlane.xlu0 %6864  ;;  %v6948_v43 = vmul.f32 0.015625, %v6862_v38  ;;  %10737 = vrsqrt.f32 %v7011_v50  ;;  %v17831_v38 = vld [vmem:[#allocation57_spill] sm:$0xff]  ;;  %v17843_v50 = vld [vmem:[#allocation116_spill] sm:$0xff] }
0x1519   : > { %v6949_v46 = vmul.f32 0.015625, %v6865_v53  ;;  %v10724_v53 = vpop.eup %10723 }
0x151a   : > { %v6871_v26 = vpop.xlane.xlu1 %6870  ;;  %v7012_v30 = vadd.f32 1e-05, %v6948_v43  ;;  %v10726_v61 = vpop.eup %10725  ;;  %v7132_v22 = vmul.f32 %v10724_v53, %v17837_v24  ;;  %v10121_v53 = vld [vmem:[%s16813_s8 + $0x10] sm:$0xff]  }
0x151b   : > { %7255 = vrot.lane.b32.xlu0 %v7164_v20, %s10902_s23  ;;  %v6951_v48 = vmul.f32 0.015625, %v6871_v26  ;;  %v7013_v27 = vadd.f32 1e-05, %v6949_v46  ;;  %v17830_v20 = vld [vmem:[#allocation48_spill] sm:$0xff]  ;;  %v10728_v8 = vpop.eup %10727  ;;  %v7173_v26 = vpack.c.bf16 %v7131_v44, %v7130_v4 }
0x151c   : > { %7257 = vrot.lane.b32.xlu1 %v7165_v18, %s10902_s23  ;;  %v6868_v14 = vpop.xlane.xlu0 %6867  ;;  %v7126_v23 = vmul.f32 %v10710_v40, %v17830_v20  ;;  %v7125_v18 = vmul.f32 %v10712_v33, %v17831_v38  ;;  %v10730_v62 = vpop.eup %10729  ;;  %v17839_v46 = vld [vmem:[#allocation132_spill] sm:$0xff] }
0x151d   : > { %v6950_v51 = vmul.f32 0.015625, %v6868_v14  ;;  %v7015_v56 = vadd.f32 1e-05, %v6951_v48  ;;  %10739 = vrsqrt.f32 %v7013_v27  ;;  %v10732_v0 = vpop.eup %10731  ;;  %v7133_v14 = vmul.f32 %v10728_v8, %v17839_v46  ;;  %v17849_v8 = vld [vmem:[#allocation31_spill] sm:$0xff]  ;;  %v17850_v44 = vld [vmem:[#allocation4_spill] sm:$0xff] }
0x151e   : > { %v7242_v60 = vpop.permute.xlu1 %7241  ;;  %v7170_v39 = vpack.c.bf16 %v7125_v18, %v7124_v19  ;;  %v7171_v17 = vpack.c.bf16 %v7127_v10, %v7126_v23  ;;  %v7135_v25 = vmul.f32 %v10730_v62, %v17840_v21  ;;  %v7137_v28 = vmul.f32 %v10732_v0, %v17841_v37  ;;  %v17848_v19 = vld [vmem:[#allocation2_spill] sm:$0xff]  ;;  %v17851_v0 = vld [vmem:[#allocation36_spill] sm:$0xff] }
0x151f   : > { %7259 = vrot.lane.b32.xlu0 %v7166_v63, %s10902_s23  ;;  %v7014_v15 = vadd.f32 1e-05, %v6950_v51  ;;  %v17838_v63 = vld [vmem:[#allocation67_spill] sm:$0xff]  ;;  %v7174_v49 = vpack.c.bf16 %v7133_v14, %v7132_v22  ;;  %v10119_v23 = vld [vmem:[%s16813_s8] sm:$0xff]  }
0x1520   : > { %7261 = vrot.lane.b32.xlu1 %v7167_v2, %s10902_s23  ;;  %v7240_v11 = vpop.permute.xlu0 %7239  ;;  %v7134_v35 = vmul.f32 %v10726_v61, %v17838_v63  ;;  %v10734_v16 = vpop.eup %10733  ;;  %10028 = vmatprep.subr.bf16.mxu1 %v10119_v23  ;;  %v10122_v61 = vld [vmem:[%s16813_s8 + $0x18] sm:$0xff]   ;;  %v17852_v63 = vld [vmem:[#allocation11_spill] sm:$0xff]  ;;  %v15822_v46 = vld [vmem:[%s16812_s7] ss:$0 sm:$0xff] }
0x1521   : > { %9900 = vmatprep.mubr.msk.bf16.mxu0 %vm702_vm0, %v7240_v11  ;;  %10741 = vrsqrt.f32 %v7014_v15  ;;  %v10736_v2 = vpop.eup %10735  ;;  %v7138_v7 = vmul.f32 %v10734_v16, %v17842_v42  ;;  %v17846_v15 = vld [vmem:[#allocation8_spill] sm:$0xff]  ;;  %9956 = vmatprep.subr.bf16.mxu0 %v10119_v23 }
0x1522   : > { %9901 = vmatmul.mubr.msk.bf16.gmra.mrb[144].mxu0 %vm702_vm0, %v7242_v60  ;;  %10743 = vrsqrt.f32 %v7012_v30  ;;  %v10738_v51 = vpop.eup %10737  ;;  %v7175_v43 = vpack.c.bf16 %v7135_v25, %v7134_v35  ;;  %v7136_v48 = vmul.f32 %v10736_v2, %v17843_v50  ;;  %10032 = vmatpush3.bf16.msra.mxu1 %v10119_v23 }
0x1523   : > { %7263 = vrot.lane.b32.xlu0 %v7168_v9, %s10902_s23  ;;  %10745 = vrsqrt.f32 %v7015_v56  ;;  %v7139_v33 = vmul.f32 %v10738_v51, %v17844_v36  ;;  %v17847_v9 = vld [vmem:[#allocation46_spill] sm:$0xff]  ;;  %9957 = vmatpush3.bf16.msra.mxu0 %v10119_v23 }
0x1524   : > { %7265 = vrot.lane.b32.xlu1 %v7169_v52, %s10902_s23  ;;  %v7176_v11 = vpack.c.bf16 %v7137_v28, %v7136_v48  ;;  %10029 = vmatprep.subr.bf16.mxu1 %v10120_v32 }
0x1525   : > { %v7177_v59 = vpack.c.bf16 %v7139_v33, %v7138_v7  ;;  %9958 = vmatprep.subr.bf16.mxu0 %v10120_v32 }
0x1526   : > { %10033 = vmatpush3.bf16.msra.mxu1 %v10120_v32 }
0x1527   : > { %7267 = vrot.lane.b32.xlu0 %v7170_v39, %s10902_s23  ;;  %v10740_v5 = vpop.eup %10739  ;;  %9959 = vmatpush3.bf16.msra.mxu0 %v10120_v32 }
0x1528   : > { %7269 = vrot.lane.b32.xlu1 %v7171_v17, %s10902_s23  ;;  %v7141_v54 = vmul.f32 %v10740_v5, %v17845_v1  ;;  %10030 = vmatprep.subr.bf16.mxu1 %v10121_v53 }
0x1529   : > { %9960 = vmatprep.subr.bf16.mxu0 %v10121_v53 }
0x152a   : > { %10034 = vmatpush3.bf16.msra.mxu1 %v10121_v53 }
0x152b   : > { %7271 = vrot.lane.b32.xlu0 %v7172_v3, %s10902_s23  ;;  %v10742_v40 = vpop.eup %10741  ;;  %10031 = vmatprep.subr.bf16.mxu1 %v10122_v61 }
0x152c   : > { %7273 = vrot.lane.b32.xlu1 %v7173_v26, %s10902_s23  ;;  %v10744_v47 = vpop.eup %10743  ;;  %v7142_v60 = vmul.f32 %v10742_v40, %v17846_v15  ;;  %9961 = vmatpush3.bf16.msra.mxu0 %v10121_v53 }
0x152d   : > { %v10746_v27 = vpop.eup %10745  ;;  %v7140_v13 = vmul.f32 %v10744_v47, %v17847_v9  ;;  %9962 = vmatprep.subr.bf16.mxu0 %v10122_v61 }
0x152e   : > { %v7143_v55 = vmul.f32 %v10746_v27, %v17848_v19  ;;  %10035 = vmatpush3.bf16.msra.mxu1 %v10122_v61 }
0x152f   : > { %7275 = vrot.lane.b32.xlu0 %v7174_v49, %s10902_s23  ;;  %v7178_v30 = vpack.c.bf16 %v7141_v54, %v7140_v13 }
0x1530   : > { %7277 = vrot.lane.b32.xlu1 %v7175_v43, %s10902_s23  ;;  %v7179_v52 = vpack.c.bf16 %v7143_v55, %v7142_v60  ;;  %9963 = vmatpush3.bf16.msra.mxu0 %v10122_v61  ;;  %v17854_v61 = vld [vmem:[#allocation12_spill] sm:$0xff] }
0x1533   : > { %7279 = vrot.lane.b32.xlu0 %v7176_v11, %s10902_s23 }
0x1534   : > { %7281 = vrot.lane.b32.xlu1 %v7177_v59, %s10902_s23 }
0x1537   : > { %7283 = vrot.lane.b32.xlu0 %v7178_v30, %s10902_s23 }
0x1538   : > { %7285 = vrot.lane.b32.xlu1 %v7179_v52, %s10902_s23 }
0x154f   : > { %v6874_v20 = vpop.xlane.xlu1 %6873 }
0x1550   : > { %v6952_v58 = vmul.f32 0.015625, %v6874_v20 }
0x1551   : > { %v6877_v56 = vpop.xlane.xlu0 %6876 }
0x1552   : > { %v7016_v38 = vadd.f32 1e-05, %v6952_v58  ;;  %v6953_v18 = vmul.f32 0.015625, %v6877_v56 }
0x1553   : > { %v6883_v29 = vpop.xlane.xlu1 %6882 }
0x1554   : > { %10747 = vrsqrt.f32 %v7016_v38  ;;  %v7017_v10 = vadd.f32 1e-05, %v6953_v18  ;;  %v6955_v45 = vmul.f32 0.015625, %v6883_v29 }
0x1555   : > { %v6880_v39 = vpop.xlane.xlu0 %6879 }
0x1556   : > { %10749 = vrsqrt.f32 %v7017_v10  ;;  %v7019_v41 = vadd.f32 1e-05, %v6955_v45  ;;  %v6954_v31 = vmul.f32 0.015625, %v6880_v39 }
0x1557   : > { %v7246_v4 = vpop.permute.xlu1 %7245 }
0x1558   : > { %10751 = vrsqrt.f32 %v7019_v41  ;;  %v7018_v17 = vadd.f32 1e-05, %v6954_v31 }
0x1559   : > { %v7244_v6 = vpop.permute.xlu0 %7243 }
0x155a   : > { %10753 = vrsqrt.f32 %v7018_v17  ;;  %9904 = vmatprep.mubr.msk.bf16.mxu0 %vm702_vm0, %v7244_v6  ;;  %v17853_v6 = vld [vmem:[#allocation82_spill] sm:$0xff] }
0x155b   : > { %9905 = vmatmul.mubr.msk.bf16.gmra.mrb[148].mxu0 %vm702_vm0, %v7246_v4 }
0x155e   : > { %v10748_v57 = vpop.eup %10747 }
0x155f   : > { %v7144_v12 = vmul.f32 %v10748_v57, %v17849_v8 }
0x1560   : > { %v10750_v34 = vpop.eup %10749 }
0x1561   : > { %v7145_v62 = vmul.f32 %v10750_v34, %v17850_v44 }
0x1562   : > { %v10752_v3 = vpop.eup %10751 }
0x1563   : > { %v7180_v24 = vpack.c.bf16 %v7145_v62, %v7144_v12  ;;  %v7147_v35 = vmul.f32 %v10752_v3, %v17852_v63 }
0x1564   : > { %v10754_v22 = vpop.eup %10753 }
0x1565   : > { %7287 = vrot.lane.b32.xlu0 %v7180_v24, %s10902_s23  ;;  %v7146_v26 = vmul.f32 %v10754_v22, %v17851_v0 }
0x1567   : > { %v7181_v16 = vpack.c.bf16 %v7147_v35, %v7146_v26 }
0x1569   : > { %7289 = vrot.lane.b32.xlu1 %v7181_v16, %s10902_s23 }
0x1583   : > { %v9894_v14 = vpop.f32.mrb[136].mxu0 }
0x1584   : > { %v15825_v2 = vadd.f32 %v9894_v14, %v15822_v46  ;;  %v7449_v21 = vpop.f32.mrb[137].mxu0 }
0x1585   : > { %v15828_v25 = vadd.f32 %v15822_v46, %v7449_v21  ;;  %v9895_v51 = vpop.f32.mrb[138].mxu0 }
0x1586   : > { %v7770_v49 = vmul.f32 0.044715, %v15825_v2  ;;  %v7461_v37 = vadd.f32 %v9895_v51, %v15822_v46  ;;  %v7452_v28 = vpop.f32.mrb[139].mxu0  ;;  %v7706_v0 = vmul.f32 0.5, %v15825_v2 }
0x1587   : > { %v7768_v5 = vmul.f32 0.044715, %v15828_v25  ;;  %v15834_v43 = vadd.f32 %v15822_v46, %v7452_v28  ;;  %v7704_v16 = vmul.f32 0.5, %v15828_v25 }
0x1588   : > { %v7834_v42 = vmul.f32 %v7770_v49, %v15825_v2  ;;  %v7771_v7 = vmul.f32 0.044715, %v7461_v37  ;;  %v6886_v40 = vpop.xlane.xlu1 %6885  ;;  %v7707_v26 = vmul.f32 0.5, %v7461_v37 }
0x1589   : > { %v7832_v50 = vmul.f32 %v7768_v5, %v15828_v25  ;;  %v7769_v48 = vmul.f32 0.044715, %v15834_v43  ;;  %v6956_v47 = vmul.f32 0.015625, %v6886_v40  ;;  %v7705_v14 = vmul.f32 0.5, %v15834_v43  ;;  %v17855_v5 = vld [vmem:[#allocation84_spill] sm:$0xff] }
0x158a   : > { %v7898_v36 = vmul.f32 %v7834_v42, %v15825_v2  ;;  %v7835_v33 = vmul.f32 %v7771_v7, %v7461_v37  ;;  %v6889_v27 = vpop.xlane.xlu0 %6888 }
0x158b   : > { %v7896_v11 = vmul.f32 %v7832_v50, %v15828_v25  ;;  %v7833_v1 = vmul.f32 %v7769_v48, %v15834_v43  ;;  %v7020_v54 = vadd.f32 1e-05, %v6956_v47  ;;  %v6957_v59 = vmul.f32 0.015625, %v6889_v27 }
0x158c   : > { %v7962_v15 = vadd.f32 %v7898_v36, %v15825_v2  ;;  %v7899_v60 = vmul.f32 %v7835_v33, %v7461_v37  ;;  %v6895_v9 = vpop.xlane.xlu1 %6894  ;;  %v17856_v2 = vld [vmem:[#allocation60_spill] sm:$0xff] }
0x158d   : > { %v7960_v13 = vadd.f32 %v7896_v11, %v15828_v25  ;;  %v7897_v19 = vmul.f32 %v7833_v1, %v15834_v43  ;;  %10755 = vrsqrt.f32 %v7020_v54  ;;  %v7021_v55 = vadd.f32 1e-05, %v6957_v59 }
0x158e   : > { %v8026_v30 = vmul.f32 0.7978846, %v7962_v15  ;;  %v7963_v52 = vadd.f32 %v7899_v60, %v7461_v37  ;;  %v6959_v20 = vmul.f32 0.015625, %v6895_v9  ;;  %v6892_v23 = vpop.xlane.xlu0 %6891 }
0x158f   : > { %v8024_v58 = vmul.f32 0.7978846, %v7960_v13  ;;  %v7961_v56 = vadd.f32 %v7897_v19, %v15834_v43  ;;  %10757 = vrsqrt.f32 %v7021_v55  ;;  %v6958_v38 = vmul.f32 0.015625, %v6892_v23 }
0x1590   : > { %10759 = vtanh.f32 %v8026_v30  ;;  %v8027_v18 = vmul.f32 0.7978846, %v7963_v52  ;;  %v7023_v29 = vadd.f32 1e-05, %v6959_v20  ;;  %v7250_v32 = vpop.permute.xlu1 %7249 }
0x1591   : > { %10761 = vtanh.f32 %v8024_v58  ;;  %v8025_v10 = vmul.f32 0.7978846, %v7961_v56  ;;  %v7022_v45 = vadd.f32 1e-05, %v6958_v38 }
0x1592   : > { %10763 = vtanh.f32 %v8027_v18  ;;  %v7248_v39 = vpop.permute.xlu0 %7247 }
0x1593   : > { %10765 = vtanh.f32 %v8025_v10  ;;  %9908 = vmatprep.mubr.msk.bf16.mxu0 %vm702_vm0, %v7248_v39 }
0x1594   : > { %10767 = vrsqrt.f32 %v7023_v29  ;;  %v7252_v41 = vpop.permute.xlu1 %7251  ;;  %9909 = vmatmul.mubr.msk.bf16.gmra.mrb[152].mxu0 %vm702_vm0, %v7250_v32 }
0x1595   : > { %10769 = vrsqrt.f32 %v7022_v45  ;;  %9912 = vmatprep.mubr.msk.bf16.mxu0 %vm702_vm0, %v7252_v41 }
0x1596   : > { %v7256_v62 = vpop.permute.xlu0 %7255 }
0x1597   : > { %v10756_v31 = vpop.eup %10755 }
0x1598   : > { %v7148_v4 = vmul.f32 %v10756_v31, %v17853_v6  ;;  %v7254_v12 = vpop.permute.xlu1 %7253 }
0x1599   : > { %v10758_v53 = vpop.eup %10757 }
0x159a   : > { %v10760_v17 = vpop.eup %10759  ;;  %v7149_v57 = vmul.f32 %v10758_v53, %v17854_v61  ;;  %v7260_v47 = vpop.permute.xlu0 %7259 }
0x159b   : > { %v10762_v34 = vpop.eup %10761  ;;  %v8154_v8 = vadd.f32 1.0, %v10760_v17 }
0x159c   : > { %v10764_v44 = vpop.eup %10763  ;;  %9913 = vmatmul.mubr.msk.bf16.gmra.mrb[156].mxu0 %vm702_vm0, %v7254_v12  ;;  %v7182_v3 = vpack.c.bf16 %v7149_v57, %v7148_v4  ;;  %v8152_v24 = vadd.f32 1.0, %v10762_v34  ;;  %v7258_v48 = vpop.permute.xlu1 %7257 }
0x159d   : > { %v10766_v22 = vpop.eup %10765  ;;  %v8155_v63 = vadd.f32 1.0, %v10764_v44  ;;  %9916 = vmatprep.mubr.msk.bf16.mxu0 %vm702_vm0, %v7256_v62  ;;  %v15857_v49 = vmul.f32 %v8154_v8, %v7706_v0 }
0x159e   : > { %v10768_v35 = vpop.eup %10767  ;;  %7291 = vrot.lane.b32.xlu0 %v7182_v3, %s10902_s23  ;;  %v8153_v21 = vadd.f32 1.0, %v10766_v22  ;;  %v15863_v7 = vmul.f32 %v8152_v24, %v7704_v16  ;;  %v7264_v33 = vpop.permute.xlu0 %7263 }
0x159f   : > { %v10770_v51 = vpop.eup %10769  ;;  %v15859_v28 = vmul.f32 %v8155_v63, %v7707_v26  ;;  %v7151_v37 = vmul.f32 %v10768_v35, %v17856_v2 }
0x15a0   : > { %v7150_v42 = vmul.f32 %v10770_v51, %v17855_v5  ;;  %v15865_v40 = vmul.f32 %v8153_v21, %v7705_v14  ;;  %v7262_v36 = vpop.permute.xlu1 %7261 }
0x15a1   : > { %v8281_v50 = vpack.c.bf16 %v15859_v28, %v15857_v49 }
0x15a2   : > { %v7183_v25 = vpack.c.bf16 %v7151_v37, %v7150_v42  ;;  %v8280_v43 = vpack.c.bf16 %v15865_v40, %v15863_v7  ;;  %v7268_v11 = vpop.permute.xlu0 %7267 }
0x15a4   : > { %7293 = vrot.lane.b32.xlu1 %v7183_v25, %s10902_s23  ;;  %9917 = vmatmul.mubr.msk.bf16.gmra.mrb[160].mxu0 %vm702_vm0, %v7258_v48  ;;  %v7266_v27 = vpop.permute.xlu1 %7265 }
0x15a5   : > { %9920 = vmatprep.mubr.msk.bf16.mxu0 %vm702_vm0, %v7260_v47 }
0x15a6   : > { %v7272_v54 = vpop.permute.xlu0 %7271 }
0x15a8   : > { %v7270_v1 = vpop.permute.xlu1 %7269 }
0x15aa   : > { %v7276_v10 = vpop.permute.xlu0 %7275 }
0x15ac   : > { %9921 = vmatmul.mubr.msk.bf16.gmra.mrb[164].mxu0 %vm702_vm0, %v7262_v36  ;;  %v7274_v18 = vpop.permute.xlu1 %7273 }
0x15ad   : > { %9924 = vmatprep.mubr.msk.bf16.mxu0 %vm702_vm0, %v7264_v33 }
0x15ae   : > { %v7280_v44 = vpop.permute.xlu0 %7279 }
0x15b0   : > { %v7278_v12 = vpop.permute.xlu1 %7277 }
0x15b2   : > { %v7284_v22 = vpop.permute.xlu0 %7283 }
0x15b4   : > { %9925 = vmatmul.mubr.msk.bf16.gmra.mrb[168].mxu0 %vm702_vm0, %v7266_v27  ;;  %v7282_v3 = vpop.permute.xlu1 %7281 }
0x15b5   : > { %9928 = vmatprep.mubr.msk.bf16.mxu0 %vm702_vm0, %v7268_v11 }
0x15b8   : > { %v7286_v36 = vpop.permute.xlu1 %7285 }
0x15bc   : > { %v9898_v59 = vpop.f32.mrb[140].mxu0  ;;  %9929 = vmatmul.mubr.msk.bf16.gmra.mrb[172].mxu0 %vm702_vm0, %v7270_v1 }
0x15bd   : > { %v7474_v15 = vadd.f32 %v9898_v59, %v15822_v46  ;;  %v7465_v60 = vpop.f32.mrb[141].mxu0  ;;  %9932 = vmatprep.mubr.msk.bf16.mxu0 %vm702_vm0, %v7272_v54 }
0x15be   : > { %v7466_v9 = vadd.f32 %v15822_v46, %v7465_v60  ;;  %v9899_v13 = vpop.f32.mrb[142].mxu0 }
0x15bf   : > { %v7774_v19 = vmul.f32 0.044715, %v7474_v15  ;;  %v7477_v55 = vadd.f32 %v9899_v13, %v15822_v46  ;;  %v7468_v30 = vpop.f32.mrb[143].mxu0  ;;  %v7710_v16 = vmul.f32 0.5, %v7474_v15 }
0x15c0   : > { %v7772_v52 = vmul.f32 0.044715, %v7466_v9  ;;  %v7469_v20 = vadd.f32 %v15822_v46, %v7468_v30  ;;  %v7708_v51 = vmul.f32 0.5, %v7466_v9 }
0x15c1   : > { %v7838_v23 = vmul.f32 %v7774_v19, %v7474_v15  ;;  %v7775_v58 = vmul.f32 0.044715, %v7477_v55  ;;  %v7711_v14 = vmul.f32 0.5, %v7477_v55 }
0x15c2   : > { %v7836_v56 = vmul.f32 %v7772_v52, %v7466_v9  ;;  %v7773_v38 = vmul.f32 0.044715, %v7469_v20  ;;  %v7709_v5 = vmul.f32 0.5, %v7469_v20 }
0x15c3   : > { %v7902_v29 = vmul.f32 %v7838_v23, %v7474_v15  ;;  %v7839_v32 = vmul.f32 %v7775_v58, %v7477_v55 }
0x15c4   : > { %v7900_v45 = vmul.f32 %v7836_v56, %v7466_v9  ;;  %v7837_v39 = vmul.f32 %v7773_v38, %v7469_v20  ;;  %9933 = vmatmul.mubr.msk.bf16.gmra.mrb[176].mxu0 %vm702_vm0, %v7274_v18 }
0x15c5   : > { %v7966_v41 = vadd.f32 %v7902_v29, %v7474_v15  ;;  %v7903_v31 = vmul.f32 %v7839_v32, %v7477_v55  ;;  %9936 = vmatprep.mubr.msk.bf16.mxu0 %vm702_vm0, %v7276_v10 }
0x15c6   : > { %v7964_v53 = vadd.f32 %v7900_v45, %v7466_v9  ;;  %v7901_v17 = vmul.f32 %v7837_v39, %v7469_v20 }
0x15c7   : > { %v8030_v6 = vmul.f32 0.7978846, %v7966_v41  ;;  %v7967_v4 = vadd.f32 %v7903_v31, %v7477_v55 }
0x15c8   : > { %v8028_v61 = vmul.f32 0.7978846, %v7964_v53  ;;  %v7965_v57 = vadd.f32 %v7901_v17, %v7469_v20 }
0x15c9   : > { %10771 = vtanh.f32 %v8030_v6  ;;  %v8031_v34 = vmul.f32 0.7978846, %v7967_v4 }
0x15ca   : > { %10773 = vtanh.f32 %v8028_v61  ;;  %v8029_v8 = vmul.f32 0.7978846, %v7965_v57 }
0x15cb   : > { %10775 = vtanh.f32 %v8031_v34 }
0x15cc   : > { %10777 = vtanh.f32 %v8029_v8  ;;  %9937 = vmatmul.mubr.msk.bf16.gmra.mrb[180].mxu0 %vm702_vm0, %v7278_v12 }
0x15cd   : > { %9940 = vmatprep.mubr.msk.bf16.mxu0 %vm702_vm0, %v7280_v44 }
0x15d3   : > { %v10772_v62 = vpop.eup %10771 }
0x15d4   : > { %v10774_v24 = vpop.eup %10773  ;;  %v8158_v0 = vadd.f32 1.0, %v10772_v62  ;;  %9941 = vmatmul.mubr.msk.bf16.gmra.mrb[184].mxu0 %vm702_vm0, %v7282_v3 }
0x15d5   : > { %v10776_v26 = vpop.eup %10775  ;;  %9944 = vmatprep.mubr.msk.bf16.mxu0 %vm702_vm0, %v7284_v22  ;;  %v8156_v63 = vadd.f32 1.0, %v10774_v24 }
0x15d6   : > { %v10778_v35 = vpop.eup %10777  ;;  %v8159_v21 = vadd.f32 1.0, %v10776_v26  ;;  %v8222_v2 = vmul.f32 %v8158_v0, %v7710_v16 }
0x15d7   : > { %v8157_v42 = vadd.f32 1.0, %v10778_v35  ;;  %v8220_v25 = vmul.f32 %v8156_v63, %v7708_v51  ;;  %v7288_v27 = vpop.permute.xlu0 %7287 }
0x15d8   : > { %v8223_v37 = vmul.f32 %v8159_v21, %v7711_v14 }
0x15d9   : > { %v8221_v48 = vmul.f32 %v8157_v42, %v7709_v5 }
0x15da   : > { %v8283_v47 = vpack.c.bf16 %v8223_v37, %v8222_v2 }
0x15db   : > { %v8282_v33 = vpack.c.bf16 %v8221_v48, %v8220_v25  ;;  %v7290_v11 = vpop.permute.xlu1 %7289 }
0x15dc   : > { %9945 = vmatmul.mubr.msk.bf16.gmra.mrb[188].mxu0 %vm702_vm0, %v7286_v36 }
0x15dd   : > { %9948 = vmatprep.mubr.msk.bf16.mxu0 %vm702_vm0, %v7288_v27  ;;  %9968 = vmatprep.mubr.msk.bf16.mxu1 %vm702_vm0, %v8282_v33 }
0x15de   : > { %9969 = vmatmul.mubr.msk.bf16.vlgmr.msra.gmra.mrb[136].mxu1 %vm702_vm0, %v8283_v47 }
0x15e4   : > { %9949 = vmatmul.mubr.msk.bf16.gmra.mrb[192].mxu0 %vm702_vm0, %v7290_v11 }
0x15f5   : > { %v9902_v1 = vpop.f32.mrb[144].mxu0 }
0x15f6   : > { %v7490_v54 = vadd.f32 %v9902_v1, %v15822_v46  ;;  %v7481_v59 = vpop.f32.mrb[145].mxu0 }
0x15f7   : > { %v7482_v15 = vadd.f32 %v15822_v46, %v7481_v59  ;;  %v9903_v60 = vpop.f32.mrb[146].mxu0 }
0x15f8   : > { %v7778_v9 = vmul.f32 0.044715, %v7490_v54  ;;  %v7493_v13 = vadd.f32 %v9903_v60, %v15822_v46  ;;  %v7484_v19 = vpop.f32.mrb[147].mxu0  ;;  %v7714_v62 = vmul.f32 0.5, %v7490_v54 }
0x15f9   : > { %v7776_v55 = vmul.f32 0.044715, %v7482_v15  ;;  %v7485_v30 = vadd.f32 %v15822_v46, %v7484_v19  ;;  %v7712_v0 = vmul.f32 0.5, %v7482_v15 }
0x15fa   : > { %v7842_v52 = vmul.f32 %v7778_v9, %v7490_v54  ;;  %v7779_v20 = vmul.f32 0.044715, %v7493_v13  ;;  %v7715_v3 = vmul.f32 0.5, %v7493_v13 }
0x15fb   : > { %v7840_v23 = vmul.f32 %v7776_v55, %v7482_v15  ;;  %v7777_v58 = vmul.f32 0.044715, %v7485_v30  ;;  %v7713_v26 = vmul.f32 0.5, %v7485_v30 }
0x15fc   : > { %v7906_v56 = vmul.f32 %v7842_v52, %v7490_v54  ;;  %v7843_v38 = vmul.f32 %v7779_v20, %v7493_v13 }
0x15fd   : > { %v7904_v18 = vmul.f32 %v7840_v23, %v7482_v15  ;;  %v7841_v29 = vmul.f32 %v7777_v58, %v7485_v30 }
0x15fe   : > { %v7970_v32 = vadd.f32 %v7906_v56, %v7490_v54  ;;  %v7907_v10 = vmul.f32 %v7843_v38, %v7493_v13 }
0x15ff   : > { %v7968_v45 = vadd.f32 %v7904_v18, %v7482_v15  ;;  %v7905_v39 = vmul.f32 %v7841_v29, %v7485_v30 }
0x1600   : > { %v8034_v41 = vmul.f32 0.7978846, %v7970_v32  ;;  %v7971_v31 = vadd.f32 %v7907_v10, %v7493_v13 }
0x1601   : > { %v8032_v53 = vmul.f32 0.7978846, %v7968_v45  ;;  %v7969_v17 = vadd.f32 %v7905_v39, %v7485_v30 }
0x1602   : > { %10779 = vtanh.f32 %v8034_v41  ;;  %v8035_v6 = vmul.f32 0.7978846, %v7971_v31 }
0x1603   : > { %10781 = vtanh.f32 %v8032_v53  ;;  %v8033_v4 = vmul.f32 0.7978846, %v7969_v17 }
0x1604   : > { %10783 = vtanh.f32 %v8035_v6 }
0x1605   : > { %10785 = vtanh.f32 %v8033_v4 }
0x160c   : > { %v10780_v61 = vpop.eup %10779 }
0x160d   : > { %v10782_v57 = vpop.eup %10781  ;;  %v8162_v34 = vadd.f32 1.0, %v10780_v61 }
0x160e   : > { %v10784_v8 = vpop.eup %10783  ;;  %v8160_v12 = vadd.f32 1.0, %v10782_v57 }
0x160f   : > { %v10786_v44 = vpop.eup %10785  ;;  %v8163_v24 = vadd.f32 1.0, %v10784_v8  ;;  %v8226_v35 = vmul.f32 %v8162_v34, %v7714_v62 }
0x1610   : > { %v7292_v22 = vpop.permute.xlu0 %7291  ;;  %v8161_v63 = vadd.f32 1.0, %v10786_v44  ;;  %v8224_v14 = vmul.f32 %v8160_v12, %v7712_v0 }
0x1611   : > { %9952 = vmatprep.mubr.msk.bf16.mxu0 %vm702_vm0, %v7292_v22  ;;  %v8227_v16 = vmul.f32 %v8163_v24, %v7715_v3 }
0x1612   : > { %v8225_v21 = vmul.f32 %v8161_v63, %v7713_v26 }
0x1613   : > { %v8285_v51 = vpack.c.bf16 %v8227_v16, %v8226_v35 }
0x1614   : > { %v8284_v5 = vpack.c.bf16 %v8225_v21, %v8224_v14 }
0x1616   : > { %v7294_v42 = vpop.permute.xlu1 %7293  ;;  %9972 = vmatprep.mubr.msk.bf16.mxu1 %vm702_vm0, %v8284_v5 }
0x1617   : > { %9953 = vmatmul.mubr.msk.bf16.gmra.mrb[196].mxu0 %vm702_vm0, %v7294_v42  ;;  %9973 = vmatmul.mubr.msk.bf16.gmra.mrb[140].mxu1 %vm702_vm0, %v8285_v51 }
0x1618   : > { %9964 = vmatprep.mubr.msk.bf16.mxu0 %vm702_vm0, %v8280_v43 }
0x161f   : > { %9965 = vmatmul.mubr.msk.bf16.vlgmr.msra.gmra.mrb[200].mxu0 %vm702_vm0, %v8281_v50 }
0x162e   : > { %v9906_v2 = vpop.f32.mrb[148].mxu0 }
0x162f   : > { %v7506_v37 = vadd.f32 %v9906_v2, %v15822_v46  ;;  %v7497_v25 = vpop.f32.mrb[149].mxu0 }
0x1630   : > { %v7498_v48 = vadd.f32 %v15822_v46, %v7497_v25  ;;  %v9907_v47 = vpop.f32.mrb[150].mxu0 }
0x1631   : > { %v7782_v36 = vmul.f32 0.044715, %v7506_v37  ;;  %v7509_v33 = vadd.f32 %v9907_v47, %v15822_v46  ;;  %v7500_v27 = vpop.f32.mrb[151].mxu0  ;;  %v7718_v10 = vmul.f32 0.5, %v7506_v37 }
0x1632   : > { %v7780_v11 = vmul.f32 0.044715, %v7498_v48  ;;  %v7501_v7 = vadd.f32 %v15822_v46, %v7500_v27  ;;  %v7716_v41 = vmul.f32 0.5, %v7498_v48 }
0x1633   : > { %v7846_v40 = vmul.f32 %v7782_v36, %v7506_v37  ;;  %v7783_v43 = vmul.f32 0.044715, %v7509_v33  ;;  %v7719_v45 = vmul.f32 0.5, %v7509_v33 }
0x1634   : > { %v7844_v1 = vmul.f32 %v7780_v11, %v7498_v48  ;;  %v7781_v49 = vmul.f32 0.044715, %v7501_v7  ;;  %v7717_v31 = vmul.f32 0.5, %v7501_v7 }
0x1635   : > { %v7910_v28 = vmul.f32 %v7846_v40, %v7506_v37  ;;  %v7847_v50 = vmul.f32 %v7783_v43, %v7509_v33 }
0x1636   : > { %v7908_v54 = vmul.f32 %v7844_v1, %v7498_v48  ;;  %v7845_v59 = vmul.f32 %v7781_v49, %v7501_v7 }
0x1637   : > { %v7974_v15 = vadd.f32 %v7910_v28, %v7506_v37  ;;  %v7911_v60 = vmul.f32 %v7847_v50, %v7509_v33 }
0x1638   : > { %v7972_v9 = vadd.f32 %v7908_v54, %v7498_v48  ;;  %v7909_v13 = vmul.f32 %v7845_v59, %v7501_v7 }
0x1639   : > { %v8038_v19 = vmul.f32 0.7978846, %v7974_v15  ;;  %v7975_v55 = vadd.f32 %v7911_v60, %v7509_v33 }
0x163a   : > { %v8036_v30 = vmul.f32 0.7978846, %v7972_v9  ;;  %v7973_v52 = vadd.f32 %v7909_v13, %v7501_v7 }
0x163b   : > { %10787 = vtanh.f32 %v8038_v19  ;;  %v8039_v20 = vmul.f32 0.7978846, %v7975_v55 }
0x163c   : > { %10789 = vtanh.f32 %v8036_v30  ;;  %v8037_v23 = vmul.f32 0.7978846, %v7973_v52 }
0x163d   : > { %10791 = vtanh.f32 %v8039_v20 }
0x163e   : > { %10793 = vtanh.f32 %v8037_v23 }
0x1645   : > { %v10788_v58 = vpop.eup %10787 }
0x1646   : > { %v10790_v56 = vpop.eup %10789  ;;  %v8166_v38 = vadd.f32 1.0, %v10788_v58 }
0x1647   : > { %v10792_v18 = vpop.eup %10791  ;;  %v8164_v29 = vadd.f32 1.0, %v10790_v56 }
0x1648   : > { %v10794_v32 = vpop.eup %10793  ;;  %v8167_v39 = vadd.f32 1.0, %v10792_v18  ;;  %v8230_v17 = vmul.f32 %v8166_v38, %v7718_v10 }
0x1649   : > { %v8165_v53 = vadd.f32 1.0, %v10794_v32  ;;  %v8228_v4 = vmul.f32 %v8164_v29, %v7716_v41 }
0x164a   : > { %v8231_v6 = vmul.f32 %v8167_v39, %v7719_v45 }
0x164b   : > { %v8229_v61 = vmul.f32 %v8165_v53, %v7717_v31 }
0x164c   : > { %v8287_v57 = vpack.c.bf16 %v8231_v6, %v8230_v17 }
0x164d   : > { %v8286_v34 = vpack.c.bf16 %v8229_v61, %v8228_v4 }
0x164f   : > { %9976 = vmatprep.mubr.msk.bf16.mxu1 %vm702_vm0, %v8286_v34 }
0x1650   : > { %9977 = vmatmul.mubr.msk.bf16.gmra.mrb[144].mxu1 %vm702_vm0, %v8287_v57 }
0x1667   : > { %v9910_v8 = vpop.f32.mrb[152].mxu0 }
0x1668   : > { %v7522_v12 = vadd.f32 %v9910_v8, %v15822_v46  ;;  %v7513_v44 = vpop.f32.mrb[153].mxu0 }
0x1669   : > { %v7514_v62 = vadd.f32 %v15822_v46, %v7513_v44  ;;  %v9911_v3 = vpop.f32.mrb[154].mxu0 }
0x166a   : > { %v7786_v24 = vmul.f32 0.044715, %v7522_v12  ;;  %v7525_v22 = vadd.f32 %v9911_v3, %v15822_v46  ;;  %v7516_v0 = vpop.f32.mrb[155].mxu0  ;;  %v15923_v48 = vmul.f32 0.5, %v7522_v12 }
0x166b   : > { %v7784_v26 = vmul.f32 0.044715, %v7514_v62  ;;  %v7517_v63 = vadd.f32 %v15822_v46, %v7516_v0  ;;  %v15921_v25 = vmul.f32 0.5, %v7514_v62 }
0x166c   : > { %v7850_v35 = vmul.f32 %v7786_v24, %v7522_v12  ;;  %v7787_v16 = vmul.f32 0.044715, %v7525_v22  ;;  %v15926_v11 = vmul.f32 0.5, %v7525_v22 }
0x166d   : > { %v7848_v14 = vmul.f32 %v7784_v26, %v7514_v62  ;;  %v7785_v21 = vmul.f32 0.044715, %v7517_v63  ;;  %v15929_v49 = vmul.f32 0.5, %v7517_v63 }
0x166e   : > { %v7914_v51 = vmul.f32 %v7850_v35, %v7522_v12  ;;  %v7851_v5 = vmul.f32 %v7787_v16, %v7525_v22 }
0x166f   : > { %v7912_v42 = vmul.f32 %v7848_v14, %v7514_v62  ;;  %v7849_v2 = vmul.f32 %v7785_v21, %v7517_v63  ;;  %v9914_v37 = vpop.f32.mrb[156].mxu0 }
0x1670   : > { %v7978_v47 = vadd.f32 %v7914_v51, %v7522_v12  ;;  %v7915_v36 = vmul.f32 %v7851_v5, %v7525_v22  ;;  %v7538_v33 = vadd.f32 %v9914_v37, %v15822_v46  ;;  %v7529_v27 = vpop.f32.mrb[157].mxu0 }
0x1671   : > { %v7976_v7 = vadd.f32 %v7912_v42, %v7514_v62  ;;  %v7913_v40 = vmul.f32 %v7849_v2, %v7517_v63  ;;  %v7530_v43 = vadd.f32 %v15822_v46, %v7529_v27  ;;  %v9915_v1 = vpop.f32.mrb[158].mxu0 }
0x1672   : > { %v8042_v28 = vmul.f32 0.7978846, %v7978_v47  ;;  %v7979_v50 = vadd.f32 %v7915_v36, %v7525_v22  ;;  %v7790_v54 = vmul.f32 0.044715, %v7538_v33  ;;  %v7541_v59 = vadd.f32 %v9915_v1, %v15822_v46  ;;  %v7532_v15 = vpop.f32.mrb[159].mxu0 }
0x1673   : > { %v8040_v60 = vmul.f32 0.7978846, %v7976_v7  ;;  %v7977_v9 = vadd.f32 %v7913_v40, %v7517_v63  ;;  %v7788_v13 = vmul.f32 0.044715, %v7530_v43  ;;  %v7533_v19 = vadd.f32 %v15822_v46, %v7532_v15 }
0x1674   : > { %10795 = vtanh.f32 %v8042_v28  ;;  %v8043_v55 = vmul.f32 0.7978846, %v7979_v50  ;;  %v7854_v30 = vmul.f32 %v7790_v54, %v7538_v33  ;;  %v7791_v52 = vmul.f32 0.044715, %v7541_v59 }
0x1675   : > { %10797 = vtanh.f32 %v8040_v60  ;;  %v8041_v20 = vmul.f32 0.7978846, %v7977_v9  ;;  %v7852_v23 = vmul.f32 %v7788_v13, %v7530_v43  ;;  %v7789_v58 = vmul.f32 0.044715, %v7533_v19 }
0x1676   : > { %10799 = vtanh.f32 %v8043_v55  ;;  %v7918_v56 = vmul.f32 %v7854_v30, %v7538_v33  ;;  %v7855_v38 = vmul.f32 %v7791_v52, %v7541_v59  ;;  %v15933_v18 = vmul.f32 0.5, %v7530_v43 }
0x1677   : > { %10801 = vtanh.f32 %v8041_v20  ;;  %v7916_v29 = vmul.f32 %v7852_v23, %v7530_v43  ;;  %v7853_v32 = vmul.f32 %v7789_v58, %v7533_v19  ;;  %v9918_v10 = vpop.f32.mrb[160].mxu0  ;;  %v15935_v45 = vmul.f32 0.5, %v7533_v19 }
0x1678   : > { %v7982_v39 = vadd.f32 %v7918_v56, %v7538_v33  ;;  %v7919_v41 = vmul.f32 %v7855_v38, %v7541_v59  ;;  %v15938_v31 = vadd.f32 %v9918_v10, %v15822_v46  ;;  %v7545_v53 = vpop.f32.mrb[161].mxu0  ;;  %v15940_v17 = vmul.f32 0.5, %v7538_v33 }
0x1679   : > { %v7980_v6 = vadd.f32 %v7916_v29, %v7530_v43  ;;  %v7917_v4 = vmul.f32 %v7853_v32, %v7533_v19  ;;  %v7546_v61 = vadd.f32 %v15822_v46, %v7545_v53  ;;  %v9919_v57 = vpop.f32.mrb[162].mxu0  ;;  %v15943_v34 = vmul.f32 0.5, %v7541_v59 }
0x167a   : > { %v8046_v8 = vmul.f32 0.7978846, %v7982_v39  ;;  %v7983_v12 = vadd.f32 %v7919_v41, %v7541_v59  ;;  %v7794_v44 = vmul.f32 0.044715, %v15938_v31  ;;  %v15947_v62 = vadd.f32 %v9919_v57, %v15822_v46  ;;  %v7548_v3 = vpop.f32.mrb[163].mxu0 }
0x167b   : > { %v8044_v24 = vmul.f32 0.7978846, %v7980_v6  ;;  %v7981_v22 = vadd.f32 %v7917_v4, %v7533_v19  ;;  %v7792_v0 = vmul.f32 0.044715, %v7546_v61  ;;  %v15950_v26 = vadd.f32 %v15822_v46, %v7548_v3 }
0x167c   : > { %10803 = vtanh.f32 %v8046_v8  ;;  %v8047_v63 = vmul.f32 0.7978846, %v7983_v12  ;;  %v7858_v35 = vmul.f32 %v7794_v44, %v15938_v31  ;;  %v7795_v16 = vmul.f32 0.044715, %v15947_v62 }
0x167d   : > { %10805 = vtanh.f32 %v8044_v24  ;;  %v8045_v14 = vmul.f32 0.7978846, %v7981_v22  ;;  %v7856_v21 = vmul.f32 %v7792_v0, %v7546_v61  ;;  %v7793_v51 = vmul.f32 0.044715, %v15950_v26 }
0x167e   : > { %v10796_v5 = vpop.eup %10795  ;;  %10807 = vtanh.f32 %v8047_v63  ;;  %v7922_v42 = vmul.f32 %v7858_v35, %v15938_v31  ;;  %v7859_v2 = vmul.f32 %v7795_v16, %v15947_v62  ;;  %v15957_v37 = vmul.f32 0.5, %v7546_v61 }
0x167f   : > { %v10798_v47 = vpop.eup %10797  ;;  %10809 = vtanh.f32 %v8045_v14  ;;  %v7920_v36 = vmul.f32 %v7856_v21, %v7546_v61  ;;  %v7857_v33 = vmul.f32 %v7793_v51, %v15950_v26  ;;  %v9922_v27 = vpop.f32.mrb[164].mxu0  ;;  %v8170_v7 = vadd.f32 1.0, %v10796_v5 }
0x1680   : > { %v10800_v40 = vpop.eup %10799  ;;  %v7986_v43 = vadd.f32 %v7922_v42, %v15938_v31  ;;  %v7923_v1 = vmul.f32 %v7859_v2, %v15947_v62  ;;  %v15963_v28 = vadd.f32 %v9922_v27, %v15822_v46  ;;  %v7561_v50 = vpop.f32.mrb[165].mxu0  ;;  %v8168_v54 = vadd.f32 1.0, %v10798_v47 }
0x1681   : > { %v10802_v59 = vpop.eup %10801  ;;  %v7984_v15 = vadd.f32 %v7920_v36, %v7546_v61  ;;  %v7921_v60 = vmul.f32 %v7857_v33, %v15950_v26  ;;  %v15967_v9 = vadd.f32 %v15822_v46, %v7561_v50  ;;  %v9923_v13 = vpop.f32.mrb[166].mxu0  ;;  %v8171_v19 = vadd.f32 1.0, %v10800_v40 }
0x1682   : > { %v8050_v55 = vmul.f32 0.7978846, %v7986_v43  ;;  %v7987_v30 = vadd.f32 %v7923_v1, %v15947_v62  ;;  %v7798_v52 = vmul.f32 0.044715, %v15963_v28  ;;  %v15972_v20 = vadd.f32 %v9923_v13, %v15822_v46  ;;  %v7564_v23 = vpop.f32.mrb[167].mxu0 }
0x1683   : > { %v8048_v58 = vmul.f32 0.7978846, %v7984_v15  ;;  %v7985_v56 = vadd.f32 %v7921_v60, %v15950_v26  ;;  %v7796_v38 = vmul.f32 0.044715, %v15967_v9  ;;  %v15977_v29 = vadd.f32 %v15822_v46, %v7564_v23 }
0x1684   : > { %10811 = vtanh.f32 %v8050_v55  ;;  %v8051_v32 = vmul.f32 0.7978846, %v7987_v30  ;;  %v7862_v10 = vmul.f32 %v7798_v52, %v15963_v28  ;;  %v7799_v39 = vmul.f32 0.044715, %v15972_v20 }
0x1685   : > { %10813 = vtanh.f32 %v8048_v58  ;;  %v8049_v41 = vmul.f32 0.7978846, %v7985_v56  ;;  %v7860_v53 = vmul.f32 %v7796_v38, %v15967_v9  ;;  %v7797_v6 = vmul.f32 0.044715, %v15977_v29 }
0x1686   : > { %v15983_v4 = vpop.eup %10803  ;;  %10815 = vtanh.f32 %v8051_v32  ;;  %v7926_v61 = vmul.f32 %v7862_v10, %v15963_v28  ;;  %v7863_v57 = vmul.f32 %v7799_v39, %v15972_v20  ;;  %v8169_v8 = vadd.f32 1.0, %v10802_v59 }
0x1687   : > { %v10806_v12 = vpop.eup %10805  ;;  %10817 = vtanh.f32 %v8049_v41  ;;  %v7924_v44 = vmul.f32 %v7860_v53, %v15967_v9  ;;  %v7861_v3 = vmul.f32 %v7797_v6, %v15977_v29  ;;  %v9926_v24 = vpop.f32.mrb[168].mxu0  ;;  %v8232_v22 = vmul.f32 %v8168_v54, %v15921_v25 }
0x1688   : > { %v15990_v0 = vpop.eup %10807  ;;  %v7990_v63 = vadd.f32 %v7926_v61, %v15963_v28  ;;  %v7927_v35 = vmul.f32 %v7863_v57, %v15972_v20  ;;  %v15995_v16 = vadd.f32 %v9926_v24, %v15822_v46  ;;  %v7577_v14 = vpop.f32.mrb[169].mxu0  ;;  %v8233_v21 = vmul.f32 %v8169_v8, %v15929_v49 }
0x1689   : > { %v10810_v51 = vpop.eup %10809  ;;  %v7988_v5 = vadd.f32 %v7924_v44, %v15967_v9  ;;  %v7925_v42 = vmul.f32 %v7861_v3, %v15977_v29  ;;  %v16001_v2 = vadd.f32 %v15822_v46, %v7577_v14  ;;  %v9927_v25 = vpop.f32.mrb[170].mxu0  ;;  %v8234_v47 = vmul.f32 %v8170_v7, %v15923_v48 }
0x168a   : > { %v8054_v36 = vmul.f32 0.7978846, %v7990_v63  ;;  %v7991_v33 = vadd.f32 %v7927_v35, %v15972_v20  ;;  %v7802_v27 = vmul.f32 0.044715, %v15995_v16  ;;  %v8288_v40 = vpack.c.bf16 %v8233_v21, %v8232_v22  ;;  %v7580_v43 = vpop.f32.mrb[171].mxu0 }
0x168b   : > { %v8052_v1 = vmul.f32 0.7978846, %v7988_v5  ;;  %v7989_v49 = vadd.f32 %v7925_v42, %v15977_v29  ;;  %v7800_v50 = vmul.f32 0.044715, %v16001_v2  ;;  %v16009_v54 = vadd.f32 %v9927_v25, %v15822_v46 }
0x168c   : > { %10819 = vtanh.f32 %v8054_v36  ;;  %v8055_v59 = vmul.f32 0.7978846, %v7991_v33  ;;  %v7866_v15 = vmul.f32 %v7802_v27, %v15995_v16  ;;  %9980 = vmatprep.mubr.msk.bf16.mxu1 %vm702_vm0, %v8288_v40  ;;  %v8235_v48 = vmul.f32 %v8171_v19, %v15926_v11 }
0x168d   : > { %10821 = vtanh.f32 %v8052_v1  ;;  %v8053_v7 = vmul.f32 0.7978846, %v7989_v49  ;;  %v7864_v60 = vmul.f32 %v7800_v50, %v16001_v2  ;;  %v7803_v13 = vmul.f32 0.044715, %v16009_v54 }
0x168e   : > { %v16016_v55 = vpop.eup %10811  ;;  %10823 = vtanh.f32 %v8055_v59  ;;  %v7930_v30 = vmul.f32 %v7866_v15, %v15995_v16  ;;  %v8289_v52 = vpack.c.bf16 %v8235_v48, %v8234_v47  ;;  %v16020_v23 = vadd.f32 %v15822_v46, %v7580_v43 }
0x168f   : > { %v16022_v58 = vpop.eup %10813  ;;  %10825 = vtanh.f32 %v8053_v7  ;;  %v7928_v11 = vmul.f32 %v7864_v60, %v16001_v2  ;;  %v7867_v19 = vmul.f32 %v7803_v13, %v16009_v54  ;;  %v9930_v56 = vpop.f32.mrb[172].mxu0  ;;  %v8172_v38 = vadd.f32 1.0, %v10806_v12 }
0x1690   : > { %v16026_v32 = vpop.eup %10815  ;;  %v7994_v10 = vadd.f32 %v7930_v30, %v15995_v16  ;;  %9981 = vmatmul.mubr.msk.bf16.gmra.mrb[148].mxu1 %vm702_vm0, %v8289_v52  ;;  %v7801_v39 = vmul.f32 0.044715, %v16020_v23  ;;  %v16032_v41 = vadd.f32 %v9930_v56, %v15822_v46  ;;  %v7593_v53 = vpop.f32.mrb[173].mxu0  ;;  %v8173_v6 = vadd.f32 1.0, %v10810_v51 }
0x1691   : > { %v16034_v61 = vpop.eup %10817  ;;  %v7992_v57 = vadd.f32 %v7928_v11, %v16001_v2  ;;  %v7931_v8 = vmul.f32 %v7867_v19, %v16009_v54  ;;  %v16039_v12 = vadd.f32 %v15822_v46, %v7593_v53  ;;  %v8236_v44 = vmul.f32 %v8172_v38, %v15933_v18  ;;  %v9931_v3 = vpop.f32.mrb[174].mxu0  ;;  %v16081_v38 = vld [vmem:[%s16812_s7] ss:$0 sm:$0xff] }
0x1692   : > { %v8058_v24 = vmul.f32 0.7978846, %v7994_v10  ;;  %v7865_v22 = vmul.f32 %v7801_v39, %v16020_v23  ;;  %v7806_v63 = vmul.f32 0.044715, %v16032_v41  ;;  %v8237_v35 = vmul.f32 %v8173_v6, %v15935_v45  ;;  %v7596_v14 = vpop.f32.mrb[175].mxu0 }
0x1693   : > { %v8056_v21 = vmul.f32 0.7978846, %v7992_v57  ;;  %v7995_v51 = vadd.f32 %v7931_v8, %v16009_v54  ;;  %v7804_v5 = vmul.f32 0.044715, %v16039_v12  ;;  %v16048_v42 = vadd.f32 %v9931_v3, %v15822_v46 }
0x1694   : > { %10827 = vtanh.f32 %v8058_v24  ;;  %v7929_v18 = vmul.f32 %v7865_v22, %v16020_v23  ;;  %v7870_v25 = vmul.f32 %v7806_v63, %v16032_v41  ;;  %v8290_v47 = vpack.c.bf16 %v8237_v35, %v8236_v44 }
0x1695   : > { %10829 = vtanh.f32 %v8056_v21  ;;  %v8059_v36 = vmul.f32 0.7978846, %v7995_v51  ;;  %v7868_v33 = vmul.f32 %v7804_v5, %v16039_v12  ;;  %v7807_v45 = vmul.f32 0.044715, %v16048_v42 }
0x1696   : > { %v16054_v27 = vpop.eup %10819  ;;  %v7993_v40 = vadd.f32 %v7929_v18, %v16020_v23  ;;  %v7934_v43 = vmul.f32 %v7870_v25, %v16032_v41  ;;  %9984 = vmatprep.mubr.msk.bf16.mxu1 %vm702_vm0, %v8290_v47  ;;  %v8174_v1 = vadd.f32 1.0, %v15983_v4  ;;  %v8175_v49 = vadd.f32 1.0, %v15990_v0 }
0x1697   : > { %v16061_v50 = vpop.eup %10821  ;;  %10831 = vtanh.f32 %v8059_v36  ;;  %v7932_v59 = vmul.f32 %v7868_v33, %v16039_v12  ;;  %v7871_v15 = vmul.f32 %v7807_v45, %v16048_v42  ;;  %v16066_v48 = vadd.f32 %v15822_v46, %v7596_v14  ;;  %v9934_v7 = vpop.f32.mrb[176].mxu0 }
0x1698   : > { %v16068_v60 = vpop.eup %10823  ;;  %v8057_v13 = vmul.f32 0.7978846, %v7993_v40  ;;  %v7998_v30 = vadd.f32 %v7934_v43, %v16032_v41  ;;  %v8238_v4 = vmul.f32 %v8174_v1, %v15940_v17  ;;  %v8239_v0 = vmul.f32 %v8175_v49, %v15943_v34  ;;  %v7609_v52 = vpop.f32.mrb[177].mxu0 }
0x1699   : > { %v16073_v11 = vpop.eup %10825  ;;  %v7996_v19 = vadd.f32 %v7932_v59, %v16039_v12  ;;  %v7935_v56 = vmul.f32 %v7871_v15, %v16048_v42  ;;  %v7805_v46 = vmul.f32 0.044715, %v16066_v48  ;;  %v16084_v10 = vadd.f32 %v16081_v38, %v9934_v7  ;;  %v9935_v17 = vpop.f32.mrb[178].mxu0 }
0x169a   : > { %10833 = vtanh.f32 %v8057_v13  ;;  %v8062_v34 = vmul.f32 0.7978846, %v7998_v30  ;;  %v8291_v39 = vpack.c.bf16 %v8239_v0, %v8238_v4  ;;  %v16087_v53 = vadd.f32 %v16081_v38, %v7609_v52  ;;  %v7612_v6 = vpop.f32.mrb[179].mxu0 }
0x169b   : > { %v8060_v57 = vmul.f32 0.7978846, %v7996_v19  ;;  %v7999_v8 = vadd.f32 %v7935_v56, %v16048_v42  ;;  %v7869_v44 = vmul.f32 %v7805_v46, %v16066_v48  ;;  %v7810_v3 = vmul.f32 0.044715, %v16084_v10 }
0x169c   : > { %10835 = vtanh.f32 %v8062_v34  ;;  %9985 = vmatmul.mubr.msk.bf16.gmra.mrb[152].mxu1 %vm702_vm0, %v8291_v39  ;;  %v7808_v24 = vmul.f32 0.044715, %v16087_v53  ;;  %v7729_v22 = vmul.f32 0.5, %v15950_v26  ;;  %v8176_v63 = vadd.f32 1.0, %v16022_v58 }
0x169d   : > { %10837 = vtanh.f32 %v8060_v57  ;;  %v8063_v35 = vmul.f32 0.7978846, %v7999_v8  ;;  %v7933_v14 = vmul.f32 %v7869_v44, %v16066_v48  ;;  %v7874_v21 = vmul.f32 %v7810_v3, %v16084_v10 }
0x169e   : > { %v16098_v51 = vpop.eup %10827  ;;  %v7872_v5 = vmul.f32 %v7808_v24, %v16087_v53  ;;  %v8177_v18 = vadd.f32 1.0, %v16034_v61  ;;  %v8240_v25 = vmul.f32 %v8176_v63, %v15957_v37  ;;  %v16104_v47 = vadd.f32 %v16081_v38, %v9935_v17 }
0x169f   : > { %v16106_v26 = vpop.eup %10829  ;;  %10839 = vtanh.f32 %v8063_v35  ;;  %v7997_v58 = vadd.f32 %v7933_v14, %v16066_v48  ;;  %v7938_v36 = vmul.f32 %v7874_v21, %v16084_v10  ;;  %v7730_v33 = vmul.f32 0.5, %v15938_v31  ;;  %v9938_v45 = vpop.f32.mrb[180].mxu0 }
0x16a0   : > { %v7936_v40 = vmul.f32 %v7872_v5, %v16087_v53  ;;  %v8241_v43 = vmul.f32 %v8177_v18, %v7729_v22  ;;  %v7811_v61 = vmul.f32 0.044715, %v16104_v47  ;;  %v7731_v37 = vmul.f32 0.5, %v15947_v62  ;;  %v7625_v1 = vpop.f32.mrb[181].mxu0 }
0x16a1   : > { %v16114_v49 = vpop.eup %10831  ;;  %v8061_v59 = vmul.f32 0.7978846, %v7997_v58  ;;  %v8002_v15 = vadd.f32 %v7938_v36, %v16084_v10  ;;  %v8178_v7 = vadd.f32 1.0, %v16016_v55  ;;  %v8179_v13 = vadd.f32 1.0, %v16026_v32  ;;  %v9939_v30 = vpop.f32.mrb[182].mxu0 }
0x16a2   : > { %v8000_v31 = vadd.f32 %v7936_v40, %v16087_v53  ;;  %v8292_v4 = vpack.c.bf16 %v8241_v43, %v8240_v25  ;;  %v7875_v0 = vmul.f32 %v7811_v61, %v16104_v47  ;;  %v16122_v52 = vadd.f32 %v16081_v38, %v7612_v6  ;;  %v7628_v62 = vpop.f32.mrb[183].mxu0 }
0x16a3   : > { %10841 = vtanh.f32 %v8061_v59  ;;  %v8066_v19 = vmul.f32 0.7978846, %v8002_v15  ;;  %v8242_v56 = vmul.f32 %v8178_v7, %v7730_v33  ;;  %v8243_v46 = vmul.f32 %v8179_v13, %v7731_v37 }
0x16a4   : > { %v16124_v17 = vpop.eup %10833  ;;  %v8064_v34 = vmul.f32 0.7978846, %v8000_v31  ;;  %9988 = vmatprep.mubr.msk.bf16.mxu1 %vm702_vm0, %v8292_v4  ;;  %v7939_v55 = vmul.f32 %v7875_v0, %v16104_v47  ;;  %v7809_v32 = vmul.f32 0.044715, %v16122_v52  ;;  %v16130_v39 = vadd.f32 %v16081_v38, %v9938_v45 }
0x16a5   : > { %10843 = vtanh.f32 %v8066_v19  ;;  %v8293_v6 = vpack.c.bf16 %v8243_v46, %v8242_v56  ;;  %v16133_v57 = vadd.f32 %v16081_v38, %v7625_v1  ;;  %v7732_v8 = vmul.f32 0.5, %v15967_v9 }
0x16a6   : > { %v16136_v44 = vpop.eup %10835  ;;  %10845 = vtanh.f32 %v8064_v34  ;;  %v8003_v3 = vadd.f32 %v7939_v55, %v16104_v47  ;;  %v7873_v24 = vmul.f32 %v7809_v32, %v16122_v52  ;;  %v7814_v22 = vmul.f32 0.044715, %v16130_v39 }
0x16a7   : > { %v16141_v63 = vpop.eup %10837  ;;  %9989 = vmatmul.mubr.msk.bf16.gmra.mrb[156].mxu1 %vm702_vm0, %v8293_v6  ;;  %v7812_v35 = vmul.f32 0.044715, %v16133_v57  ;;  %v7733_v14 = vmul.f32 0.5, %v15977_v29  ;;  %v8180_v21 = vadd.f32 1.0, %v16061_v50  ;;  %v8181_v9 = vadd.f32 1.0, %v16073_v11  ;;  %v9942_v5 = vpop.f32.mrb[184].mxu0 }
0x16a8   : > { %v8067_v18 = vmul.f32 0.7978846, %v8003_v3  ;;  %v7937_v25 = vmul.f32 %v7873_v24, %v16122_v52  ;;  %v7878_v58 = vmul.f32 %v7814_v22, %v16130_v39  ;;  %v16151_v36 = vadd.f32 %v16081_v38, %v9939_v30  ;;  %v7641_v33 = vpop.f32.mrb[185].mxu0 }
0x16a9   : > { %v16153_v45 = vpop.eup %10839  ;;  %v7876_v40 = vmul.f32 %v7812_v35, %v16133_v57  ;;  %v8244_v43 = vmul.f32 %v8180_v21, %v7732_v8  ;;  %v8245_v29 = vmul.f32 %v8181_v9, %v7733_v14  ;;  %v7734_v50 = vmul.f32 0.5, %v15963_v28  ;;  %v9943_v61 = vpop.f32.mrb[186].mxu0 }
0x16aa   : > { %10847 = vtanh.f32 %v8067_v18  ;;  %v8001_v11 = vadd.f32 %v7937_v25, %v16122_v52  ;;  %v7942_v37 = vmul.f32 %v7878_v58, %v16130_v39  ;;  %v7815_v1 = vmul.f32 0.044715, %v16151_v36  ;;  %v16160_v59 = vpop.f32.mrb[187].mxu0 }
0x16ab   : > { %v7940_v15 = vmul.f32 %v7876_v40, %v16133_v57  ;;  %v8294_v7 = vpack.c.bf16 %v8245_v29, %v8244_v43  ;;  %v7735_v13 = vmul.f32 0.5, %v15972_v20  ;;  %v8182_v30 = vadd.f32 1.0, %v16054_v27 }
0x16ac   : > { %v8065_v31 = vmul.f32 0.7978846, %v8001_v11  ;;  %v8006_v28 = vadd.f32 %v7942_v37, %v16130_v39  ;;  %v7879_v4 = vmul.f32 %v7815_v1, %v16151_v36  ;;  %v8183_v0 = vadd.f32 1.0, %v16068_v60 }
0x16ad   : > { %v16168_v19 = vpop.eup %10841  ;;  %v8004_v56 = vadd.f32 %v7940_v15, %v16133_v57  ;;  %9992 = vmatprep.mubr.msk.bf16.mxu1 %vm702_vm0, %v8294_v7  ;;  %v8246_v46 = vmul.f32 %v8182_v30, %v7734_v50  ;;  %v16173_v34 = vadd.f32 %v16081_v38, %v7628_v62  ;;  %v16176_v20 = vadd.f32 %v16081_v38, %v9942_v5 }
0x16ae   : > { %10849 = vtanh.f32 %v8065_v31  ;;  %v8070_v27 = vmul.f32 0.7978846, %v8006_v28  ;;  %v7943_v55 = vmul.f32 %v7879_v4, %v16151_v36  ;;  %v8247_v32 = vmul.f32 %v8183_v0, %v7735_v13 }
0x16af   : > { %v16179_v6 = vpop.eup %10843  ;;  %v8068_v60 = vmul.f32 0.7978846, %v8004_v56  ;;  %v7813_v8 = vmul.f32 0.044715, %v16173_v34  ;;  %v7818_v3 = vmul.f32 0.044715, %v16176_v20  ;;  %v16184_v24 = vadd.f32 %v16081_v38, %v7641_v33 }
0x16b0   : > { %v16186_v62 = vpop.eup %10845  ;;  %10851 = vtanh.f32 %v8070_v27  ;;  %v8007_v22 = vadd.f32 %v7943_v55, %v16151_v36  ;;  %v8295_v35 = vpack.c.bf16 %v8247_v32, %v8246_v46  ;;  %v9946_v14 = vpop.f32.mrb[188].mxu0  ;;  %v7736_v18 = vmul.f32 0.5, %v16001_v2 }
0x16b1   : > { %v7877_v21 = vmul.f32 %v7813_v8, %v16173_v34  ;;  %v7882_v9 = vmul.f32 %v7818_v3, %v16176_v20  ;;  %v7816_v5 = vmul.f32 0.044715, %v16184_v24  ;;  %v7657_v25 = vpop.f32.mrb[189].mxu0  ;;  %v16193_v58 = vpop.f32.mrb[136].mxu1  ;;  %10853 = vtanh.f32 %v8068_v60 }
0x16b2   : > { %9993 = vmatmul.mubr.msk.bf16.gmra.mrb[160].mxu1 %vm702_vm0, %v8295_v35  ;;  %v7737_v33 = vmul.f32 0.5, %v16020_v23  ;;  %v8184_v40 = vadd.f32 1.0, %v16106_v26  ;;  %v8185_v43 = vadd.f32 1.0, %v16124_v17  ;;  %v9947_v29 = vpop.f32.mrb[190].mxu0  ;;  %v16203_v2 = vadd.f32 %v16081_v38, %v9943_v61  ;;  %v16207_v15 = vpop.f32.mrb[137].mxu1 }
0x16b3   : > { %v7941_v50 = vmul.f32 %v7877_v21, %v16173_v34  ;;  %v7946_v11 = vmul.f32 %v7882_v9, %v16176_v20  ;;  %v7880_v37 = vmul.f32 %v7816_v5, %v16184_v24  ;;  %v16205_v1 = vpop.f32.mrb[191].mxu0  ;;  %v8071_v23 = vmul.f32 0.7978846, %v8007_v22  ;;  %v16212_v30 = vpop.f32.mrb[138].mxu1 }
0x16b4   : > { %v16209_v7 = vpop.eup %10847  ;;  %v8248_v26 = vmul.f32 %v8184_v40, %v7736_v18  ;;  %v8249_v13 = vmul.f32 %v8185_v43, %v7737_v33  ;;  %v7738_v17 = vmul.f32 0.5, %v15995_v16  ;;  %v7819_v4 = vmul.f32 0.044715, %v16203_v2  ;;  %v16218_v0 = vpop.f32.mrb[139].mxu1 }
0x16b5   : > { %v8005_v31 = vadd.f32 %v7941_v50, %v16173_v34  ;;  %v8010_v28 = vadd.f32 %v7946_v11, %v16176_v20  ;;  %v7944_v61 = vmul.f32 %v7880_v37, %v16184_v24  ;;  %v7739_v46 = vmul.f32 0.5, %v16009_v54 }
0x16b6   : > { %v8296_v56 = vpack.c.bf16 %v8249_v13, %v8248_v26  ;;  %v8186_v27 = vadd.f32 1.0, %v16098_v51  ;;  %v8187_v55 = vadd.f32 1.0, %v16114_v49  ;;  %v7883_v8 = vmul.f32 %v7819_v4, %v16203_v2 }
0x16b7   : > { %v8069_v16 = vmul.f32 0.7978846, %v8005_v31  ;;  %v8074_v32 = vmul.f32 0.7978846, %v8010_v28  ;;  %v8008_v60 = vadd.f32 %v7944_v61, %v16184_v24  ;;  %v16225_v3 = vpop.f32.mrb[192].mxu0  ;;  %v16232_v54 = vadd.f32 %v16081_v38, %v16160_v59 }
0x16b8   : > { %v16227_v22 = vpop.eup %10849  ;;  %9996 = vmatprep.mubr.msk.bf16.mxu1 %vm702_vm0, %v8296_v56  ;;  %v8250_v35 = vmul.f32 %v8186_v27, %v7738_v17  ;;  %v8251_v21 = vmul.f32 %v8187_v55, %v7739_v46  ;;  %v16235_v51 = vadd.f32 %v16081_v38, %v9946_v14  ;;  %v7673_v49 = vpop.f32.mrb[193].mxu0  ;;  %10855 = vtanh.f32 %v8071_v23 }
0x16b9   : > { %v8072_v9 = vmul.f32 0.7978846, %v8008_v60  ;;  %v7947_v5 = vmul.f32 %v7883_v8, %v16203_v2  ;;  %v16239_v18 = vadd.f32 %v16081_v38, %v7657_v25  ;;  %v16241_v33 = vpop.f32.mrb[194].mxu0  ;;  %10857 = vtanh.f32 %v8069_v16 }
0x16ba   : > { %v16243_v40 = vpop.eup %10851  ;;  %v8297_v43 = vpack.c.bf16 %v8251_v21, %v8250_v35  ;;  %v7817_v59 = vmul.f32 0.044715, %v16232_v54  ;;  %v7822_v50 = vmul.f32 0.044715, %v16235_v51  ;;  %v16247_v14 = vpop.f32.mrb[195].mxu0  ;;  %10859 = vtanh.f32 %v8074_v32 }
0x16bb   : > { %v8011_v11 = vadd.f32 %v7947_v5, %v16203_v2  ;;  %v7820_v37 = vmul.f32 0.044715, %v16239_v18  ;;  %v16251_v23 = vpop.eup %10853  ;;  %v7740_v13 = vmul.f32 0.5, %v16039_v12  ;;  %v8188_v17 = vadd.f32 1.0, %v16141_v63 }
0x16bc   : > { %9997 = vmatmul.mubr.msk.bf16.gmra.mrb[164].mxu1 %vm702_vm0, %v8297_v43  ;;  %v7881_v25 = vmul.f32 %v7817_v59, %v16232_v54  ;;  %v7886_v26 = vmul.f32 %v7822_v50, %v16235_v51  ;;  %v7741_v28 = vmul.f32 0.5, %v16066_v48  ;;  %v8189_v61 = vadd.f32 1.0, %v16168_v19 }
0x16bd   : > { %v7884_v31 = vmul.f32 %v7820_v37, %v16239_v18  ;;  %v16262_v4 = vadd.f32 %v16081_v38, %v9947_v29  ;;  %10861 = vtanh.f32 %v8072_v9  ;;  %v8075_v56 = vmul.f32 0.7978846, %v8011_v11 }
0x16be   : > { %v7945_v46 = vmul.f32 %v7881_v25, %v16232_v54  ;;  %v7950_v27 = vmul.f32 %v7886_v26, %v16235_v51  ;;  %v8252_v12 = vmul.f32 %v8188_v17, %v7740_v13  ;;  %v8253_v16 = vmul.f32 %v8189_v61, %v7741_v28 }
0x16bf   : > { %v7948_v55 = vmul.f32 %v7884_v31, %v16239_v18  ;;  %v7823_v63 = vmul.f32 0.044715, %v16262_v4  ;;  %v7742_v19 = vmul.f32 0.5, %v16032_v41  ;;  %v7743_v29 = vmul.f32 0.5, %v16048_v42 }
0x16c0   : > { %v8009_v32 = vadd.f32 %v7945_v46, %v16232_v54  ;;  %v8014_v48 = vadd.f32 %v7950_v27, %v16235_v51  ;;  %v8298_v8 = vpack.c.bf16 %v8253_v16, %v8252_v12  ;;  %v8190_v21 = vadd.f32 1.0, %v16136_v44 }
0x16c1   : > { %v8012_v60 = vadd.f32 %v7948_v55, %v16239_v18  ;;  %v7887_v35 = vmul.f32 %v7823_v63, %v16262_v4  ;;  %v8191_v43 = vadd.f32 1.0, %v16153_v45  ;;  %v16278_v59 = vadd.f32 %v16081_v38, %v16205_v1 }
0x16c2   : > { %v8073_v9 = vmul.f32 0.7978846, %v8009_v32  ;;  %v8078_v5 = vmul.f32 0.7978846, %v8014_v48  ;;  %v16280_v50 = vpop.eup %10855  ;;  %10863 = vtanh.f32 %v8075_v56  ;;  %10000 = vmatprep.mubr.msk.bf16.mxu1 %vm702_vm0, %v8298_v8  ;;  %v8254_v37 = vmul.f32 %v8190_v21, %v7742_v19 }
0x16c3   : > { %v8076_v41 = vmul.f32 0.7978846, %v8012_v60  ;;  %v7951_v42 = vmul.f32 %v7887_v35, %v16262_v4  ;;  %v10858_v11 = vpop.eup %10857  ;;  %v8255_v44 = vmul.f32 %v8191_v43, %v7743_v29  ;;  %v7821_v25 = vmul.f32 0.044715, %v16278_v59 }
0x16c4   : > { %10865 = vtanh.f32 %v8073_v9  ;;  %v16285_v26 = vpop.eup %10859  ;;  %v16290_v1 = vadd.f32 %v16081_v38, %v16225_v3  ;;  %v16294_v31 = vadd.f32 %v16081_v38, %v7673_v49  ;;  %v7744_v56 = vmul.f32 0.5, %v16087_v53 }
0x16c5   : > { %10867 = vtanh.f32 %v8078_v5  ;;  %v8015_v45 = vadd.f32 %v7951_v42, %v16262_v4  ;;  %v8299_v13 = vpack.c.bf16 %v8255_v44, %v8254_v37  ;;  %v7885_v17 = vmul.f32 %v7821_v25, %v16278_v59 }
0x16c6   : > { %10869 = vtanh.f32 %v8076_v41  ;;  %v7826_v61 = vmul.f32 0.044715, %v16290_v1  ;;  %v7745_v46 = vmul.f32 0.5, %v16122_v52  ;;  %v7824_v55 = vmul.f32 0.044715, %v16294_v31 }
0x16c7   : > { %v8079_v28 = vmul.f32 0.7978846, %v8015_v45  ;;  %v10862_v27 = vpop.eup %10861  ;;  %10001 = vmatmul.mubr.msk.bf16.gmra.mrb[168].mxu1 %vm702_vm0, %v8299_v13  ;;  %v7949_v3 = vmul.f32 %v7885_v17, %v16278_v59  ;;  %v8192_v12 = vadd.f32 1.0, %v16186_v62  ;;  %v8193_v16 = vadd.f32 1.0, %v16227_v22 }
0x16c8   : > { %v7890_v49 = vmul.f32 %v7826_v61, %v16290_v1  ;;  %v16307_v63 = vadd.f32 %v16081_v38, %v16241_v33  ;;  %v7746_v53 = vmul.f32 0.5, %v16084_v10  ;;  %v7888_v32 = vmul.f32 %v7824_v55, %v16294_v31 }
0x16c9   : > { %10871 = vtanh.f32 %v8079_v28  ;;  %v8013_v52 = vadd.f32 %v7949_v3, %v16278_v59  ;;  %v8256_v48 = vmul.f32 %v8192_v12, %v7744_v56  ;;  %v8257_v19 = vmul.f32 %v8193_v16, %v7745_v46 }
0x16ca   : > { %v7954_v29 = vmul.f32 %v7890_v49, %v16290_v1  ;;  %v7827_v62 = vmul.f32 0.044715, %v16307_v63  ;;  %v7747_v22 = vmul.f32 0.5, %v16104_v47  ;;  %v8194_v60 = vadd.f32 1.0, %v16179_v6 }
0x16cb   : > { %v8077_v8 = vmul.f32 0.7978846, %v8013_v52  ;;  %v7952_v33 = vmul.f32 %v7888_v32, %v16294_v31  ;;  %v8300_v35 = vpack.c.bf16 %v8257_v19, %v8256_v48  ;;  %v8195_v10 = vadd.f32 1.0, %v16209_v7 }
0x16cc   : > { %v10864_v21 = vpop.eup %10863  ;;  %v8018_v9 = vadd.f32 %v7954_v29, %v16290_v1  ;;  %v7891_v5 = vmul.f32 %v7827_v62, %v16307_v63  ;;  %v8258_v43 = vmul.f32 %v8194_v60, %v7746_v53  ;;  %v16322_v41 = vadd.f32 %v16081_v38, %v16247_v14 }
0x16cd   : > { %10873 = vtanh.f32 %v8077_v8  ;;  %v8016_v47 = vadd.f32 %v7952_v33, %v16294_v31  ;;  %10004 = vmatprep.mubr.msk.bf16.mxu1 %vm702_vm0, %v8300_v35  ;;  %v8259_v6 = vmul.f32 %v8195_v10, %v7747_v22  ;;  %v7748_v37 = vmul.f32 0.5, %v16133_v57 }
0x16ce   : > { %v10866_v42 = vpop.eup %10865  ;;  %v8082_v44 = vmul.f32 0.7978846, %v8018_v9  ;;  %v7955_v25 = vmul.f32 %v7891_v5, %v16307_v63  ;;  %v7825_v45 = vmul.f32 0.044715, %v16322_v41  ;;  %v7749_v13 = vmul.f32 0.5, %v16173_v34 }
0x16cf   : > { %v10868_v7 = vpop.eup %10867  ;;  %v8080_v14 = vmul.f32 0.7978846, %v8016_v47  ;;  %v8301_v28 = vpack.c.bf16 %v8259_v6, %v8258_v43  ;;  %v8196_v61 = vadd.f32 1.0, %v16251_v23  ;;  %v8197_v56 = vadd.f32 1.0, %v10858_v11 }
0x16d0   : > { %v10870_v17 = vpop.eup %10869  ;;  %10875 = vtanh.f32 %v8082_v44  ;;  %v8019_v46 = vadd.f32 %v7955_v25, %v16307_v63  ;;  %v7889_v3 = vmul.f32 %v7825_v45, %v16322_v41  ;;  %v7750_v57 = vmul.f32 0.5, %v16130_v39 }
0x16d1   : > { %10877 = vtanh.f32 %v8080_v14  ;;  %10005 = vmatmul.mubr.msk.bf16.gmra.mrb[172].mxu1 %vm702_vm0, %v8301_v28  ;;  %v8260_v55 = vmul.f32 %v8196_v61, %v7748_v37  ;;  %v8261_v12 = vmul.f32 %v8197_v56, %v7749_v13  ;;  %v7751_v34 = vmul.f32 0.5, %v16151_v36 }
0x16d2   : > { %v8083_v49 = vmul.f32 0.7978846, %v8019_v46  ;;  %v7953_v53 = vmul.f32 %v7889_v3, %v16322_v41  ;;  %v8198_v23 = vadd.f32 1.0, %v16243_v40  ;;  %v8199_v11 = vadd.f32 1.0, %v16280_v50 }
0x16d3   : > { %v10872_v16 = vpop.eup %10871  ;;  %v8302_v52 = vpack.c.bf16 %v8261_v12, %v8260_v55  ;;  %v7752_v32 = vmul.f32 0.5, %v16184_v24  ;;  %v7753_v39 = vmul.f32 0.5, %v16232_v54  ;;  %v8200_v48 = vadd.f32 1.0, %v10862_v27 }
0x16d4   : > { %10879 = vtanh.f32 %v8083_v49  ;;  %v8017_v19 = vadd.f32 %v7953_v53, %v16322_v41  ;;  %v8262_v29 = vmul.f32 %v8198_v23, %v7750_v57  ;;  %v8263_v62 = vmul.f32 %v8199_v11, %v7751_v34 }
0x16d5   : > { %10008 = vmatprep.mubr.msk.bf16.mxu1 %vm702_vm0, %v8302_v52  ;;  %v8201_v36 = vadd.f32 1.0, %v10866_v42  ;;  %v8264_v22 = vmul.f32 %v8200_v48, %v7752_v32  ;;  %v7754_v60 = vmul.f32 0.5, %v16176_v20  ;;  %v7755_v40 = vmul.f32 0.5, %v16203_v2 }
0x16d6   : > { %v8081_v50 = vmul.f32 0.7978846, %v8017_v19  ;;  %v8303_v8 = vpack.c.bf16 %v8263_v62, %v8262_v29  ;;  %v8202_v24 = vadd.f32 1.0, %v16285_v26  ;;  %v8203_v33 = vadd.f32 1.0, %v10864_v21 }
0x16d7   : > { %v10874_v54 = vpop.eup %10873  ;;  %v8265_v27 = vmul.f32 %v8201_v36, %v7753_v39  ;;  %v7756_v35 = vmul.f32 0.5, %v16239_v18  ;;  %v7757_v10 = vmul.f32 0.5, %v16278_v59  ;;  %v8204_v9 = vadd.f32 1.0, %v10870_v17 }
0x16d8   : > { %10881 = vtanh.f32 %v8081_v50  ;;  %v8266_v5 = vmul.f32 %v8202_v24, %v7754_v60  ;;  %v8267_v43 = vmul.f32 %v8203_v33, %v7755_v40  ;;  %v8205_v42 = vadd.f32 1.0, %v10874_v54 }
0x16d9   : > { %10009 = vmatmul.mubr.msk.bf16.gmra.mrb[176].mxu1 %vm702_vm0, %v8303_v8  ;;  %v8304_v20 = vpack.c.bf16 %v8265_v27, %v8264_v22  ;;  %v8268_v2 = vmul.f32 %v8204_v9, %v7756_v35  ;;  %v7758_v47 = vmul.f32 0.5, %v16235_v51  ;;  %v7759_v26 = vmul.f32 0.5, %v16262_v4  ;;  %v16372_v35 = vld [vmem:[%s16814_s9] ss:$0 sm:$0xff] }
0x16da   : > { %v10876_v21 = vpop.eup %10875  ;;  %v8305_v6 = vpack.c.bf16 %v8267_v43, %v8266_v5  ;;  %v8269_v37 = vmul.f32 %v8205_v42, %v7757_v10  ;;  %v8206_v44 = vadd.f32 1.0, %v10868_v7  ;;  %v8207_v18 = vadd.f32 1.0, %v10872_v16 }
0x16db   : > { %v10878_v25 = vpop.eup %10877  ;;  %10012 = vmatprep.mubr.msk.bf16.mxu1 %vm702_vm0, %v8304_v20  ;;  %v8210_v17 = vadd.f32 1.0, %v10876_v21  ;;  %v7762_v61 = vmul.f32 0.5, %v16290_v1  ;;  %v7763_v51 = vmul.f32 0.5, %v16307_v63  ;;  %v7760_v57 = vmul.f32 0.5, %v16294_v31 }
0x16dc   : > { %v8306_v59 = vpack.c.bf16 %v8269_v37, %v8268_v2  ;;  %v8270_v45 = vmul.f32 %v8206_v44, %v7758_v47  ;;  %v8271_v13 = vmul.f32 %v8207_v18, %v7759_v26  ;;  %v8208_v4 = vadd.f32 1.0, %v10878_v25 }
0x16dd   : > { %v8274_v46 = vmul.f32 %v8210_v17, %v7762_v61  ;;  %v7761_v55 = vmul.f32 0.5, %v16322_v41  ;;  %v8506_v17 = vadd.f32 %v16193_v58, %v16372_v35  ;;  %v8509_v61 = vadd.f32 %v16212_v30, %v16372_v35 }
0x16de   : > { %v10880_v14 = vpop.eup %10879  ;;  %v8307_v28 = vpack.c.bf16 %v8271_v13, %v8270_v45  ;;  %v8272_v16 = vmul.f32 %v8208_v4, %v7760_v57  ;;  %v8498_v45 = vadd.f32 %v16372_v35, %v16207_v15  ;;  %v8501_v13 = vadd.f32 %v16372_v35, %v16218_v0 }
0x16df   : > { %v8211_v56 = vadd.f32 1.0, %v10880_v14 }
0x16e1   : > { %10013 = vmatmul.mubr.msk.bf16.gmra.mrb[180].mxu1 %vm702_vm0, %v8305_v6  ;;  %v8275_v7 = vmul.f32 %v8211_v56, %v7763_v51 }
0x16e2   : > { %v10882_v3 = vpop.eup %10881  ;;  %10016 = vmatprep.mubr.msk.bf16.mxu1 %vm702_vm0, %v8306_v59 }
0x16e3   : > { %v8209_v12 = vadd.f32 1.0, %v10882_v3  ;;  %v8309_v34 = vpack.c.bf16 %v8275_v7, %v8274_v46 }
0x16e5   : > { %v8273_v49 = vmul.f32 %v8209_v12, %v7761_v55 }
0x16e7   : > { %v8308_v1 = vpack.c.bf16 %v8273_v49, %v8272_v16 }
0x16e9   : > { %10017 = vmatmul.mubr.msk.bf16.gmra.mrb[184].mxu1 %vm702_vm0, %v8307_v28 }
0x16ea   : > { %v9954_v63 = vpop.f32.mrb[196].mxu0  ;;  %v16359_v53 = vpop.f32.mrb[140].mxu1  ;;  %10020 = vmatprep.mubr.msk.bf16.mxu1 %vm702_vm0, %v8308_v1 }
0x16eb   : > { %v7698_v23 = vadd.f32 %v16081_v38, %v9954_v63  ;;  %v7689_v11 = vpop.f32.mrb[197].mxu0  ;;  %v8513_v52 = vpop.f32.mrb[141].mxu1  ;;  %v8522_v1 = vadd.f32 %v16359_v53, %v16372_v35 }
0x16ec   : > { %v7690_v31 = vadd.f32 %v16081_v38, %v7689_v11  ;;  %v9955_v32 = vpop.f32.mrb[198].mxu0  ;;  %v16364_v41 = vpop.f32.mrb[142].mxu1  ;;  %v8514_v0 = vadd.f32 %v16372_v35, %v8513_v52 }
0x16ed   : > { %v7830_v39 = vmul.f32 0.044715, %v7698_v23  ;;  %v7701_v48 = vadd.f32 %v16081_v38, %v9955_v32  ;;  %v7692_v19 = vpop.f32.mrb[199].mxu0  ;;  %v8516_v29 = vpop.f32.mrb[143].mxu1  ;;  %v7766_v46 = vmul.f32 0.5, %v7698_v23  ;;  %v8525_v11 = vadd.f32 %v16364_v41, %v16372_v35 }
0x16ee   : > { %v7828_v62 = vmul.f32 0.044715, %v7690_v31  ;;  %v7693_v36 = vadd.f32 %v16081_v38, %v7692_v19  ;;  %v7764_v3 = vmul.f32 0.5, %v7690_v31  ;;  %v8517_v12 = vadd.f32 %v16372_v35, %v8516_v29 }
0x16ef   : > { %v7894_v22 = vmul.f32 %v7830_v39, %v7698_v23  ;;  %v7831_v60 = vmul.f32 0.044715, %v7701_v48  ;;  %v7767_v7 = vmul.f32 0.5, %v7701_v48 }
0x16f0   : > { %v7892_v40 = vmul.f32 %v7828_v62, %v7690_v31  ;;  %v7829_v50 = vmul.f32 0.044715, %v7693_v36  ;;  %v7765_v57 = vmul.f32 0.5, %v7693_v36 }
0x16f1   : > { %v7958_v8 = vmul.f32 %v7894_v22, %v7698_v23  ;;  %v7895_v24 = vmul.f32 %v7831_v60, %v7701_v48  ;;  %10021 = vmatmul.mubr.msk.bf16.gmra.mrb[188].mxu1 %vm702_vm0, %v8309_v34 }
0x16f2   : > { %v7956_v33 = vmul.f32 %v7892_v40, %v7690_v31  ;;  %v7893_v54 = vmul.f32 %v7829_v50, %v7693_v36  ;;  %v9966_v27 = vpop.f32.mrb[200].mxu0 }
0x16f3   : > { %v8022_v10 = vadd.f32 %v7958_v8, %v7698_v23  ;;  %v7959_v9 = vmul.f32 %v7895_v24, %v7701_v48  ;;  %v8481_v5 = vpop.f32.mrb[201].mxu0  ;;  %v8490_v25 = vadd.f32 %v9966_v27, %v16372_v35 }
0x16f4   : > { %v8020_v38 = vadd.f32 %v7956_v33, %v7690_v31  ;;  %v7957_v43 = vmul.f32 %v7893_v54, %v7693_v36  ;;  %v8482_v42 = vadd.f32 %v16372_v35, %v8481_v5  ;;  %v9967_v20 = vpop.f32.mrb[202].mxu0 }
0x16f5   : > { %v8086_v2 = vmul.f32 0.7978846, %v8022_v10  ;;  %v8023_v47 = vadd.f32 %v7959_v9, %v7701_v48  ;;  %v8484_v26 = vpop.f32.mrb[203].mxu0  ;;  %v8493_v59 = vadd.f32 %v9967_v20, %v16372_v35 }
0x16f6   : > { %v8084_v21 = vmul.f32 0.7978846, %v8020_v38  ;;  %v8021_v6 = vadd.f32 %v7957_v43, %v7693_v36  ;;  %v8485_v37 = vadd.f32 %v16372_v35, %v8484_v26  ;;  %8800 = vrot.lane.b32.xlu0 %v8482_v42, %s10902_s23 }
0x16f7   : > { %10883 = vtanh.f32 %v8086_v2  ;;  %v8087_v44 = vmul.f32 0.7978846, %v8023_v47 }
0x16f8   : > { %10885 = vtanh.f32 %v8084_v21  ;;  %v8085_v18 = vmul.f32 0.7978846, %v8021_v6  ;;  %8802 = vrot.lane.b32.xlu1 %v8485_v37, %s10902_s23 }
0x16f9   : > { %10887 = vtanh.f32 %v8087_v44 }
0x16fa   : > { %10889 = vtanh.f32 %v8085_v18  ;;  %8804 = vrot.lane.b32.xlu0 %v8490_v25, %s10902_s23 }
0x16fc   : > { %8806 = vrot.lane.b32.xlu1 %v8493_v59, %s10902_s23 }
0x16fe   : > { %8808 = vrot.lane.b32.xlu0 %v8498_v45, %s10902_s23 }
0x1700   : > { %8810 = vrot.lane.b32.xlu1 %v8501_v13, %s10902_s23 }
0x1701   : > { %v10884_v14 = vpop.eup %10883 }
0x1702   : > { %v10886_v28 = vpop.eup %10885  ;;  %8812 = vrot.lane.b32.xlu0 %v8506_v17, %s10902_s23  ;;  %v8214_v15 = vadd.f32 1.0, %v10884_v14 }
0x1703   : > { %v10888_v51 = vpop.eup %10887  ;;  %v8212_v56 = vadd.f32 1.0, %v10886_v28 }
0x1704   : > { %v10890_v4 = vpop.eup %10889  ;;  %8814 = vrot.lane.b32.xlu1 %v8509_v61, %s10902_s23  ;;  %v8215_v58 = vadd.f32 1.0, %v10888_v51  ;;  %v8278_v30 = vmul.f32 %v8214_v15, %v7766_v46 }
0x1705   : > { %v8213_v55 = vadd.f32 1.0, %v10890_v4  ;;  %v8276_v16 = vmul.f32 %v8212_v56, %v7764_v3 }
0x1706   : > { %8816 = vrot.lane.b32.xlu0 %v8514_v0, %s10902_s23  ;;  %v8279_v34 = vmul.f32 %v8215_v58, %v7767_v7 }
0x1707   : > { %v8277_v49 = vmul.f32 %v8213_v55, %v7765_v57 }
0x1708   : > { %8818 = vrot.lane.b32.xlu1 %v8517_v12, %s10902_s23  ;;  %v8311_v63 = vpack.c.bf16 %v8279_v34, %v8278_v30 }
0x1709   : > { %v8310_v23 = vpack.c.bf16 %v8277_v49, %v8276_v16 }
0x170a   : > { %8820 = vrot.lane.b32.xlu0 %v8522_v1, %s10902_s23 }
0x170b   : > { %10024 = vmatprep.mubr.msk.bf16.mxu1 %vm702_vm0, %v8310_v23 }
0x170c   : > { %8822 = vrot.lane.b32.xlu1 %v8525_v11, %s10902_s23  ;;  %10025 = vmatmul.mubr.msk.bf16.gmra.mrb[192].mxu1 %vm702_vm0, %v8311_v63 }
0x1723   : > { %v9978_v52 = vpop.f32.mrb[144].mxu1 }
0x1724   : > { %v8529_v31 = vpop.f32.mrb[145].mxu1  ;;  %v8538_v41 = vadd.f32 %v9978_v52, %v16372_v35 }
0x1725   : > { %v8530_v32 = vadd.f32 %v16372_v35, %v8529_v31  ;;  %v9979_v53 = vpop.f32.mrb[146].mxu1 }
0x1726   : > { %v8532_v39 = vpop.f32.mrb[147].mxu1  ;;  %v8541_v19 = vadd.f32 %v9979_v53, %v16372_v35 }
0x1727   : > { %v8533_v48 = vadd.f32 %v16372_v35, %v8532_v39  ;;  %8824 = vrot.lane.b32.xlu0 %v8530_v32, %s10902_s23 }
0x1729   : > { %8826 = vrot.lane.b32.xlu1 %v8533_v48, %s10902_s23 }
0x172b   : > { %8828 = vrot.lane.b32.xlu0 %v8538_v41, %s10902_s23 }
0x172d   : > { %8830 = vrot.lane.b32.xlu1 %v8541_v19, %s10902_s23 }
0x1763   : > { %v9982_v29 = vpop.f32.mrb[148].mxu1 }
0x1764   : > { %v8545_v62 = vpop.f32.mrb[149].mxu1  ;;  %v8554_v50 = vadd.f32 %v9982_v29, %v16372_v35 }
0x1765   : > { %v8546_v36 = vadd.f32 %v16372_v35, %v8545_v62  ;;  %v9983_v22 = vpop.f32.mrb[150].mxu1 }
0x1766   : > { %v8548_v60 = vpop.f32.mrb[151].mxu1  ;;  %v8557_v8 = vadd.f32 %v9983_v22, %v16372_v35 }
0x1767   : > { %v8549_v40 = vadd.f32 %v16372_v35, %v8548_v60  ;;  %8832 = vrot.lane.b32.xlu0 %v8546_v36, %s10902_s23 }
0x1768   : > { %v16467_v52 = vpop.permute.xlu0 %8800 }
0x1769   : > { %8834 = vrot.lane.b32.xlu1 %v8549_v40, %s10902_s23 }
0x176a   : > { %v16471_v39 = vpop.permute.xlu1 %8802 }
0x176b   : > { %8836 = vrot.lane.b32.xlu0 %v8554_v50, %s10902_s23 }
0x176c   : > { %v16477_v62 = vpop.permute.xlu0 %8804 }
0x176d   : > { %8838 = vrot.lane.b32.xlu1 %v8557_v8, %s10902_s23 }
0x176e   : > { %v16481_v22 = vpop.permute.xlu1 %8806 }
0x176f   : > { %v9986_v24 = vpop.f32.mrb[152].mxu1 }
0x1770   : > { %v8561_v33 = vpop.f32.mrb[153].mxu1  ;;  %v8570_v5 = vadd.f32 %v9986_v24, %v16372_v35 }
0x1771   : > { %v8562_v54 = vadd.f32 %v16372_v35, %v8561_v33  ;;  %v9987_v27 = vpop.f32.mrb[154].mxu1 }
0x1772   : > { %v8564_v10 = vpop.f32.mrb[155].mxu1  ;;  %v8573_v38 = vadd.f32 %v9987_v27, %v16372_v35 }
0x1773   : > { %v8565_v9 = vadd.f32 %v16372_v35, %v8564_v10  ;;  %8840 = vrot.lane.b32.xlu0 %v8562_v54, %s10902_s23  ;;  %v16487_v54 = vpop.permute.xlu0 %8808  ;;  %v16491_v10 = vpop.permute.xlu1 %8810 }
0x1775   : > { %8842 = vrot.lane.b32.xlu1 %v8565_v9, %s10902_s23 }
0x1777   : > { %8844 = vrot.lane.b32.xlu0 %v8570_v5, %s10902_s23 }
0x1779   : > { %8846 = vrot.lane.b32.xlu1 %v8573_v38, %s10902_s23 }
0x177a   : > { %v9990_v43 = vpop.f32.mrb[156].mxu1 }
0x177b   : > { %v8577_v42 = vpop.f32.mrb[157].mxu1  ;;  %v8586_v21 = vadd.f32 %v9990_v43, %v16372_v35 }
0x177c   : > { %v8578_v20 = vadd.f32 %v16372_v35, %v8577_v42  ;;  %v9991_v2 = vpop.f32.mrb[158].mxu1  ;;  %v16497_v42 = vpop.permute.xlu0 %8812 }
0x177d   : > { %v8580_v47 = vpop.f32.mrb[159].mxu1  ;;  %v8589_v6 = vadd.f32 %v9991_v2, %v16372_v35 }
0x177e   : > { %v8581_v26 = vadd.f32 %v16372_v35, %v8580_v47  ;;  %8848 = vrot.lane.b32.xlu0 %v8578_v20, %s10902_s23 }
0x1780   : > { %8850 = vrot.lane.b32.xlu1 %v8581_v26, %s10902_s23  ;;  %v16501_v26 = vpop.permute.xlu1 %8814 }
0x1782   : > { %8852 = vrot.lane.b32.xlu0 %v8586_v21, %s10902_s23 }
0x1784   : > { %8854 = vrot.lane.b32.xlu1 %v8589_v6, %s10902_s23 }
0x1785   : > { %v9994_v37 = vpop.f32.mrb[160].mxu1 }
0x1786   : > { %v8593_v44 = vpop.f32.mrb[161].mxu1  ;;  %v8602_v13 = vadd.f32 %v9994_v37, %v16372_v35  ;;  %v8817_v37 = vpop.permute.xlu0 %8816 }
0x1787   : > { %v8594_v18 = vadd.f32 %v16372_v35, %v8593_v44  ;;  %v9995_v25 = vpop.f32.mrb[162].mxu1 }
0x1788   : > { %v8596_v59 = vpop.f32.mrb[163].mxu1  ;;  %v8605_v17 = vadd.f32 %v9995_v25, %v16372_v35 }
0x1789   : > { %v8597_v45 = vadd.f32 %v16372_v35, %v8596_v59  ;;  %8856 = vrot.lane.b32.xlu0 %v8594_v18, %s10902_s23  ;;  %v8819_v59 = vpop.permute.xlu1 %8818 }
0x178b   : > { %8858 = vrot.lane.b32.xlu1 %v8597_v45, %s10902_s23 }
0x178d   : > { %8860 = vrot.lane.b32.xlu0 %v8602_v13, %s10902_s23 }
0x178f   : > { %v9998_v14 = vpop.f32.mrb[164].mxu1  ;;  %8862 = vrot.lane.b32.xlu1 %v8605_v17, %s10902_s23 }
0x1790   : > { %v8609_v28 = vpop.f32.mrb[165].mxu1  ;;  %v8618_v4 = vadd.f32 %v9998_v14, %v16372_v35 }
0x1791   : > { %v8610_v61 = vadd.f32 %v16372_v35, %v8609_v28  ;;  %v9999_v15 = vpop.f32.mrb[166].mxu1  ;;  %v8821_v28 = vpop.permute.xlu0 %8820 }
0x1792   : > { %v8612_v51 = vpop.f32.mrb[167].mxu1  ;;  %v8621_v0 = vadd.f32 %v9999_v15, %v16372_v35  ;;  %v8823_v15 = vpop.permute.xlu1 %8822 }
0x1793   : > { %v8613_v56 = vadd.f32 %v16372_v35, %v8612_v51  ;;  %8864 = vrot.lane.b32.xlu0 %v8610_v61, %s10902_s23 }
0x1795   : > { %8866 = vrot.lane.b32.xlu1 %v8613_v56, %s10902_s23 }
0x1797   : > { %8868 = vrot.lane.b32.xlu0 %v8618_v4, %s10902_s23 }
0x1799   : > { %8870 = vrot.lane.b32.xlu1 %v8621_v0, %s10902_s23  ;;  %v8825_v56 = vpop.permute.xlu0 %8824 }
0x179a   : > { %v10002_v46 = vpop.f32.mrb[168].mxu1 }
0x179b   : > { %v8625_v7 = vpop.f32.mrb[169].mxu1  ;;  %v8634_v12 = vadd.f32 %v10002_v46, %v16372_v35  ;;  %v8827_v4 = vpop.permute.xlu1 %8826 }
0x179c   : > { %v8626_v58 = vadd.f32 %v16372_v35, %v8625_v7  ;;  %v10003_v3 = vpop.f32.mrb[170].mxu1 }
0x179d   : > { %v8628_v57 = vpop.f32.mrb[171].mxu1  ;;  %v8637_v30 = vadd.f32 %v10003_v3, %v16372_v35  ;;  %v8829_v0 = vpop.permute.xlu0 %8828 }
0x179e   : > { %v8629_v55 = vadd.f32 %v16372_v35, %v8628_v57  ;;  %8872 = vrot.lane.b32.xlu0 %v8626_v58, %s10902_s23 }
0x179f   : > { %v8831_v46 = vpop.permute.xlu1 %8830 }
0x17a0   : > { %8874 = vrot.lane.b32.xlu1 %v8629_v55, %s10902_s23 }
0x17a2   : > { %8876 = vrot.lane.b32.xlu0 %v8634_v12, %s10902_s23 }
0x17a4   : > { %v10006_v34 = vpop.f32.mrb[172].mxu1  ;;  %8878 = vrot.lane.b32.xlu1 %v8637_v30, %s10902_s23 }
0x17a5   : > { %v8641_v16 = vpop.f32.mrb[173].mxu1  ;;  %v8650_v11 = vadd.f32 %v10006_v34, %v16372_v35 }
0x17a6   : > { %v8642_v49 = vadd.f32 %v16372_v35, %v8641_v16  ;;  %v10007_v1 = vpop.f32.mrb[174].mxu1 }
0x17a7   : > { %v8644_v63 = vpop.f32.mrb[175].mxu1  ;;  %v8653_v31 = vadd.f32 %v10007_v1, %v16372_v35 }
0x17a8   : > { %v8645_v23 = vadd.f32 %v16372_v35, %v8644_v63  ;;  %8880 = vrot.lane.b32.xlu0 %v8642_v49, %s10902_s23 }
0x17aa   : > { %8882 = vrot.lane.b32.xlu1 %v8645_v23, %s10902_s23 }
0x17ac   : > { %v10010_v32 = vpop.f32.mrb[176].mxu1  ;;  %8884 = vrot.lane.b32.xlu0 %v8650_v11, %s10902_s23 }
0x17ad   : > { %v8657_v53 = vpop.f32.mrb[177].mxu1  ;;  %v8666_v36 = vadd.f32 %v10010_v32, %v16372_v35 }
0x17ae   : > { %v8658_v48 = vadd.f32 %v16372_v35, %v8657_v53  ;;  %v10011_v41 = vpop.f32.mrb[178].mxu1  ;;  %8886 = vrot.lane.b32.xlu1 %v8653_v31, %s10902_s23  ;;  %v17857_v31 = vld [vmem:[#allocation53_spill] sm:$0xff] }
0x17af   : > { %v8660_v19 = vpop.f32.mrb[179].mxu1  ;;  %v8669_v60 = vadd.f32 %v10011_v41, %v16372_v35  ;;  %v8992_v32 = vadd.f32 %v16467_v52, %v17857_v31 }
0x17b0   : > { %v8661_v29 = vadd.f32 %v16372_v35, %v8660_v19  ;;  %8888 = vrot.lane.b32.xlu0 %v8658_v48, %s10902_s23  ;;  %v17858_v48 = vld [vmem:[#allocation55_spill] sm:$0xff] }
0x17b1   : > { %v8993_v41 = vadd.f32 %v16471_v39, %v17858_v48 }
0x17b2   : > { %8890 = vrot.lane.b32.xlu1 %v8661_v29, %s10902_s23  ;;  %v17859_v29 = vld [vmem:[#allocation110_spill] sm:$0xff] }
0x17b4   : > { %v10014_v40 = vpop.f32.mrb[180].mxu1  ;;  %8892 = vrot.lane.b32.xlu0 %v8666_v36, %s10902_s23  ;;  %v8994_v36 = vadd.f32 %v16477_v62, %v17859_v29  ;;  %v17863_v62 = vld [vmem:[#allocation18_spill] sm:$0xff] }
0x17b5   : > { %v8673_v50 = vpop.f32.mrb[181].mxu1  ;;  %v8682_v9 = vadd.f32 %v10014_v40, %v16372_v35  ;;  %v17861_v40 = vld [vmem:[#allocation26_spill] sm:$0xff] }
0x17b6   : > { %v8674_v8 = vadd.f32 %v16372_v35, %v8673_v50  ;;  %v10015_v24 = vpop.f32.mrb[182].mxu1  ;;  %8894 = vrot.lane.b32.xlu1 %v8669_v60, %s10902_s23  ;;  %v8996_v50 = vadd.f32 %v16487_v54, %v17861_v40  ;;  %v17865_v54 = vld [vmem:[#allocation59_spill] sm:$0xff] }
0x17b7   : > { %v8676_v33 = vpop.f32.mrb[183].mxu1  ;;  %v8685_v5 = vadd.f32 %v10015_v24, %v16372_v35 }
0x17b8   : > { %v8677_v27 = vadd.f32 %v16372_v35, %v8676_v33  ;;  %8896 = vrot.lane.b32.xlu0 %v8674_v8, %s10902_s23  ;;  %v17862_v8 = vld [vmem:[#allocation24_spill] sm:$0xff]  ;;  %v8998_v33 = vadd.f32 %v16497_v42, %v17863_v62 }
0x17b9   : > { %v8997_v24 = vadd.f32 %v16491_v10, %v17862_v8  ;;  %v17885_v8 = vld [vmem:[#allocation63_spill] sm:$0xff] }
0x17ba   : > { %8898 = vrot.lane.b32.xlu1 %v8677_v27, %s10902_s23 }
0x17bc   : > { %v10018_v38 = vpop.f32.mrb[184].mxu1  ;;  %8900 = vrot.lane.b32.xlu0 %v8682_v9, %s10902_s23 }
0x17bd   : > { %v8689_v43 = vpop.f32.mrb[185].mxu1  ;;  %v8698_v6 = vadd.f32 %v10018_v38, %v16372_v35  ;;  %v9000_v38 = vadd.f32 %v8817_v37, %v17865_v54 }
0x17be   : > { %v8690_v20 = vadd.f32 %v16372_v35, %v8689_v43  ;;  %v10019_v2 = vpop.f32.mrb[186].mxu1  ;;  %8902 = vrot.lane.b32.xlu1 %v8685_v5, %s10902_s23  ;;  %v17866_v43 = vld [vmem:[#allocation65_spill] sm:$0xff] }
0x17bf   : > { %v8692_v47 = vpop.f32.mrb[187].mxu1  ;;  %v8701_v44 = vadd.f32 %v10019_v2, %v16372_v35  ;;  %v9001_v10 = vadd.f32 %v8819_v59, %v17866_v43  ;;  %v17867_v2 = vld [vmem:[#allocation35_spill] sm:$0xff] }
0x17c0   : > { %v8693_v21 = vadd.f32 %v16372_v35, %v8692_v47  ;;  %8904 = vrot.lane.b32.xlu0 %v8690_v20, %s10902_s23  ;;  %v9002_v42 = vadd.f32 %v8821_v28, %v17867_v2 }
0x17c2   : > { %8906 = vrot.lane.b32.xlu1 %v8693_v21, %s10902_s23  ;;  %v17868_v21 = vld [vmem:[#allocation33_spill] sm:$0xff] }
0x17c4   : > { %v10022_v18 = vpop.f32.mrb[188].mxu1  ;;  %8908 = vrot.lane.b32.xlu0 %v8698_v6, %s10902_s23  ;;  %v9003_v6 = vadd.f32 %v8823_v15, %v17868_v21  ;;  %v17873_v15 = vld [vmem:[#allocation78_spill] sm:$0xff] }
0x17c5   : > { %v8705_v25 = vpop.f32.mrb[189].mxu1  ;;  %v8714_v61 = vadd.f32 %v10022_v18, %v16372_v35 }
0x17c6   : > { %v8706_v45 = vadd.f32 %v16372_v35, %v8705_v25  ;;  %v10023_v13 = vpop.f32.mrb[190].mxu1  ;;  %8910 = vrot.lane.b32.xlu1 %v8701_v44, %s10902_s23  ;;  %v17869_v44 = vld [vmem:[#allocation73_spill] sm:$0xff]  ;;  %v17870_v25 = vld [vmem:[#allocation136_spill] sm:$0xff] }
0x17c7   : > { %v8708_v17 = vpop.f32.mrb[191].mxu1  ;;  %v8717_v51 = vadd.f32 %v10023_v13, %v16372_v35  ;;  %v9004_v18 = vadd.f32 %v8825_v56, %v17869_v44  ;;  %v9005_v59 = vadd.f32 %v8827_v4, %v17870_v25  ;;  %v17874_v56 = vld [vmem:[#allocation6_spill] sm:$0xff] }
0x17c8   : > { %v8709_v14 = vadd.f32 %v16372_v35, %v8708_v17  ;;  %8912 = vrot.lane.b32.xlu0 %v8706_v45, %s10902_s23  ;;  %v17871_v45 = vld [vmem:[#allocation62_spill] sm:$0xff] }
0x17c9   : > { %v9006_v13 = vadd.f32 %v8829_v0, %v17871_v45  ;;  %v17875_v0 = vld [vmem:[#allocation5_spill] sm:$0xff] }
0x17ca   : > { %8914 = vrot.lane.b32.xlu1 %v8709_v14, %s10902_s23  ;;  %v17872_v14 = vld [vmem:[#allocation69_spill] sm:$0xff] }
0x17cb   : > { %v9007_v28 = vadd.f32 %v8831_v46, %v17872_v14  ;;  %v17876_v46 = vld [vmem:[#allocation71_spill] sm:$0xff] }
0x17cc   : > { %8916 = vrot.lane.b32.xlu0 %v8714_v61, %s10902_s23 }
0x17ce   : > { %8918 = vrot.lane.b32.xlu1 %v8717_v51, %s10902_s23 }
0x17d9   : > { %v8833_v7 = vpop.permute.xlu0 %8832 }
0x17da   : > { %v9008_v51 = vadd.f32 %v8833_v7, %v17873_v15  ;;  %v17877_v7 = vld [vmem:[#allocation121_spill] sm:$0xff] }
0x17db   : > { %v8835_v58 = vpop.permute.xlu1 %8834  ;;  %v17889_v15 = vld [vmem:[#allocation149_spill] sm:$0xff] }
0x17dc   : > { %v9009_v4 = vadd.f32 %v8835_v58, %v17874_v56  ;;  %v17878_v58 = vld [vmem:[#allocation150_spill] sm:$0xff] }
0x17dd   : > { %v16518_v3 = vpop.permute.xlu0 %8836 }
0x17df   : > { %v10026_v57 = vpop.f32.mrb[192].mxu1  ;;  %v16520_v12 = vpop.permute.xlu1 %8838 }
0x17e0   : > { %v8721_v55 = vpop.f32.mrb[193].mxu1  ;;  %v8730_v63 = vadd.f32 %v10026_v57, %v16372_v35 }
0x17e1   : > { %v8722_v30 = vadd.f32 %v16372_v35, %v8721_v55  ;;  %v10027_v34 = vpop.f32.mrb[194].mxu1  ;;  %v9010_v55 = vadd.f32 %v16518_v3, %v17875_v0  ;;  %v17879_v3 = vld [vmem:[#allocation83_spill] sm:$0xff] }
0x17e2   : > { %v8724_v16 = vpop.f32.mrb[195].mxu1  ;;  %v8733_v11 = vadd.f32 %v10027_v34, %v16372_v35  ;;  %v9011_v34 = vadd.f32 %v16520_v12, %v17876_v46  ;;  %v17880_v12 = vld [vmem:[#allocation80_spill] sm:$0xff] }
0x17e3   : > { %v8725_v49 = vadd.f32 %v16372_v35, %v8724_v16  ;;  %8920 = vrot.lane.b32.xlu0 %v8722_v30, %s10902_s23  ;;  %v17860_v35 = vld [vmem:[#allocation50_spill] sm:$0xff] }
0x17e4   : > { %v8995_v60 = vadd.f32 %v16481_v22, %v17860_v35  ;;  %v17864_v22 = vld [vmem:[#allocation23_spill] sm:$0xff] }
0x17e5   : > { %v8841_v1 = vpop.permute.xlu0 %8840  ;;  %8922 = vrot.lane.b32.xlu1 %v8725_v49, %s10902_s23  ;;  %v8999_v9 = vadd.f32 %v16501_v26, %v17864_v22 }
0x17e6   : > { %v9012_v16 = vadd.f32 %v8841_v1, %v17877_v7  ;;  %v17881_v1 = vld [vmem:[#allocation20_spill] sm:$0xff] }
0x17e7   : > { %v8843_v23 = vpop.permute.xlu1 %8842  ;;  %8924 = vrot.lane.b32.xlu0 %v8730_v63, %s10902_s23 }
0x17e8   : > { %v9013_v63 = vadd.f32 %v8843_v23, %v17878_v58  ;;  %v17882_v23 = vld [vmem:[#allocation129_spill] sm:$0xff]  ;;  %v17892_v58 = vld [vmem:[#allocation148_spill] sm:$0xff] }
0x17e9   : > { %8926 = vrot.lane.b32.xlu1 %v8733_v11, %s10902_s23  ;;  %v8845_v53 = vpop.permute.xlu0 %8844 }
0x17ea   : > { %v9014_v31 = vadd.f32 %v8845_v53, %v17879_v3  ;;  %v17883_v53 = vld [vmem:[#allocation151_spill] sm:$0xff] }
0x17eb   : > { %9088 = vrot.lane.b32.xlu0 %v8992_v32, %s10902_s23  ;;  %v8847_v19 = vpop.permute.xlu1 %8846 }
0x17ec   : > { %v9015_v48 = vadd.f32 %v8847_v19, %v17880_v12  ;;  %v17884_v19 = vld [vmem:[#allocation15_spill] sm:$0xff] }
0x17ed   : > { %9090 = vrot.lane.b32.xlu1 %v8993_v41, %s10902_s23 }
0x17ef   : > { %9092 = vrot.lane.b32.xlu0 %v8994_v36, %s10902_s23 }
0x17f0   : > { %v8849_v52 = vpop.permute.xlu0 %8848 }
0x17f1   : > { %9094 = vrot.lane.b32.xlu1 %v8995_v60, %s10902_s23  ;;  %v9016_v29 = vadd.f32 %v8849_v52, %v17881_v1  ;;  %v17894_v1 = vld [vmem:[#allocation152_spill] sm:$0xff] }
0x17f2   : > { %v8851_v39 = vpop.permute.xlu1 %8850 }
0x17f3   : > { %9096 = vrot.lane.b32.xlu0 %v8996_v50, %s10902_s23  ;;  %v9017_v36 = vadd.f32 %v8851_v39, %v17882_v23  ;;  %v17886_v39 = vld [vmem:[#allocation74_spill] sm:$0xff] }
0x17f4   : > { %v8853_v27 = vpop.permute.xlu0 %8852 }
0x17f5   : > { %9098 = vrot.lane.b32.xlu1 %v8997_v24, %s10902_s23  ;;  %v9018_v60 = vadd.f32 %v8853_v27, %v17883_v53  ;;  %v17887_v27 = vld [vmem:[#allocation135_spill] sm:$0xff] }
0x17f6   : > { %v8855_v5 = vpop.permute.xlu1 %8854 }
0x17f7   : > { %9100 = vrot.lane.b32.xlu0 %v8998_v33, %s10902_s23  ;;  %v9019_v50 = vadd.f32 %v8855_v5, %v17884_v19  ;;  %v17896_v19 = vld [vmem:[#allocation154_spill] sm:$0xff] }
0x17f9   : > { %9102 = vrot.lane.b32.xlu1 %v8999_v9, %s10902_s23  ;;  %v17888_v9 = vld [vmem:[#allocation155_spill] sm:$0xff] }
0x17fb   : > { %v8857_v20 = vpop.permute.xlu0 %8856  ;;  %9104 = vrot.lane.b32.xlu0 %v9000_v38, %s10902_s23 }
0x17fc   : > { %v9020_v52 = vadd.f32 %v8857_v20, %v17885_v8 }
0x17fd   : > { %v8859_v47 = vpop.permute.xlu1 %8858  ;;  %9106 = vrot.lane.b32.xlu1 %v9001_v10, %s10902_s23 }
0x17fe   : > { %v9021_v62 = vadd.f32 %v8859_v47, %v17886_v39 }
0x17ff   : > { %v8861_v26 = vpop.permute.xlu0 %8860  ;;  %9108 = vrot.lane.b32.xlu0 %v9002_v42, %s10902_s23 }
0x1800   : > { %v9022_v22 = vadd.f32 %v8861_v26, %v17887_v27  ;;  %v17898_v27 = vld [vmem:[#allocation97_spill] sm:$0xff] }
0x1801   : > { %v8863_v37 = vpop.permute.xlu1 %8862  ;;  %9110 = vrot.lane.b32.xlu1 %v9003_v6, %s10902_s23 }
0x1802   : > { %v9023_v5 = vadd.f32 %v8863_v37, %v17888_v9 }
0x1803   : > { %9112 = vrot.lane.b32.xlu0 %v9004_v18, %s10902_s23 }
0x1805   : > { %v16566_v17 = vpop.permute.xlu0 %8864  ;;  %9114 = vrot.lane.b32.xlu1 %v9005_v59, %s10902_s23 }
0x1807   : > { %v16570_v61 = vpop.permute.xlu1 %8866  ;;  %9116 = vrot.lane.b32.xlu0 %v9006_v13, %s10902_s23 }
0x1809   : > { %9118 = vrot.lane.b32.xlu1 %v9007_v28, %s10902_s23  ;;  %v16576_v57 = vpop.permute.xlu0 %8868 }
0x180b   : > { %9120 = vrot.lane.b32.xlu0 %v9008_v51, %s10902_s23  ;;  %v16581_v30 = vpop.permute.xlu1 %8870  ;;  %v9024_v51 = vadd.f32 %v16566_v17, %v17889_v15 }
0x180d   : > { %9122 = vrot.lane.b32.xlu1 %v9009_v4, %s10902_s23  ;;  %v17890_v4 = vld [vmem:[#allocation10_spill] sm:$0xff] }
0x180e   : > { %v9025_v0 = vadd.f32 %v16570_v61, %v17890_v4 }
0x180f   : > { %9124 = vrot.lane.b32.xlu0 %v9010_v55, %s10902_s23 }
0x1810   : > { %v16588_v49 = vpop.permute.xlu0 %8872 }
0x1811   : > { %9126 = vrot.lane.b32.xlu1 %v9011_v34, %s10902_s23  ;;  %v17891_v34 = vld [vmem:[#allocation153_spill] sm:$0xff] }
0x1812   : > { %v16592_v11 = vpop.permute.xlu1 %8874  ;;  %v9026_v17 = vadd.f32 %v16576_v57, %v17891_v34 }
0x1813   : > { %9128 = vrot.lane.b32.xlu0 %v9012_v16, %s10902_s23 }
0x1814   : > { %v16596_v32 = vpop.permute.xlu0 %8876 }
0x1815   : > { %9130 = vrot.lane.b32.xlu1 %v9013_v63, %s10902_s23  ;;  %v9027_v63 = vadd.f32 %v16581_v30, %v17892_v58  ;;  %v17903_v58 = vld [vmem:[#allocation100_spill] sm:$0xff] }
0x1816   : > { %v16600_v41 = vpop.permute.xlu1 %8878 }
0x1817   : > { %9132 = vrot.lane.b32.xlu0 %v9014_v31, %s10902_s23  ;;  %v17893_v31 = vld [vmem:[#allocation156_spill] sm:$0xff] }
0x1818   : > { %v9028_v12 = vadd.f32 %v16588_v49, %v17893_v31 }
0x1819   : > { %9134 = vrot.lane.b32.xlu1 %v9015_v48, %s10902_s23 }
0x181a   : > { %v16606_v35 = vpop.permute.xlu0 %8880 }
0x181b   : > { %9136 = vrot.lane.b32.xlu0 %v9016_v29, %s10902_s23  ;;  %v9029_v29 = vadd.f32 %v16592_v11, %v17894_v1 }
0x181c   : > { %v16610_v40 = vpop.permute.xlu1 %8882 }
0x181d   : > { %9138 = vrot.lane.b32.xlu1 %v9017_v36, %s10902_s23  ;;  %v17895_v36 = vld [vmem:[#allocation88_spill] sm:$0xff] }
0x181e   : > { %v16616_v24 = vpop.permute.xlu0 %8884  ;;  %v9030_v53 = vadd.f32 %v16596_v32, %v17895_v36  ;;  %v17907_v36 = vld [vmem:[#allocation127_spill] sm:$0xff] }
0x181f   : > { %9140 = vrot.lane.b32.xlu0 %v9018_v60, %s10902_s23 }
0x1820   : > { %v16620_v33 = vpop.permute.xlu1 %8886 }
0x1821   : > { %9142 = vrot.lane.b32.xlu1 %v9019_v50, %s10902_s23  ;;  %v9031_v50 = vadd.f32 %v16600_v41, %v17896_v19 }
0x1822   : > { %v16626_v54 = vpop.permute.xlu0 %8888 }
0x1823   : > { %9144 = vrot.lane.b32.xlu0 %v9020_v52, %s10902_s23  ;;  %v17897_v52 = vld [vmem:[#allocation147_spill] sm:$0xff] }
0x1824   : > { %v16629_v38 = vpop.permute.xlu1 %8890  ;;  %v9032_v39 = vadd.f32 %v16606_v35, %v17897_v52 }
0x1825   : > { %9146 = vrot.lane.b32.xlu1 %v9021_v62, %s10902_s23 }
0x1826   : > { %v16632_v43 = vpop.permute.xlu0 %8892 }
0x1827   : > { %9148 = vrot.lane.b32.xlu0 %v9022_v22, %s10902_s23  ;;  %v9033_v22 = vadd.f32 %v16610_v40, %v17898_v27  ;;  %v17911_v27 = vld [vmem:[#allocation85_spill] sm:$0xff] }
0x1828   : > { %v16634_v10 = vpop.permute.xlu1 %8894 }
0x1829   : > { %9150 = vrot.lane.b32.xlu1 %v9023_v5, %s10902_s23  ;;  %s9545_s23 = sshll.u32 %s17922_s14, 8  ;;  %v17899_v5 = vld [vmem:[#allocation42_spill] sm:$0xff] }
0x182a   : > { %v16636_v20 = vpop.permute.xlu0 %8896  ;;  %s16674_s25 = scalar_lea.vmem %s16815_s10, %s9545_s23  ;;  %v9034_v15 = vadd.f32 %v16616_v24, %v17899_v5 }
0x182c   : > { %v16638_v2 = vpop.permute.xlu1 %8898 }
0x182e   : > { %v16640_v42 = vpop.permute.xlu0 %8900 }
0x1830   : > { %v16642_v47 = vpop.permute.xlu1 %8902 }
0x1832   : > { %v16644_v21 = vpop.permute.xlu0 %8904 }
0x1834   : > { %v16646_v6 = vpop.permute.xlu1 %8906 }
0x1836   : > { %v16648_v26 = vpop.permute.xlu0 %8908 }
0x1838   : > { %v16650_v44 = vpop.permute.xlu1 %8910 }
0x183a   : > { %v16652_v18 = vpop.permute.xlu0 %8912 }
0x183c   : > { %v16654_v37 = vpop.permute.xlu1 %8914 }
0x183e   : > { %v16656_v25 = vpop.permute.xlu0 %8916 }
0x1840   : > { %v16658_v59 = vpop.permute.xlu1 %8918 }
0x1855   : > { %v16660_v45 = vpop.permute.xlu0 %8920 }
0x1857   : > { %v16662_v13 = vpop.permute.xlu1 %8922 }
0x1859   : > { %v16664_v14 = vpop.permute.xlu0 %8924 }
0x185b   : > { %v16667_v28 = vpop.permute.xlu1 %8926 }
0x185d   : > { %v9089_v56 = vpop.permute.xlu0 %9088 }
0x185e   : > { %v9184_v55 = vsel %vm702_vm0, %v9089_v56, %v9024_v51  ;;  %v17900_v56 = vld [vmem:[#allocation47_spill] sm:$0xff] }
0x185f   : > { %9216 = vst [vmem:[%s16674_s25] sm:$0xff] %v9184_v55  ;;  %v9091_v46 = vpop.permute.xlu1 %9090  ;;  %v9035_v4 = vadd.f32 %v16620_v33, %v17900_v56  ;;  %v17901_v55 = vld [vmem:[#allocation9_spill] sm:$0xff] }
0x1860   : > { %v9185_v7 = vsel %vm702_vm0, %v9091_v46, %v9025_v0  ;;  %v9036_v46 = vadd.f32 %v16626_v54, %v17901_v55  ;;  %v17915_v55 = vld [vmem:[#allocation72_spill] sm:$0xff] }
0x1861   : > { %9217 = vst [vmem:[%s16674_s25 + $0x8] sm:$0xff] %v9185_v7  ;;  %v9093_v16 = vpop.permute.xlu0 %9092 }
0x1862   : > { %v9186_v3 = vsel %vm702_vm0, %v9093_v16, %v9026_v17  ;;  %v17902_v17 = vld [vmem:[#allocation120_spill] sm:$0xff] }
0x1863   : > { %9218 = vst [vmem:[%s16674_s25 + $0x10] sm:$0xff] %v9186_v3  ;;  %v9095_v61 = vpop.permute.xlu1 %9094  ;;  %v9037_v7 = vadd.f32 %v16629_v38, %v17902_v17 }
0x1864   : > { %v9187_v48 = vsel %vm702_vm0, %v9095_v61, %v9027_v63  ;;  %v9038_v63 = vadd.f32 %v16632_v43, %v17903_v58  ;;  %v17904_v61 = vld [vmem:[#allocation117_spill] sm:$0xff] }
0x1865   : > { %9219 = vst [vmem:[%s16674_s25 + $0x18] sm:$0xff] %v9187_v48  ;;  %v9097_v57 = vpop.permute.xlu0 %9096  ;;  %v9039_v31 = vadd.f32 %v16634_v10, %v17904_v61  ;;  %v17905_v48 = vld [vmem:[#allocation90_spill] sm:$0xff] }
0x1866   : > { %v9188_v23 = vsel %vm702_vm0, %v9097_v57, %v9028_v12  ;;  %v9040_v57 = vadd.f32 %v16636_v20, %v17905_v48  ;;  %v17919_v61 = vld [vmem:[#allocation106_spill] sm:$0xff] }
0x1867   : > { %9220 = vst [vmem:[%s16674_s25 + $0x20] sm:$0xff] %v9188_v23  ;;  %v9099_v30 = vpop.permute.xlu1 %9098 }
0x1868   : > { %v9189_v60 = vsel %vm702_vm0, %v9099_v30, %v9029_v29  ;;  %v17906_v29 = vld [vmem:[#allocation158_spill] sm:$0xff] }
0x1869   : > { %9221 = vst [vmem:[%s16674_s25 + $0x28] sm:$0xff] %v9189_v60  ;;  %v9101_v49 = vpop.permute.xlu0 %9100  ;;  %v9041_v23 = vadd.f32 %v16638_v2, %v17906_v29 }
0x186a   : > { %v9190_v8 = vsel %vm702_vm0, %v9101_v49, %v9030_v53  ;;  %v9042_v53 = vadd.f32 %v16640_v42, %v17907_v36  ;;  %v17908_v49 = vld [vmem:[#allocation128_spill] sm:$0xff] }
0x186b   : > { %9222 = vst [vmem:[%s16674_s25 + $0x30] sm:$0xff] %v9190_v8  ;;  %v9103_v11 = vpop.permute.xlu1 %9102  ;;  %v9043_v19 = vadd.f32 %v16642_v47, %v17908_v49  ;;  %v17909_v8 = vld [vmem:[#allocation86_spill] sm:$0xff] }
0x186c   : > { %v9191_v62 = vsel %vm702_vm0, %v9103_v11, %v9031_v50  ;;  %v9044_v11 = vadd.f32 %v16644_v21, %v17909_v8 }
0x186d   : > { %9223 = vst [vmem:[%s16674_s25 + $0x38] sm:$0xff] %v9191_v62  ;;  %v9105_v32 = vpop.permute.xlu0 %9104 }
0x186e   : > { %v9192_v9 = vsel %vm702_vm0, %v9105_v32, %v9032_v39  ;;  %v17910_v39 = vld [vmem:[#allocation157_spill] sm:$0xff] }
0x186f   : > { %9224 = vst [vmem:[%s16674_s25 + $0x40] sm:$0xff] %v9192_v9  ;;  %v9107_v41 = vpop.permute.xlu1 %9106  ;;  %v9045_v62 = vadd.f32 %v16646_v6, %v17910_v39 }
0x1870   : > { %v9193_v51 = vsel %vm702_vm0, %v9107_v41, %v9033_v22  ;;  %v9046_v22 = vadd.f32 %v16648_v26, %v17911_v27  ;;  %v17912_v41 = vld [vmem:[#allocation19_spill] sm:$0xff] }
0x1871   : > { %9225 = vst [vmem:[%s16674_s25 + $0x48] sm:$0xff] %v9193_v51  ;;  %v9109_v35 = vpop.permute.xlu0 %9108  ;;  %v9047_v5 = vadd.f32 %v16650_v44, %v17912_v41  ;;  %v17913_v51 = vld [vmem:[#allocation92_spill] sm:$0xff] }
0x1872   : > { %v9194_v0 = vsel %vm702_vm0, %v9109_v35, %v9034_v15  ;;  %v9048_v35 = vadd.f32 %v16652_v18, %v17913_v51 }
0x1873   : > { %9226 = vst [vmem:[%s16674_s25 + $0x50] sm:$0xff] %v9194_v0  ;;  %v9111_v40 = vpop.permute.xlu1 %9110 }
0x1874   : > { %v9195_v34 = vsel %vm702_vm0, %v9111_v40, %v9035_v4  ;;  %v17914_v4 = vld [vmem:[#allocation144_spill] sm:$0xff] }
0x1875   : > { %9227 = vst [vmem:[%s16674_s25 + $0x58] sm:$0xff] %v9195_v34  ;;  %v9113_v24 = vpop.permute.xlu0 %9112  ;;  %v9049_v0 = vadd.f32 %v16654_v37, %v17914_v4 }
0x1876   : > { %v9196_v16 = vsel %vm702_vm0, %v9113_v24, %v9036_v46  ;;  %v9050_v46 = vadd.f32 %v16656_v25, %v17915_v55  ;;  %v17916_v24 = vld [vmem:[#allocation96_spill] sm:$0xff] }
0x1877   : > { %9228 = vst [vmem:[%s16674_s25 + $0x60] sm:$0xff] %v9196_v16  ;;  %v9115_v33 = vpop.permute.xlu1 %9114  ;;  %v9051_v17 = vadd.f32 %v16658_v59, %v17916_v24  ;;  %v17917_v16 = vld [vmem:[#allocation107_spill] sm:$0xff] }
0x1878   : > { %v9197_v3 = vsel %vm702_vm0, %v9115_v33, %v9037_v7  ;;  %v9052_v33 = vadd.f32 %v16660_v45, %v17917_v16  ;;  %v17920_v45 = vld [vmem:[#allocation111_spill] sm:$0xff] }
0x1879   : > { %9229 = vst [vmem:[%s16674_s25 + $0x68] sm:$0xff] %v9197_v3  ;;  %v9117_v54 = vpop.permute.xlu0 %9116  ;;  %v9055_v48 = vadd.f32 %v16667_v28, %v17920_v45 }
0x187a   : > { %v9198_v12 = vsel %vm702_vm0, %v9117_v54, %v9038_v63  ;;  %v17918_v63 = vld [vmem:[#allocation101_spill] sm:$0xff] }
0x187b   : > { %9230 = vst [vmem:[%s16674_s25 + $0x70] sm:$0xff] %v9198_v12  ;;  %v9119_v38 = vpop.permute.xlu1 %9118  ;;  %v9053_v3 = vadd.f32 %v16662_v13, %v17918_v63 }
0x187c   : > { %v9199_v1 = vsel %vm702_vm0, %v9119_v38, %v9039_v31  ;;  %v9054_v31 = vadd.f32 %v16664_v14, %v17919_v61 }
0x187d   : > { %9231 = vst [vmem:[%s16674_s25 + $0x78] sm:$0xff] %v9199_v1  ;;  %v9121_v43 = vpop.permute.xlu0 %9120 }
0x187e   : > { %v9200_v30 = vsel %vm702_vm0, %v9121_v43, %v9040_v57 }
0x187f   : > { %9232 = vst [vmem:[%s16674_s25 + $0x80] sm:$0xff] %v9200_v30  ;;  %v9123_v10 = vpop.permute.xlu1 %9122 }
0x1880   : > { %v9201_v60 = vsel %vm702_vm0, %v9123_v10, %v9041_v23 }
0x1881   : > { %9233 = vst [vmem:[%s16674_s25 + $0x88] sm:$0xff] %v9201_v60  ;;  %v9125_v20 = vpop.permute.xlu0 %9124 }
0x1882   : > { %v9202_v50 = vsel %vm702_vm0, %v9125_v20, %v9042_v53 }
0x1883   : > { %9234 = vst [vmem:[%s16674_s25 + $0x90] sm:$0xff] %v9202_v50  ;;  %v9127_v2 = vpop.permute.xlu1 %9126 }
0x1884   : > { %v9203_v52 = vsel %vm702_vm0, %v9127_v2, %v9043_v19 }
0x1885   : > { %9235 = vst [vmem:[%s16674_s25 + $0x98] sm:$0xff] %v9203_v52  ;;  %v9129_v42 = vpop.permute.xlu0 %9128 }
0x1886   : > { %v9204_v32 = vsel %vm702_vm0, %v9129_v42, %v9044_v11 }
0x1887   : > { %9236 = vst [vmem:[%s16674_s25 + $0xa0] sm:$0xff] %v9204_v32  ;;  %v9131_v47 = vpop.permute.xlu1 %9130 }
0x1888   : > { %v9205_v9 = vsel %vm702_vm0, %v9131_v47, %v9045_v62 }
0x1889   : > { %9237 = vst [vmem:[%s16674_s25 + $0xa8] sm:$0xff] %v9205_v9  ;;  %v9133_v21 = vpop.permute.xlu0 %9132 }
0x188a   : > { %v9206_v15 = vsel %vm702_vm0, %v9133_v21, %v9046_v22 }
0x188b   : > { %9238 = vst [vmem:[%s16674_s25 + $0xb0] sm:$0xff] %v9206_v15  ;;  %v9135_v6 = vpop.permute.xlu1 %9134 }
0x188c   : > { %v9207_v56 = vsel %vm702_vm0, %v9135_v6, %v9047_v5 }
0x188d   : > { %9239 = vst [vmem:[%s16674_s25 + $0xb8] sm:$0xff] %v9207_v56  ;;  %v9137_v26 = vpop.permute.xlu0 %9136 }
0x188e   : > { %v9208_v40 = vsel %vm702_vm0, %v9137_v26, %v9048_v35 }
0x188f   : > { %9240 = vst [vmem:[%s16674_s25 + $0xc0] sm:$0xff] %v9208_v40  ;;  %v9139_v44 = vpop.permute.xlu1 %9138 }
0x1890   : > { %v9209_v34 = vsel %vm702_vm0, %v9139_v44, %v9049_v0 }
0x1891   : > { %9241 = vst [vmem:[%s16674_s25 + $0xc8] sm:$0xff] %v9209_v34  ;;  %v9141_v18 = vpop.permute.xlu0 %9140 }
0x1892   : > { %v9210_v7 = vsel %vm702_vm0, %v9141_v18, %v9050_v46 }
0x1893   : > { %9242 = vst [vmem:[%s16674_s25 + $0xd0] sm:$0xff] %v9210_v7  ;;  %v9143_v37 = vpop.permute.xlu1 %9142 }
0x1894   : > { %v9211_v58 = vsel %vm702_vm0, %v9143_v37, %v9051_v17 }
0x1895   : > { %9243 = vst [vmem:[%s16674_s25 + $0xd8] sm:$0xff] %v9211_v58  ;;  %v9145_v25 = vpop.permute.xlu0 %9144 }
0x1896   : > { %v9212_v54 = vsel %vm702_vm0, %v9145_v25, %v9052_v33 }
0x1897   : > { %9244 = vst [vmem:[%s16674_s25 + $0xe0] sm:$0xff] %v9212_v54  ;;  %v9147_v59 = vpop.permute.xlu1 %9146 }
0x1898   : > { %v9213_v12 = vsel %vm702_vm0, %v9147_v59, %v9053_v3 }
0x1899   : > { %9245 = vst [vmem:[%s16674_s25 + $0xe8] sm:$0xff] %v9213_v12  ;;  %v9149_v38 = vpop.permute.xlu0 %9148 }
0x189a   : > { %v9214_v57 = vsel %vm702_vm0, %v9149_v38, %v9054_v31 }
0x189b   : > { %9246 = vst [vmem:[%s16674_s25 + $0xf0] sm:$0xff] %v9214_v57  ;;  %v9151_v1 = vpop.permute.xlu1 %9150 }
0x189c   : > { %v9215_v13 = vsel %vm702_vm0, %v9151_v1, %v9055_v48 }
0x189d   : > { %9247 = vst [vmem:[%s16674_s25 + $0xf8] sm:$0xff] %v9215_v13 }
0x189e PF: > { %s20_s13 = sadd.s32 1, %s10898_s13  }
0x189f   : > { %p17_p4 = scmp.ge.s32.totalorder %s20_s13, 4  }
0x18a1   :  { %19 = sbr.rel (!%p17_p4) target bundleno = 1 (0x1), region = 93 }

</bundles_post_ra>
